<compile_context>
chip_gen: v6e
topology: v6e:2x2x1
jax: 0.10.0
libtpu: 0.0.40
codegen_flags: <defaults>
</compile_context>

<pallas_src>
import jax
import jax.numpy as jnp
from jax.experimental import pallas as pl
from jax.experimental.pallas import tpu as pltpu


def _pick_gather_dtype():
    """bf16 slab math only on chips with a bf16 VPU (v6e / v7x); f32 elsewhere."""
    try:
        kind = jax.devices()[0].device_kind.lower()
    except Exception:
        return jnp.float32
    if ("v6" in kind) or ("v7" in kind) or ("7x" in kind):
        return jnp.bfloat16
    return jnp.float32


# -------------------- fused deformable-attention kernel -------------------- #

def _make_defor_kernel(n_levels, num_points, max_num_levels, spatial_hw, gather_dtype):
    P = num_points
    N = n_levels
    HP = max_num_levels * P          # width of the x block (= width of y block)
    for (Hl, Wl) in spatial_hw[:N]:
        # wrap-into-[0,Nv) + circular roll gather needs >= 2 rows / cols per level
        assert Hl >= 2 and Wl >= 2, "each feature level must be at least 2x2"

    def kernel(q_ref, qp_ref, ref_ref, value_ref,
               w_cmb_ref, b_cmb_ref, w_vo_ref, b_vo_ref, b_out_ref, o_ref):
        identity = q_ref[...]                                        # [TQ, C]
        q = identity + qp_ref[...]                                   # query + query_pos

        # ONE fused MXU pass for sampling_offsets + attention_weights linears.
        cmb = (jnp.dot(q, w_cmb_ref[...], preferred_element_type=jnp.float32)
               + b_cmb_ref[...])                                     # [TQ, 3*HP]
        off = cmb[:, :2 * HP]                                        # [x block | y block]
        aw = cmb[:, 2 * HP:2 * HP + N * P]                           # first N levels only

        # softmax over the N*P attention columns (exact denominator)
        aw = aw - jnp.max(aw, axis=-1, keepdims=True)
        e = jnp.exp(aw)
        aw_sm = e / jnp.sum(e, axis=-1, keepdims=True)

        TQ = q.shape[0]
        C = value_ref.shape[-1]
        acc = jnp.zeros((TQ, C), jnp.float32)        # sum_l A_l @ V_l   (raw values)
        rowsum = jnp.zeros((TQ, 1), jnp.float32)     # sum of gather weights (for bias)

        for l in range(N):
            Hl, Wl = spatial_hw[l]
            Nv = Hl * Wl

            # --- vectorized per-point sampling math on [TQ, P] slabs ---
            offx = off[:, l * P:(l + 1) * P]
            offy = off[:, HP + l * P:HP + (l + 1) * P]
            ref_x = ref_ref[:, 2 * l:2 * l + 1]                      # [TQ, 1]
            ref_y = ref_ref[:, 2 * l + 1:2 * l + 2]

            # grid_sample(align_corners=False): pixel = ref*size + off - 0.5
            px = ref_x * float(Wl) + offx - 0.5                      # [TQ, P]
            py = ref_y * float(Hl) + offy - 0.5
            x0f = jnp.floor(px)
            y0f = jnp.floor(py)
            fx = px - x0f
            fy = py - y0f
            x0 = x0f.astype(jnp.int32)
            y0 = y0f.astype(jnp.int32)

            # corner validity (zeros padding outside the feature map)
            vx0 = ((x0 >= 0) & (x0 < Wl)).astype(jnp.float32)
            vx1 = ((x0 >= -1) & (x0 < Wl - 1)).astype(jnp.float32)
            vy0 = ((y0 >= 0) & (y0 < Hl)).astype(jnp.float32)
            vy1 = ((y0 >= -1) & (y0 < Hl - 1)).astype(jnp.float32)

            aw_l = aw_sm[:, l * P:(l + 1) * P]                       # [TQ, P]
            wx0 = (1.0 - fx) * vx0
            wx1 = fx * vx1
            wy0 = (1.0 - fy) * vy0
            wy1 = fy * vy1
            rowsum = rowsum + jnp.sum(aw_l * (wx0 + wx1) * (wy0 + wy1),
                                      axis=-1, keepdims=True)
            w00 = (aw_l * wy0 * wx0).astype(gather_dtype)            # corner (y0,   x0  )
            w01 = (aw_l * wy0 * wx1).astype(gather_dtype)            # corner (y0,   x0+1)
            w10 = (aw_l * wy1 * wx0).astype(gather_dtype)            # corner (y0+1, x0  )
            w11 = (aw_l * wy1 * wx1).astype(gather_dtype)            # corner (y0+1, x0+1)

            # base flat index of the (y0, x0) corner, wrapped into [0, Nv); the
            # x+1 corner index is the wrapped base+1.  For any corner with nonzero
            # weight the wrapped index + circular row-roll lands exactly at its
            # true flat index; invalid corners carry zero weight.
            idx00 = y0 * Wl + x0
            base = jnp.where(idx00 < 0, idx00 + Nv, idx00)           # [TQ, P] int32
            base1 = base + 1
            base1 = jnp.where(base1 >= Nv, base1 - Nv, base1)

            iota = jax.lax.broadcasted_iota(jnp.int32, (1, Nv), 1)   # tiny
            zero = jnp.zeros((), gather_dtype)
            A0 = jnp.zeros((TQ, Nv), gather_dtype)                   # row y0
            A1 = jnp.zeros((TQ, Nv), gather_dtype)                   # row y0+1 (pre-roll)
            for p in range(P):
                m0 = iota == base[:, p:p + 1]                        # one compare / corner pair
                m1 = iota == base1[:, p:p + 1]
                # weight folded directly into the select (no astype/multiply pass);
                # m0 and m1 positions are disjoint, so the nested where is exact.
                A0 = A0 + jnp.where(m0, w00[:, p:p + 1],
                                    jnp.where(m1, w01[:, p:p + 1], zero))
                A1 = A1 + jnp.where(m0, w10[:, p:p + 1],
                                    jnp.where(m1, w11[:, p:p + 1], zero))
            # ONE XLU row-shift per level (hoisted out of the point loop)
            A = A0 + pltpu.roll(A1, Wl, 1)
            acc = acc + jnp.dot(A, value_ref[l], preferred_element_type=jnp.float32)

        # value_proj and output_proj constant-folded:  (A@V) @ (Wv@Wo) + rowsum*(bv@Wo) + bo
        # TODO(synk): nn.Dropout(p=0.1) is stochastic only in train mode; eval-mode identity here.
        out = (jnp.dot(acc, w_vo_ref[...], preferred_element_type=jnp.float32)
               + rowsum * b_vo_ref[...] + b_out_ref[...] + identity)
        o_ref[...] = out.astype(o_ref.dtype)

    return kernel


# ------------------------------- module glue -------------------------------- #

def init_params(key, embed_dims, num_points, max_num_levels):
    C = embed_dims
    off_dim = max_num_levels * num_points * 2
    aw_dim = max_num_levels * num_points
    ks = jax.random.split(key, 6)

    def u(k, shape, scale):
        return jax.random.uniform(k, shape, jnp.float32, -scale, scale)

    xav = (6.0 / (2 * C)) ** 0.5
    return {
        "w_off_t": u(ks[0], (C, off_dim), 0.05),
        "b_off":   u(ks[1], (1, off_dim), 1.0),
        "w_aw_t":  u(ks[2], (C, aw_dim), 0.05),
        "b_aw":    u(ks[3], (1, aw_dim), 0.1),
        "w_value_t": u(ks[4], (C, C), xav),
        "b_value":   jnp.zeros((1, C), jnp.float32),
        "w_out_t":   u(ks[5], (C, C), xav),
        "b_out":     jnp.zeros((1, C), jnp.float32),
    }


def defor_attn_forward(query, query_pos, value, reference_points, spatial_hw,
                       params, num_points=4, max_num_levels=2, tile_q=64,
                       gather_dtype=None):
    """Forward pass of DeforAttn (num_heads == 1, eval-mode dropout) — one fused kernel."""
    bs, Nq, C = query.shape
    N, Nv, _ = value.shape
    P = num_points
    HP = max_num_levels * P
    assert bs == 1 and N <= max_num_levels
    assert tile_q % 8 == 0 and Nq % tile_q == 0

    if gather_dtype is None:
        gather_dtype = _pick_gather_dtype()

    q2 = query[0]
    qp2 = query_pos[0]
    ref2 = reference_points[0].reshape(Nq, N * 2)
    value_k = value.astype(gather_dtype)      # bf16 on v6e/v7x halves VMEM + DMA

    # sampling_offsets columns permuted to [all-x | all-y] (level-major, point-minor),
    # then concatenated with attention_weights -> ONE fused q @ [C, 3*HP] matmul.
    perm = jnp.concatenate([2 * jnp.arange(HP), 2 * jnp.arange(HP) + 1])
    w_cmb = jnp.concatenate([params["w_off_t"][:, perm], params["w_aw_t"]], axis=1)
    b_cmb = jnp.concatenate([params["b_off"][:, perm], params["b_aw"]], axis=1)

    # Constant-fold value_proj into output_proj (host-side, zero runtime cost):
    #   ((A@V) @ Wv + rowsum*bv) @ Wo + bo  ==  (A@V) @ (Wv@Wo) + rowsum*(bv@Wo) + bo
    w_vo = params["w_value_t"] @ params["w_out_t"]
    b_vo = params["b_value"] @ params["w_out_t"]

    kernel = _make_defor_kernel(N, P, max_num_levels, tuple(spatial_hw), gather_dtype)

    # TODO(synk): at production Nv, move `value` to memory_space=pl.ANY + one manual
    # DMA into VMEM scratch (or the two-stage row/col gather) so the resident full
    # block does not blow v7x's 64 MiB VMEM; at these shapes it is tiny.
    out = pl.pallas_call(
        kernel,
        out_shape=jax.ShapeDtypeStruct((Nq, C), query.dtype),
        grid=(Nq // tile_q,),
        in_specs=[
            pl.BlockSpec((tile_q, C), lambda i: (i, 0)),          # query (identity)
            pl.BlockSpec((tile_q, C), lambda i: (i, 0)),          # query_pos
            pl.BlockSpec((tile_q, N * 2), lambda i: (i, 0)),      # reference points
            pl.BlockSpec((N, Nv, C), lambda i: (0, 0, 0)),        # raw value (resident)
            pl.BlockSpec((C, 3 * HP), lambda i: (0, 0)),          # W_off|W_aw (fused)
            pl.BlockSpec((1, 3 * HP), lambda i: (0, 0)),          # b_off|b_aw (fused)
            pl.BlockSpec((C, C), lambda i: (0, 0)),               # Wv @ Wo
            pl.BlockSpec((1, C), lambda i: (0, 0)),               # bv @ Wo
            pl.BlockSpec((1, C), lambda i: (0, 0)),               # b_out
        ],
        out_specs=pl.BlockSpec((tile_q, C), lambda i: (i, 0)),
        compiler_params=pltpu.CompilerParams(
            dimension_semantics=("parallel",),
            vmem_limit_bytes=32 * 1024 * 1024),
    )(q2, qp2, ref2, value_k, w_cmb, b_cmb, w_vo, b_vo, params["b_out"])

    return out[None]


# ------------------------ plain-JAX reference check ------------------------- #

def reference_forward(query, query_pos, value, reference_points, spatial_hw,
                      params, num_points, max_num_levels):
    bs, Nq, C = query.shape
    N, Nv, _ = value.shape
    P = num_points
    q = (query + query_pos)[0]
    off = q @ params["w_off_t"] + params["b_off"]
    aw = q @ params["w_aw_t"] + params["b_aw"]
    off = off.reshape(Nq, max_num_levels, P, 2)[:, :N]
    aw = aw.reshape(Nq, max_num_levels, P)[:, :N].reshape(Nq, N * P)
    aw = jax.nn.softmax(aw, axis=-1).reshape(Nq, N, P)
    v = (value.reshape(N * Nv, C) @ params["w_value_t"]
         + params["b_value"]).reshape(N, Nv, C)
    out = jnp.zeros((Nq, C), jnp.float32)
    for l in range(N):
        Hl, Wl = spatial_hw[l]
        ref = reference_points[0, :, l, :]
        loc = ref[:, None, :] + off[:, l] / jnp.array([Wl, Hl], jnp.float32)
        x = loc[..., 0] * Wl - 0.5
        y = loc[..., 1] * Hl - 0.5
        x0 = jnp.floor(x); y0 = jnp.floor(y)
        fx = x - x0; fy = y - y0
        x0i = x0.astype(jnp.int32); y0i = y0.astype(jnp.int32)
        samp = jnp.zeros((Nq, P, C), jnp.float32)
        for yi, xi, wb in ((y0i, x0i, (1 - fy) * (1 - fx)),
                           (y0i, x0i + 1, (1 - fy) * fx),
                           (y0i + 1, x0i, fy * (1 - fx)),
                           (y0i + 1, x0i + 1, fy * fx)):
            valid = ((xi >= 0) & (xi < Wl) & (yi >= 0) & (yi < Hl)).astype(jnp.float32)
            idx = jnp.clip(yi, 0, Hl - 1) * Wl + jnp.clip(xi, 0, Wl - 1)
            g = jnp.take(v[l], idx.reshape(-1), axis=0).reshape(Nq, P, C)
            samp = samp + g * (wb * valid)[..., None]
        out = out + jnp.sum(samp * aw[:, l, :, None], axis=1)
    out = out @ params["w_out_t"] + params["b_out"] + query[0]
    return out[None]


if __name__ == "__main__":
    key = jax.random.PRNGKey(0)
    embed_dims, num_points, max_num_levels = 32, 4, 2
    H = W = 16
    N = 2                     # number of agents / value levels
    Nq = H * W
    Nv = H * W
    spatial_hw = ((H, W), (H, W))

    k1, k2, k3, k4, kp = jax.random.split(key, 5)
    query = jax.random.normal(k1, (1, Nq, embed_dims), jnp.float32)
    query_pos = jax.random.normal(k2, (1, Nq, embed_dims), jnp.float32)
    value = jax.random.normal(k3, (N, Nv, embed_dims), jnp.float32)
    reference_points = jax.random.uniform(k4, (1, Nq, N, 2), dtype=jnp.float32)
    params = init_params(kp, embed_dims, num_points, max_num_levels)

    out = defor_attn_forward(query, query_pos, value, reference_points,
                             spatial_hw, params, num_points, max_num_levels,
                             tile_q=64)
    out = jax.block_until_ready(out)
    assert out.shape == (1, Nq, embed_dims)

    ref = jax.block_until_ready(
        reference_forward(query, query_pos, value, reference_points,
                          spatial_hw, params, num_points, max_num_levels))
    if not bool(jnp.allclose(out, ref, atol=3e-2, rtol=3e-2)):
        raise AssertionError(
            f"mismatch vs reference, max abs err={float(jnp.max(jnp.abs(out - ref)))}")
    print("KERNEL_OK")
</pallas_src>

<mosaic_0001>
module attributes {stable_mosaic.version = 11 : i64} {
  func.func @kernel(%arg0: i32, %arg1: memref<64x32xf32, #tpu.memory_space<vmem>>, %arg2: memref<64x32xf32, #tpu.memory_space<vmem>>, %arg3: memref<64x4xf32, #tpu.memory_space<vmem>>, %arg4: memref<2x256x32xf32, #tpu.memory_space<vmem>>, %arg5: memref<32x24xf32, #tpu.memory_space<vmem>>, %arg6: memref<1x24xf32, #tpu.memory_space<vmem>>, %arg7: memref<32x32xf32, #tpu.memory_space<vmem>>, %arg8: memref<1x32xf32, #tpu.memory_space<vmem>>, %arg9: memref<1x32xf32, #tpu.memory_space<vmem>>, %arg10: memref<64x32xf32, #tpu.memory_space<vmem>>) attributes {dimension_semantics = [#tpu.dimension_semantics<parallel>], iteration_bounds = array<i64: 4>, scalar_prefetch = 0 : i64, scratch_operands = 0 : i64, tpu.core_type = #tpu.core_type<tc>, window_params = [{transform_indices = @transform_0, window_bounds = array<i64: 64, 32>}, {transform_indices = @transform_1, window_bounds = array<i64: 64, 32>}, {transform_indices = @transform_2, window_bounds = array<i64: 64, 4>}, {pipeline_mode = #tpu.pipeline_mode<synchronous>, transform_indices = @transform_3, window_bounds = array<i64: 2, 256, 32>}, {pipeline_mode = #tpu.pipeline_mode<synchronous>, transform_indices = @transform_4, window_bounds = array<i64: 32, 24>}, {pipeline_mode = #tpu.pipeline_mode<synchronous>, transform_indices = @transform_5, window_bounds = array<i64: 1, 24>}, {pipeline_mode = #tpu.pipeline_mode<synchronous>, transform_indices = @transform_6, window_bounds = array<i64: 32, 32>}, {pipeline_mode = #tpu.pipeline_mode<synchronous>, transform_indices = @transform_7, window_bounds = array<i64: 1, 32>}, {pipeline_mode = #tpu.pipeline_mode<synchronous>, transform_indices = @transform_8, window_bounds = array<i64: 1, 32>}, {transform_indices = @transform_9, window_bounds = array<i64: 64, 32>}]} {
    %c0 = arith.constant 0 : index
    %c0_0 = arith.constant 0 : index
    %0 = vector.load %arg1[%c0, %c0_0] : memref<64x32xf32, #tpu.memory_space<vmem>>, vector<64x32xf32>
    %c0_1 = arith.constant 0 : index
    %c0_2 = arith.constant 0 : index
    %1 = vector.load %arg2[%c0_1, %c0_2] : memref<64x32xf32, #tpu.memory_space<vmem>>, vector<64x32xf32>
    %2 = arith.addf %0, %1 : vector<64x32xf32>
    %c0_3 = arith.constant 0 : index
    %c0_4 = arith.constant 0 : index
    %3 = vector.load %arg5[%c0_3, %c0_4] : memref<32x24xf32, #tpu.memory_space<vmem>>, vector<32x24xf32>
    %cst = arith.constant dense<0.000000e+00> : vector<64x24xf32>
    %4 = tpu.matmul %2, %3, %cst {dimension_numbers = #tpu.dot_dimension_numbers<[1], [0], [0], [1], [0, 0, 1, 1], [], []>} : vector<64x32xf32>, vector<32x24xf32>, vector<64x24xf32> -> vector<64x24xf32>
    %c0_5 = arith.constant 0 : index
    %c0_6 = arith.constant 0 : index
    %5 = vector.load %arg6[%c0_5, %c0_6] : memref<1x24xf32, #tpu.memory_space<vmem>>, vector<1x24xf32>
    %6 = vector.broadcast %5 : vector<1x24xf32> to vector<64x24xf32>
    %7 = arith.addf %4, %6 : vector<64x24xf32>
    %8 = vector.extract_strided_slice %7 {offsets = [0, 0], sizes = [64, 16], strides = [1, 1]} : vector<64x24xf32> to vector<64x16xf32>
    %9 = vector.extract_strided_slice %7 {offsets = [0, 16], sizes = [64, 8], strides = [1, 1]} : vector<64x24xf32> to vector<64x8xf32>
    %cst_7 = arith.constant dense<0xFF800000> : vector<64xf32>
    %10 = vector.multi_reduction <maximumf>, %9, %cst_7 [1] : vector<64x8xf32> to vector<64xf32>
    %11 = vector.shape_cast %10 : vector<64xf32> to vector<64x1xf32>
    %12 = vector.broadcast %11 : vector<64x1xf32> to vector<64x8xf32>
    %13 = arith.subf %9, %12 : vector<64x8xf32>
    %14 = math.exp %13 : vector<64x8xf32>
    %cst_8 = arith.constant dense<0.000000e+00> : vector<64xf32>
    %15 = vector.multi_reduction <add>, %14, %cst_8 [1] : vector<64x8xf32> to vector<64xf32>
    %16 = vector.shape_cast %15 : vector<64xf32> to vector<64x1xf32>
    %17 = vector.broadcast %16 : vector<64x1xf32> to vector<64x8xf32>
    %18 = arith.divf %14, %17 : vector<64x8xf32>
    %cst_9 = arith.constant 0.000000e+00 : f32
    %19 = vector.broadcast %cst_9 : f32 to vector<64x32xf32>
    %cst_10 = arith.constant 0.000000e+00 : f32
    %20 = vector.broadcast %cst_10 : f32 to vector<64x1xf32>
    %21 = vector.extract_strided_slice %8 {offsets = [0, 0], sizes = [64, 4], strides = [1, 1]} : vector<64x16xf32> to vector<64x4xf32>
    %22 = vector.extract_strided_slice %8 {offsets = [0, 8], sizes = [64, 4], strides = [1, 1]} : vector<64x16xf32> to vector<64x4xf32>
    %c0_11 = arith.constant 0 : index
    %c0_12 = arith.constant 0 : index
    %23 = vector.load %arg3[%c0_11, %c0_12] : memref<64x4xf32, #tpu.memory_space<vmem>>, vector<64x1xf32>
    %c0_13 = arith.constant 0 : index
    %c1 = arith.constant 1 : index
    %24 = vector.load %arg3[%c0_13, %c1] : memref<64x4xf32, #tpu.memory_space<vmem>>, vector<64x1xf32>
    %cst_14 = arith.constant 1.600000e+01 : f32
    %25 = vector.broadcast %cst_14 : f32 to vector<64x1xf32>
    %26 = arith.mulf %23, %25 : vector<64x1xf32>
    %27 = vector.broadcast %26 : vector<64x1xf32> to vector<64x4xf32>
    %28 = arith.addf %27, %21 : vector<64x4xf32>
    %cst_15 = arith.constant 5.000000e-01 : f32
    %29 = vector.broadcast %cst_15 : f32 to vector<64x4xf32>
    %30 = arith.subf %28, %29 : vector<64x4xf32>
    %cst_16 = arith.constant 1.600000e+01 : f32
    %31 = vector.broadcast %cst_16 : f32 to vector<64x1xf32>
    %32 = arith.mulf %24, %31 : vector<64x1xf32>
    %33 = vector.broadcast %32 : vector<64x1xf32> to vector<64x4xf32>
    %34 = arith.addf %33, %22 : vector<64x4xf32>
    %cst_17 = arith.constant 5.000000e-01 : f32
    %35 = vector.broadcast %cst_17 : f32 to vector<64x4xf32>
    %36 = arith.subf %34, %35 : vector<64x4xf32>
    %37 = math.floor %30 : vector<64x4xf32>
    %38 = math.floor %36 : vector<64x4xf32>
    %39 = arith.subf %30, %37 : vector<64x4xf32>
    %40 = arith.subf %36, %38 : vector<64x4xf32>
    %41 = arith.fptosi %37 : vector<64x4xf32> to vector<64x4xi32>
    %42 = arith.fptosi %38 : vector<64x4xf32> to vector<64x4xi32>
    %c0_i32 = arith.constant 0 : i32
    %43 = vector.broadcast %c0_i32 : i32 to vector<64x4xi32>
    %44 = arith.cmpi sge, %41, %43 : vector<64x4xi32>
    %c16_i32 = arith.constant 16 : i32
    %45 = vector.broadcast %c16_i32 : i32 to vector<64x4xi32>
    %46 = arith.cmpi slt, %41, %45 : vector<64x4xi32>
    %47 = arith.andi %44, %46 : vector<64x4xi1>
    %48 = arith.extui %47 : vector<64x4xi1> to vector<64x4xi32>
    %49 = arith.sitofp %48 : vector<64x4xi32> to vector<64x4xf32>
    %c-1_i32 = arith.constant -1 : i32
    %50 = vector.broadcast %c-1_i32 : i32 to vector<64x4xi32>
    %51 = arith.cmpi sge, %41, %50 : vector<64x4xi32>
    %c15_i32 = arith.constant 15 : i32
    %52 = vector.broadcast %c15_i32 : i32 to vector<64x4xi32>
    %53 = arith.cmpi slt, %41, %52 : vector<64x4xi32>
    %54 = arith.andi %51, %53 : vector<64x4xi1>
    %55 = arith.extui %54 : vector<64x4xi1> to vector<64x4xi32>
    %56 = arith.sitofp %55 : vector<64x4xi32> to vector<64x4xf32>
    %c0_i32_18 = arith.constant 0 : i32
    %57 = vector.broadcast %c0_i32_18 : i32 to vector<64x4xi32>
    %58 = arith.cmpi sge, %42, %57 : vector<64x4xi32>
    %c16_i32_19 = arith.constant 16 : i32
    %59 = vector.broadcast %c16_i32_19 : i32 to vector<64x4xi32>
    %60 = arith.cmpi slt, %42, %59 : vector<64x4xi32>
    %61 = arith.andi %58, %60 : vector<64x4xi1>
    %62 = arith.extui %61 : vector<64x4xi1> to vector<64x4xi32>
    %63 = arith.sitofp %62 : vector<64x4xi32> to vector<64x4xf32>
    %c-1_i32_20 = arith.constant -1 : i32
    %64 = vector.broadcast %c-1_i32_20 : i32 to vector<64x4xi32>
    %65 = arith.cmpi sge, %42, %64 : vector<64x4xi32>
    %c15_i32_21 = arith.constant 15 : i32
    %66 = vector.broadcast %c15_i32_21 : i32 to vector<64x4xi32>
    %67 = arith.cmpi slt, %42, %66 : vector<64x4xi32>
    %68 = arith.andi %65, %67 : vector<64x4xi1>
    %69 = arith.extui %68 : vector<64x4xi1> to vector<64x4xi32>
    %70 = arith.sitofp %69 : vector<64x4xi32> to vector<64x4xf32>
    %71 = vector.extract_strided_slice %18 {offsets = [0, 0], sizes = [64, 4], strides = [1, 1]} : vector<64x8xf32> to vector<64x4xf32>
    %cst_22 = arith.constant 1.000000e+00 : f32
    %72 = vector.broadcast %cst_22 : f32 to vector<64x4xf32>
    %73 = arith.subf %72, %39 : vector<64x4xf32>
    %74 = arith.mulf %73, %49 : vector<64x4xf32>
    %75 = arith.mulf %39, %56 : vector<64x4xf32>
    %cst_23 = arith.constant 1.000000e+00 : f32
    %76 = vector.broadcast %cst_23 : f32 to vector<64x4xf32>
    %77 = arith.subf %76, %40 : vector<64x4xf32>
    %78 = arith.mulf %77, %63 : vector<64x4xf32>
    %79 = arith.mulf %40, %70 : vector<64x4xf32>
    %80 = arith.addf %74, %75 : vector<64x4xf32>
    %81 = arith.mulf %71, %80 : vector<64x4xf32>
    %82 = arith.addf %78, %79 : vector<64x4xf32>
    %83 = arith.mulf %81, %82 : vector<64x4xf32>
    %cst_24 = arith.constant dense<0.000000e+00> : vector<64xf32>
    %84 = vector.multi_reduction <add>, %83, %cst_24 [1] : vector<64x4xf32> to vector<64xf32>
    %85 = vector.shape_cast %84 : vector<64xf32> to vector<64x1xf32>
    %86 = arith.addf %20, %85 : vector<64x1xf32>
    %87 = arith.mulf %71, %78 : vector<64x4xf32>
    %88 = arith.mulf %87, %74 : vector<64x4xf32>
    %89 = arith.mulf %71, %78 : vector<64x4xf32>
    %90 = arith.mulf %89, %75 : vector<64x4xf32>
    %91 = arith.mulf %71, %79 : vector<64x4xf32>
    %92 = arith.mulf %91, %74 : vector<64x4xf32>
    %93 = arith.mulf %71, %79 : vector<64x4xf32>
    %94 = arith.mulf %93, %75 : vector<64x4xf32>
    %c16_i32_25 = arith.constant 16 : i32
    %95 = vector.broadcast %c16_i32_25 : i32 to vector<64x4xi32>
    %96 = arith.muli %42, %95 : vector<64x4xi32>
    %97 = arith.addi %96, %41 : vector<64x4xi32>
    %c0_i32_26 = arith.constant 0 : i32
    %98 = vector.broadcast %c0_i32_26 : i32 to vector<64x4xi32>
    %99 = arith.cmpi slt, %97, %98 : vector<64x4xi32>
    %c256_i32 = arith.constant 256 : i32
    %100 = vector.broadcast %c256_i32 : i32 to vector<64x4xi32>
    %101 = arith.addi %97, %100 : vector<64x4xi32>
    %102 = arith.select %99, %101, %97 : vector<64x4xi1>, vector<64x4xi32>
    %c1_i32 = arith.constant 1 : i32
    %103 = vector.broadcast %c1_i32 : i32 to vector<64x4xi32>
    %104 = arith.addi %102, %103 : vector<64x4xi32>
    %c256_i32_27 = arith.constant 256 : i32
    %105 = vector.broadcast %c256_i32_27 : i32 to vector<64x4xi32>
    %106 = arith.cmpi sge, %104, %105 : vector<64x4xi32>
    %c256_i32_28 = arith.constant 256 : i32
    %107 = vector.broadcast %c256_i32_28 : i32 to vector<64x4xi32>
    %108 = arith.subi %104, %107 : vector<64x4xi32>
    %109 = arith.select %106, %108, %104 : vector<64x4xi1>, vector<64x4xi32>
    %110 = tpu.iota {dimensions = array<i32: 1>} : vector<1x256xi32>
    %cst_29 = arith.constant 0.000000e+00 : f32
    %111 = vector.broadcast %cst_29 : f32 to vector<64x256xf32>
    %cst_30 = arith.constant 0.000000e+00 : f32
    %112 = vector.broadcast %cst_30 : f32 to vector<64x256xf32>
    %113 = vector.extract_strided_slice %102 {offsets = [0, 0], sizes = [64, 1], strides = [1, 1]} : vector<64x4xi32> to vector<64x1xi32>
    %114 = vector.broadcast %110 : vector<1x256xi32> to vector<64x256xi32>
    %115 = vector.broadcast %113 : vector<64x1xi32> to vector<64x256xi32>
    %116 = arith.cmpi eq, %114, %115 : vector<64x256xi32>
    %117 = vector.extract_strided_slice %109 {offsets = [0, 0], sizes = [64, 1], strides = [1, 1]} : vector<64x4xi32> to vector<64x1xi32>
    %118 = vector.broadcast %110 : vector<1x256xi32> to vector<64x256xi32>
    %119 = vector.broadcast %117 : vector<64x1xi32> to vector<64x256xi32>
    %120 = arith.cmpi eq, %118, %119 : vector<64x256xi32>
    %121 = vector.extract_strided_slice %88 {offsets = [0, 0], sizes = [64, 1], strides = [1, 1]} : vector<64x4xf32> to vector<64x1xf32>
    %122 = vector.extract_strided_slice %90 {offsets = [0, 0], sizes = [64, 1], strides = [1, 1]} : vector<64x4xf32> to vector<64x1xf32>
    %cst_31 = arith.constant 0.000000e+00 : f32
    %123 = vector.shape_cast %122 : vector<64x1xf32> to vector<64x1xf32>
    %124 = vector.broadcast %123 : vector<64x1xf32> to vector<64x256xf32>
    %125 = vector.broadcast %cst_31 : f32 to vector<64x256xf32>
    %126 = arith.select %120, %124, %125 : vector<64x256xi1>, vector<64x256xf32>
    %127 = vector.shape_cast %121 : vector<64x1xf32> to vector<64x1xf32>
    %128 = vector.broadcast %127 : vector<64x1xf32> to vector<64x256xf32>
    %129 = arith.select %116, %128, %126 : vector<64x256xi1>, vector<64x256xf32>
    %130 = arith.addf %111, %129 : vector<64x256xf32>
    %131 = vector.extract_strided_slice %92 {offsets = [0, 0], sizes = [64, 1], strides = [1, 1]} : vector<64x4xf32> to vector<64x1xf32>
    %132 = vector.extract_strided_slice %94 {offsets = [0, 0], sizes = [64, 1], strides = [1, 1]} : vector<64x4xf32> to vector<64x1xf32>
    %cst_32 = arith.constant 0.000000e+00 : f32
    %133 = vector.shape_cast %132 : vector<64x1xf32> to vector<64x1xf32>
    %134 = vector.broadcast %133 : vector<64x1xf32> to vector<64x256xf32>
    %135 = vector.broadcast %cst_32 : f32 to vector<64x256xf32>
    %136 = arith.select %120, %134, %135 : vector<64x256xi1>, vector<64x256xf32>
    %137 = vector.shape_cast %131 : vector<64x1xf32> to vector<64x1xf32>
    %138 = vector.broadcast %137 : vector<64x1xf32> to vector<64x256xf32>
    %139 = arith.select %116, %138, %136 : vector<64x256xi1>, vector<64x256xf32>
    %140 = arith.addf %112, %139 : vector<64x256xf32>
    %141 = vector.extract_strided_slice %102 {offsets = [0, 1], sizes = [64, 1], strides = [1, 1]} : vector<64x4xi32> to vector<64x1xi32>
    %142 = vector.broadcast %110 : vector<1x256xi32> to vector<64x256xi32>
    %143 = vector.broadcast %141 : vector<64x1xi32> to vector<64x256xi32>
    %144 = arith.cmpi eq, %142, %143 : vector<64x256xi32>
    %145 = vector.extract_strided_slice %109 {offsets = [0, 1], sizes = [64, 1], strides = [1, 1]} : vector<64x4xi32> to vector<64x1xi32>
    %146 = vector.broadcast %110 : vector<1x256xi32> to vector<64x256xi32>
    %147 = vector.broadcast %145 : vector<64x1xi32> to vector<64x256xi32>
    %148 = arith.cmpi eq, %146, %147 : vector<64x256xi32>
    %149 = vector.extract_strided_slice %88 {offsets = [0, 1], sizes = [64, 1], strides = [1, 1]} : vector<64x4xf32> to vector<64x1xf32>
    %150 = vector.extract_strided_slice %90 {offsets = [0, 1], sizes = [64, 1], strides = [1, 1]} : vector<64x4xf32> to vector<64x1xf32>
    %cst_33 = arith.constant 0.000000e+00 : f32
    %151 = vector.shape_cast %150 : vector<64x1xf32> to vector<64x1xf32>
    %152 = vector.broadcast %151 : vector<64x1xf32> to vector<64x256xf32>
    %153 = vector.broadcast %cst_33 : f32 to vector<64x256xf32>
    %154 = arith.select %148, %152, %153 : vector<64x256xi1>, vector<64x256xf32>
    %155 = vector.shape_cast %149 : vector<64x1xf32> to vector<64x1xf32>
    %156 = vector.broadcast %155 : vector<64x1xf32> to vector<64x256xf32>
    %157 = arith.select %144, %156, %154 : vector<64x256xi1>, vector<64x256xf32>
    %158 = arith.addf %130, %157 : vector<64x256xf32>
    %159 = vector.extract_strided_slice %92 {offsets = [0, 1], sizes = [64, 1], strides = [1, 1]} : vector<64x4xf32> to vector<64x1xf32>
    %160 = vector.extract_strided_slice %94 {offsets = [0, 1], sizes = [64, 1], strides = [1, 1]} : vector<64x4xf32> to vector<64x1xf32>
    %cst_34 = arith.constant 0.000000e+00 : f32
    %161 = vector.shape_cast %160 : vector<64x1xf32> to vector<64x1xf32>
    %162 = vector.broadcast %161 : vector<64x1xf32> to vector<64x256xf32>
    %163 = vector.broadcast %cst_34 : f32 to vector<64x256xf32>
    %164 = arith.select %148, %162, %163 : vector<64x256xi1>, vector<64x256xf32>
    %165 = vector.shape_cast %159 : vector<64x1xf32> to vector<64x1xf32>
    %166 = vector.broadcast %165 : vector<64x1xf32> to vector<64x256xf32>
    %167 = arith.select %144, %166, %164 : vector<64x256xi1>, vector<64x256xf32>
    %168 = arith.addf %140, %167 : vector<64x256xf32>
    %169 = vector.extract_strided_slice %102 {offsets = [0, 2], sizes = [64, 1], strides = [1, 1]} : vector<64x4xi32> to vector<64x1xi32>
    %170 = vector.broadcast %110 : vector<1x256xi32> to vector<64x256xi32>
    %171 = vector.broadcast %169 : vector<64x1xi32> to vector<64x256xi32>
    %172 = arith.cmpi eq, %170, %171 : vector<64x256xi32>
    %173 = vector.extract_strided_slice %109 {offsets = [0, 2], sizes = [64, 1], strides = [1, 1]} : vector<64x4xi32> to vector<64x1xi32>
    %174 = vector.broadcast %110 : vector<1x256xi32> to vector<64x256xi32>
    %175 = vector.broadcast %173 : vector<64x1xi32> to vector<64x256xi32>
    %176 = arith.cmpi eq, %174, %175 : vector<64x256xi32>
    %177 = vector.extract_strided_slice %88 {offsets = [0, 2], sizes = [64, 1], strides = [1, 1]} : vector<64x4xf32> to vector<64x1xf32>
    %178 = vector.extract_strided_slice %90 {offsets = [0, 2], sizes = [64, 1], strides = [1, 1]} : vector<64x4xf32> to vector<64x1xf32>
    %cst_35 = arith.constant 0.000000e+00 : f32
    %179 = vector.shape_cast %178 : vector<64x1xf32> to vector<64x1xf32>
    %180 = vector.broadcast %179 : vector<64x1xf32> to vector<64x256xf32>
    %181 = vector.broadcast %cst_35 : f32 to vector<64x256xf32>
    %182 = arith.select %176, %180, %181 : vector<64x256xi1>, vector<64x256xf32>
    %183 = vector.shape_cast %177 : vector<64x1xf32> to vector<64x1xf32>
    %184 = vector.broadcast %183 : vector<64x1xf32> to vector<64x256xf32>
    %185 = arith.select %172, %184, %182 : vector<64x256xi1>, vector<64x256xf32>
    %186 = arith.addf %158, %185 : vector<64x256xf32>
    %187 = vector.extract_strided_slice %92 {offsets = [0, 2], sizes = [64, 1], strides = [1, 1]} : vector<64x4xf32> to vector<64x1xf32>
    %188 = vector.extract_strided_slice %94 {offsets = [0, 2], sizes = [64, 1], strides = [1, 1]} : vector<64x4xf32> to vector<64x1xf32>
    %cst_36 = arith.constant 0.000000e+00 : f32
    %189 = vector.shape_cast %188 : vector<64x1xf32> to vector<64x1xf32>
    %190 = vector.broadcast %189 : vector<64x1xf32> to vector<64x256xf32>
    %191 = vector.broadcast %cst_36 : f32 to vector<64x256xf32>
    %192 = arith.select %176, %190, %191 : vector<64x256xi1>, vector<64x256xf32>
    %193 = vector.shape_cast %187 : vector<64x1xf32> to vector<64x1xf32>
    %194 = vector.broadcast %193 : vector<64x1xf32> to vector<64x256xf32>
    %195 = arith.select %172, %194, %192 : vector<64x256xi1>, vector<64x256xf32>
    %196 = arith.addf %168, %195 : vector<64x256xf32>
    %197 = vector.extract_strided_slice %102 {offsets = [0, 3], sizes = [64, 1], strides = [1, 1]} : vector<64x4xi32> to vector<64x1xi32>
    %198 = vector.broadcast %110 : vector<1x256xi32> to vector<64x256xi32>
    %199 = vector.broadcast %197 : vector<64x1xi32> to vector<64x256xi32>
    %200 = arith.cmpi eq, %198, %199 : vector<64x256xi32>
    %201 = vector.extract_strided_slice %109 {offsets = [0, 3], sizes = [64, 1], strides = [1, 1]} : vector<64x4xi32> to vector<64x1xi32>
    %202 = vector.broadcast %110 : vector<1x256xi32> to vector<64x256xi32>
    %203 = vector.broadcast %201 : vector<64x1xi32> to vector<64x256xi32>
    %204 = arith.cmpi eq, %202, %203 : vector<64x256xi32>
    %205 = vector.extract_strided_slice %88 {offsets = [0, 3], sizes = [64, 1], strides = [1, 1]} : vector<64x4xf32> to vector<64x1xf32>
    %206 = vector.extract_strided_slice %90 {offsets = [0, 3], sizes = [64, 1], strides = [1, 1]} : vector<64x4xf32> to vector<64x1xf32>
    %cst_37 = arith.constant 0.000000e+00 : f32
    %207 = vector.shape_cast %206 : vector<64x1xf32> to vector<64x1xf32>
    %208 = vector.broadcast %207 : vector<64x1xf32> to vector<64x256xf32>
    %209 = vector.broadcast %cst_37 : f32 to vector<64x256xf32>
    %210 = arith.select %204, %208, %209 : vector<64x256xi1>, vector<64x256xf32>
    %211 = vector.shape_cast %205 : vector<64x1xf32> to vector<64x1xf32>
    %212 = vector.broadcast %211 : vector<64x1xf32> to vector<64x256xf32>
    %213 = arith.select %200, %212, %210 : vector<64x256xi1>, vector<64x256xf32>
    %214 = arith.addf %186, %213 : vector<64x256xf32>
    %215 = vector.extract_strided_slice %92 {offsets = [0, 3], sizes = [64, 1], strides = [1, 1]} : vector<64x4xf32> to vector<64x1xf32>
    %216 = vector.extract_strided_slice %94 {offsets = [0, 3], sizes = [64, 1], strides = [1, 1]} : vector<64x4xf32> to vector<64x1xf32>
    %cst_38 = arith.constant 0.000000e+00 : f32
    %217 = vector.shape_cast %216 : vector<64x1xf32> to vector<64x1xf32>
    %218 = vector.broadcast %217 : vector<64x1xf32> to vector<64x256xf32>
    %219 = vector.broadcast %cst_38 : f32 to vector<64x256xf32>
    %220 = arith.select %204, %218, %219 : vector<64x256xi1>, vector<64x256xf32>
    %221 = vector.shape_cast %215 : vector<64x1xf32> to vector<64x1xf32>
    %222 = vector.broadcast %221 : vector<64x1xf32> to vector<64x256xf32>
    %223 = arith.select %200, %222, %220 : vector<64x256xi1>, vector<64x256xf32>
    %224 = arith.addf %196, %223 : vector<64x256xf32>
    %c16_i32_39 = arith.constant 16 : i32
    %225 = tpu.dynamic_rotate %224 by %c16_i32_39 dim 1 : vector<64x256xf32>, i32 -> vector<64x256xf32>
    %226 = arith.addf %214, %225 : vector<64x256xf32>
    %c0_40 = arith.constant 0 : index
    %c0_41 = arith.constant 0 : index
    %c0_42 = arith.constant 0 : index
    %227 = vector.load %arg4[%c0_40, %c0_41, %c0_42] : memref<2x256x32xf32, #tpu.memory_space<vmem>>, vector<1x256x32xf32>
    %228 = vector.shape_cast %227 : vector<1x256x32xf32> to vector<256x32xf32>
    %cst_43 = arith.constant dense<0.000000e+00> : vector<64x32xf32>
    %229 = tpu.matmul %226, %228, %cst_43 {dimension_numbers = #tpu.dot_dimension_numbers<[1], [0], [0], [1], [0, 0, 1, 1], [], []>} : vector<64x256xf32>, vector<256x32xf32>, vector<64x32xf32> -> vector<64x32xf32>
    %230 = arith.addf %19, %229 : vector<64x32xf32>
    %231 = vector.extract_strided_slice %8 {offsets = [0, 4], sizes = [64, 4], strides = [1, 1]} : vector<64x16xf32> to vector<64x4xf32>
    %232 = vector.extract_strided_slice %8 {offsets = [0, 12], sizes = [64, 4], strides = [1, 1]} : vector<64x16xf32> to vector<64x4xf32>
    %c0_44 = arith.constant 0 : index
    %c2 = arith.constant 2 : index
    %233 = vector.load %arg3[%c0_44, %c2] : memref<64x4xf32, #tpu.memory_space<vmem>>, vector<64x1xf32>
    %c0_45 = arith.constant 0 : index
    %c3 = arith.constant 3 : index
    %234 = vector.load %arg3[%c0_45, %c3] : memref<64x4xf32, #tpu.memory_space<vmem>>, vector<64x1xf32>
    %cst_46 = arith.constant 1.600000e+01 : f32
    %235 = vector.broadcast %cst_46 : f32 to vector<64x1xf32>
    %236 = arith.mulf %233, %235 : vector<64x1xf32>
    %237 = vector.broadcast %236 : vector<64x1xf32> to vector<64x4xf32>
    %238 = arith.addf %237, %231 : vector<64x4xf32>
    %cst_47 = arith.constant 5.000000e-01 : f32
    %239 = vector.broadcast %cst_47 : f32 to vector<64x4xf32>
    %240 = arith.subf %238, %239 : vector<64x4xf32>
    %cst_48 = arith.constant 1.600000e+01 : f32
    %241 = vector.broadcast %cst_48 : f32 to vector<64x1xf32>
    %242 = arith.mulf %234, %241 : vector<64x1xf32>
    %243 = vector.broadcast %242 : vector<64x1xf32> to vector<64x4xf32>
    %244 = arith.addf %243, %232 : vector<64x4xf32>
    %cst_49 = arith.constant 5.000000e-01 : f32
    %245 = vector.broadcast %cst_49 : f32 to vector<64x4xf32>
    %246 = arith.subf %244, %245 : vector<64x4xf32>
    %247 = math.floor %240 : vector<64x4xf32>
    %248 = math.floor %246 : vector<64x4xf32>
    %249 = arith.subf %240, %247 : vector<64x4xf32>
    %250 = arith.subf %246, %248 : vector<64x4xf32>
    %251 = arith.fptosi %247 : vector<64x4xf32> to vector<64x4xi32>
    %252 = arith.fptosi %248 : vector<64x4xf32> to vector<64x4xi32>
    %c0_i32_50 = arith.constant 0 : i32
    %253 = vector.broadcast %c0_i32_50 : i32 to vector<64x4xi32>
    %254 = arith.cmpi sge, %251, %253 : vector<64x4xi32>
    %c16_i32_51 = arith.constant 16 : i32
    %255 = vector.broadcast %c16_i32_51 : i32 to vector<64x4xi32>
    %256 = arith.cmpi slt, %251, %255 : vector<64x4xi32>
    %257 = arith.andi %254, %256 : vector<64x4xi1>
    %258 = arith.extui %257 : vector<64x4xi1> to vector<64x4xi32>
    %259 = arith.sitofp %258 : vector<64x4xi32> to vector<64x4xf32>
    %c-1_i32_52 = arith.constant -1 : i32
    %260 = vector.broadcast %c-1_i32_52 : i32 to vector<64x4xi32>
    %261 = arith.cmpi sge, %251, %260 : vector<64x4xi32>
    %c15_i32_53 = arith.constant 15 : i32
    %262 = vector.broadcast %c15_i32_53 : i32 to vector<64x4xi32>
    %263 = arith.cmpi slt, %251, %262 : vector<64x4xi32>
    %264 = arith.andi %261, %263 : vector<64x4xi1>
    %265 = arith.extui %264 : vector<64x4xi1> to vector<64x4xi32>
    %266 = arith.sitofp %265 : vector<64x4xi32> to vector<64x4xf32>
    %c0_i32_54 = arith.constant 0 : i32
    %267 = vector.broadcast %c0_i32_54 : i32 to vector<64x4xi32>
    %268 = arith.cmpi sge, %252, %267 : vector<64x4xi32>
    %c16_i32_55 = arith.constant 16 : i32
    %269 = vector.broadcast %c16_i32_55 : i32 to vector<64x4xi32>
    %270 = arith.cmpi slt, %252, %269 : vector<64x4xi32>
    %271 = arith.andi %268, %270 : vector<64x4xi1>
    %272 = arith.extui %271 : vector<64x4xi1> to vector<64x4xi32>
    %273 = arith.sitofp %272 : vector<64x4xi32> to vector<64x4xf32>
    %c-1_i32_56 = arith.constant -1 : i32
    %274 = vector.broadcast %c-1_i32_56 : i32 to vector<64x4xi32>
    %275 = arith.cmpi sge, %252, %274 : vector<64x4xi32>
    %c15_i32_57 = arith.constant 15 : i32
    %276 = vector.broadcast %c15_i32_57 : i32 to vector<64x4xi32>
    %277 = arith.cmpi slt, %252, %276 : vector<64x4xi32>
    %278 = arith.andi %275, %277 : vector<64x4xi1>
    %279 = arith.extui %278 : vector<64x4xi1> to vector<64x4xi32>
    %280 = arith.sitofp %279 : vector<64x4xi32> to vector<64x4xf32>
    %281 = vector.extract_strided_slice %18 {offsets = [0, 4], sizes = [64, 4], strides = [1, 1]} : vector<64x8xf32> to vector<64x4xf32>
    %cst_58 = arith.constant 1.000000e+00 : f32
    %282 = vector.broadcast %cst_58 : f32 to vector<64x4xf32>
    %283 = arith.subf %282, %249 : vector<64x4xf32>
    %284 = arith.mulf %283, %259 : vector<64x4xf32>
    %285 = arith.mulf %249, %266 : vector<64x4xf32>
    %cst_59 = arith.constant 1.000000e+00 : f32
    %286 = vector.broadcast %cst_59 : f32 to vector<64x4xf32>
    %287 = arith.subf %286, %250 : vector<64x4xf32>
    %288 = arith.mulf %287, %273 : vector<64x4xf32>
    %289 = arith.mulf %250, %280 : vector<64x4xf32>
    %290 = arith.addf %284, %285 : vector<64x4xf32>
    %291 = arith.mulf %281, %290 : vector<64x4xf32>
    %292 = arith.addf %288, %289 : vector<64x4xf32>
    %293 = arith.mulf %291, %292 : vector<64x4xf32>
    %cst_60 = arith.constant dense<0.000000e+00> : vector<64xf32>
    %294 = vector.multi_reduction <add>, %293, %cst_60 [1] : vector<64x4xf32> to vector<64xf32>
    %295 = vector.shape_cast %294 : vector<64xf32> to vector<64x1xf32>
    %296 = arith.addf %86, %295 : vector<64x1xf32>
    %297 = arith.mulf %281, %288 : vector<64x4xf32>
    %298 = arith.mulf %297, %284 : vector<64x4xf32>
    %299 = arith.mulf %281, %288 : vector<64x4xf32>
    %300 = arith.mulf %299, %285 : vector<64x4xf32>
    %301 = arith.mulf %281, %289 : vector<64x4xf32>
    %302 = arith.mulf %301, %284 : vector<64x4xf32>
    %303 = arith.mulf %281, %289 : vector<64x4xf32>
    %304 = arith.mulf %303, %285 : vector<64x4xf32>
    %c16_i32_61 = arith.constant 16 : i32
    %305 = vector.broadcast %c16_i32_61 : i32 to vector<64x4xi32>
    %306 = arith.muli %252, %305 : vector<64x4xi32>
    %307 = arith.addi %306, %251 : vector<64x4xi32>
    %c0_i32_62 = arith.constant 0 : i32
    %308 = vector.broadcast %c0_i32_62 : i32 to vector<64x4xi32>
    %309 = arith.cmpi slt, %307, %308 : vector<64x4xi32>
    %c256_i32_63 = arith.constant 256 : i32
    %310 = vector.broadcast %c256_i32_63 : i32 to vector<64x4xi32>
    %311 = arith.addi %307, %310 : vector<64x4xi32>
    %312 = arith.select %309, %311, %307 : vector<64x4xi1>, vector<64x4xi32>
    %c1_i32_64 = arith.constant 1 : i32
    %313 = vector.broadcast %c1_i32_64 : i32 to vector<64x4xi32>
    %314 = arith.addi %312, %313 : vector<64x4xi32>
    %c256_i32_65 = arith.constant 256 : i32
    %315 = vector.broadcast %c256_i32_65 : i32 to vector<64x4xi32>
    %316 = arith.cmpi sge, %314, %315 : vector<64x4xi32>
    %c256_i32_66 = arith.constant 256 : i32
    %317 = vector.broadcast %c256_i32_66 : i32 to vector<64x4xi32>
    %318 = arith.subi %314, %317 : vector<64x4xi32>
    %319 = arith.select %316, %318, %314 : vector<64x4xi1>, vector<64x4xi32>
    %320 = tpu.iota {dimensions = array<i32: 1>} : vector<1x256xi32>
    %cst_67 = arith.constant 0.000000e+00 : f32
    %321 = vector.broadcast %cst_67 : f32 to vector<64x256xf32>
    %cst_68 = arith.constant 0.000000e+00 : f32
    %322 = vector.broadcast %cst_68 : f32 to vector<64x256xf32>
    %323 = vector.extract_strided_slice %312 {offsets = [0, 0], sizes = [64, 1], strides = [1, 1]} : vector<64x4xi32> to vector<64x1xi32>
    %324 = vector.broadcast %320 : vector<1x256xi32> to vector<64x256xi32>
    %325 = vector.broadcast %323 : vector<64x1xi32> to vector<64x256xi32>
    %326 = arith.cmpi eq, %324, %325 : vector<64x256xi32>
    %327 = vector.extract_strided_slice %319 {offsets = [0, 0], sizes = [64, 1], strides = [1, 1]} : vector<64x4xi32> to vector<64x1xi32>
    %328 = vector.broadcast %320 : vector<1x256xi32> to vector<64x256xi32>
    %329 = vector.broadcast %327 : vector<64x1xi32> to vector<64x256xi32>
    %330 = arith.cmpi eq, %328, %329 : vector<64x256xi32>
    %331 = vector.extract_strided_slice %298 {offsets = [0, 0], sizes = [64, 1], strides = [1, 1]} : vector<64x4xf32> to vector<64x1xf32>
    %332 = vector.extract_strided_slice %300 {offsets = [0, 0], sizes = [64, 1], strides = [1, 1]} : vector<64x4xf32> to vector<64x1xf32>
    %cst_69 = arith.constant 0.000000e+00 : f32
    %333 = vector.shape_cast %332 : vector<64x1xf32> to vector<64x1xf32>
    %334 = vector.broadcast %333 : vector<64x1xf32> to vector<64x256xf32>
    %335 = vector.broadcast %cst_69 : f32 to vector<64x256xf32>
    %336 = arith.select %330, %334, %335 : vector<64x256xi1>, vector<64x256xf32>
    %337 = vector.shape_cast %331 : vector<64x1xf32> to vector<64x1xf32>
    %338 = vector.broadcast %337 : vector<64x1xf32> to vector<64x256xf32>
    %339 = arith.select %326, %338, %336 : vector<64x256xi1>, vector<64x256xf32>
    %340 = arith.addf %321, %339 : vector<64x256xf32>
    %341 = vector.extract_strided_slice %302 {offsets = [0, 0], sizes = [64, 1], strides = [1, 1]} : vector<64x4xf32> to vector<64x1xf32>
    %342 = vector.extract_strided_slice %304 {offsets = [0, 0], sizes = [64, 1], strides = [1, 1]} : vector<64x4xf32> to vector<64x1xf32>
    %cst_70 = arith.constant 0.000000e+00 : f32
    %343 = vector.shape_cast %342 : vector<64x1xf32> to vector<64x1xf32>
    %344 = vector.broadcast %343 : vector<64x1xf32> to vector<64x256xf32>
    %345 = vector.broadcast %cst_70 : f32 to vector<64x256xf32>
    %346 = arith.select %330, %344, %345 : vector<64x256xi1>, vector<64x256xf32>
    %347 = vector.shape_cast %341 : vector<64x1xf32> to vector<64x1xf32>
    %348 = vector.broadcast %347 : vector<64x1xf32> to vector<64x256xf32>
    %349 = arith.select %326, %348, %346 : vector<64x256xi1>, vector<64x256xf32>
    %350 = arith.addf %322, %349 : vector<64x256xf32>
    %351 = vector.extract_strided_slice %312 {offsets = [0, 1], sizes = [64, 1], strides = [1, 1]} : vector<64x4xi32> to vector<64x1xi32>
    %352 = vector.broadcast %320 : vector<1x256xi32> to vector<64x256xi32>
    %353 = vector.broadcast %351 : vector<64x1xi32> to vector<64x256xi32>
    %354 = arith.cmpi eq, %352, %353 : vector<64x256xi32>
    %355 = vector.extract_strided_slice %319 {offsets = [0, 1], sizes = [64, 1], strides = [1, 1]} : vector<64x4xi32> to vector<64x1xi32>
    %356 = vector.broadcast %320 : vector<1x256xi32> to vector<64x256xi32>
    %357 = vector.broadcast %355 : vector<64x1xi32> to vector<64x256xi32>
    %358 = arith.cmpi eq, %356, %357 : vector<64x256xi32>
    %359 = vector.extract_strided_slice %298 {offsets = [0, 1], sizes = [64, 1], strides = [1, 1]} : vector<64x4xf32> to vector<64x1xf32>
    %360 = vector.extract_strided_slice %300 {offsets = [0, 1], sizes = [64, 1], strides = [1, 1]} : vector<64x4xf32> to vector<64x1xf32>
    %cst_71 = arith.constant 0.000000e+00 : f32
    %361 = vector.shape_cast %360 : vector<64x1xf32> to vector<64x1xf32>
    %362 = vector.broadcast %361 : vector<64x1xf32> to vector<64x256xf32>
    %363 = vector.broadcast %cst_71 : f32 to vector<64x256xf32>
    %364 = arith.select %358, %362, %363 : vector<64x256xi1>, vector<64x256xf32>
    %365 = vector.shape_cast %359 : vector<64x1xf32> to vector<64x1xf32>
    %366 = vector.broadcast %365 : vector<64x1xf32> to vector<64x256xf32>
    %367 = arith.select %354, %366, %364 : vector<64x256xi1>, vector<64x256xf32>
    %368 = arith.addf %340, %367 : vector<64x256xf32>
    %369 = vector.extract_strided_slice %302 {offsets = [0, 1], sizes = [64, 1], strides = [1, 1]} : vector<64x4xf32> to vector<64x1xf32>
    %370 = vector.extract_strided_slice %304 {offsets = [0, 1], sizes = [64, 1], strides = [1, 1]} : vector<64x4xf32> to vector<64x1xf32>
    %cst_72 = arith.constant 0.000000e+00 : f32
    %371 = vector.shape_cast %370 : vector<64x1xf32> to vector<64x1xf32>
    %372 = vector.broadcast %371 : vector<64x1xf32> to vector<64x256xf32>
    %373 = vector.broadcast %cst_72 : f32 to vector<64x256xf32>
    %374 = arith.select %358, %372, %373 : vector<64x256xi1>, vector<64x256xf32>
    %375 = vector.shape_cast %369 : vector<64x1xf32> to vector<64x1xf32>
    %376 = vector.broadcast %375 : vector<64x1xf32> to vector<64x256xf32>
    %377 = arith.select %354, %376, %374 : vector<64x256xi1>, vector<64x256xf32>
    %378 = arith.addf %350, %377 : vector<64x256xf32>
    %379 = vector.extract_strided_slice %312 {offsets = [0, 2], sizes = [64, 1], strides = [1, 1]} : vector<64x4xi32> to vector<64x1xi32>
    %380 = vector.broadcast %320 : vector<1x256xi32> to vector<64x256xi32>
    %381 = vector.broadcast %379 : vector<64x1xi32> to vector<64x256xi32>
    %382 = arith.cmpi eq, %380, %381 : vector<64x256xi32>
    %383 = vector.extract_strided_slice %319 {offsets = [0, 2], sizes = [64, 1], strides = [1, 1]} : vector<64x4xi32> to vector<64x1xi32>
    %384 = vector.broadcast %320 : vector<1x256xi32> to vector<64x256xi32>
    %385 = vector.broadcast %383 : vector<64x1xi32> to vector<64x256xi32>
    %386 = arith.cmpi eq, %384, %385 : vector<64x256xi32>
    %387 = vector.extract_strided_slice %298 {offsets = [0, 2], sizes = [64, 1], strides = [1, 1]} : vector<64x4xf32> to vector<64x1xf32>
    %388 = vector.extract_strided_slice %300 {offsets = [0, 2], sizes = [64, 1], strides = [1, 1]} : vector<64x4xf32> to vector<64x1xf32>
    %cst_73 = arith.constant 0.000000e+00 : f32
    %389 = vector.shape_cast %388 : vector<64x1xf32> to vector<64x1xf32>
    %390 = vector.broadcast %389 : vector<64x1xf32> to vector<64x256xf32>
    %391 = vector.broadcast %cst_73 : f32 to vector<64x256xf32>
    %392 = arith.select %386, %390, %391 : vector<64x256xi1>, vector<64x256xf32>
    %393 = vector.shape_cast %387 : vector<64x1xf32> to vector<64x1xf32>
    %394 = vector.broadcast %393 : vector<64x1xf32> to vector<64x256xf32>
    %395 = arith.select %382, %394, %392 : vector<64x256xi1>, vector<64x256xf32>
    %396 = arith.addf %368, %395 : vector<64x256xf32>
    %397 = vector.extract_strided_slice %302 {offsets = [0, 2], sizes = [64, 1], strides = [1, 1]} : vector<64x4xf32> to vector<64x1xf32>
    %398 = vector.extract_strided_slice %304 {offsets = [0, 2], sizes = [64, 1], strides = [1, 1]} : vector<64x4xf32> to vector<64x1xf32>
    %cst_74 = arith.constant 0.000000e+00 : f32
    %399 = vector.shape_cast %398 : vector<64x1xf32> to vector<64x1xf32>
    %400 = vector.broadcast %399 : vector<64x1xf32> to vector<64x256xf32>
    %401 = vector.broadcast %cst_74 : f32 to vector<64x256xf32>
    %402 = arith.select %386, %400, %401 : vector<64x256xi1>, vector<64x256xf32>
    %403 = vector.shape_cast %397 : vector<64x1xf32> to vector<64x1xf32>
    %404 = vector.broadcast %403 : vector<64x1xf32> to vector<64x256xf32>
    %405 = arith.select %382, %404, %402 : vector<64x256xi1>, vector<64x256xf32>
    %406 = arith.addf %378, %405 : vector<64x256xf32>
    %407 = vector.extract_strided_slice %312 {offsets = [0, 3], sizes = [64, 1], strides = [1, 1]} : vector<64x4xi32> to vector<64x1xi32>
    %408 = vector.broadcast %320 : vector<1x256xi32> to vector<64x256xi32>
    %409 = vector.broadcast %407 : vector<64x1xi32> to vector<64x256xi32>
    %410 = arith.cmpi eq, %408, %409 : vector<64x256xi32>
    %411 = vector.extract_strided_slice %319 {offsets = [0, 3], sizes = [64, 1], strides = [1, 1]} : vector<64x4xi32> to vector<64x1xi32>
    %412 = vector.broadcast %320 : vector<1x256xi32> to vector<64x256xi32>
    %413 = vector.broadcast %411 : vector<64x1xi32> to vector<64x256xi32>
    %414 = arith.cmpi eq, %412, %413 : vector<64x256xi32>
    %415 = vector.extract_strided_slice %298 {offsets = [0, 3], sizes = [64, 1], strides = [1, 1]} : vector<64x4xf32> to vector<64x1xf32>
    %416 = vector.extract_strided_slice %300 {offsets = [0, 3], sizes = [64, 1], strides = [1, 1]} : vector<64x4xf32> to vector<64x1xf32>
    %cst_75 = arith.constant 0.000000e+00 : f32
    %417 = vector.shape_cast %416 : vector<64x1xf32> to vector<64x1xf32>
    %418 = vector.broadcast %417 : vector<64x1xf32> to vector<64x256xf32>
    %419 = vector.broadcast %cst_75 : f32 to vector<64x256xf32>
    %420 = arith.select %414, %418, %419 : vector<64x256xi1>, vector<64x256xf32>
    %421 = vector.shape_cast %415 : vector<64x1xf32> to vector<64x1xf32>
    %422 = vector.broadcast %421 : vector<64x1xf32> to vector<64x256xf32>
    %423 = arith.select %410, %422, %420 : vector<64x256xi1>, vector<64x256xf32>
    %424 = arith.addf %396, %423 : vector<64x256xf32>
    %425 = vector.extract_strided_slice %302 {offsets = [0, 3], sizes = [64, 1], strides = [1, 1]} : vector<64x4xf32> to vector<64x1xf32>
    %426 = vector.extract_strided_slice %304 {offsets = [0, 3], sizes = [64, 1], strides = [1, 1]} : vector<64x4xf32> to vector<64x1xf32>
    %cst_76 = arith.constant 0.000000e+00 : f32
    %427 = vector.shape_cast %426 : vector<64x1xf32> to vector<64x1xf32>
    %428 = vector.broadcast %427 : vector<64x1xf32> to vector<64x256xf32>
    %429 = vector.broadcast %cst_76 : f32 to vector<64x256xf32>
    %430 = arith.select %414, %428, %429 : vector<64x256xi1>, vector<64x256xf32>
    %431 = vector.shape_cast %425 : vector<64x1xf32> to vector<64x1xf32>
    %432 = vector.broadcast %431 : vector<64x1xf32> to vector<64x256xf32>
    %433 = arith.select %410, %432, %430 : vector<64x256xi1>, vector<64x256xf32>
    %434 = arith.addf %406, %433 : vector<64x256xf32>
    %c16_i32_77 = arith.constant 16 : i32
    %435 = tpu.dynamic_rotate %434 by %c16_i32_77 dim 1 : vector<64x256xf32>, i32 -> vector<64x256xf32>
    %436 = arith.addf %424, %435 : vector<64x256xf32>
    %c1_78 = arith.constant 1 : index
    %c0_79 = arith.constant 0 : index
    %c0_80 = arith.constant 0 : index
    %437 = vector.load %arg4[%c1_78, %c0_79, %c0_80] : memref<2x256x32xf32, #tpu.memory_space<vmem>>, vector<1x256x32xf32>
    %438 = vector.shape_cast %437 : vector<1x256x32xf32> to vector<256x32xf32>
    %cst_81 = arith.constant dense<0.000000e+00> : vector<64x32xf32>
    %439 = tpu.matmul %436, %438, %cst_81 {dimension_numbers = #tpu.dot_dimension_numbers<[1], [0], [0], [1], [0, 0, 1, 1], [], []>} : vector<64x256xf32>, vector<256x32xf32>, vector<64x32xf32> -> vector<64x32xf32>
    %440 = arith.addf %230, %439 : vector<64x32xf32>
    %c0_82 = arith.constant 0 : index
    %c0_83 = arith.constant 0 : index
    %441 = vector.load %arg7[%c0_82, %c0_83] : memref<32x32xf32, #tpu.memory_space<vmem>>, vector<32x32xf32>
    %cst_84 = arith.constant dense<0.000000e+00> : vector<64x32xf32>
    %442 = tpu.matmul %440, %441, %cst_84 {dimension_numbers = #tpu.dot_dimension_numbers<[1], [0], [0], [1], [0, 0, 1, 1], [], []>} : vector<64x32xf32>, vector<32x32xf32>, vector<64x32xf32> -> vector<64x32xf32>
    %c0_85 = arith.constant 0 : index
    %c0_86 = arith.constant 0 : index
    %443 = vector.load %arg8[%c0_85, %c0_86] : memref<1x32xf32, #tpu.memory_space<vmem>>, vector<1x32xf32>
    %444 = vector.broadcast %296 : vector<64x1xf32> to vector<64x32xf32>
    %445 = vector.broadcast %443 : vector<1x32xf32> to vector<64x32xf32>
    %446 = arith.mulf %444, %445 : vector<64x32xf32>
    %447 = arith.addf %442, %446 : vector<64x32xf32>
    %c0_87 = arith.constant 0 : index
    %c0_88 = arith.constant 0 : index
    %448 = vector.load %arg9[%c0_87, %c0_88] : memref<1x32xf32, #tpu.memory_space<vmem>>, vector<1x32xf32>
    %449 = vector.broadcast %448 : vector<1x32xf32> to vector<64x32xf32>
    %450 = arith.addf %447, %449 : vector<64x32xf32>
    %451 = arith.addf %450, %0 : vector<64x32xf32>
    %c0_89 = arith.constant 0 : index
    %c0_90 = arith.constant 0 : index
    %452 = vector.load %arg10[%c0_89, %c0_90] : memref<64x32xf32, #tpu.memory_space<vmem>>, vector<64x32xf32>
    tpu.vector_store %arg10[%c0_89, %c0_90], %451 {strides = array<i32>} : memref<64x32xf32, #tpu.memory_space<vmem>>, vector<64x32xf32>,
    return
  }
  func.func @transform_0(%arg0: i32) -> (i32, i32) {
    %c0_i32 = arith.constant 0 : i32
    %c0_i32_0 = arith.constant 0 : i32
    return %arg0, %c0_i32 : i32, i32
  }
  func.func @transform_1(%arg0: i32) -> (i32, i32) {
    %c0_i32 = arith.constant 0 : i32
    %c0_i32_0 = arith.constant 0 : i32
    return %arg0, %c0_i32 : i32, i32
  }
  func.func @transform_2(%arg0: i32) -> (i32, i32) {
    %c0_i32 = arith.constant 0 : i32
    %c0_i32_0 = arith.constant 0 : i32
    return %arg0, %c0_i32 : i32, i32
  }
  func.func @transform_3(%arg0: i32) -> (i32, i32, i32) {
    %c0_i32 = arith.constant 0 : i32
    %c0_i32_0 = arith.constant 0 : i32
    %c0_i32_1 = arith.constant 0 : i32
    %c0_i32_2 = arith.constant 0 : i32
    return %c0_i32, %c0_i32_0, %c0_i32_1 : i32, i32, i32
  }
  func.func @transform_4(%arg0: i32) -> (i32, i32) {
    %c0_i32 = arith.constant 0 : i32
    %c0_i32_0 = arith.constant 0 : i32
    %c0_i32_1 = arith.constant 0 : i32
    return %c0_i32, %c0_i32_0 : i32, i32
  }
  func.func @transform_5(%arg0: i32) -> (i32, i32) {
    %c0_i32 = arith.constant 0 : i32
    %c0_i32_0 = arith.constant 0 : i32
    %c0_i32_1 = arith.constant 0 : i32
    return %c0_i32, %c0_i32_0 : i32, i32
  }
  func.func @transform_6(%arg0: i32) -> (i32, i32) {
    %c0_i32 = arith.constant 0 : i32
    %c0_i32_0 = arith.constant 0 : i32
    %c0_i32_1 = arith.constant 0 : i32
    return %c0_i32, %c0_i32_0 : i32, i32
  }
  func.func @transform_7(%arg0: i32) -> (i32, i32) {
    %c0_i32 = arith.constant 0 : i32
    %c0_i32_0 = arith.constant 0 : i32
    %c0_i32_1 = arith.constant 0 : i32
    return %c0_i32, %c0_i32_0 : i32, i32
  }
  func.func @transform_8(%arg0: i32) -> (i32, i32) {
    %c0_i32 = arith.constant 0 : i32
    %c0_i32_0 = arith.constant 0 : i32
    %c0_i32_1 = arith.constant 0 : i32
    return %c0_i32, %c0_i32_0 : i32, i32
  }
  func.func @transform_9(%arg0: i32) -> (i32, i32) {
    %c0_i32 = arith.constant 0 : i32
    %c0_i32_0 = arith.constant 0 : i32
    return %arg0, %c0_i32 : i32, i32
  }
}

</mosaic_0001>

<bundles_post_ra>
// kernel: tpu_custom_call.1
= control target key start
LH: loop header
LB: loop body
LE: loop exit
PB: predicated region body
PF: predicated region fallthrough
CT: control target
= control target key end

     0   :  { %s6170_s30 = smov 0   ;;  %s11717_s0 = inlined_call_operand.vmem [shape: f32[256,32], index: 0, kind: input, shape index: {}]   ;;  %s11718_s1 = inlined_call_operand.vmem [shape: f32[256,32], index: 1, kind: input, shape index: {}]   ;;  %s11719_s2 = inlined_call_operand.vmem [shape: f32[256,4], index: 2, kind: input, shape index: {}]   ;;  %s11720_s3 = inlined_call_operand.vmem [shape: f32[2,256,32], index: 3, kind: input, shape index: {}]   ;;  %s11721_s4 = inlined_call_operand.vmem [shape: f32[32,24], index: 4, kind: input, shape index: {}]   ;;  %s11722_s5 = inlined_call_operand.vmem [shape: f32[1,24], index: 5, kind: input, shape index: {}]   ;;  %s11723_s6 = inlined_call_operand.vmem [shape: f32[32,32], index: 6, kind: input, shape index: {}]   ;;  %s11724_s7 = inlined_call_operand.vmem [shape: f32[1,32], index: 7, kind: input, shape index: {}]   ;;  %s11725_s8 = inlined_call_operand.vmem [shape: f32[1,32], index: 8, kind: input, shape index: {}]   ;;  %s11726_s9 = inlined_call_operand.vmem [shape: f32[256,32], index: 9, kind: output, shape index: {}]  }
   0x1 LB: > { %s5406_s10 = sadd.s32 4294967295, %s6093_s30   ;;  %p5410_p0 = scmp.ge.s32.totalorder %s6093_s30, 1  ;;  %s6093_s30 = sphi %s6170_s30, %s19_s30  }
   0x2   : > { %p310_p1 = scmp.lt.s32.totalorder %s6093_s30, 5 }
   0x4   : > { %p311_p2 = pnand %p5410_p0, %p310_p1 }
   0x6   : > { %314 = sbr.rel (%p311_p2) target bundleno = 3014 (0xbc6), region = 56 }
   0xb   : > { %v407_v0 = vld [vmem:[%s11721_s4 + $0x18] sm:$0xff]  ;;  %v406_v1 = vld [vmem:[%s11721_s4 + $0x10] sm:$0xff]  ;;  %s5411_s15 = sshll.u32 %s5406_s10, 3  ;;  %v6095_v2 = vmov 0   ;;  %v405_v3 = vld [vmem:[%s11721_s4 + $0x8] sm:$0xff]  ;;  %vm11856_vm0 = vcmask 261120  }
   0xc   : > { %5720 = vmatprep.subr.mxu0 %v407_v0  ;;  %p357_p3 = scmp.lt.s32.totalorder %s5411_s15, 31  ;;  %5866 = vset.pattern.permute.xlu1 %v6095_v2  ;;  %v404_v4 = vld [vmem:[%s11721_s4] sm:$0xff]  ;;  %v6096_v38 = vmov 1   ;;  %vm545_vm1 = vcmask 195712   ;;  %s6097_s12 = smov 8  }
   0xd   : > { %5721 = vmatpush3.msra.mxu0 %v407_v0  ;;  %5865 = vset.pattern.permute.xlu0 %v6095_v2  ;;  %v5419_v46 = vld [vmem:[%s11722_s5] ss:$0 sm:$0xff]  ;;  %s6100_s13 = smov 16   ;;  %s6104_s14 = smov 112  }
   0xe   : > { %5722 = vmatprep.subr.mxu0 %v406_v1  ;;  %s13185_s15 = smov (!%p357_p3, %s5411_s15), 31 }
   0xf   : > { %5723 = vmatpush3.msra.mxu0 %v406_v1  ;;  %s6190_s20 = sshll.u32 %s13185_s15, 3  ;;  %s6111_s15 = smov 108  }
  0x10   : > { %5724 = vmatprep.subr.mxu0 %v405_v3  ;;  %s6196_s23 = scalar_lea.vmem %s11717_s0, %s6190_s20  ;;  %s6202_s26 = scalar_lea.vmem %s11718_s1, %s6190_s20 }
  0x11   : > { %5725 = vmatpush3.msra.mxu0 %v405_v3  ;;  %v380_v5 = vld [vmem:[%s6196_s23] sm:$0xff]  ;;  %v381_v7 = vld [vmem:[%s6196_s23 + $0x8] sm:$0xff]  ;;  %v382_v10 = vld [vmem:[%s6196_s23 + $0x10] sm:$0xff]  ;;  %s6217_s29 = scalar_lea.vmem %s11719_s2, %s6190_s20 }
  0x12   : > { %5726 = vmatprep.subr.mxu0 %v404_v4  ;;  %v388_v6 = vld [vmem:[%s6202_s26] sm:$0xff]  ;;  %v389_v9 = vld [vmem:[%s6202_s26 + $0x8] sm:$0xff]  ;;  %v390_v11 = vld [vmem:[%s6202_s26 + $0x10] sm:$0xff] }
  0x13   : > { %5727 = vmatpush3.msra.mxu0 %v404_v4  ;;  %v396_v8 = vadd.f32 %v388_v6, %v380_v5  ;;  %v397_v12 = vadd.f32 %v389_v9, %v381_v7  ;;  %v398_v13 = vadd.f32 %v390_v11, %v382_v10  ;;  %v383_v14 = vld [vmem:[%s6196_s23 + $0x18] sm:$0xff]  ;;  %v384_v16 = vld [vmem:[%s6196_s23 + $0x20] sm:$0xff]  ;;  %v385_v19 = vld [vmem:[%s6196_s23 + $0x28] sm:$0xff] }
  0x14   : > { %v391_v15 = vld [vmem:[%s6202_s26 + $0x18] sm:$0xff]  ;;  %v392_v17 = vld [vmem:[%s6202_s26 + $0x20] sm:$0xff]  ;;  %v393_v21 = vld [vmem:[%s6202_s26 + $0x28] sm:$0xff] }
  0x15   : > { %5728 = vmatprep.mubr.msk.f32.mxu0 %vm11856_vm0, %v396_v8  ;;  %v399_v18 = vadd.f32 %v391_v15, %v383_v14  ;;  %v400_v20 = vadd.f32 %v392_v17, %v384_v16  ;;  %v668_v22 = vld [vmem:[%s6217_s29 + $0x8] sm:$0xff]  ;;  %v669_v23 = vld [vmem:[%s6217_s29 + $0x10] sm:$0xff]  ;;  %v667_v27 = vld [vmem:[%s6217_s29] sm:$0xff]  ;;  %v401_v28 = vadd.f32 %v393_v21, %v385_v19 }
  0x16   : > { %5729 = vmatmul.mubr.msk.f32.vlgmr.msra.gmra.mxu0 %vm11856_vm0, %v397_v12  ;;  %v386_v24 = vld [vmem:[%s6196_s23 + $0x30] sm:$0xff]  ;;  %v6229_v26 = vmul.f32 16.0, %v668_v22  ;;  %v6234_v29 = vmul.f32 16.0, %v669_v23  ;;  %v6236_v30 = vmul.f32 16.0, %v667_v27  ;;  %v387_v32 = vld [vmem:[%s6196_s23 + $0x38] sm:$0xff]  ;;  %v671_v37 = vld [vmem:[%s6217_s29 + $0x20] sm:$0xff] }
  0x17   : > { %5731 = vmatprep.mubr.msk.f32.mxu0 %vm11856_vm0, %v398_v13  ;;  %v394_v25 = vld [vmem:[%s6202_s26 + $0x30] sm:$0xff]  ;;  %v395_v33 = vld [vmem:[%s6202_s26 + $0x38] sm:$0xff]  ;;  %v6252_v39 = vmul.f32 16.0, %v671_v37  ;;  %v672_v40 = vld [vmem:[%s6217_s29 + $0x28] sm:$0xff]  ;;  %s11676_s26 = scalar_lea.vmem %s11726_s9, %s6190_s20 }
  0x18   : > { %12307 = vst [vmem:[#allocation2_spill] sm:$0xff] %v6229_v26  ;;  %690 = vperm.xlu1 %5866, %v6229_v26   ;;  %12308 = vst [vmem:[#allocation3_spill] sm:$0xff] %v6234_v29  ;;  %v402_v31 = vadd.f32 %v394_v25, %v386_v24  ;;  %v670_v34 = vld [vmem:[%s6217_s29 + $0x18] sm:$0xff]  ;;  %685 = vperm.xlu0 %5865, %v6236_v30   ;;  %v403_v35 = vadd.f32 %v395_v33, %v387_v32  ;;  %v673_v41 = vld [vmem:[%s6217_s29 + $0x30] sm:$0xff]  ;;  %v6258_v42 = vmul.f32 16.0, %v672_v40 }
  0x19   : > { %12309 = vst [vmem:[#allocation4_spill] sm:$0xff] %v6236_v30  ;;  %v6245_v36 = vmul.f32 16.0, %v670_v34  ;;  %12311 = vst [vmem:[#allocation6_spill] sm:$0xff] %v6252_v39  ;;  %v6260_v43 = vmul.f32 16.0, %v673_v41  ;;  %v674_v44 = vld [vmem:[%s6217_s29 + $0x38] sm:$0xff]  ;;  %v11731_v34 = vmov 8  }
  0x1a   : > { %5732 = vmatmul.mubr.msk.f32.gmra.mxu0 %vm11856_vm0, %v399_v18  ;;  %12312 = vst [vmem:[#allocation7_spill] sm:$0xff] %v6258_v42  ;;  %v6266_v45 = vmul.f32 16.0, %v674_v44 }
  0x1b   : > { %5734 = vmatprep.mubr.msk.f32.mxu0 %vm11856_vm0, %v400_v20  ;;  %12310 = vst [vmem:[#allocation5_spill] sm:$0xff] %v6245_v36  ;;  %12313 = vst [vmem:[#allocation8_spill] sm:$0xff] %v6260_v43 }
  0x1c   : > { %695 = vperm.xlu1 %5866, %v6234_v29   ;;  %5868 = vset.pattern.permute.xlu0 %v6096_v38  ;;  %12314 = vst [vmem:[#allocation9_spill] sm:$0xff] %v6266_v45 }
  0x1d   : > { %744 = vperm.xlu0 %5868, %v6229_v26  }
  0x1e   : > { %5735 = vmatmul.mubr.msk.f32.gmra.mxu0 %vm11856_vm0, %v401_v28 }
  0x1f   : > { %5737 = vmatprep.mubr.msk.f32.mxu0 %vm11856_vm0, %v402_v31 }
  0x20   : > { %700 = vperm.xlu1 %5866, %v6245_v36  }
  0x21   : > { %756 = vperm.xlu0 %5868, %v6252_v39  }
  0x22   : > { %5738 = vmatmul.mubr.msk.f32.gmra.mxu0 %vm11856_vm0, %v403_v35 }
  0x24   : > { %705 = vperm.xlu1 %5866, %v6252_v39  }
  0x25   : > { %764 = vperm.xlu0 %5868, %v6260_v43  }
  0x28   : > { %710 = vperm.xlu1 %5866, %v6258_v42  }
  0x29   : > { %5873 = vset.pattern.permute.xlu0 %v11731_v34 }
  0x2c   : > { %715 = vperm.xlu1 %5866, %v6260_v43   ;;  %v12324_v43 = vmov 8  }
  0x30   : > { %720 = vperm.xlu1 %5866, %v6266_v45  }
  0x34   : > { %5867 = vset.pattern.permute.xlu1 %v6096_v38 }
  0x35   : > { %740 = vperm.xlu1 %5867, %v6236_v30  }
  0x39   : > { %748 = vperm.xlu1 %5867, %v6234_v29  }
  0x3d   : > { %752 = vperm.xlu1 %5867, %v6245_v36   ;;  %v12329_v36 = vmov 10  }
  0x41   : > { %760 = vperm.xlu1 %5867, %v6258_v42  }
  0x45   : > { %768 = vperm.xlu1 %5867, %v6266_v45  }
  0x49   : > { %5869 = vset.pattern.permute.xlu1 %v11731_v34 }
  0x93   : > { %v691_v63 = vpop.permute.xlu1 %690  ;;  %v686_v3 = vpop.permute.xlu0 %685 }
  0x97   : > { %v696_v13 = vpop.permute.xlu1 %695 }
  0x98   : > { %v745_v17 = vpop.permute.xlu0 %744 }
  0x9b   : > { %v701_v14 = vpop.permute.xlu1 %700 }
  0x9f   : > { %v6313_v15 = vpop.permute.xlu1 %705 }
  0xa3   : > { %v6315_v16 = vpop.permute.xlu1 %710 }
  0xa7   : > { %v6318_v20 = vpop.permute.xlu1 %715 }
  0xab   : > { %v6322_v24 = vpop.permute.xlu1 %720 }
  0xb0   : > { %v741_v35 = vpop.permute.xlu1 %740 }
  0xd6   : > { %v5730_v47 = vpop.f32.mrf.mxu0 }
  0xd7   : > { %v6277_v48 = vadd.f32 %v5730_v47, %v5419_v46 }
  0xd8   : > { %v506_v49 = vpop.f32.mrf.mxu0 }
  0xd9   : > { %12315 = vst [vmem:[#allocation10_spill] sm:$0xff] %v6277_v48  ;;  %v6279_v50 = vadd.f32 %v5419_v46, %v506_v49  ;;  %v549_v51 = vsel %vm545_vm1, %v6277_v48, -inf  ;;  %v724_v2 = vadd.f32 %v691_v63, %v6277_v48  ;;  %v772_v18 = vadd.f32 %v745_v17, %v6277_v48 }
  0xda   : > { %550 = vmax.xlane.f32.xlu0 %v549_v51  ;;  %v5733_v52 = vpop.f32.mrf.mxu0 }
  0xdb   : > { %12316 = vst [vmem:[#allocation11_spill] sm:$0xff] %v6279_v50  ;;  %v6283_v53 = vadd.f32 %v5733_v52, %v5419_v46  ;;  %v546_v57 = vsel %vm545_vm1, %v6279_v50, -inf  ;;  %v5429_v4 = vadd.f32 -0.5, %v724_v2  ;;  %v723_v5 = vadd.f32 %v686_v3, %v6279_v50 }
  0xdc   : > { %v516_v54 = vpop.f32.mrf.mxu0  ;;  %v5437_v21 = vadd.f32 -0.5, %v772_v18  ;;  %v771_v40 = vadd.f32 %v741_v35, %v6279_v50 }
  0xdd   : > { %12317 = vst [vmem:[#allocation12_spill] sm:$0xff] %v6283_v53  ;;  %v6285_v55 = vadd.f32 %v5419_v46, %v516_v54  ;;  %v555_v56 = vsel %vm545_vm1, %v6283_v53, -inf  ;;  %v788_v6 = vfloor.f32 %v5429_v4  ;;  %v6303_v7 = vadd.f32 -0.5, %v723_v5 }
  0xde   : > { %556 = vmax.xlane.f32.xlu1 %v555_v56  ;;  %v5736_v58 = vpop.f32.mrf.mxu0  ;;  %547 = vmax.xlane.f32.xlu0 %v546_v57  ;;  %v796_v25 = vfloor.f32 %v5437_v21  ;;  %v726_v32 = vadd.f32 %v701_v14, %v6283_v53  ;;  %v6344_v47 = vadd.f32 -0.5, %v771_v40 }
  0xdf   : > { %12318 = vst [vmem:[#allocation13_spill] sm:$0xff] %v6285_v55  ;;  %v6291_v60 = vadd.f32 %v5736_v58, %v5419_v46  ;;  %v552_v62 = vsel %vm545_vm1, %v6285_v55, -inf  ;;  %v5770_v8 = vtrunc.f32 %v788_v6  ;;  %v787_v9 = vfloor.f32 %v6303_v7 }
  0xe0   : > { %v526_v59 = vpop.f32.mrf.mxu0  ;;  %v5786_v33 = vtrunc.f32 %v796_v25  ;;  %v6333_v37 = vadd.f32 -0.5, %v726_v32  ;;  %v725_v44 = vadd.f32 %v696_v13, %v6285_v55  ;;  %v812_v52 = vsub.f32 %v5437_v21, %v796_v25 }
  0xe1   : > { %12319 = vst [vmem:[#allocation14_spill] sm:$0xff] %v6291_v60  ;;  %v6293_v61 = vadd.f32 %v5419_v46, %v526_v59  ;;  %v561_v1 = vsel %vm545_vm1, %v6291_v60, -inf  ;;  %v5771_v10 = vcvt.f32.s32 %v5770_v8  ;;  %v5768_v11 = vtrunc.f32 %v787_v9 }
  0xe2   : > { %553 = vmax.xlane.f32.xlu1 %v552_v62  ;;  %v5739_v19 = vpop.f32.mrf.mxu0  ;;  %v6335_v38 = vcvt.f32.s32 %v5786_v33  ;;  %v790_v41 = vfloor.f32 %v6333_v37  ;;  %v6348_v51 = vadd.f32 -0.5, %v725_v44  ;;  %v804_v54 = vsub.f32 %v5429_v4, %v788_v6 }
  0xe3   : > { %12320 = vst [vmem:[#allocation15_spill] sm:$0xff] %v6293_v61  ;;  %v558_v0 = vsel %vm545_vm1, %v6293_v61, -inf  ;;  %v6309_v12 = vcvt.f32.s32 %v5768_v11  ;;  %v6324_v27 = vadd.f32 %v5739_v19, %v5419_v46  ;;  %vm836_vm4 = vcmp.ge.s32.totalorder %v5771_v10, 0 }
  0xe4   : > { %559 = vmax.xlane.f32.xlu0 %v558_v0  ;;  %v536_v22 = vpop.f32.mrf.mxu0  ;;  %vm916_vm2 = vcmp.ge.s32.totalorder %v6335_v38, 0  ;;  %vm924_vm3 = vcmp.lt.s32.totalorder %v6335_v38, 16  ;;  %vm844_vm5 = vcmp.lt.s32.totalorder %v5771_v10, 16  ;;  %v5774_v49 = vtrunc.f32 %v790_v41 }
  0xe5   : > { %v6320_v23 = vadd.f32 %v5419_v46, %v536_v22  ;;  %12322 = vst [vmem:[#allocation17_spill] sm:$0xff] %v6324_v27  ;;  %v567_v31 = vsel %vm545_vm1, %v6324_v27, -inf  ;;  %v6340_v46 = vpop.permute.xlu1 %748  ;;  %vm932_vm6 = vmand %vm916_vm2, %vm924_vm3  ;;  %vm876_vm8 = vcmp.ge.s32.totalorder %v5771_v10, 4294967295  ;;  %vm884_vm9 = vcmp.lt.s32.totalorder %v5771_v10, 15 }
  0xe6   : > { %562 = vmax.xlane.f32.xlu1 %v561_v1  ;;  %vm852_vm7 = vmand %vm836_vm4, %vm844_vm5  ;;  %v795_v56 = vfloor.f32 %v6344_v47  ;;  %v6351_v58 = vcvt.f32.s32 %v5774_v49  ;;  %v789_v59 = vfloor.f32 %v6348_v51  ;;  %v11727_v62 = vmov 0.0  }
  0xe7   : > { %12321 = vst [vmem:[#allocation16_spill] sm:$0xff] %v6320_v23  ;;  %v564_v28 = vsel %vm545_vm1, %v6320_v23, -inf  ;;  %v5461_v63 = vsel %vm932_vm6, 1.0, %v11727_v62  ;;  %v5445_v0 = vsel %vm852_vm7, 1.0, %v11727_v62  ;;  %v1020_v1 = vsub.f32 1.0, %v812_v52  ;;  %vm892_vm10 = vmand %vm876_vm8, %vm884_vm9 }
  0xe8   : > { %v996_v2 = vsub.f32 1.0, %v804_v54  ;;  %vm835_vm11 = vcmp.ge.s32.totalorder %v6309_v12, 0  ;;  %vm843_vm12 = vcmp.lt.s32.totalorder %v6309_v12, 16  ;;  %vm956_vm13 = vcmp.ge.s32.totalorder %v6335_v38, 4294967295 }
  0xe9   : > { %v753_v57 = vpop.permute.xlu1 %752  ;;  %vm964_vm14 = vcmp.lt.s32.totalorder %v6335_v38, 15  ;;  %v5784_v4 = vtrunc.f32 %v795_v56  ;;  %v1028_v5 = vmul.f32 %v5461_v63, %v1020_v1  ;;  %v5772_v8 = vtrunc.f32 %v789_v59  ;;  %vm851_vm15 = vmand %vm835_vm11, %vm843_vm12 }
  0xea   : > { %v774_v3 = vadd.f32 %v753_v57, %v6283_v53  ;;  %v1004_v6 = vmul.f32 %v5445_v0, %v996_v2  ;;  %v803_v11 = vsub.f32 %v6303_v7, %v787_v9  ;;  %vm972_vm1 = vmand %vm956_vm13, %vm964_vm14  ;;  %vm875_vm2 = vcmp.ge.s32.totalorder %v6309_v12, 4294967295 }
  0xeb   : > { %vm883_vm3 = vcmp.lt.s32.totalorder %v6309_v12, 15  ;;  %v6373_v14 = vcvt.f32.s32 %v5784_v4  ;;  %v6375_v17 = vcvt.f32.s32 %v5772_v8  ;;  %v5444_v19 = vsel %vm851_vm15, 1.0, %v11727_v62  ;;  %v757_v8 = vpop.permute.xlu0 %756 }
  0xec   : > { %v5439_v13 = vadd.f32 -0.5, %v774_v3  ;;  %v5469_v21 = vsel %vm972_vm1, 1.0, %v11727_v62  ;;  %v995_v7 = vsub.f32 1.0, %v803_v11  ;;  %vm891_vm4 = vmand %vm875_vm2, %vm883_vm3  ;;  %v728_v25 = vadd.f32 %v6315_v16, %v6291_v60 }
  0xed   : > { %vm955_vm5 = vcmp.ge.s32.totalorder %v6373_v14, 4294967295  ;;  %vm963_vm6 = vcmp.lt.s32.totalorder %v6373_v14, 15  ;;  %v1036_v22 = vmul.f32 %v5469_v21, %v812_v52  ;;  %vm915_vm8 = vcmp.ge.s32.totalorder %v6373_v14, 0 }
  0xee   : > { %v798_v9 = vfloor.f32 %v5439_v13  ;;  %vm971_vm7 = vmand %vm955_vm5, %vm963_vm6  ;;  %vm923_vm9 = vcmp.lt.s32.totalorder %v6373_v14, 16  ;;  %v773_v32 = vadd.f32 %v6340_v46, %v6285_v55  ;;  %v6393_v40 = vadd.f32 -0.5, %v728_v25 }
  0xef   : > { %v727_v16 = vadd.f32 %v6313_v15, %v6293_v61  ;;  %v5468_v44 = vsel %vm971_vm7, 1.0, %v11727_v62  ;;  %v811_v49 = vsub.f32 %v6344_v47, %v795_v56  ;;  %v1092_v57 = vadd.f32 %v1036_v22, %v1028_v5 }
  0xf0   : > { %v792_v63 = vfloor.f32 %v6393_v40  ;;  %vm837_vm14 = vcmp.ge.s32.totalorder %v6375_v17, 0  ;;  %vm845_vm15 = vcmp.lt.s32.totalorder %v6375_v17, 16  ;;  %vm838_vm1 = vcmp.ge.s32.totalorder %v6351_v58, 0 }
  0xf1   : > { %v1035_v46 = vmul.f32 %v5468_v44, %v811_v49  ;;  %v6406_v0 = vadd.f32 -0.5, %v727_v16  ;;  %v1019_v1 = vsub.f32 1.0, %v811_v49  ;;  %vm846_vm2 = vcmp.lt.s32.totalorder %v6351_v58, 16  ;;  %vm853_vm3 = vmand %vm837_vm14, %vm845_vm15 }
  0xf2   : > { %v5778_v3 = vtrunc.f32 %v792_v63  ;;  %v805_v21 = vsub.f32 %v6348_v51, %v789_v59  ;;  %vm877_vm5 = vcmp.ge.s32.totalorder %v6375_v17, 4294967295  ;;  %vm885_vm6 = vcmp.lt.s32.totalorder %v6375_v17, 15 }
  0xf3   : > { %v791_v4 = vfloor.f32 %v6406_v0  ;;  %vm878_vm7 = vcmp.ge.s32.totalorder %v6351_v58, 4294967295  ;;  %v5446_v59 = vsel %vm853_vm3, 1.0, %v11727_v62 }
  0xf7   : > { %1390 = vrot.lane.b32.xlu1 %v5771_v10, %s6097_s12  ;;  %v5453_v10 = vsel %vm892_vm10, 1.0, %v11727_v62  ;;  %vm931_vm10 = vmand %vm915_vm8, %vm923_vm9  ;;  %vm886_vm8 = vcmp.lt.s32.totalorder %v6351_v58, 15 }
  0xf8   : > { %v1012_v18 = vmul.f32 %v5453_v10, %v804_v54  ;;  %v6403_v54 = vadd.f32 -0.5, %v773_v32  ;;  %v5460_v15 = vsel %vm931_vm10, 1.0, %v11727_v62  ;;  %vm893_vm9 = vmand %vm877_vm5, %vm885_vm6 }
  0xf9   : > { %v1027_v2 = vmul.f32 %v5460_v15, %v1019_v1  ;;  %vm894_vm10 = vmand %vm878_vm7, %vm886_vm8 }
  0xfa   : > { %1388 = vrot.lane.b32.xlu0 %v6309_v12, %s6097_s12  ;;  %v1003_v12 = vmul.f32 %v5444_v19, %v995_v7  ;;  %v1044_v35 = vadd.f32 %v1012_v18, %v1004_v6  ;;  %v797_v47 = vfloor.f32 %v6403_v54  ;;  %v806_v7 = vsub.f32 %v6333_v37, %v790_v41 }
  0xfb   : > { %v1091_v10 = vadd.f32 %v1035_v46, %v1027_v2  ;;  %v997_v41 = vsub.f32 1.0, %v805_v21 }
 0x119   : > { %565 = vmax.xlane.f32.xlu0 %v564_v28  ;;  %v5452_v28 = vsel %vm891_vm4, 1.0, %v11727_v62  ;;  %vm854_vm4 = vmand %vm838_vm1, %vm846_vm2 }
 0x11a   : > { %v1011_v33 = vmul.f32 %v5452_v28, %v803_v11  ;;  %v6427_v11 = vcvt.f32.s32 %v5778_v3  ;;  %v5447_v37 = vsel %vm854_vm4, 1.0, %v11727_v62 }
 0x11b   : > { %568 = vmax.xlane.f32.xlu1 %v567_v31  ;;  %v5790_v31 = vtrunc.f32 %v798_v9 }
 0x11c   : > { %v1043_v56 = vadd.f32 %v1011_v33, %v1003_v12 }
 0x11d   : > { %v6401_v52 = vcvt.f32.s32 %v5790_v31  ;;  %v1005_v31 = vmul.f32 %v5446_v59, %v997_v41 }
 0x11f   : > { %vm918_vm11 = vcmp.ge.s32.totalorder %v6401_v52, 0  ;;  %vm926_vm12 = vcmp.lt.s32.totalorder %v6401_v52, 16 }
 0x120   : > { %vm934_vm13 = vmand %vm918_vm11, %vm926_vm12  ;;  %vm958_vm11 = vcmp.ge.s32.totalorder %v6401_v52, 4294967295  ;;  %vm966_vm12 = vcmp.lt.s32.totalorder %v6401_v52, 15 }
 0x121   : > { %vm974_vm15 = vmand %vm958_vm11, %vm966_vm12 }
 0x122   : > { %v5471_v1 = vsel %vm974_vm15, 1.0, %v11727_v62 }
 0x12c   : > { %1394 = vrot.lane.b32.xlu1 %v6351_v58, %s6097_s12 }
 0x12f   : > { %1214 = vrot.lane.b32.xlu0 %v1028_v5, %s6097_s12  ;;  %v6417_v5 = vsub.f32 %v5439_v13, %v798_v9  ;;  %v5776_v13 = vtrunc.f32 %v791_v4  ;;  %v775_v9 = vadd.f32 %v757_v8, %v6293_v61 }
 0x130   : > { %1254 = vrot.lane.b32.xlu1 %v1004_v6, %s6100_s13  ;;  %v5788_v6 = vtrunc.f32 %v797_v47 }
 0x131   : > { %v1022_v19 = vsub.f32 1.0, %v6417_v5  ;;  %v6449_v25 = vcvt.f32.s32 %v5776_v13  ;;  %v5440_v28 = vadd.f32 -0.5, %v775_v9  ;;  %v1038_v8 = vmul.f32 %v5471_v1, %v6417_v5 }
 0x133   : > { %1392 = vrot.lane.b32.xlu0 %v6375_v17, %s6097_s12  ;;  %v998_v17 = vsub.f32 1.0, %v806_v7  ;;  %v799_v44 = vfloor.f32 %v5440_v28  ;;  %vm839_vm8 = vcmp.ge.s32.totalorder %v6449_v25, 0  ;;  %vm887_vm15 = vcmp.lt.s32.totalorder %v6449_v25, 15 }
 0x134   : > { %1294 = vrot.lane.b32.xlu1 %v1012_v18, %s6100_s13  ;;  %v5463_v18 = vsel %vm934_vm13, 1.0, %v11727_v62 }
 0x135   : > { %v1030_v51 = vmul.f32 %v5463_v18, %v1022_v19  ;;  %v1006_v32 = vmul.f32 %v5447_v37, %v998_v17  ;;  %v5792_v3 = vtrunc.f32 %v799_v44 }
 0x137   : > { %1252 = vrot.lane.b32.xlu0 %v1003_v12, %s6100_s13  ;;  %v6447_v12 = vcvt.f32.s32 %v5788_v6  ;;  %v1094_v37 = vadd.f32 %v1038_v8, %v1030_v51 }
 0x138   : > { %1334 = vrot.lane.b32.xlu1 %v1036_v22, %s6097_s12  ;;  %v761_v22 = vpop.permute.xlu1 %760 }
 0x139   : > { %v776_v58 = vadd.f32 %v761_v22, %v6291_v60  ;;  %vm957_vm13 = vcmp.ge.s32.totalorder %v6447_v12, 4294967295  ;;  %vm965_vm14 = vcmp.lt.s32.totalorder %v6447_v12, 15  ;;  %vm917_vm2 = vcmp.ge.s32.totalorder %v6447_v12, 0  ;;  %v765_v22 = vpop.permute.xlu0 %764 }
 0x13a   : > { %vm973_vm1 = vmand %vm957_vm13, %vm965_vm14  ;;  %vm925_vm3 = vcmp.lt.s32.totalorder %v6447_v12, 16  ;;  %vm879_vm14 = vcmp.ge.s32.totalorder %v6449_v25, 4294967295 }
 0x13b   : > { %1292 = vrot.lane.b32.xlu0 %v1011_v33, %s6100_s13  ;;  %v5454_v33 = vsel %vm893_vm9, 1.0, %v11727_v62  ;;  %v5441_v16 = vadd.f32 -0.5, %v776_v58  ;;  %v5470_v15 = vsel %vm973_vm1, 1.0, %v11727_v62  ;;  %vm933_vm4 = vmand %vm917_vm2, %vm925_vm3  ;;  %v6498_v58 = vsub.f32 %v5440_v28, %v799_v44 }
 0x13c   : > { %1061 = vrot.lane.b32.xlu1 %v1044_v35, %s6100_s13  ;;  %v5455_v35 = vsel %vm894_vm10, 1.0, %v11727_v62  ;;  %v1013_v49 = vmul.f32 %v5454_v33, %v805_v21  ;;  %v5462_v13 = vsel %vm933_vm4, 1.0, %v11727_v62  ;;  %vm847_vm9 = vcmp.lt.s32.totalorder %v6449_v25, 16  ;;  %vm895_vm3 = vmand %vm879_vm14, %vm887_vm15 }
 0x13d   : > { %vm855_vm12 = vmand %vm839_vm8, %vm847_vm9  ;;  %vm840_vm1 = vcmp.ge.s32.totalorder %v6427_v11, 0  ;;  %vm848_vm2 = vcmp.lt.s32.totalorder %v6427_v11, 16  ;;  %vm888_vm8 = vcmp.lt.s32.totalorder %v6427_v11, 15 }
 0x13e   : > { %vm856_vm4 = vmand %vm840_vm1, %vm848_vm2 }
 0x13f   : > { %1332 = vrot.lane.b32.xlu0 %v1035_v46, %s6097_s12  ;;  %v1014_v46 = vmul.f32 %v5455_v35, %v806_v7  ;;  %v807_v35 = vsub.f32 %v6406_v0, %v791_v4 }
 0x140   : > { %1109 = vrot.lane.b32.xlu1 %v1092_v57, %s6097_s12  ;;  %v729_v57 = vadd.f32 %v6318_v20, %v6320_v23  ;;  %v730_v20 = vadd.f32 %v6322_v24, %v6324_v27 }
 0x141   : > { %v1046_v21 = vadd.f32 %v1014_v46, %v1006_v32 }
 0x142   : > { %v6487_v9 = vadd.f32 -0.5, %v730_v20  ;;  %v5456_v20 = vsel %vm895_vm3, 1.0, %v11727_v62 }
 0x143   : > { %1059 = vrot.lane.b32.xlu0 %v1043_v56, %s6100_s13  ;;  %v813_v56 = vsub.f32 %v6403_v54, %v797_v47  ;;  %v6484_v54 = vcvt.f32.s32 %v5792_v3  ;;  %v1045_v47 = vadd.f32 %v1013_v49, %v1005_v31 }
 0x144   : > { %1212 = vrot.lane.b32.xlu1 %v1027_v2, %s6097_s12  ;;  %v800_v2 = vfloor.f32 %v5441_v16  ;;  %v794_v17 = vfloor.f32 %v6487_v9 }
 0x145   : > { %v1037_v6 = vmul.f32 %v5470_v15, %v813_v56  ;;  %v1021_v18 = vsub.f32 1.0, %v813_v56  ;;  %vm919_vm5 = vcmp.ge.s32.totalorder %v6484_v54, 0  ;;  %vm927_vm6 = vcmp.lt.s32.totalorder %v6484_v54, 16 }
 0x146   : > { %v5794_v19 = vtrunc.f32 %v800_v2  ;;  %vm935_vm7 = vmand %vm919_vm5, %vm927_vm6  ;;  %v5782_v28 = vtrunc.f32 %v794_v17  ;;  %v816_v44 = vsub.f32 %v5441_v16, %v800_v2  ;;  %v5448_v16 = vsel %vm855_vm12, 1.0, %v11727_v62 }
 0x147   : > { %1107 = vrot.lane.b32.xlu0 %v1091_v10, %s6097_s12  ;;  %v6477_v10 = vadd.f32 -0.5, %v729_v57  ;;  %v1029_v7 = vmul.f32 %v5462_v13, %v1021_v18  ;;  %v5464_v33 = vsel %vm935_vm7, 1.0, %v11727_v62  ;;  %v999_v15 = vsub.f32 1.0, %v807_v35 }
 0x148   : > { %1398 = vrot.lane.b32.xlu1 %v6427_v11, %s6097_s12  ;;  %v6491_v24 = vcvt.f32.s32 %v5794_v19  ;;  %v6524_v4 = vcvt.f32.s32 %v5782_v28  ;;  %v808_v56 = vsub.f32 %v6393_v40, %v792_v63  ;;  %vm959_vm5 = vcmp.ge.s32.totalorder %v6484_v54, 4294967295 }
 0x149   : > { %v793_v5 = vfloor.f32 %v6477_v10  ;;  %v1093_v59 = vadd.f32 %v1037_v6, %v1029_v7  ;;  %vm967_vm6 = vcmp.lt.s32.totalorder %v6484_v54, 15  ;;  %vm880_vm7 = vcmp.ge.s32.totalorder %v6427_v11, 4294967295 }
 0x14a   : > { %vm920_vm10 = vcmp.ge.s32.totalorder %v6491_v24, 0  ;;  %vm928_vm11 = vcmp.lt.s32.totalorder %v6491_v24, 16  ;;  %v5449_v13 = vsel %vm856_vm4, 1.0, %v11727_v62  ;;  %vm975_vm9 = vmand %vm959_vm5, %vm967_vm6  ;;  %v1000_v40 = vsub.f32 1.0, %v808_v56 }
 0x14b   : > { %1396 = vrot.lane.b32.xlu0 %v6449_v25, %s6097_s12  ;;  %v5780_v41 = vtrunc.f32 %v793_v5  ;;  %vm936_vm13 = vmand %vm920_vm10, %vm928_vm11  ;;  %v1024_v25 = vsub.f32 1.0, %v816_v44  ;;  %vm960_vm11 = vcmp.ge.s32.totalorder %v6491_v24, 4294967295  ;;  %vm968_vm12 = vcmp.lt.s32.totalorder %v6491_v24, 15 }
 0x14c   : > { %1218 = vrot.lane.b32.xlu1 %v1030_v51, %s6097_s12  ;;  %v769_v51 = vpop.permute.xlu1 %768  ;;  %v5465_v1 = vsel %vm936_vm13, 1.0, %v11727_v62  ;;  %vm896_vm10 = vmand %vm880_vm7, %vm888_vm8  ;;  %v1015_v11 = vmul.f32 %v5456_v20, %v807_v35  ;;  %v1008_v19 = vmul.f32 %v5449_v13, %v1000_v40 }
 0x14d   : > { %vm976_vm13 = vmand %vm960_vm11, %vm968_vm12  ;;  %vm850_vm11 = vcmp.lt.s32.totalorder %v6524_v4, 16 }
 0x14f   : > { %1256 = vrot.lane.b32.xlu0 %v1005_v31, %s6100_s13  ;;  %v777_v31 = vadd.f32 %v765_v22, %v6320_v23 }
 0x150   : > { %1258 = vrot.lane.b32.xlu1 %v1006_v32, %s6100_s13  ;;  %v6507_v32 = vcvt.f32.s32 %v5780_v41  ;;  %v5473_v41 = vsel %vm976_vm13, 1.0, %v11727_v62 }
 0x151   : > { %v5442_v57 = vadd.f32 -0.5, %v777_v31 }
 0x152   : > { %vm841_vm2 = vcmp.ge.s32.totalorder %v6507_v32, 0  ;;  %vm849_vm3 = vcmp.lt.s32.totalorder %v6507_v32, 16  ;;  %vm881_vm8 = vcmp.ge.s32.totalorder %v6507_v32, 4294967295 }
 0x153   : > { %1296 = vrot.lane.b32.xlu0 %v1013_v49, %s6100_s13  ;;  %v1023_v49 = vsub.f32 1.0, %v6498_v58  ;;  %v801_v3 = vfloor.f32 %v5442_v57  ;;  %vm857_vm6 = vmand %vm841_vm2, %vm849_vm3  ;;  %vm890_vm2 = vcmp.lt.s32.totalorder %v6524_v4, 15 }
 0x154   : > { %1298 = vrot.lane.b32.xlu1 %v1014_v46, %s6100_s13  ;;  %v778_v46 = vadd.f32 %v769_v51, %v6324_v27 }
 0x155   : > { %v1031_v0 = vmul.f32 %v5464_v33, %v1023_v49  ;;  %v5796_v18 = vtrunc.f32 %v801_v3  ;;  %v6558_v51 = vsub.f32 %v5442_v57, %v801_v3  ;;  %v1040_v33 = vmul.f32 %v5473_v41, %v816_v44 }
 0x156   : > { %v5443_v2 = vadd.f32 -0.5, %v778_v46 }
 0x157   : > { %1336 = vrot.lane.b32.xlu0 %v1037_v6, %s6097_s12  ;;  %v1007_v6 = vmul.f32 %v5448_v16, %v999_v15  ;;  %v6548_v22 = vcvt.f32.s32 %v5796_v18  ;;  %v1025_v46 = vsub.f32 1.0, %v6558_v51 }
 0x158   : > { %1338 = vrot.lane.b32.xlu1 %v1038_v8, %s6097_s12  ;;  %v1032_v8 = vmul.f32 %v5465_v1, %v1024_v25  ;;  %v802_v63 = vfloor.f32 %v5443_v2  ;;  %v810_v25 = vsub.f32 %v6487_v9, %v794_v17 }
 0x159   : > { %vm921_vm14 = vcmp.ge.s32.totalorder %v6548_v22, 0  ;;  %vm929_vm15 = vcmp.lt.s32.totalorder %v6548_v22, 16  ;;  %v1047_v28 = vadd.f32 %v1015_v11, %v1007_v6 }
 0x15a   : > { %vm937_vm1 = vmand %vm921_vm14, %vm929_vm15  ;;  %v818_v35 = vsub.f32 %v5443_v2, %v802_v63  ;;  %v1096_v15 = vadd.f32 %v1040_v33, %v1032_v8  ;;  %vm961_vm14 = vcmp.ge.s32.totalorder %v6548_v22, 4294967295  ;;  %vm969_vm15 = vcmp.lt.s32.totalorder %v6548_v22, 15 }
 0x15b   : > { %1063 = vrot.lane.b32.xlu0 %v1045_v47, %s6100_s13  ;;  %v5472_v47 = vsel %vm975_vm9, 1.0, %v11727_v62  ;;  %v5466_v57 = vsel %vm937_vm1, 1.0, %v11727_v62  ;;  %vm889_vm9 = vcmp.lt.s32.totalorder %v6507_v32, 15  ;;  %vm882_vm1 = vcmp.ge.s32.totalorder %v6524_v4, 4294967295  ;;  %vm977_vm3 = vmand %vm961_vm14, %vm969_vm15 }
 0x15c   : > { %1065 = vrot.lane.b32.xlu1 %v1046_v21, %s6100_s13  ;;  %v5457_v21 = vsel %vm896_vm10, 1.0, %v11727_v62  ;;  %vm842_vm10 = vcmp.ge.s32.totalorder %v6524_v4, 0  ;;  %v1026_v1 = vsub.f32 1.0, %v818_v35  ;;  %vm897_vm12 = vmand %vm881_vm8, %vm889_vm9  ;;  %v1002_v3 = vsub.f32 1.0, %v810_v25 }
 0x15d   : > { %vm858_vm13 = vmand %vm842_vm10, %vm850_vm11 }
 0x15f   : > { %1111 = vrot.lane.b32.xlu0 %v1093_v59, %s6097_s12  ;;  %v1039_v59 = vmul.f32 %v5472_v47, %v6498_v58  ;;  %v809_v58 = vsub.f32 %v6477_v10, %v793_v5 }
 0x160   : > { %1113 = vrot.lane.b32.xlu1 %v1094_v37, %s6097_s12  ;;  %v1016_v37 = vmul.f32 %v5457_v21, %v808_v56  ;;  %v5450_v56 = vsel %vm857_vm6, 1.0, %v11727_v62 }
 0x161   : > { %v1095_v49 = vadd.f32 %v1039_v59, %v1031_v0  ;;  %v1001_v10 = vsub.f32 1.0, %v809_v58 }
 0x162   : > { %v1048_v44 = vadd.f32 %v1016_v37, %v1008_v19 }
 0x163   : > { %1400 = vrot.lane.b32.xlu0 %v6507_v32, %s6097_s12  ;;  %v6571_v16 = vpop.xlane.xlu0 %550  ;;  %v1009_v9 = vmul.f32 %v5450_v56, %v1001_v10 }
 0x164   : > { %1216 = vrot.lane.b32.xlu1 %v1029_v7, %s6097_s12  ;;  %v5798_v7 = vtrunc.f32 %v802_v63  ;;  %v5474_v63 = vsel %vm977_vm3, 1.0, %v11727_v62 }
 0x166   : > { %v6554_v31 = vcvt.f32.s32 %v5798_v7 }
 0x167   : > { %1220 = vrot.lane.b32.xlu0 %v1031_v0, %s6097_s12  ;;  %v6579_v5 = vpop.xlane.xlu1 %556  ;;  %v1033_v0 = vmul.f32 %v5466_v57, %v1025_v46  ;;  %v6592_v32 = vpop.xlane.xlu0 %547 }
 0x168   : > { %1402 = vrot.lane.b32.xlu1 %v6524_v4, %s6097_s12  ;;  %vm922_vm4 = vcmp.ge.s32.totalorder %v6554_v31, 0  ;;  %vm930_vm5 = vcmp.lt.s32.totalorder %v6554_v31, 16  ;;  %vm970_vm6 = vcmp.lt.s32.totalorder %v6554_v31, 15 }
 0x169   : > { %vm938_vm7 = vmand %vm922_vm4, %vm930_vm5  ;;  %vm962_vm5 = vcmp.ge.s32.totalorder %v6554_v31, 4294967295 }
 0x16a   : > { %v5467_v2 = vsel %vm938_vm7, 1.0, %v11727_v62  ;;  %vm898_vm4 = vmand %vm882_vm1, %vm890_vm2 }
 0x16b   : > { %1260 = vrot.lane.b32.xlu0 %v1007_v6, %s6100_s13  ;;  %v1034_v17 = vmul.f32 %v5467_v2, %v1026_v1  ;;  %v5458_v6 = vsel %vm897_vm12, 1.0, %v11727_v62  ;;  %v6596_v20 = vpop.xlane.xlu1 %553  ;;  %v5459_v18 = vsel %vm898_vm4, 1.0, %v11727_v62  ;;  %vm978_vm7 = vmand %vm962_vm5, %vm970_vm6  ;;  %v1383_v2 = vmul.u32 16, %v6401_v52 }
 0x16c   : > { %1222 = vrot.lane.b32.xlu1 %v1032_v8, %s6097_s12  ;;  %v5451_v8 = vsel %vm858_vm13, 1.0, %v11727_v62  ;;  %v1017_v13 = vmul.f32 %v5458_v6, %v809_v58  ;;  %v1018_v47 = vmul.f32 %v5459_v18, %v810_v25  ;;  %v5475_v21 = vsel %vm978_vm7, 1.0, %v11727_v62 }
 0x16d   : > { %v6602_v4 = vpop.xlane.xlu0 %559  ;;  %v1010_v40 = vmul.f32 %v5451_v8, %v1002_v3  ;;  %v1042_v41 = vmul.f32 %v5475_v21, %v818_v35  ;;  %v11743_v25 = vmov 11   ;;  %v1382_v3 = vmul.u32 16, %v6447_v12 }
 0x16f   : > { %1300 = vrot.lane.b32.xlu0 %v1015_v11, %s6100_s13  ;;  %v6608_v11 = vpop.xlane.xlu1 %562 }
 0x170   : > { %1262 = vrot.lane.b32.xlu1 %v1008_v19, %s6100_s13  ;;  %v1041_v19 = vmul.f32 %v5474_v63, %v6558_v51  ;;  %v1381_v51 = vmul.u32 16, %v6335_v38  ;;  %v11733_v38 = vmov 10  }
 0x171   : > { %v1389_v7 = vpop.permute.xlu0 %1388 }
 0x172   : > { %v1097_v58 = vadd.f32 %v1041_v19, %v1033_v0 }
 0x173   : > { %1340 = vrot.lane.b32.xlu0 %v1039_v59, %s6097_s12  ;;  %v1380_v59 = vmul.u32 16, %v6373_v14  ;;  %v1098_v14 = vadd.f32 %v1042_v41, %v1034_v17 }
 0x174   : > { %1302 = vrot.lane.b32.xlu1 %v1016_v37, %s6100_s13  ;;  %v1049_v37 = vadd.f32 %v1017_v13, %v1009_v9 }
 0x177   : > { %1067 = vrot.lane.b32.xlu0 %v1047_v28, %s6100_s13  ;;  %v1404_v28 = vadd.s32 %v1389_v7, %v1380_v59 }
 0x178   : > { %1342 = vrot.lane.b32.xlu1 %v1040_v33, %s6097_s12  ;;  %v1391_v33 = vpop.permute.xlu1 %1390 }
 0x179   : > { %v1405_v46 = vadd.s32 %v1391_v33, %v1381_v51  ;;  %vm1412_vm8 = vcmp.lt.s32.totalorder %v1404_v28, 0 }
 0x17b   : > { %1115 = vrot.lane.b32.xlu0 %v1095_v49, %s6097_s12  ;;  %v1050_v49 = vadd.f32 %v1018_v47, %v1010_v40  ;;  %v1421_v57 = vadd.s32 256, %v1405_v46  ;;  %vm1413_vm9 = vcmp.lt.s32.totalorder %v1405_v46, 0 }
 0x17c   : > { %1069 = vrot.lane.b32.xlu1 %v1048_v44, %s6100_s13  ;;  %v1420_v44 = vadd.s32 256, %v1404_v28 }
 0x17d   : > { %v1429_v10 = vsel %vm1413_vm9, %v1421_v57, %v1405_v46  ;;  %vm626_vm9 = vcmask 64512  }
 0x17e   : > { %v1428_v35 = vsel %vm1412_vm8, %v1420_v44, %v1404_v28 }
 0x17f   : > { %1224 = vrot.lane.b32.xlu0 %v1033_v0, %s6097_s12  ;;  %v1436_v33 = vadd.s32 1, %v1428_v35 }
 0x180   : > { %1117 = vrot.lane.b32.xlu1 %v1096_v15, %s6097_s12  ;;  %v11729_v15 = vmov 9  }
 0x181   : > { %v5476_v44 = vadd.s32 4294967040, %v1436_v33  ;;  %vm1444_vm13 = vcmp.ge.s32.totalorder %v1436_v33, 256 }
 0x183   : > { %1264 = vrot.lane.b32.xlu0 %v1009_v9, %s6100_s13 }
 0x184   : > { %1226 = vrot.lane.b32.xlu1 %v1034_v17, %s6097_s12 }
 0x187   : > { %1304 = vrot.lane.b32.xlu0 %v1017_v13, %s6100_s13 }
 0x188   : > { %1266 = vrot.lane.b32.xlu1 %v1010_v40, %s6100_s13 }
 0x18b   : > { %1344 = vrot.lane.b32.xlu0 %v1041_v19, %s6097_s12 }
 0x18c   : > { %1306 = vrot.lane.b32.xlu1 %v1018_v47, %s6100_s13 }
 0x18f   : > { %1071 = vrot.lane.b32.xlu0 %v1049_v37, %s6100_s13  ;;  %v1437_v37 = vadd.s32 1, %v1429_v10 }
 0x190   : > { %1346 = vrot.lane.b32.xlu1 %v1042_v41, %s6097_s12 }
 0x191   : > { %v5477_v51 = vadd.s32 4294967040, %v1437_v37  ;;  %vm1445_vm12 = vcmp.ge.s32.totalorder %v1437_v37, 256 }
 0x193   : > { %1119 = vrot.lane.b32.xlu0 %v1097_v58, %s6097_s12  ;;  %v1461_v46 = vsel %vm1445_vm12, %v5477_v51, %v1437_v37 }
 0x194   : > { %1073 = vrot.lane.b32.xlu1 %v1050_v49, %s6100_s13 }
 0x197   : > { %1472 = vperm.xlu0 %5873, %v1428_v35  }
 0x198   : > { %1121 = vrot.lane.b32.xlu1 %v1098_v14, %s6097_s12 }
 0x19b   : > { %5874 = vset.pattern.permute.xlu0 %v11729_v15 }
 0x19c   : > { %1475 = vperm.xlu1 %5869, %v1429_v10   ;;  %1808 = vperm.xlu0 %5874, %v1428_v35  }
 0x1a0   : > { %5870 = vset.pattern.permute.xlu1 %v11729_v15  ;;  %5875 = vset.pattern.permute.xlu0 %v11733_v38 }
 0x1a1   : > { %1811 = vperm.xlu1 %5870, %v1429_v10   ;;  %2112 = vperm.xlu0 %5875, %v1428_v35  }
 0x1a2   : > { %v6624_v0 = vpop.xlane.xlu0 %565 }
 0x1a4   : > { %v6626_v1 = vpop.xlane.xlu1 %568 }
 0x1a5   : > { %5871 = vset.pattern.permute.xlu1 %v11733_v38  ;;  %5876 = vset.pattern.permute.xlu0 %v11743_v25 }
 0x1a6   : > { %2115 = vperm.xlu1 %5871, %v1429_v10   ;;  %2416 = vperm.xlu0 %5876, %v1428_v35   ;;  %v6630_v56 = vpop.permute.xlu0 %1214  ;;  %v1460_v35 = vsel %vm1444_vm13, %v5476_v44, %v1436_v33 }
 0x1a8   : > { %v1395_v9 = vpop.permute.xlu1 %1394 }
 0x1a9   : > { %v1407_v17 = vadd.s32 %v1395_v9, %v1383_v2  ;;  %v1385_v9 = vmul.u32 16, %v6491_v24 }
 0x1aa   : > { %5872 = vset.pattern.permute.xlu1 %v11743_v25  ;;  %v1393_v8 = vpop.permute.xlu0 %1392  ;;  %5877 = vset.pattern.permute.xlu0 %v11731_v34 }
 0x1ab   : > { %vm1415_vm10 = vcmp.lt.s32.totalorder %v1407_v17, 0  ;;  %v1423_v6 = vadd.s32 256, %v1407_v17  ;;  %2419 = vperm.xlu1 %5872, %v1429_v10   ;;  %v1406_v13 = vadd.s32 %v1393_v8, %v1382_v3  ;;  %v1384_v8 = vmul.u32 16, %v6484_v54 }
 0x1ac   : > { %v6636_v40 = vpop.permute.xlu1 %1254 }
 0x1ad   : > { %v6638_v63 = vsel %vm1415_vm10, %v1423_v6, %v1407_v17  ;;  %vm1414_vm11 = vcmp.lt.s32.totalorder %v1406_v13, 0  ;;  %v1422_v18 = vadd.s32 256, %v1406_v13 }
 0x1ae   : > { %1481 = vperm.xlu0 %5877, %v6638_v63   ;;  %v6641_v52 = vpop.permute.xlu0 %1252 }
 0x1af   : > { %5885 = vset.pattern.permute.xlu1 %v11731_v34  ;;  %v6646_v19 = vsel %vm1414_vm11, %v1422_v18, %v1406_v13 }
 0x1b0   : > { %v6644_v12 = vpop.permute.xlu1 %1294  ;;  %1478 = vperm.xlu1 %5885, %v6646_v19   ;;  %v1438_v62 = vadd.s32 1, %v6646_v19 }
 0x1b2   : > { %5878 = vset.pattern.permute.xlu0 %v11729_v15  ;;  %v6650_v47 = vpop.permute.xlu0 %1292  ;;  %vm1446_vm2 = vcmp.ge.s32.totalorder %v1438_v62, 256 }
 0x1b3   : > { %1817 = vperm.xlu0 %5878, %v6638_v63  }
 0x1b4   : > { %v6653_v21 = vpop.permute.xlu1 %1334  ;;  %5886 = vset.pattern.permute.xlu1 %v11729_v15 }
 0x1b5   : > { %1814 = vperm.xlu1 %5886, %v6646_v19  }
 0x1b6   : > { %v6657_v7 = vpop.permute.xlu0 %1332 }
 0x1b7   : > { %5879 = vset.pattern.permute.xlu0 %v11733_v38 }
 0x1b8   : > { %v6660_v59 = vpop.permute.xlu1 %1061  ;;  %2121 = vperm.xlu0 %5879, %v6638_v63  }
 0x1b9   : > { %5887 = vset.pattern.permute.xlu1 %v11733_v38 }
 0x1ba   : > { %2118 = vperm.xlu1 %5887, %v6646_v19   ;;  %v6665_v41 = vpop.permute.xlu0 %1059 }
 0x1bc   : > { %v6667_v28 = vpop.permute.xlu1 %1109  ;;  %5880 = vset.pattern.permute.xlu0 %v11743_v25 }
 0x1bd   : > { %2425 = vperm.xlu0 %5880, %v6638_v63  }
 0x1be   : > { %5888 = vset.pattern.permute.xlu1 %v11743_v25  ;;  %v6672_v58 = vpop.permute.xlu0 %1107 }
 0x1bf   : > { %2422 = vperm.xlu1 %5888, %v6646_v19  }
 0x1c0   : > { %v6675_v49 = vpop.permute.xlu1 %1212 }
 0x1c1   : > { %5881 = vset.pattern.permute.xlu0 %v11731_v34 }
 0x1c2   : > { %1515 = vperm.xlu0 %5881, %v1461_v46   ;;  %v1397_v14 = vpop.permute.xlu0 %1396 }
 0x1c3   : > { %5889 = vset.pattern.permute.xlu1 %v11731_v34  ;;  %v1408_v18 = vadd.s32 %v1397_v14, %v1384_v8 }
 0x1c4   : > { %v1399_v57 = vpop.permute.xlu1 %1398  ;;  %1512 = vperm.xlu1 %5889, %v1460_v35  }
 0x1c5   : > { %v1409_v6 = vadd.s32 %v1399_v57, %v1385_v9  ;;  %v1424_v51 = vadd.s32 256, %v1408_v18  ;;  %vm1416_vm15 = vcmp.lt.s32.totalorder %v1408_v18, 0 }
 0x1c6   : > { %5882 = vset.pattern.permute.xlu0 %v11729_v15  ;;  %v6680_v10 = vpop.permute.xlu0 %1256 }
 0x1c7   : > { %1851 = vperm.xlu0 %5882, %v1461_v46   ;;  %v1425_v24 = vadd.s32 256, %v1409_v6  ;;  %vm1417_vm14 = vcmp.lt.s32.totalorder %v1409_v6, 0  ;;  %v6712_v57 = vsel %vm1416_vm15, %v1424_v51, %v1408_v18  ;;  %v1439_v18 = vadd.s32 1, %v6638_v63 }
 0x1c8   : > { %v6682_v2 = vpop.permute.xlu1 %1218  ;;  %5890 = vset.pattern.permute.xlu1 %v11729_v15 }
 0x1c9   : > { %1848 = vperm.xlu1 %5890, %v1460_v35   ;;  %v6704_v44 = vsel %vm1417_vm14, %v1425_v24, %v1409_v6  ;;  %vm1447_vm1 = vcmp.ge.s32.totalorder %v1439_v18, 256 }
 0x1ca   : > { %v6686_v17 = vpop.permute.xlu0 %1296 }
 0x1cb   : > { %5883 = vset.pattern.permute.xlu0 %v11733_v38 }
 0x1cc   : > { %v6689_v3 = vpop.permute.xlu1 %1258  ;;  %2155 = vperm.xlu0 %5883, %v1461_v46  }
 0x1cd   : > { %5891 = vset.pattern.permute.xlu1 %v11733_v38 }
 0x1ce   : > { %2152 = vperm.xlu1 %5891, %v1460_v35   ;;  %v6693_v13 = vpop.permute.xlu0 %1336 }
 0x1d0   : > { %v6695_v37 = vpop.permute.xlu1 %1298  ;;  %5884 = vset.pattern.permute.xlu0 %v11743_v25 }
 0x1d1   : > { %2459 = vperm.xlu0 %5884, %v1461_v46  }
 0x1d2   : > { %5892 = vset.pattern.permute.xlu1 %v11743_v25  ;;  %v6699_v33 = vpop.permute.xlu0 %1063 }
 0x1d3   : > { %2456 = vperm.xlu1 %5892, %v1460_v35  }
 0x1d4   : > { %v6701_v54 = vpop.permute.xlu1 %1338 }
 0x1d5   : > { %5893 = vset.pattern.permute.xlu0 %v11731_v34 }
 0x1d6   : > { %1487 = vperm.xlu0 %5893, %v6704_v44   ;;  %v6707_v14 = vpop.permute.xlu0 %1111 }
 0x1d7   : > { %5901 = vset.pattern.permute.xlu1 %v11731_v34 }
 0x1d8   : > { %v6710_v46 = vpop.permute.xlu1 %1065  ;;  %1484 = vperm.xlu1 %5901, %v6712_v57  }
 0x1da   : > { %5894 = vset.pattern.permute.xlu0 %v11729_v15  ;;  %v1401_v35 = vpop.permute.xlu0 %1400 }
 0x1db   : > { %1823 = vperm.xlu0 %5894, %v6704_v44  }
 0x1dc   : > { %v6717_v9 = vpop.permute.xlu1 %1113  ;;  %5902 = vset.pattern.permute.xlu1 %v11729_v15  ;;  %v5479_v15 = vadd.s32 4294967040, %v1439_v18 }
 0x1dd   : > { %1820 = vperm.xlu1 %5902, %v6712_v57  }
 0x1de   : > { %v6721_v6 = vpop.permute.xlu0 %1220  ;;  %v1463_v39 = vsel %vm1447_vm1, %v5479_v15, %v1439_v18  ;;  %v1387_v15 = vmul.u32 16, %v6554_v31 }
 0x1df   : > { %5895 = vset.pattern.permute.xlu0 %v11733_v38 }
 0x1e0   : > { %v6724_v8 = vpop.permute.xlu1 %1216  ;;  %2127 = vperm.xlu0 %5895, %v6704_v44  }
 0x1e1   : > { %5903 = vset.pattern.permute.xlu1 %v11733_v38  ;;  %v5478_v38 = vadd.s32 4294967040, %v1438_v62 }
 0x1e2   : > { %2124 = vperm.xlu1 %5903, %v6712_v57   ;;  %v6730_v24 = vpop.permute.xlu0 %1260 }
 0x1e3   : > { %v1462_v42 = vsel %vm1446_vm2, %v5478_v38, %v1438_v62  ;;  %v1386_v38 = vmul.u32 16, %v6548_v22 }
 0x1e4   : > { %v1403_v51 = vpop.permute.xlu1 %1402  ;;  %5896 = vset.pattern.permute.xlu0 %v11743_v25 }
 0x1e5   : > { %2431 = vperm.xlu0 %5896, %v6704_v44   ;;  %v1411_v62 = vadd.s32 %v1403_v51, %v1387_v15 }
 0x1e6   : > { %5904 = vset.pattern.permute.xlu1 %v11743_v25  ;;  %v6736_v34 = vpop.permute.xlu0 %1300  ;;  %v12327_v25 = vmov 9  }
 0x1e7   : > { %2428 = vperm.xlu1 %5904, %v6712_v57   ;;  %v1427_v31 = vadd.s32 256, %v1411_v62  ;;  %vm1419_vm3 = vcmp.lt.s32.totalorder %v1411_v62, 0 }
 0x1e8   : > { %v6739_v63 = vpop.permute.xlu1 %1222 }
 0x1e9   : > { %12323 = vst [vmem:[#allocation18_spill] sm:$0xff] %v6739_v63  ;;  %5897 = vset.pattern.permute.xlu0 %v12324_v43  ;;  %v1435_v15 = vsel %vm1419_vm3, %v1427_v31, %v1411_v62 }
 0x1ea   : > { %1521 = vperm.xlu0 %5897, %v1463_v39   ;;  %v6742_v45 = vpop.permute.xlu0 %1340 }
 0x1eb   : > { %12325 = vst [vmem:[#allocation19_spill] sm:$0xff] %v6742_v45  ;;  %5905 = vset.pattern.permute.xlu1 %v12324_v43  ;;  %v12332_v45 = vmov 11  }
 0x1ec   : > { %v6745_v19 = vpop.permute.xlu1 %1262  ;;  %1518 = vperm.xlu1 %5905, %v1462_v42  }
 0x1ed   : > { %12326 = vst [vmem:[#allocation20_spill] sm:$0xff] %v6745_v19 }
 0x1ee   : > { %5898 = vset.pattern.permute.xlu0 %v12327_v25  ;;  %v6748_v29 = vpop.permute.xlu0 %1067 }
 0x1ef   : > { %1857 = vperm.xlu0 %5898, %v1463_v39  }
 0x1f0   : > { %v6750_v26 = vpop.permute.xlu1 %1302  ;;  %5906 = vset.pattern.permute.xlu1 %v12327_v25 }
 0x1f1   : > { %12328 = vst [vmem:[#allocation21_spill] sm:$0xff] %v6750_v26  ;;  %1854 = vperm.xlu1 %5906, %v1462_v42   ;;  %v1410_v26 = vadd.s32 %v1401_v35, %v1386_v38 }
 0x1f2   : > { %v6754_v18 = vpop.permute.xlu0 %1115 }
 0x1f3   : > { %5899 = vset.pattern.permute.xlu0 %v12329_v36  ;;  %v1426_v51 = vadd.s32 256, %v1410_v26  ;;  %vm1418_vm4 = vcmp.lt.s32.totalorder %v1410_v26, 0 }
 0x1f4   : > { %v6757_v30 = vpop.permute.xlu1 %1342  ;;  %2161 = vperm.xlu0 %5899, %v1463_v39  }
 0x1f5   : > { %12330 = vst [vmem:[#allocation22_spill] sm:$0xff] %v6757_v30  ;;  %5907 = vset.pattern.permute.xlu1 %v12329_v36 }
 0x1f6   : > { %2158 = vperm.xlu1 %5907, %v1462_v42   ;;  %v6761_v19 = vpop.permute.xlu0 %1224 }
 0x1f7   : > { %12331 = vst [vmem:[#allocation23_spill] sm:$0xff] %v6761_v19 }
 0x1f8   : > { %v6763_v63 = vpop.permute.xlu1 %1069  ;;  %5900 = vset.pattern.permute.xlu0 %v12332_v45 }
 0x1f9   : > { %2465 = vperm.xlu0 %5900, %v1463_v39   ;;  %v1434_v39 = vsel %vm1418_vm4, %v1426_v51, %v1410_v26  ;;  %v1441_v26 = vadd.s32 1, %v6704_v44 }
 0x1fa   : > { %5908 = vset.pattern.permute.xlu1 %v12332_v45  ;;  %v6767_v30 = vpop.permute.xlu0 %1264 }
 0x1fb   : > { %12333 = vst [vmem:[#allocation24_spill] sm:$0xff] %v6767_v30  ;;  %2462 = vperm.xlu1 %5908, %v1462_v42   ;;  %vm1449_vm5 = vcmp.ge.s32.totalorder %v1441_v26, 256 }
 0x1fc   : > { %v6769_v22 = vpop.permute.xlu1 %1117 }
 0x1fd   : > { %5909 = vset.pattern.permute.xlu0 %v12324_v43 }
 0x1fe   : > { %1493 = vperm.xlu0 %5909, %v1435_v15   ;;  %v6772_v35 = vpop.permute.xlu0 %1304 }
 0x1ff   : > { %12334 = vst [vmem:[#allocation25_spill] sm:$0xff] %v6772_v35  ;;  %5917 = vset.pattern.permute.xlu1 %v12324_v43 }
 0x200   : > { %v6775_v38 = vpop.permute.xlu1 %1226  ;;  %1490 = vperm.xlu1 %5917, %v1434_v39  }
 0x201   : > { %12335 = vst [vmem:[#allocation26_spill] sm:$0xff] %v6775_v38  ;;  %v5481_v38 = vadd.s32 4294967040, %v1441_v26 }
 0x202   : > { %5910 = vset.pattern.permute.xlu0 %v12327_v25  ;;  %v6778_v30 = vpop.permute.xlu0 %1344 }
 0x203   : > { %12336 = vst [vmem:[#allocation27_spill] sm:$0xff] %v6778_v30  ;;  %1829 = vperm.xlu0 %5910, %v1435_v15   ;;  %v1465_v35 = vsel %vm1449_vm5, %v5481_v38, %v1441_v26  ;;  %v1443_v26 = vadd.s32 1, %v1435_v15 }
 0x204   : > { %v6780_v42 = vpop.permute.xlu1 %1266  ;;  %5918 = vset.pattern.permute.xlu1 %v12327_v25 }
 0x205   : > { %12337 = vst [vmem:[#allocation28_spill] sm:$0xff] %v6780_v42  ;;  %1826 = vperm.xlu1 %5918, %v1434_v39   ;;  %v1440_v42 = vadd.s32 1, %v6712_v57  ;;  %vm1451_vm7 = vcmp.ge.s32.totalorder %v1443_v26, 256 }
 0x206   : > { %v6786_v31 = vpop.permute.xlu0 %1071 }
 0x207   : > { %5911 = vset.pattern.permute.xlu0 %v12329_v36  ;;  %12339 = vst [vmem:[#allocation30_spill] sm:$0xff] %v6786_v31  ;;  %v5480_v44 = vadd.s32 4294967040, %v1440_v42  ;;  %vm1448_vm6 = vcmp.ge.s32.totalorder %v1440_v42, 256 }
 0x208   : > { %v6784_v62 = vpop.permute.xlu1 %1306  ;;  %2133 = vperm.xlu0 %5911, %v1435_v15  }
 0x209   : > { %12338 = vst [vmem:[#allocation29_spill] sm:$0xff] %v6784_v62  ;;  %5919 = vset.pattern.permute.xlu1 %v12329_v36  ;;  %v1464_v19 = vsel %vm1448_vm6, %v5480_v44, %v1440_v42  ;;  %v1442_v44 = vadd.s32 1, %v1434_v39 }
 0x20a   : > { %2130 = vperm.xlu1 %5919, %v1434_v39   ;;  %v6794_v30 = vpop.permute.xlu0 %1119 }
 0x20b   : > { %12341 = vst [vmem:[#allocation32_spill] sm:$0xff] %v6794_v30  ;;  %vm1450_vm8 = vcmp.ge.s32.totalorder %v1442_v44, 256 }
 0x20c   : > { %v6790_v51 = vpop.permute.xlu1 %1346  ;;  %5912 = vset.pattern.permute.xlu0 %v12332_v45 }
 0x20d   : > { %12340 = vst [vmem:[#allocation31_spill] sm:$0xff] %v6790_v51  ;;  %2437 = vperm.xlu0 %5912, %v1435_v15   ;;  %v5482_v15 = vadd.s32 4294967040, %v1442_v44 }
 0x20e   : > { %5920 = vset.pattern.permute.xlu1 %v12332_v45 }
 0x20f   : > { %2434 = vperm.xlu1 %5920, %v1434_v39   ;;  %v571_v39 = vsub.f32 %v6277_v48, %v6571_v16 }
 0x210   : > { %v6797_v62 = vpop.permute.xlu1 %1073 }
 0x211   : > { %12342 = vst [vmem:[#allocation33_spill] sm:$0xff] %v6797_v62  ;;  %5913 = vset.pattern.permute.xlu0 %v12324_v43 }
 0x212   : > { %1527 = vperm.xlu0 %5913, %v1465_v35   ;;  %v6800_v51 = vpop.permute.xlu0 %1472 }
 0x213   : > { %12343 = vst [vmem:[#allocation34_spill] sm:$0xff] %v6800_v51  ;;  %5921 = vset.pattern.permute.xlu1 %v12324_v43 }
 0x214   : > { %v6803_v57 = vpop.permute.xlu1 %1121  ;;  %1524 = vperm.xlu1 %5921, %v1464_v19  }
 0x215   : > { %12344 = vst [vmem:[#allocation35_spill] sm:$0xff] %v6803_v57  ;;  %v570_v57 = vsub.f32 %v6279_v50, %v6592_v32  ;;  %v574_v32 = vsub.f32 %v6293_v61, %v6602_v4  ;;  %v572_v4 = vsub.f32 %v6285_v55, %v6596_v20 }
 0x216   : > { %5914 = vset.pattern.permute.xlu0 %v12327_v25 }
 0x217   : > { %1863 = vperm.xlu0 %5914, %v1465_v35   ;;  %v6808_v62 = vpop.permute.xlu0 %1808  ;;  %v586_v16 = vmul.f32 1.442695, %v574_v32 }
 0x218   : > { %v6806_v30 = vpop.permute.xlu1 %1475  ;;  %12346 = vst [vmem:[#allocation37_spill] sm:$0xff] %v6808_v62  ;;  %5922 = vset.pattern.permute.xlu1 %v12327_v25 }
 0x219   : > { %12345 = vst [vmem:[#allocation36_spill] sm:$0xff] %v6806_v30  ;;  %1860 = vperm.xlu1 %5922, %v1464_v19   ;;  %v5483_v30 = vadd.s32 4294967040, %v1443_v26 }
 0x21b   : > { %5915 = vset.pattern.permute.xlu0 %v12329_v36 }
 0x21c   : > { %v6812_v38 = vpop.permute.xlu1 %1811  ;;  %2167 = vperm.xlu0 %5915, %v1465_v35   ;;  %v6815_v42 = vpop.permute.xlu0 %2112 }
 0x21d   : > { %12347 = vst [vmem:[#allocation38_spill] sm:$0xff] %v6812_v38  ;;  %5923 = vset.pattern.permute.xlu1 %v12329_v36  ;;  %12348 = vst [vmem:[#allocation39_spill] sm:$0xff] %v6815_v42  ;;  %v1467_v42 = vsel %vm1451_vm7, %v5483_v30, %v1443_v26  ;;  %v573_v30 = vsub.f32 %v6283_v53, %v6579_v5 }
 0x21e   : > { %2164 = vperm.xlu1 %5923, %v1464_v19  }
 0x220   : > { %5916 = vset.pattern.permute.xlu0 %v12332_v45 }
 0x221   : > { %v6818_v51 = vpop.permute.xlu1 %2115  ;;  %2471 = vperm.xlu0 %5916, %v1465_v35   ;;  %v6823_v62 = vpop.permute.xlu0 %2416  ;;  %v578_v35 = vmul.f32 1.442695, %v570_v57  ;;  %v576_v57 = vsub.f32 %v6320_v23, %v6624_v0  ;;  %v582_v0 = vmul.f32 1.442695, %v572_v4 }
 0x222   : > { %12349 = vst [vmem:[#allocation40_spill] sm:$0xff] %v6818_v51  ;;  %5924 = vset.pattern.permute.xlu1 %v12332_v45  ;;  %12350 = vst [vmem:[#allocation41_spill] sm:$0xff] %v6823_v62  ;;  %v580_v62 = vmul.f32 1.442695, %v571_v39  ;;  %v577_v39 = vsub.f32 %v6324_v27, %v6626_v1 }
 0x223   : > { %2468 = vperm.xlu1 %5924, %v1464_v19   ;;  %v1466_v19 = vsel %vm1450_vm8, %v5482_v15, %v1442_v44  ;;  %6047 = vpow2.f32 %v578_v35  ;;  %v590_v5 = vmul.f32 1.442695, %v576_v57 }
 0x224   : > { %6049 = vpow2.f32 %v580_v62 }
 0x225   : > { %5925 = vset.pattern.permute.xlu0 %v12324_v43  ;;  %6051 = vpow2.f32 %v586_v16 }
 0x226   : > { %v6828_v31 = vpop.permute.xlu1 %2419  ;;  %1533 = vperm.xlu0 %5925, %v1467_v42  }
 0x227   : > { %12351 = vst [vmem:[#allocation42_spill] sm:$0xff] %v6828_v31  ;;  %5929 = vset.pattern.permute.xlu1 %v12324_v43  ;;  %v584_v43 = vmul.f32 1.442695, %v573_v30 }
 0x228   : > { %1530 = vperm.xlu1 %5929, %v1466_v19  }
 0x229   : > { %v6833_v50 = vpop.permute.xlu0 %1481  ;;  %6053 = vpow2.f32 %v584_v43 }
 0x22a   : > { %12352 = vst [vmem:[#allocation43_spill] sm:$0xff] %v6833_v50  ;;  %5926 = vset.pattern.permute.xlu0 %v12327_v25  ;;  %6055 = vpow2.f32 %v590_v5 }
 0x22b   : > { %1869 = vperm.xlu0 %5926, %v1467_v42   ;;  %v6840_v26 = vpop.permute.xlu1 %1478  ;;  %6057 = vpow2.f32 %v582_v0 }
 0x22c   : > { %12353 = vst [vmem:[#allocation44_spill] sm:$0xff] %v6840_v26  ;;  %5930 = vset.pattern.permute.xlu1 %v12327_v25  ;;  %v575_v25 = vsub.f32 %v6291_v60, %v6608_v11  ;;  %v592_v11 = vmul.f32 1.442695, %v577_v39 }
 0x22d   : > { %1866 = vperm.xlu1 %5930, %v1466_v19  }
 0x22e   : > { %v6845_v44 = vpop.permute.xlu0 %1817  ;;  %v588_v62 = vmul.f32 1.442695, %v575_v25 }
 0x22f   : > { %12354 = vst [vmem:[#allocation45_spill] sm:$0xff] %v6845_v44  ;;  %5927 = vset.pattern.permute.xlu0 %v12329_v36 }
 0x230   : > { %2173 = vperm.xlu0 %5927, %v1467_v42   ;;  %v6848_v15 = vpop.permute.xlu1 %1814  ;;  %v6861_v32 = vpop.eup %6047  ;;  %6059 = vpow2.f32 %v588_v62 }
 0x231   : > { %12355 = vst [vmem:[#allocation46_spill] sm:$0xff] %v6848_v15  ;;  %5931 = vset.pattern.permute.xlu1 %v12329_v36  ;;  %6061 = vpow2.f32 %v592_v11 }
 0x232   : > { %2170 = vperm.xlu1 %5931, %v1466_v19  }
 0x233   : > { %v6853_v20 = vpop.permute.xlu0 %2121 }
 0x234   : > { %12356 = vst [vmem:[#allocation47_spill] sm:$0xff] %v6853_v20  ;;  %5928 = vset.pattern.permute.xlu0 %v12332_v45 }
 0x235   : > { %2477 = vperm.xlu0 %5928, %v1467_v42   ;;  %v6858_v35 = vpop.permute.xlu1 %2118  ;;  %v6867_v42 = vpop.eup %6049 }
 0x236   : > { %12357 = vst [vmem:[#allocation48_spill] sm:$0xff] %v6858_v35  ;;  %5932 = vset.pattern.permute.xlu1 %v12332_v45  ;;  %v6871_v1 = vpop.eup %6051 }
 0x237   : > { %2474 = vperm.xlu1 %5932, %v1466_v19   ;;  %v6879_v19 = vpop.eup %6053 }
 0x238   : > { %v6863_v36 = vpop.permute.xlu0 %2425  ;;  %v6881_v16 = vpop.eup %6055 }
 0x239   : > { %12358 = vst [vmem:[#allocation49_spill] sm:$0xff] %v6863_v36  ;;  %602 = vrot.lane.b32.xlu0 %v6861_v32, %s6104_s14  ;;  %v6891_v4 = vpop.eup %6057 }
 0x23a   : > { %v6869_v30 = vpop.permute.xlu1 %2422 }
 0x23b   : > { %12359 = vst [vmem:[#allocation50_spill] sm:$0xff] %v6869_v30  ;;  %604 = vrot.lane.b32.xlu1 %v6867_v42, %s6104_s14 }
 0x23d   : > { %610 = vrot.lane.b32.xlu0 %v6871_v1, %s6104_s14  ;;  %v6877_v45 = vpop.permute.xlu0 %1515  ;;  %v6897_v0 = vpop.eup %6059 }
 0x23e   : > { %12360 = vst [vmem:[#allocation51_spill] sm:$0xff] %v6877_v45  ;;  %v6905_v39 = vpop.eup %6061 }
 0x23f   : > { %v6883_v57 = vpop.permute.xlu1 %1512  ;;  %608 = vrot.lane.b32.xlu1 %v6879_v19, %s6104_s14 }
 0x240   : > { %12361 = vst [vmem:[#allocation52_spill] sm:$0xff] %v6883_v57 }
 0x241   : > { %614 = vrot.lane.b32.xlu0 %v6881_v16, %s6104_s14 }
 0x242   : > { %v6889_v43 = vpop.permute.xlu0 %1851 }
 0x243   : > { %12362 = vst [vmem:[#allocation53_spill] sm:$0xff] %v6889_v43  ;;  %606 = vrot.lane.b32.xlu1 %v6891_v4, %s6104_s14 }
 0x244   : > { %v6895_v5 = vpop.permute.xlu1 %1848 }
 0x245   : > { %12363 = vst [vmem:[#allocation54_spill] sm:$0xff] %v6895_v5 }
 0x247   : > { %v6899_v25 = vpop.permute.xlu0 %2155  ;;  %612 = vrot.lane.b32.xlu1 %v6897_v0, %s6104_s14 }
 0x248   : > { %12364 = vst [vmem:[#allocation55_spill] sm:$0xff] %v6899_v25 }
 0x249   : > { %v6903_v62 = vpop.permute.xlu1 %2152 }
 0x24a   : > { %12365 = vst [vmem:[#allocation56_spill] sm:$0xff] %v6903_v62 }
 0x24b   : > { %616 = vrot.lane.b32.xlu1 %v6905_v39, %s6104_s14 }
 0x24c   : > { %v6909_v11 = vpop.permute.xlu0 %2459 }
 0x24d   : > { %12366 = vst [vmem:[#allocation57_spill] sm:$0xff] %v6909_v11 }
 0x24e   : > { %v6911_v23 = vpop.permute.xlu1 %2456 }
 0x24f   : > { %12367 = vst [vmem:[#allocation58_spill] sm:$0xff] %v6911_v23 }
 0x251   : > { %v6913_v61 = vpop.permute.xlu0 %1487 }
 0x252   : > { %12368 = vst [vmem:[#allocation59_spill] sm:$0xff] %v6913_v61 }
 0x253   : > { %v6915_v27 = vpop.permute.xlu1 %1484 }
 0x254   : > { %12369 = vst [vmem:[#allocation60_spill] sm:$0xff] %v6915_v27 }
 0x256   : > { %v6917_v60 = vpop.permute.xlu0 %1823 }
 0x257   : > { %12370 = vst [vmem:[#allocation61_spill] sm:$0xff] %v6917_v60 }
 0x258   : > { %v6919_v53 = vpop.permute.xlu1 %1820 }
 0x259   : > { %12371 = vst [vmem:[#allocation62_spill] sm:$0xff] %v6919_v53 }
 0x25b   : > { %v6921_v48 = vpop.permute.xlu0 %2127 }
 0x25c   : > { %12372 = vst [vmem:[#allocation63_spill] sm:$0xff] %v6921_v48 }
 0x25d   : > { %v6923_v55 = vpop.permute.xlu1 %2124 }
 0x25e   : > { %12373 = vst [vmem:[#allocation64_spill] sm:$0xff] %v6923_v55 }
 0x260   : > { %v6925_v36 = vpop.permute.xlu0 %2431 }
 0x261   : > { %12374 = vst [vmem:[#allocation65_spill] sm:$0xff] %v6925_v36 }
 0x262   : > { %v6927_v31 = vpop.permute.xlu1 %2428 }
 0x263   : > { %12375 = vst [vmem:[#allocation66_spill] sm:$0xff] %v6927_v31 }
 0x265   : > { %v6929_v30 = vpop.permute.xlu0 %1521 }
 0x266   : > { %12376 = vst [vmem:[#allocation67_spill] sm:$0xff] %v6929_v30 }
 0x267   : > { %v6931_v11 = vpop.permute.xlu1 %1518 }
 0x268   : > { %12377 = vst [vmem:[#allocation68_spill] sm:$0xff] %v6931_v11 }
 0x26a   : > { %v6933_v23 = vpop.permute.xlu0 %1857 }
 0x26b   : > { %12378 = vst [vmem:[#allocation69_spill] sm:$0xff] %v6933_v23 }
 0x26c   : > { %v6935_v61 = vpop.permute.xlu1 %1854 }
 0x26d   : > { %12379 = vst [vmem:[#allocation70_spill] sm:$0xff] %v6935_v61 }
 0x26f   : > { %v6937_v27 = vpop.permute.xlu0 %2161 }
 0x270   : > { %12380 = vst [vmem:[#allocation71_spill] sm:$0xff] %v6937_v27 }
 0x271   : > { %v6939_v60 = vpop.permute.xlu1 %2158 }
 0x272   : > { %12381 = vst [vmem:[#allocation72_spill] sm:$0xff] %v6939_v60 }
 0x274   : > { %v6941_v15 = vpop.permute.xlu0 %2465 }
 0x275   : > { %12382 = vst [vmem:[#allocation73_spill] sm:$0xff] %v6941_v15 }
 0x276   : > { %v6943_v48 = vpop.permute.xlu1 %2462 }
 0x277   : > { %12383 = vst [vmem:[#allocation74_spill] sm:$0xff] %v6943_v48 }
 0x279   : > { %v6945_v57 = vpop.permute.xlu0 %1493 }
 0x27a   : > { %12384 = vst [vmem:[#allocation75_spill] sm:$0xff] %v6945_v57 }
 0x27b   : > { %v6947_v36 = vpop.permute.xlu1 %1490 }
 0x27c   : > { %12385 = vst [vmem:[#allocation76_spill] sm:$0xff] %v6947_v36 }
 0x27e   : > { %v6949_v31 = vpop.permute.xlu0 %1829 }
 0x27f   : > { %12386 = vst [vmem:[#allocation77_spill] sm:$0xff] %v6949_v31 }
 0x280   : > { %v6951_v35 = vpop.permute.xlu1 %1826 }
 0x281   : > { %12387 = vst [vmem:[#allocation78_spill] sm:$0xff] %v6951_v35 }
 0x283   : > { %v6953_v11 = vpop.permute.xlu0 %2133 }
 0x284   : > { %12388 = vst [vmem:[#allocation79_spill] sm:$0xff] %v6953_v11 }
 0x285   : > { %v6955_v26 = vpop.permute.xlu1 %2130 }
 0x286   : > { %12389 = vst [vmem:[#allocation80_spill] sm:$0xff] %v6955_v26 }
 0x288   : > { %v6957_v61 = vpop.permute.xlu0 %2437 }
 0x289   : > { %12390 = vst [vmem:[#allocation81_spill] sm:$0xff] %v6957_v61 }
 0x28a   : > { %v6959_v45 = vpop.permute.xlu1 %2434 }
 0x28b   : > { %12391 = vst [vmem:[#allocation82_spill] sm:$0xff] %v6959_v45 }
 0x28d   : > { %v6961_v60 = vpop.permute.xlu0 %1527 }
 0x28e   : > { %12392 = vst [vmem:[#allocation83_spill] sm:$0xff] %v6961_v60 }
 0x28f   : > { %v6963_v15 = vpop.permute.xlu1 %1524 }
 0x290   : > { %12393 = vst [vmem:[#allocation84_spill] sm:$0xff] %v6963_v15 }
 0x292   : > { %v6965_v48 = vpop.permute.xlu0 %1863 }
 0x293   : > { %12394 = vst [vmem:[#allocation85_spill] sm:$0xff] %v6965_v48 }
 0x294   : > { %v6967_v57 = vpop.permute.xlu1 %1860 }
 0x295   : > { %12395 = vst [vmem:[#allocation86_spill] sm:$0xff] %v6967_v57 }
 0x297   : > { %v6969_v36 = vpop.permute.xlu0 %2167 }
 0x298   : > { %12396 = vst [vmem:[#allocation87_spill] sm:$0xff] %v6969_v36 }
 0x299   : > { %v6971_v31 = vpop.permute.xlu1 %2164 }
 0x29c   : > { %v6973_v35 = vpop.permute.xlu0 %2471 }
 0x29d   : > { %12397 = vst [vmem:[#allocation88_spill] sm:$0xff] %v6973_v35 }
 0x29e   : > { %v6975_v11 = vpop.permute.xlu1 %2468 }
 0x29f   : > { %12398 = vst [vmem:[#allocation89_spill] sm:$0xff] %v6975_v11 }
 0x2a1   : > { %v6977_v26 = vpop.permute.xlu0 %1533 }
 0x2a2   : > { %12399 = vst [vmem:[#allocation90_spill] sm:$0xff] %v6977_v26 }
 0x2a3   : > { %v6979_v61 = vpop.permute.xlu1 %1530 }
 0x2a4   : > { %12400 = vst [vmem:[#allocation91_spill] sm:$0xff] %v6979_v61 }
 0x2a6   : > { %v6981_v45 = vpop.permute.xlu0 %1869 }
 0x2a7   : > { %12401 = vst [vmem:[#allocation92_spill] sm:$0xff] %v6981_v45 }
 0x2a8   : > { %v6983_v60 = vpop.permute.xlu1 %1866 }
 0x2a9   : > { %12402 = vst [vmem:[#allocation93_spill] sm:$0xff] %v6983_v60 }
 0x2ab   : > { %v6985_v15 = vpop.permute.xlu0 %2173 }
 0x2ac   : > { %12403 = vst [vmem:[#allocation94_spill] sm:$0xff] %v6985_v15 }
 0x2ad   : > { %v6987_v48 = vpop.permute.xlu1 %2170 }
 0x2ae   : > { %12404 = vst [vmem:[#allocation95_spill] sm:$0xff] %v6987_v48 }
 0x2b0   : > { %v6989_v20 = vpop.permute.xlu0 %2477 }
 0x2b1   : > { %12405 = vst [vmem:[#allocation96_spill] sm:$0xff] %v6989_v20 }
 0x2b2   : > { %v6991_v36 = vpop.permute.xlu1 %2474 }
 0x2b3   : > { %12406 = vst [vmem:[#allocation97_spill] sm:$0xff] %v6991_v36 }
 0x2b4   : > { %v603_v35 = vpop.permute.xlu0 %602 }
 0x2b5   : > { %v627_v11 = vsel %vm626_vm9, %v603_v35, 0.0 }
 0x2b6   : > { %628 = vadd.xlane.f32.xlu0 %v627_v11  ;;  %v605_v26 = vpop.permute.xlu1 %604 }
 0x2b7   : > { %v630_v61 = vsel %vm626_vm9, %v605_v26, 0.0 }
 0x2b8   : > { %631 = vadd.xlane.f32.xlu1 %v630_v61  ;;  %v611_v15 = vpop.permute.xlu0 %610 }
 0x2b9   : > { %v639_v55 = vsel %vm626_vm9, %v611_v15, 0.0 }
 0x2ba   : > { %v609_v45 = vpop.permute.xlu1 %608 }
 0x2bb   : > { %v636_v60 = vsel %vm626_vm9, %v609_v45, 0.0 }
 0x2bc   : > { %637 = vadd.xlane.f32.xlu0 %v636_v60  ;;  %v615_v35 = vpop.permute.xlu0 %614  ;;  %v11831_v60 = vmov 17  }
 0x2bd   : > { %v645_v26 = vsel %vm626_vm9, %v615_v35, 0.0  ;;  %5934 = vset.pattern.permute.xlu0 %v11831_v60 }
 0x2be   : > { %v607_v27 = vpop.permute.xlu1 %606 }
 0x2bf   : > { %v633_v48 = vsel %vm626_vm9, %v607_v27, 0.0  ;;  %v11826_v27 = vmov 16  }
 0x2c0   : > { %634 = vadd.xlane.f32.xlu0 %v633_v48  ;;  %5933 = vset.pattern.permute.xlu1 %v11826_v27 }
 0x2c2   : > { %v613_v20 = vpop.permute.xlu1 %612 }
 0x2c3   : > { %v642_v36 = vsel %vm626_vm9, %v613_v20, 0.0 }
 0x2c4   : > { %643 = vadd.xlane.f32.xlu1 %v642_v36  ;;  %640 = vadd.xlane.f32.xlu0 %v639_v55 }
 0x2c6   : > { %v617_v11 = vpop.permute.xlu1 %616 }
 0x2c7   : > { %v648_v61 = vsel %vm626_vm9, %v617_v11, 0.0 }
 0x2c8   : > { %649 = vadd.xlane.f32.xlu1 %v648_v61  ;;  %646 = vadd.xlane.f32.xlu0 %v645_v26 }
 0x33f   : > { %v629_v20 = vpop.xlane.xlu0 %628 }
 0x341   : > { %v632_v48 = vpop.xlane.xlu1 %631 }
 0x342   : > { %6063 = vrcp.f32 %v632_v48 }
 0x343   : > { %6065 = vrcp.f32 %v629_v20  ;;  %v11827_v20 = vmov 19  }
 0x34f   : > { %v6064_v15 = vpop.eup %6063 }
 0x350   : > { %v7004_v55 = vmul.f32 %v6064_v15, %v6867_v42  ;;  %v6066_v61 = vpop.eup %6065  ;;  %v638_v15 = vpop.xlane.xlu0 %637 }
 0x352   : > { %12407 = vst [vmem:[#allocation98_spill] sm:$0xff] %v7004_v55  ;;  %v1084_v36 = vmul.f32 %v6660_v59, %v7004_v55  ;;  %v1237_v45 = vmul.f32 %v6630_v56, %v7004_v55  ;;  %v1357_v42 = vmul.f32 %v6653_v21, %v7004_v55  ;;  %v7022_v59 = vmul.f32 %v6066_v61, %v6861_v32 }
 0x353   : > { %v11829_v56 = vmov 18  }
 0x354   : > { %v1132_v35 = vmul.f32 %v6667_v28, %v1084_v36  ;;  %v7012_v11 = vmul.f32 %v6644_v12, %v1237_v45  ;;  %v7017_v26 = vmul.f32 %v6636_v40, %v1237_v45  ;;  %12408 = vst [vmem:[#allocation99_spill] sm:$0xff] %v7022_v59  ;;  %v7028_v28 = vmul.f32 %v1357_v42, %v6644_v12 }
 0x355   : > { %v1083_v48 = vmul.f32 %v6665_v41, %v7022_v59  ;;  %v7036_v21 = vmul.f32 %v1357_v42, %v6636_v40  ;;  %v1236_v12 = vmul.f32 %v6675_v49, %v7022_v59  ;;  %v1356_v40 = vmul.f32 %v6657_v7, %v7022_v59 }
 0x356   : > { %1149 = vrot.lane.b32.xlu1 %v1132_v35, %s6104_s14  ;;  %1892 = vperm.xlu0 %5934, %v7012_v11  }
 0x357   : > { %v1131_v32 = vmul.f32 %v6672_v58, %v1083_v48  ;;  %v7046_v41 = vmul.f32 %v6641_v52, %v1236_v12  ;;  %v635_v58 = vpop.xlane.xlu0 %634  ;;  %v7053_v49 = vmul.f32 %v1356_v40, %v6650_v47  ;;  %v7058_v36 = vmul.f32 %v1356_v40, %v6641_v52 }
 0x358   : > { %6067 = vrcp.f32 %v635_v58  ;;  %v1316_v45 = vmul.f32 %v6650_v47, %v1236_v12 }
 0x359   : > { %6069 = vrcp.f32 %v638_v15 }
 0x35a   : > { %1614 = vperm.xlu1 %5933, %v7017_v26   ;;  %5936 = vset.pattern.permute.xlu0 %v11829_v56 }
 0x35b   : > { %2196 = vperm.xlu0 %5936, %v7012_v11   ;;  %v641_v42 = vpop.xlane.xlu0 %640 }
 0x35c   : > { %6071 = vrcp.f32 %v641_v42 }
 0x35e   : > { %1686 = vperm.xlu1 %5933, %v7028_v28  }
 0x35f   : > { %5938 = vset.pattern.permute.xlu0 %v11827_v20 }
 0x360   : > { %2500 = vperm.xlu0 %5938, %v7012_v11  }
 0x362   : > { %1742 = vperm.xlu1 %5933, %v7036_v21  }
 0x364   : > { %1147 = vrot.lane.b32.xlu0 %v1131_v32, %s6104_s14 }
 0x365   : > { %5941 = vset.pattern.permute.xlu0 %v11831_v60  ;;  %v6068_v7 = vpop.eup %6067 }
 0x366   : > { %5935 = vset.pattern.permute.xlu1 %v11831_v60  ;;  %v7069_v52 = vmul.f32 %v6068_v7, %v6891_v4  ;;  %v6070_v47 = vpop.eup %6069 }
 0x367   : > { %1940 = vperm.xlu1 %5935, %v7017_v26  }
 0x368   : > { %1936 = vperm.xlu0 %5941, %v7046_v41   ;;  %12409 = vst [vmem:[#allocation100_spill] sm:$0xff] %v7069_v52  ;;  %v1085_v35 = vmul.f32 %v6699_v33, %v7069_v52  ;;  %v7082_v4 = vmul.f32 %v6724_v8, %v7069_v52  ;;  %v7094_v8 = vmul.f32 %v6070_v47, %v6879_v19 }
 0x369   : > { %v6072_v15 = vpop.eup %6071 }
 0x36a   : > { %v1133_v61 = vmul.f32 %v6707_v14, %v1085_v35  ;;  %v7089_v33 = vmul.f32 %v6680_v10, %v7082_v4  ;;  %v1358_v14 = vmul.f32 %v6693_v13, %v7069_v52  ;;  %12410 = vst [vmem:[#allocation101_spill] sm:$0xff] %v7094_v8  ;;  %v1086_v32 = vmul.f32 %v6710_v46, %v7094_v8  ;;  %v647_v35 = vpop.xlane.xlu0 %646  ;;  %v12435_v52 = vld [vmem:[#allocation23_spill] sm:$0xff] }
 0x36b   : > { %2004 = vperm.xlu1 %5935, %v7028_v28   ;;  %v1239_v12 = vmul.f32 %v6682_v2, %v7094_v8  ;;  %v1359_v2 = vmul.f32 %v6701_v54, %v7094_v8 }
 0x36c   : > { %2000 = vperm.xlu0 %5941, %v7053_v49   ;;  %v7099_v48 = vmul.f32 %v1358_v14, %v6686_v17  ;;  %v7106_v13 = vmul.f32 %v1358_v14, %v6680_v10  ;;  %v1134_v19 = vmul.f32 %v6717_v9, %v1086_v32  ;;  %v7118_v10 = vmul.f32 %v6072_v15, %v6871_v1 }
 0x36d   : > { %v1319_v46 = vmul.f32 %v6695_v37, %v1239_v12  ;;  %v7121_v9 = vmul.f32 %v6689_v3, %v1239_v12  ;;  %v7130_v58 = vmul.f32 %v1359_v2, %v6695_v37  ;;  %v7138_v54 = vmul.f32 %v1359_v2, %v6689_v3 }
 0x36e   : > { %12411 = vst [vmem:[#allocation102_spill] sm:$0xff] %v7118_v10  ;;  %v1087_v40 = vmul.f32 %v6748_v29, %v7118_v10  ;;  %v1240_v7 = vmul.f32 %v6721_v6, %v7118_v10  ;;  %v12412_v6 = vld [vmem:[#allocation19_spill] sm:$0xff]  ;;  %v1468_v12 = vlaneseq }
 0x36f   : > { %2052 = vperm.xlu1 %5935, %v7036_v21  }
 0x370   : > { %2048 = vperm.xlu0 %5941, %v7058_v36   ;;  %v1135_v1 = vmul.f32 %v6754_v18, %v1087_v40  ;;  %v1320_v29 = vmul.f32 %v6736_v34, %v1240_v7  ;;  %v7146_v37 = vmul.f32 %v6730_v24, %v1240_v7  ;;  %v1360_v18 = vmul.f32 %v12412_v6, %v7118_v10 }
 0x372   : > { %v7153_v3 = vmul.f32 %v1360_v18, %v6736_v34  ;;  %v644_v34 = vpop.xlane.xlu1 %643 }
 0x373   : > { %5937 = vset.pattern.permute.xlu1 %v11829_v56  ;;  %6073 = vrcp.f32 %v644_v34  ;;  %v12420_v34 = vld [vmem:[#allocation21_spill] sm:$0xff] }
 0x374   : > { %2244 = vperm.xlu1 %5937, %v7017_v26   ;;  %5943 = vset.pattern.permute.xlu0 %v11829_v56  ;;  %6075 = vrcp.f32 %v647_v35 }
 0x375   : > { %2240 = vperm.xlu0 %5943, %v7046_v41  }
 0x378   : > { %2308 = vperm.xlu1 %5937, %v7028_v28  }
 0x379   : > { %2304 = vperm.xlu0 %5943, %v7053_v49  }
 0x37c   : > { %2356 = vperm.xlu1 %5937, %v7036_v21  }
 0x37d   : > { %2352 = vperm.xlu0 %5943, %v7058_v36  }
 0x380   : > { %5939 = vset.pattern.permute.xlu1 %v11826_v27  ;;  %v6074_v32 = vpop.eup %6073 }
 0x381   : > { %1553 = vperm.xlu1 %5939, %v1316_v45   ;;  %5945 = vset.pattern.permute.xlu0 %v11827_v20 }
 0x382   : > { %2544 = vperm.xlu0 %5945, %v7046_v41  }
 0x385   : > { %5940 = vset.pattern.permute.xlu1 %v11831_v60 }
 0x386   : > { %1888 = vperm.xlu1 %5940, %v1316_v45   ;;  %1151 = vrot.lane.b32.xlu0 %v1133_v61, %s6104_s14  ;;  %v1318_v61 = vmul.f32 %v6686_v17, %v7082_v4  ;;  %v7186_v17 = vmul.f32 %v6074_v32, %v6897_v0 }
 0x387   : > { %5952 = vset.pattern.permute.xlu0 %v11831_v60 }
 0x388   : > { %12413 = vst [vmem:[#allocation19_spill] sm:$0xff] %v7186_v17  ;;  %v1088_v2 = vmul.f32 %v6763_v63, %v7186_v17  ;;  %v12419_v63 = vld [vmem:[#allocation18_spill] sm:$0xff] }
 0x38a   : > { %5942 = vset.pattern.permute.xlu1 %v11829_v56  ;;  %1944 = vperm.xlu0 %5952, %v7089_v33  }
 0x38b   : > { %2192 = vperm.xlu1 %5942, %v1316_v45  }
 0x38e   : > { %2008 = vperm.xlu0 %5952, %v7099_v48  }
 0x38f   : > { %5944 = vset.pattern.permute.xlu1 %v11827_v20 }
 0x390   : > { %2496 = vperm.xlu1 %5944, %v1316_v45   ;;  %v7158_v45 = vmul.f32 %v1360_v18, %v6730_v24  ;;  %v7172_v24 = vpop.xlane.xlu1 %649 }
 0x391   : > { %6077 = vrcp.f32 %v7172_v24  ;;  %v12441_v24 = vld [vmem:[#allocation39_spill] sm:$0xff] }
 0x392   : > { %2056 = vperm.xlu0 %5952, %v7106_v13  }
 0x394   : > { %1153 = vrot.lane.b32.xlu1 %v1134_v19, %s6104_s14 }
 0x395   : > { %5946 = vset.pattern.permute.xlu1 %v11826_v27 }
 0x396   : > { %5954 = vset.pattern.permute.xlu0 %v11829_v56 }
 0x397   : > { %2248 = vperm.xlu0 %5954, %v7089_v33  }
 0x398   : > { %1568 = vperm.xlu1 %5946, %v1319_v46  }
 0x39b   : > { %2312 = vperm.xlu0 %5954, %v7099_v48  }
 0x39c   : > { %1624 = vperm.xlu1 %5946, %v7121_v9  }
 0x39f   : > { %2360 = vperm.xlu0 %5954, %v7106_v13  }
 0x3a0   : > { %1696 = vperm.xlu1 %5946, %v7130_v58  }
 0x3a3   : > { %1155 = vrot.lane.b32.xlu0 %v1135_v1, %s6104_s14  ;;  %v1241_v1 = vmul.f32 %v12419_v63, %v7186_v17 }
 0x3a4   : > { %1752 = vperm.xlu1 %5946, %v7138_v54   ;;  %5960 = vset.pattern.permute.xlu0 %v11831_v60 }
 0x3a7   : > { %1904 = vperm.xlu0 %5960, %v1320_v29  }
 0x3a8   : > { %5947 = vset.pattern.permute.xlu1 %v11831_v60 }
 0x3a9   : > { %1900 = vperm.xlu1 %5947, %v1319_v46  }
 0x3ab   : > { %1952 = vperm.xlu0 %5960, %v7146_v37  }
 0x3ad   : > { %1948 = vperm.xlu1 %5947, %v7121_v9  }
 0x3af   : > { %2016 = vperm.xlu0 %5960, %v7153_v3  }
 0x3b1   : > { %2012 = vperm.xlu1 %5947, %v7130_v58  }
 0x3b3   : > { %2064 = vperm.xlu0 %5960, %v7158_v45  }
 0x3b5   : > { %2060 = vperm.xlu1 %5947, %v7138_v54  }
 0x3b7   : > { %5961 = vset.pattern.permute.xlu0 %v11829_v56 }
 0x3b8   : > { %2208 = vperm.xlu0 %5961, %v1320_v29  }
 0x3b9   : > { %5948 = vset.pattern.permute.xlu1 %v11829_v56 }
 0x3ba   : > { %2204 = vperm.xlu1 %5948, %v1319_v46  }
 0x3bc   : > { %2256 = vperm.xlu0 %5961, %v7146_v37  }
 0x3be   : > { %2252 = vperm.xlu1 %5948, %v7121_v9  }
 0x3c0   : > { %2320 = vperm.xlu0 %5961, %v7153_v3  }
 0x3c2   : > { %2316 = vperm.xlu1 %5948, %v7130_v58  }
 0x3c4   : > { %2368 = vperm.xlu0 %5961, %v7158_v45  }
 0x3c6   : > { %2364 = vperm.xlu1 %5948, %v7138_v54  }
 0x3c8   : > { %5962 = vset.pattern.permute.xlu0 %v11827_v20  ;;  %v7178_v42 = vpop.permute.xlu1 %1149 }
 0x3c9   : > { %2512 = vperm.xlu0 %5962, %v1320_v29  }
 0x3ca   : > { %5949 = vset.pattern.permute.xlu1 %v11827_v20 }
 0x3cb   : > { %2508 = vperm.xlu1 %5949, %v1319_v46  }
 0x3cd   : > { %2552 = vperm.xlu0 %5962, %v7089_v33  }
 0x3cf   : > { %5950 = vset.pattern.permute.xlu1 %v11826_v27 }
 0x3d0   : > { %1563 = vperm.xlu1 %5950, %v1318_v61  }
 0x3d1   : > { %5967 = vset.pattern.permute.xlu0 %v11826_v27  ;;  %v1893_v47 = vpop.permute.xlu0 %1892 }
 0x3d2   : > { %1558 = vperm.xlu0 %5967, %v7012_v11   ;;  %v7192_v11 = vand.u32 127, %v1468_v12  ;;  %v12423_v12 = vld [vmem:[#allocation20_spill] sm:$0xff] }
 0x3d4   : > { %5951 = vset.pattern.permute.xlu1 %v11831_v60  ;;  %12415 = vst [vmem:[#allocation104_spill] sm:$0xff] %v7192_v11  ;;  %v7203_v0 = vadd.s32 128, %v7192_v11  ;;  %vm11894_vm10 = vcmp.eq.s32.totalorder %v7192_v11, %v6889_v43  ;;  %vm11889_vm12 = vcmp.eq.s32.totalorder %v7192_v11, %v6812_v38  ;;  %vm11867_vm14 = vcmp.eq.s32.totalorder %v7192_v11, %v6899_v25 }
 0x3d5   : > { %v7183_v14 = vpop.permute.xlu1 %1614  ;;  %1896 = vperm.xlu1 %5951, %v1318_v61   ;;  %vm11866_vm1 = vcmp.eq.s32.totalorder %v7192_v11, %v6818_v51  ;;  %vm1871_vm3 = vcmp.eq.s32.totalorder %v7192_v11, %v6895_v5  ;;  %vm12005_vm7 = vcmp.eq.s32.totalorder %v7192_v11, %v6903_v62  ;;  %vm11935_vm9 = vcmp.eq.s32.totalorder %v7192_v11, %v12441_v24 }
 0x3d6   : > { %1573 = vperm.xlu0 %5967, %v1320_v29   ;;  %v2197_v19 = vpop.permute.xlu0 %2196  ;;  %12418 = vst [vmem:[#allocation107_spill] sm:$0xff] %v7203_v0  ;;  %vm11890_vm11 = vcmp.eq.s32.totalorder %v7203_v0, %v6889_v43  ;;  %vm11888_vm13 = vcmp.eq.s32.totalorder %v7203_v0, %v6812_v38  ;;  %vm11865_vm15 = vcmp.eq.s32.totalorder %v7203_v0, %v6899_v25  ;;  %v12439_v25 = vld [vmem:[#allocation24_spill] sm:$0xff] }
 0x3d7   : > { %v1922_v7 = vsel %vm11890_vm11, %v1893_v47, 0.0  ;;  %vm11864_vm2 = vcmp.eq.s32.totalorder %v7203_v0, %v6818_v51  ;;  %v12437_v51 = vld [vmem:[#allocation25_spill] sm:$0xff]  ;;  %vm1872_vm4 = vcmp.eq.s32.totalorder %v7203_v0, %v6895_v5  ;;  %vm11934_vm8 = vcmp.eq.s32.totalorder %v7203_v0, %v6903_v62  ;;  %v12452_v62 = vld [vmem:[#allocation35_spill] sm:$0xff] }
 0x3d8   : > { %vm11933_vm0 = vcmp.eq.s32.totalorder %v7203_v0, %v12441_v24  ;;  %vm11906_vm11 = vcmp.eq.s32.totalorder %v7203_v0, %v6933_v23 }
 0x3d9   : > { %v7188_v4 = vpop.permute.xlu1 %1686  ;;  %5953 = vset.pattern.permute.xlu1 %v11829_v56  ;;  %v6076_v56 = vpop.eup %6075 }
 0x3da   : > { %12414 = vst [vmem:[#allocation103_spill] sm:$0xff] %v7188_v4  ;;  %2200 = vperm.xlu1 %5953, %v1318_v61   ;;  %1609 = vperm.xlu0 %5967, %v7046_v41   ;;  %v1136_v41 = vmul.f32 %v6769_v22, %v1088_v2  ;;  %v7247_v2 = vmul.f32 %v12423_v12, %v1241_v1 }
 0x3db   : > { %v7194_v15 = vpop.permute.xlu0 %2500 }
 0x3dc   : > { %12416 = vst [vmem:[#allocation105_spill] sm:$0xff] %v7194_v15 }
 0x3dd   : > { %v7196_v46 = vpop.permute.xlu1 %1742 }
 0x3de   : > { %12417 = vst [vmem:[#allocation106_spill] sm:$0xff] %v7196_v46  ;;  %5955 = vset.pattern.permute.xlu1 %v11827_v20  ;;  %1619 = vperm.xlu0 %5967, %v7089_v33   ;;  %v1921_v33 = vsel %vm11894_vm10, %v1893_v47, 0.0  ;;  %vm11905_vm10 = vcmp.eq.s32.totalorder %v7203_v0, %v6845_v44 }
 0x3df   : > { %2504 = vperm.xlu1 %5955, %v1318_v61   ;;  %v7205_v40 = vpop.permute.xlu0 %1147  ;;  %v7238_v61 = vmul.f32 %v12420_v34, %v1241_v1  ;;  %v2225_v1 = vsel %vm11867_vm14, %v2197_v19, 0.0  ;;  %vm11884_vm14 = vcmp.eq.s32.totalorder %v7203_v0, %v6833_v50 }
 0x3e2   : > { %v1941_v29 = vpop.permute.xlu1 %1940  ;;  %1629 = vperm.xlu0 %5967, %v7146_v37  }
 0x3e3   : > { %v7228_v22 = vsel %vm11889_vm12, %v1941_v29, %v1921_v33  ;;  %v7233_v6 = vsel %vm11888_vm13, %v1941_v29, %v1922_v7  ;;  %1157 = vrot.lane.b32.xlu1 %v1136_v41, %s6104_s14  ;;  %v1937_v18 = vpop.permute.xlu0 %1936  ;;  %v12424_v41 = vld [vmem:[#allocation22_spill] sm:$0xff]  ;;  %v2226_v29 = vsel %vm11865_vm15, %v2197_v19, 0.0  ;;  %vm11885_vm15 = vcmp.eq.s32.totalorder %v7203_v0, %v6929_v30 }
 0x3e4   : > { %5956 = vset.pattern.permute.xlu1 %v11826_v27  ;;  %v1361_v63 = vmul.f32 %v12424_v41, %v7186_v17  ;;  %v7294_v17 = vmul.f32 %v6076_v56, %v6881_v16  ;;  %v12434_v16 = vld [vmem:[#allocation32_spill] sm:$0xff]  ;;  %vm11909_vm13 = vcmp.eq.s32.totalorder %v7203_v0, %v6919_v53  ;;  %vm11908_vm12 = vcmp.eq.s32.totalorder %v7192_v11, %v6933_v23 }
 0x3e6   : > { %v7240_v47 = vpop.permute.xlu1 %2004  ;;  %1681 = vperm.xlu0 %5967, %v7053_v49   ;;  %v7258_v7 = vmul.f32 %v1361_v63, %v12420_v34  ;;  %v7287_v60 = vmul.f32 %v1361_v63, %v12423_v12  ;;  %12428 = vst [vmem:[#allocation109_spill] sm:$0xff] %v7294_v17  ;;  %v12433_v63 = vld [vmem:[#allocation30_spill] sm:$0xff]  ;;  %v1242_v59 = vmul.f32 %v12435_v52, %v7294_v17 }
 0x3e7   : > { %12421 = vst [vmem:[#allocation18_spill] sm:$0xff] %v7240_v47  ;;  %1578 = vperm.xlu1 %5956, %v7238_v61   ;;  %v7244_v32 = vpop.permute.xlu0 %2000  ;;  %v1089_v10 = vmul.f32 %v12433_v63, %v7294_v17 }
 0x3e8   : > { %12422 = vst [vmem:[#allocation21_spill] sm:$0xff] %v7244_v32 }
 0x3e9   : > { %v1137_v56 = vmul.f32 %v12434_v16, %v1089_v10  ;;  %v12438_v16 = vld [vmem:[#allocation37_spill] sm:$0xff] }
 0x3ea   : > { %v7251_v35 = vpop.permute.xlu1 %2052  ;;  %1691 = vperm.xlu0 %5967, %v7099_v48   ;;  %vm1831_vm5 = vcmp.eq.s32.totalorder %v7192_v11, %v12438_v16  ;;  %vm11936_vm6 = vcmp.eq.s32.totalorder %v7203_v0, %v12438_v16 }
 0x3eb   : > { %12425 = vst [vmem:[#allocation20_spill] sm:$0xff] %v7251_v35  ;;  %1634 = vperm.xlu1 %5956, %v7247_v2   ;;  %v7255_v33 = vpop.permute.xlu0 %2048 }
 0x3ec   : > { %12426 = vst [vmem:[#allocation22_spill] sm:$0xff] %v7255_v33 }
 0x3ee   : > { %1701 = vperm.xlu0 %5967, %v7153_v3  }
 0x3ef   : > { %v2245_v34 = vpop.permute.xlu1 %2244  ;;  %1706 = vperm.xlu1 %5956, %v7258_v7  }
 0x3f0   : > { %v7279_v41 = vsel %vm11866_vm1, %v2245_v34, %v2225_v1  ;;  %v7284_v27 = vsel %vm11864_vm2, %v2245_v34, %v2226_v29  ;;  %v2241_v20 = vpop.permute.xlu0 %2240  ;;  %v12431_v34 = vmov 17   ;;  %vm11887_vm2 = vcmp.eq.s32.totalorder %v7192_v11, %v6929_v30 }
 0x3f1   : > { %vm11886_vm1 = vcmp.eq.s32.totalorder %v7192_v11, %v6833_v50 }
 0x3f2   : > { %1737 = vperm.xlu0 %5967, %v7058_v36  }
 0x3f3   : > { %v7290_v19 = vpop.permute.xlu1 %2308  ;;  %1762 = vperm.xlu1 %5956, %v7287_v60  }
 0x3f4   : > { %12427 = vst [vmem:[#allocation108_spill] sm:$0xff] %v7290_v19  ;;  %v7296_v1 = vpop.permute.xlu0 %2304  ;;  %v7351_v19 = vmul.f32 %v12439_v25, %v1242_v59 }
 0x3f5   : > { %12429 = vst [vmem:[#allocation110_spill] sm:$0xff] %v7296_v1 }
 0x3f6   : > { %1747 = vperm.xlu0 %5967, %v7106_v13  }
 0x3f7   : > { %v7299_v29 = vpop.permute.xlu1 %2356  ;;  %5957 = vset.pattern.permute.xlu1 %v12431_v34 }
 0x3f8   : > { %12430 = vst [vmem:[#allocation111_spill] sm:$0xff] %v7299_v29  ;;  %1908 = vperm.xlu1 %5957, %v7238_v61   ;;  %v7303_v12 = vpop.permute.xlu0 %2352  ;;  %v7319_v29 = vmul.f32 %v12437_v51, %v1242_v59 }
 0x3f9   : > { %12432 = vst [vmem:[#allocation112_spill] sm:$0xff] %v7303_v12  ;;  %v12449_v12 = vmov 19  }
 0x3fa   : > { %1757 = vperm.xlu0 %5967, %v7158_v45  }
 0x3fc   : > { %v7308_v8 = vpop.permute.xlu1 %1553  ;;  %1956 = vperm.xlu1 %5957, %v7247_v2  }
 0x3fd   : > { %v7314_v55 = vpop.permute.xlu0 %2544 }
 0x3fe   : > { %12436 = vst [vmem:[#allocation30_spill] sm:$0xff] %v7314_v55  ;;  %1159 = vrot.lane.b32.xlu0 %v1137_v56, %s6104_s14 }
 0x400   : > { %2020 = vperm.xlu1 %5957, %v7258_v7  }
 0x401   : > { %v1889_v63 = vpop.permute.xlu1 %1888  ;;  %v7325_v10 = vpop.permute.xlu0 %1151 }
 0x402   : > { %v1919_v52 = vsel %vm1871_vm3, %v1889_v63, 0.0  ;;  %v1920_v56 = vsel %vm1872_vm4, %v1889_v63, 0.0  ;;  %1583 = vperm.xlu0 %5967, %v7319_v29   ;;  %v12440_v63 = vld [vmem:[#allocation27_spill] sm:$0xff] }
 0x403   : > { %v7341_v55 = vsel %vm1831_vm5, %v1937_v18, %v1919_v52  ;;  %v7346_v46 = vsel %vm11936_vm6, %v1937_v18, %v1920_v56  ;;  %v1362_v4 = vmul.f32 %v12440_v63, %v7294_v17  ;;  %v12442_v17 = vmov 18  }
 0x404   : > { %2068 = vperm.xlu1 %5957, %v7287_v60  }
 0x405   : > { %v7355_v38 = vpop.permute.xlu0 %1944  ;;  %v7384_v35 = vmul.f32 %v1362_v4, %v12437_v51  ;;  %v6078_v51 = vpop.eup %6077 }
 0x406   : > { %v2193_v18 = vpop.permute.xlu1 %2192  ;;  %1639 = vperm.xlu0 %5967, %v7351_v19  }
 0x407   : > { %v2223_v59 = vsel %vm12005_vm7, %v2193_v18, 0.0  ;;  %v2224_v52 = vsel %vm11934_vm8, %v2193_v18, 0.0 }
 0x408   : > { %v7375_v56 = vsel %vm11935_vm9, %v2241_v20, %v2223_v59  ;;  %v7380_v63 = vsel %vm11933_vm0, %v2241_v20, %v2224_v52  ;;  %5958 = vset.pattern.permute.xlu1 %v12442_v17  ;;  %v7393_v59 = vmul.f32 %v1362_v4, %v12439_v25  ;;  %v7407_v25 = vmul.f32 %v6078_v51, %v6905_v39 }
 0x409   : > { %2212 = vperm.xlu1 %5958, %v7238_v61   ;;  %v7387_v43 = vpop.permute.xlu0 %2008 }
 0x40a   : > { %12443 = vst [vmem:[#allocation32_spill] sm:$0xff] %v7387_v43  ;;  %1711 = vperm.xlu0 %5967, %v7384_v35   ;;  %12446 = vst [vmem:[#allocation24_spill] sm:$0xff] %v7407_v25  ;;  %v12448_v43 = vld [vmem:[#allocation33_spill] sm:$0xff] }
 0x40b   : > { %v7390_v18 = vpop.permute.xlu1 %2496  ;;  %v1090_v24 = vmul.f32 %v12448_v43, %v7407_v25 }
 0x40c   : > { %12444 = vst [vmem:[#allocation23_spill] sm:$0xff] %v7390_v18 }
 0x40d   : > { %2260 = vperm.xlu1 %5958, %v7247_v2   ;;  %v7396_v20 = vpop.permute.xlu0 %2056  ;;  %v1138_v1 = vmul.f32 %v12452_v62, %v1090_v24 }
 0x40e   : > { %12445 = vst [vmem:[#allocation25_spill] sm:$0xff] %v7396_v20  ;;  %1767 = vperm.xlu0 %5967, %v7393_v59  }
 0x40f   : > { %v7399_v52 = vpop.permute.xlu1 %1153 }
 0x411   : > { %2324 = vperm.xlu1 %5958, %v7258_v7  }
 0x412   : > { %5968 = vset.pattern.permute.xlu0 %v12431_v34  ;;  %v7403_v47 = vpop.permute.xlu0 %2248 }
 0x413   : > { %v1569_v15 = vpop.permute.xlu1 %1568  ;;  %1912 = vperm.xlu0 %5968, %v7319_v29  }
 0x414   : > { %v1597_v39 = vsel %vm11887_vm2, %v1569_v15, 0.0  ;;  %v1598_v51 = vsel %vm11885_vm15, %v1569_v15, 0.0  ;;  %vm11932_vm15 = vcmp.eq.s32.totalorder %v7192_v11, %v6967_v57  ;;  %vm11910_vm2 = vcmp.eq.s32.totalorder %v7192_v11, %v6919_v53 }
 0x415   : > { %2372 = vperm.xlu1 %5958, %v7287_v60  }
 0x416   : > { %v7414_v4 = vpop.permute.xlu0 %2312 }
 0x417   : > { %12447 = vst [vmem:[#allocation27_spill] sm:$0xff] %v7414_v4  ;;  %v1625_v18 = vpop.permute.xlu1 %1624  ;;  %1960 = vperm.xlu0 %5968, %v7351_v19  }
 0x418   : > { %v1653_v4 = vsel %vm11886_vm1, %v1625_v18, %v1597_v39  ;;  %v1654_v20 = vsel %vm11884_vm14, %v1625_v18, %v1598_v51  ;;  %v12453_v39 = vld [vmem:[#allocation26_spill] sm:$0xff]  ;;  %v12456_v51 = vld [vmem:[#allocation29_spill] sm:$0xff]  ;;  %vm11907_vm14 = vcmp.eq.s32.totalorder %v7192_v11, %v6845_v44  ;;  %vm11931_vm1 = vcmp.eq.s32.totalorder %v7203_v0, %v6967_v57 }
 0x419   : > { %5959 = vset.pattern.permute.xlu1 %v12449_v12  ;;  %v1243_v16 = vmul.f32 %v12453_v39, %v7407_v25  ;;  %v12458_v39 = vld [vmem:[#allocation31_spill] sm:$0xff] }
 0x41a   : > { %2516 = vperm.xlu1 %5959, %v7238_v61   ;;  %v7437_v30 = vpop.permute.xlu0 %2360  ;;  %v12455_v61 = vmov 16  }
 0x41b   : > { %12450 = vst [vmem:[#allocation33_spill] sm:$0xff] %v7437_v30  ;;  %v7439_v15 = vpop.permute.xlu1 %1696  ;;  %2024 = vperm.xlu0 %5968, %v7384_v35   ;;  %v7453_v50 = vmul.f32 %v12456_v51, %v1243_v16 }
 0x41c   : > { %12451 = vst [vmem:[#allocation113_spill] sm:$0xff] %v7439_v15 }
 0x41e   : > { %1161 = vrot.lane.b32.xlu1 %v1138_v1, %s6104_s14  ;;  %v7446_v18 = vpop.permute.xlu0 %1155  ;;  %v12457_v1 = vld [vmem:[#allocation28_spill] sm:$0xff] }
 0x41f   : > { %v7448_v43 = vpop.permute.xlu1 %1752  ;;  %2072 = vperm.xlu0 %5968, %v7393_v59   ;;  %5963 = vset.pattern.permute.xlu1 %v12455_v61  ;;  %v7459_v24 = vmul.f32 %v12457_v1, %v1243_v16 }
 0x420   : > { %12454 = vst [vmem:[#allocation35_spill] sm:$0xff] %v7448_v43  ;;  %v1363_v43 = vmul.f32 %v12458_v39, %v7407_v25 }
 0x422   : > { %1588 = vperm.xlu1 %5963, %v7453_v50   ;;  %v1905_v15 = vpop.permute.xlu0 %1904 }
 0x423   : > { %5969 = vset.pattern.permute.xlu0 %v12442_v17  ;;  %v1927_v16 = vsel %vm11932_vm15, %v1905_v15, 0.0  ;;  %v1928_v61 = vsel %vm11931_vm1, %v1905_v15, 0.0 }
 0x424   : > { %v1901_v62 = vpop.permute.xlu1 %1900  ;;  %2216 = vperm.xlu0 %5969, %v7319_v29  }
 0x425   : > { %v1925_v15 = vsel %vm11908_vm12, %v1901_v62, 0.0  ;;  %v1926_v57 = vsel %vm11906_vm11, %v1901_v62, 0.0  ;;  %vm11911_vm11 = vcmp.eq.s32.totalorder %v7203_v0, %v6971_v31 }
 0x426   : > { %1644 = vperm.xlu1 %5963, %v7459_v24   ;;  %v1953_v39 = vpop.permute.xlu0 %1952 }
 0x427   : > { %v7487_v25 = vsel %vm11910_vm2, %v1953_v39, %v1927_v16  ;;  %v7492_v30 = vsel %vm11909_vm13, %v1953_v39, %v1928_v61  ;;  %v7504_v16 = vmul.f32 %v1363_v43, %v12456_v51  ;;  %v7519_v51 = vmul.f32 %v1363_v43, %v12457_v1  ;;  %v12462_v43 = vld [vmem:[#allocation71_spill] sm:$0xff] }
 0x428   : > { %v1949_v33 = vpop.permute.xlu1 %1948  ;;  %2264 = vperm.xlu0 %5969, %v7351_v19   ;;  %vm11921_vm13 = vcmp.eq.s32.totalorder %v7192_v11, %v12462_v43  ;;  %vm11919_vm2 = vcmp.eq.s32.totalorder %v7203_v0, %v12462_v43 }
 0x429   : > { %v1973_v61 = vsel %vm11907_vm14, %v1949_v33, %v1925_v15  ;;  %v1974_v39 = vsel %vm11905_vm10, %v1949_v33, %v1926_v57  ;;  %vm11912_vm10 = vcmp.eq.s32.totalorder %v7192_v11, %v6971_v31 }
 0x42a   : > { %v1989_v53 = vadd.f32 %v1973_v61, %v1653_v4  ;;  %v1990_v5 = vadd.f32 %v1974_v39, %v1654_v20  ;;  %1716 = vperm.xlu1 %5963, %v7504_v16   ;;  %v7513_v23 = vpop.permute.xlu0 %2016  ;;  %v12461_v20 = vld [vmem:[#allocation64_spill] sm:$0xff]  ;;  %v12463_v39 = vld [vmem:[#allocation47_spill] sm:$0xff] }
 0x42b   : > { %vm11930_vm14 = vcmp.eq.s32.totalorder %v7192_v11, %v12461_v20  ;;  %vm11929_vm12 = vcmp.eq.s32.totalorder %v7203_v0, %v12461_v20 }
 0x42c   : > { %v7515_v62 = vpop.permute.xlu1 %2012  ;;  %2328 = vperm.xlu0 %5969, %v7384_v35  }
 0x42d   : > { %12459 = vst [vmem:[#allocation26_spill] sm:$0xff] %v7515_v62 }
 0x42e   : > { %1772 = vperm.xlu1 %5963, %v7519_v51   ;;  %v7522_v15 = vpop.permute.xlu0 %2064 }
 0x430   : > { %v7524_v32 = vpop.permute.xlu1 %2060  ;;  %2376 = vperm.xlu0 %5969, %v7393_v59  }
 0x431   : > { %12460 = vst [vmem:[#allocation29_spill] sm:$0xff] %v7524_v32 }
 0x432   : > { %5964 = vset.pattern.permute.xlu1 %v12431_v34 }
 0x433   : > { %1916 = vperm.xlu1 %5964, %v7453_v50   ;;  %v2209_v57 = vpop.permute.xlu0 %2208 }
 0x434   : > { %5970 = vset.pattern.permute.xlu0 %v12449_v12  ;;  %v2231_v34 = vsel %vm11912_vm10, %v2209_v57, 0.0  ;;  %vm11918_vm10 = vcmp.eq.s32.totalorder %v7203_v0, %v12463_v39 }
 0x435   : > { %v2205_v33 = vpop.permute.xlu1 %2204  ;;  %2520 = vperm.xlu0 %5970, %v7319_v29   ;;  %v2232_v29 = vsel %vm11911_vm11, %v2209_v57, 0.0  ;;  %vm11920_vm11 = vcmp.eq.s32.totalorder %v7192_v11, %v12463_v39 }
 0x436   : > { %v2229_v57 = vsel %vm11921_vm13, %v2205_v33, 0.0 }
 0x437   : > { %1964 = vperm.xlu1 %5964, %v7459_v24   ;;  %v2257_v4 = vpop.permute.xlu0 %2256 }
 0x438   : > { %v7553_v1 = vsel %vm11930_vm14, %v2257_v4, %v2231_v34  ;;  %v7558_v61 = vsel %vm11929_vm12, %v2257_v4, %v2232_v29  ;;  %v2230_v34 = vsel %vm11919_vm2, %v2205_v33, 0.0 }
 0x439   : > { %v2253_v44 = vpop.permute.xlu1 %2252  ;;  %2560 = vperm.xlu0 %5970, %v7146_v37  }
 0x43a   : > { %v2277_v29 = vsel %vm11920_vm11, %v2253_v44, %v2229_v57  ;;  %v2278_v4 = vsel %vm11918_vm10, %v2253_v44, %v2230_v34 }
 0x43b   : > { %v7577_v32 = vadd.f32 %v2277_v29, %v1989_v53  ;;  %v7579_v62 = vadd.f32 %v2278_v4, %v1990_v5  ;;  %2028 = vperm.xlu1 %5964, %v7504_v16   ;;  %v7582_v20 = vpop.permute.xlu0 %2320 }
 0x43d   : > { %v7584_v33 = vpop.permute.xlu1 %2316  ;;  %2568 = vperm.xlu0 %5970, %v7351_v19  }
 0x43e   : > { %12464 = vst [vmem:[#allocation28_spill] sm:$0xff] %v7584_v33 }
 0x43f   : > { %2076 = vperm.xlu1 %5964, %v7519_v51   ;;  %v7588_v37 = vpop.permute.xlu0 %2368 }
 0x441   : > { %v7590_v57 = vpop.permute.xlu1 %2364  ;;  %2608 = vperm.xlu0 %5970, %v7053_v49   ;;  %v12467_v49 = vld [vmem:[#allocation51_spill] sm:$0xff] }
 0x442   : > { %12465 = vst [vmem:[#allocation31_spill] sm:$0xff] %v7590_v57  ;;  %vm11926_vm10 = vcmp.eq.s32.totalorder %v7192_v11, %v12467_v49  ;;  %vm11925_vm2 = vcmp.eq.s32.totalorder %v7203_v0, %v12467_v49  ;;  %v12469_v57 = vld [vmem:[#allocation34_spill] sm:$0xff] }
 0x443   : > { %5965 = vset.pattern.permute.xlu1 %v12442_v17  ;;  %v12468_v17 = vld [vmem:[#allocation36_spill] sm:$0xff]  ;;  %v12475_v49 = vld [vmem:[#allocation46_spill] sm:$0xff] }
 0x444   : > { %2220 = vperm.xlu1 %5965, %v7453_v50   ;;  %v7595_v53 = vpop.permute.xlu0 %2512  ;;  %vm11927_vm11 = vcmp.eq.s32.totalorder %v7192_v11, %v12468_v17  ;;  %vm11928_vm13 = vcmp.eq.s32.totalorder %v7203_v0, %v12468_v17 }
 0x445   : > { %2616 = vperm.xlu0 %5970, %v7099_v48  }
 0x446   : > { %v7598_v44 = vpop.permute.xlu1 %2508 }
 0x448   : > { %2268 = vperm.xlu1 %5965, %v7459_v24   ;;  %v7601_v5 = vpop.permute.xlu0 %2552 }
 0x449   : > { %12466 = vst [vmem:[#allocation114_spill] sm:$0xff] %v7601_v5  ;;  %2624 = vperm.xlu0 %5970, %v7153_v3  }
 0x44b   : > { %v1564_v19 = vpop.permute.xlu1 %1563 }
 0x44c   : > { %2332 = vperm.xlu1 %5965, %v7504_v16  }
 0x44d   : > { %2632 = vperm.xlu0 %5970, %v7384_v35   ;;  %v1559_v48 = vpop.permute.xlu0 %1558 }
 0x44e   : > { %v1593_v3 = vsel %vm11926_vm10, %v1559_v48, 0.0  ;;  %v1594_v34 = vsel %vm11925_vm2, %v1559_v48, 0.0  ;;  %vm1495_vm2 = vcmp.eq.s32.totalorder %v7192_v11, %v12469_v57  ;;  %vm1496_vm10 = vcmp.eq.s32.totalorder %v7203_v0, %v12469_v57  ;;  %v12538_v57 = vld [vmem:[#allocation56_spill] sm:$0xff] }
 0x44f   : > { %v1649_v35 = vsel %vm11927_vm11, %v7183_v14, %v1593_v3  ;;  %v1650_v29 = vsel %vm11928_vm13, %v7183_v14, %v1594_v34  ;;  %v12470_v3 = vld [vmem:[#allocation44_spill] sm:$0xff]  ;;  %v12473_v34 = vld [vmem:[#allocation70_spill] sm:$0xff] }
 0x450   : > { %v1985_v4 = vadd.f32 %v7228_v22, %v1649_v35  ;;  %v1986_v5 = vadd.f32 %v7233_v6, %v1650_v29  ;;  %2380 = vperm.xlu1 %5965, %v7519_v51   ;;  %v1897_v39 = vpop.permute.xlu1 %1896  ;;  %vm11985_vm11 = vcmp.eq.s32.totalorder %v7192_v11, %v12470_v3  ;;  %vm11963_vm13 = vcmp.eq.s32.totalorder %v7203_v0, %v12470_v3  ;;  %v12471_v14 = vld [vmem:[#allocation48_spill] sm:$0xff] }
 0x451   : > { %2656 = vperm.xlu0 %5970, %v7058_v36   ;;  %v1574_v48 = vpop.permute.xlu0 %1573  ;;  %vm11944_vm12 = vcmp.eq.s32.totalorder %v7192_v11, %v12471_v14  ;;  %vm11945_vm14 = vcmp.eq.s32.totalorder %v7203_v0, %v12471_v14  ;;  %v12472_v22 = vld [vmem:[#allocation52_spill] sm:$0xff]  ;;  %vm11984_vm0 = vcmp.eq.s32.totalorder %v7192_v11, %v12473_v34  ;;  %vm11943_vm8 = vcmp.eq.s32.totalorder %v7203_v0, %v12473_v34 }
 0x452   : > { %vm1535_vm1 = vcmp.eq.s32.totalorder %v7192_v11, %v12472_v22  ;;  %vm1536_vm15 = vcmp.eq.s32.totalorder %v7203_v0, %v12472_v22  ;;  %v7649_v36 = vadd.f32 %v7279_v41, %v1985_v4  ;;  %v7652_v6 = vadd.f32 %v7284_v27, %v1986_v5  ;;  %v12474_v35 = vld [vmem:[#allocation72_spill] sm:$0xff] }
 0x453   : > { %vm11942_vm9 = vcmp.eq.s32.totalorder %v7192_v11, %v12474_v35  ;;  %vm11941_vm6 = vcmp.eq.s32.totalorder %v7203_v0, %v12474_v35  ;;  %v1591_v27 = vsel %vm1535_vm1, %v7308_v8, 0.0  ;;  %v1592_v41 = vsel %vm1536_vm15, %v7308_v8, 0.0 }
 0x454   : > { %5966 = vset.pattern.permute.xlu1 %v12449_v12  ;;  %v1923_v5 = vsel %vm11984_vm0, %v1897_v39, 0.0  ;;  %v1924_v29 = vsel %vm11943_vm8, %v1897_v39, 0.0 }
 0x455   : > { %2524 = vperm.xlu1 %5966, %v7453_v50   ;;  %v2201_v12 = vpop.permute.xlu1 %2200  ;;  %2664 = vperm.xlu0 %5970, %v7106_v13   ;;  %v1610_v4 = vpop.permute.xlu0 %1609 }
 0x456   : > { %v2227_v43 = vsel %vm11942_vm9, %v2201_v12, 0.0  ;;  %v2228_v8 = vsel %vm11941_vm6, %v2201_v12, 0.0  ;;  %v1647_v33 = vsel %vm1495_vm2, %v1610_v4, %v1591_v27  ;;  %v1648_v50 = vsel %vm1496_vm10, %v1610_v4, %v1592_v41  ;;  %v12476_v27 = vld [vmem:[#allocation68_spill] sm:$0xff] }
 0x457   : > { %v2275_v13 = vsel %vm11944_vm12, %v7403_v47, %v2227_v43  ;;  %v2276_v39 = vsel %vm11945_vm14, %v7403_v47, %v2228_v8  ;;  %v1983_v12 = vadd.f32 %v7341_v55, %v1647_v33  ;;  %v1984_v17 = vadd.f32 %v7346_v46, %v1648_v50  ;;  %v12480_v4 = vld [vmem:[#allocation60_spill] sm:$0xff] }
 0x458   : > { %vm11948_vm6 = vcmp.eq.s32.totalorder %v7192_v11, %v12475_v49  ;;  %vm11947_vm9 = vcmp.eq.s32.totalorder %v7203_v0, %v12475_v49  ;;  %vm12004_vm8 = vcmp.eq.s32.totalorder %v7192_v11, %v12476_v27  ;;  %vm11946_vm12 = vcmp.eq.s32.totalorder %v7203_v0, %v12476_v27 }
 0x459   : > { %v1595_v47 = vsel %vm12004_vm8, %v1564_v19, 0.0  ;;  %v1596_v55 = vsel %vm11946_vm12, %v1564_v19, 0.0  ;;  %v7716_v46 = vadd.f32 %v7375_v56, %v1983_v12  ;;  %v7719_v43 = vadd.f32 %v7380_v63, %v1984_v17  ;;  %2548 = vperm.xlu1 %5966, %v7017_v26   ;;  %2672 = vperm.xlu0 %5970, %v7158_v45   ;;  %v1620_v33 = vpop.permute.xlu0 %1619 }
 0x45a   : > { %v1971_v41 = vsel %vm11948_vm6, %v7355_v38, %v1923_v5  ;;  %v1972_v19 = vsel %vm11947_vm9, %v7355_v38, %v1924_v29  ;;  %v1651_v56 = vsel %vm11985_vm11, %v1620_v33, %v1595_v47  ;;  %v1652_v26 = vsel %vm11963_vm13, %v1620_v33, %v1596_v55  ;;  %v7737_v45 = vpop.permute.xlu1 %2504  ;;  %v12481_v5 = vld [vmem:[#allocation84_spill] sm:$0xff] }
 0x45b   : > { %12477 = vst [vmem:[#allocation34_spill] sm:$0xff] %v7716_v46  ;;  %12478 = vst [vmem:[#allocation44_spill] sm:$0xff] %v7719_v43  ;;  %v1987_v63 = vadd.f32 %v1971_v41, %v1651_v56  ;;  %v1988_v17 = vadd.f32 %v1972_v19, %v1652_v26  ;;  %vm11951_vm14 = vcmp.eq.s32.totalorder %v7192_v11, %v12480_v4  ;;  %v12484_v56 = vld [vmem:[#allocation4_spill] sm:$0xff]  ;;  %v12485_v26 = vld [vmem:[#allocation83_spill] sm:$0xff]  ;;  %vm12013_vm13 = vcmask 31744  }
 0x45c   : > { %12479 = vst [vmem:[#allocation48_spill] sm:$0xff] %v7737_v45  ;;  %vm11949_vm12 = vcmp.eq.s32.totalorder %v7203_v0, %v12480_v4  ;;  %vm11952_vm9 = vcmp.eq.s32.totalorder %v7192_v11, %v12481_v5  ;;  %vm11950_vm6 = vcmp.eq.s32.totalorder %v7203_v0, %v12481_v5  ;;  %v12494_v43 = vld [vmem:[#allocation91_spill] sm:$0xff]  ;;  %v12498_v46 = vmov 2  }
 0x45d   : > { %v1599_v38 = vsel %vm11952_vm9, %v1574_v48, 0.0  ;;  %v1600_v29 = vsel %vm11950_vm6, %v1574_v48, 0.0  ;;  %v7753_v8 = vadd.f32 %v2275_v13, %v1987_v63  ;;  %v7755_v50 = vadd.f32 %v2276_v39, %v1988_v17  ;;  %2556 = vperm.xlu1 %5966, %v7121_v9   ;;  %2680 = vperm.xlu0 %5970, %v7393_v59   ;;  %v1630_v12 = vpop.permute.xlu0 %1629  ;;  %v12487_v63 = vld [vmem:[#allocation5_spill] sm:$0xff] }
 0x45e   : > { %v1655_v47 = vsel %vm11951_vm14, %v1630_v12, %v1599_v38  ;;  %v1656_v55 = vsel %vm11949_vm12, %v1630_v12, %v1600_v29  ;;  %v7765_v33 = vpop.permute.xlu1 %1157  ;;  %v11957_v9 = vmov 2   ;;  %vm11956_vm12 = vcmp.eq.s32.totalorder %v7192_v11, %v12485_v26 }
 0x45f   : > { %12482 = vst [vmem:[#allocation52_spill] sm:$0xff] %v7753_v8  ;;  %12483 = vst [vmem:[#allocation70_spill] sm:$0xff] %v7755_v50  ;;  %v1991_v48 = vadd.f32 %v7487_v25, %v1655_v47  ;;  %v1992_v13 = vadd.f32 %v7492_v30, %v1656_v55  ;;  %vm11954_vm6 = vcmp.eq.s32.totalorder %v7203_v0, %v12485_v26 }
 0x461   : > { %2564 = vperm.xlu1 %5966, %v7247_v2   ;;  %5971 = vset.pattern.permute.xlu0 %v11957_v9  ;;  %v7771_v59 = vpop.permute.xlu0 %1681  ;;  %v7774_v39 = vadd.f32 %v7553_v1, %v1991_v48  ;;  %v7777_v41 = vadd.f32 %v7558_v61, %v1992_v13  ;;  %v12486_v2 = vld [vmem:[#allocation59_spill] sm:$0xff] }
 0x462   : > { %v1579_v19 = vpop.permute.xlu1 %1578  ;;  %2817 = vperm.xlu0 %5971, %v12484_v56   ;;  %vm11955_vm14 = vcmp.eq.s32.totalorder %v7192_v11, %v12486_v2  ;;  %vm11953_vm9 = vcmp.eq.s32.totalorder %v7203_v0, %v12486_v2  ;;  %v12499_v2 = vld [vmem:[#allocation2_spill] sm:$0xff] }
 0x463   : > { %v1601_v25 = vsel %vm11956_vm12, %v1579_v19, 0.0  ;;  %v1602_v1 = vsel %vm11954_vm6, %v1579_v19, 0.0 }
 0x465   : > { %2572 = vperm.xlu1 %5966, %v7459_v24   ;;  %v7785_v30 = vpop.permute.xlu0 %1691 }
 0x466   : > { %v1635_v61 = vpop.permute.xlu1 %1634  ;;  %2829 = vperm.xlu0 %5971, %v12487_v63  }
 0x467   : > { %v1657_v24 = vsel %vm11955_vm14, %v1635_v61, %v1601_v25  ;;  %v1658_v17 = vsel %vm11953_vm9, %v1635_v61, %v1602_v1 }
 0x469   : > { %2612 = vperm.xlu1 %5966, %v7028_v28   ;;  %v7805_v38 = vpop.permute.xlu0 %1701  ;;  %v12490_v28 = vld [vmem:[#allocation85_spill] sm:$0xff] }
 0x46a   : > { %v7807_v29 = vpop.permute.xlu1 %1706  ;;  %vm11962_vm9 = vcmp.eq.s32.totalorder %v7192_v11, %v12490_v28  ;;  %vm11959_vm6 = vcmp.eq.s32.totalorder %v7203_v0, %v12490_v28 }
 0x46b   : > { %12488 = vst [vmem:[#allocation72_spill] sm:$0xff] %v7807_v29  ;;  %v12505_v29 = vld [vmem:[#allocation90_spill] sm:$0xff] }
 0x46d   : > { %2620 = vperm.xlu1 %5966, %v7130_v58   ;;  %v7810_v12 = vpop.permute.xlu0 %1737  ;;  %v12491_v58 = vld [vmem:[#allocation61_spill] sm:$0xff] }
 0x46e   : > { %v7812_v47 = vpop.permute.xlu1 %1762  ;;  %vm11960_vm14 = vcmp.eq.s32.totalorder %v7192_v11, %v12491_v58  ;;  %vm11961_vm12 = vcmp.eq.s32.totalorder %v7203_v0, %v12491_v58 }
 0x46f   : > { %12489 = vst [vmem:[#allocation46_spill] sm:$0xff] %v7812_v47  ;;  %v12501_v47 = vld [vmem:[#allocation3_spill] sm:$0xff] }
 0x471   : > { %2628 = vperm.xlu1 %5966, %v7258_v7   ;;  %v7815_v55 = vpop.permute.xlu0 %1747 }
 0x473   : > { %v1909_v48 = vpop.permute.xlu1 %1908 }
 0x474   : > { %v1929_v7 = vsel %vm11962_vm9, %v1909_v48, 0.0 }
 0x475   : > { %2636 = vperm.xlu1 %5966, %v7504_v16   ;;  %v7818_v13 = vpop.permute.xlu0 %1757  ;;  %v1930_v16 = vsel %vm11959_vm6, %v1909_v48, 0.0  ;;  %vm11966_vm6 = vcmp.eq.s32.totalorder %v7192_v11, %v12494_v43 }
 0x477   : > { %v1957_v19 = vpop.permute.xlu1 %1956 }
 0x478   : > { %v1977_v25 = vsel %vm11960_vm14, %v1957_v19, %v1929_v7  ;;  %v1978_v1 = vsel %vm11961_vm12, %v1957_v19, %v1930_v16  ;;  %vm11964_vm14 = vcmp.eq.s32.totalorder %v7203_v0, %v12494_v43  ;;  %v12495_v7 = vld [vmem:[#allocation76_spill] sm:$0xff] }
 0x479   : > { %v1993_v61 = vadd.f32 %v1977_v25, %v1657_v24  ;;  %v1994_v9 = vadd.f32 %v1978_v1, %v1658_v17  ;;  %2660 = vperm.xlu1 %5966, %v7036_v21   ;;  %v7841_v8 = vpop.permute.xlu0 %1159  ;;  %vm11965_vm12 = vcmp.eq.s32.totalorder %v7192_v11, %v12495_v7  ;;  %vm11967_vm9 = vcmp.eq.s32.totalorder %v7203_v0, %v12495_v7 }
 0x47a   : > { %v1172_v25 = vsel %vm12013_vm13, %v7205_v40, 0.0 }
 0x47b   : > { %v7843_v50 = vpop.permute.xlu1 %2020 }
 0x47c   : > { %12492 = vst [vmem:[#allocation68_spill] sm:$0xff] %v7843_v50  ;;  %v12515_v50 = vld [vmem:[#allocation77_spill] sm:$0xff] }
 0x47d   : > { %2668 = vperm.xlu1 %5966, %v7138_v54   ;;  %v1584_v48 = vpop.permute.xlu0 %1583 }
 0x47e   : > { %v1603_v21 = vsel %vm11966_vm6, %v1584_v48, 0.0  ;;  %v1604_v54 = vsel %vm11964_vm14, %v1584_v48, 0.0  ;;  %v12497_v48 = vld [vmem:[#allocation87_spill] sm:$0xff] }
 0x47f   : > { %v7846_v45 = vpop.permute.xlu1 %2068  ;;  %vm11971_vm6 = vcmp.eq.s32.totalorder %v7203_v0, %v12497_v48 }
 0x480   : > { %12493 = vst [vmem:[#allocation60_spill] sm:$0xff] %v7846_v45 }
 0x481   : > { %2676 = vperm.xlu1 %5966, %v7287_v60   ;;  %v1640_v24 = vpop.permute.xlu0 %1639  ;;  %v12496_v60 = vld [vmem:[#allocation63_spill] sm:$0xff] }
 0x482   : > { %v1659_v17 = vsel %vm11965_vm12, %v1640_v24, %v1603_v21  ;;  %v1660_v16 = vsel %vm11967_vm9, %v1640_v24, %v1604_v54  ;;  %vm11972_vm14 = vcmp.eq.s32.totalorder %v7192_v11, %v12496_v60  ;;  %vm11973_vm12 = vcmp.eq.s32.totalorder %v7192_v11, %v12497_v48 }
 0x483   : > { %vm11970_vm9 = vcmp.eq.s32.totalorder %v7203_v0, %v12496_v60  ;;  %v1181_v54 = vsel %vm12013_vm13, %v7399_v52, 0.0 }
 0x484   : > { %v2213_v19 = vpop.permute.xlu1 %2212 }
 0x485   : > { %2684 = vperm.xlu1 %5966, %v7519_v51   ;;  %1173 = vadd.xlane.f32.xlu0 %v1172_v25  ;;  %v7872_v1 = vpop.permute.xlu0 %1711  ;;  %v2233_v40 = vsel %vm11973_vm12, %v2213_v19, 0.0  ;;  %v2234_v51 = vsel %vm11971_vm6, %v2213_v19, 0.0 }
 0x488   : > { %v2261_v21 = vpop.permute.xlu1 %2260 }
 0x489   : > { %v2281_v24 = vsel %vm11972_vm14, %v2261_v21, %v2233_v40  ;;  %v2282_v25 = vsel %vm11970_vm9, %v2261_v21, %v2234_v51  ;;  %5972 = vset.pattern.permute.xlu1 %v12498_v46  ;;  %1182 = vadd.xlane.f32.xlu0 %v1181_v54  ;;  %v7897_v63 = vpop.permute.xlu0 %1767  ;;  %v1178_v40 = vsel %vm12013_vm13, %v7325_v10, 0.0  ;;  %v1187_v46 = vsel %vm12013_vm13, %v7765_v33, 0.0 }
 0x48a   : > { %v7899_v56 = vadd.f32 %v2281_v24, %v1993_v61  ;;  %v7901_v19 = vadd.f32 %v2282_v25, %v1994_v9  ;;  %2821 = vperm.xlu1 %5972, %v12499_v2   ;;  %v12503_v61 = vld [vmem:[#allocation93_spill] sm:$0xff]  ;;  %v12504_v9 = vld [vmem:[#allocation78_spill] sm:$0xff] }
 0x48b   : > { %vm11983_vm9 = vcmp.eq.s32.totalorder %v7192_v11, %v12503_v61  ;;  %vm11980_vm6 = vcmp.eq.s32.totalorder %v7203_v0, %v12503_v61  ;;  %vm11982_vm14 = vcmp.eq.s32.totalorder %v7192_v11, %v12504_v9  ;;  %vm11981_vm12 = vcmp.eq.s32.totalorder %v7203_v0, %v12504_v9 }
 0x48c   : > { %v7904_v52 = vpop.permute.xlu1 %2324 }
 0x48d   : > { %12500 = vst [vmem:[#allocation84_spill] sm:$0xff] %v7904_v52  ;;  %1179 = vadd.xlane.f32.xlu0 %v1178_v40 }
 0x48e   : > { %2825 = vperm.xlu1 %5972, %v12501_v47   ;;  %v1913_v51 = vpop.permute.xlu0 %1912 }
 0x48f   : > { %v1931_v10 = vsel %vm11983_vm9, %v1913_v51, 0.0  ;;  %v1932_v33 = vsel %vm11980_vm6, %v1913_v51, 0.0  ;;  %vm11986_vm6 = vcmp.eq.s32.totalorder %v7192_v11, %v12505_v29 }
 0x490   : > { %v7909_v21 = vpop.permute.xlu1 %2372 }
 0x491   : > { %12502 = vst [vmem:[#allocation91_spill] sm:$0xff] %v7909_v21  ;;  %1188 = vadd.xlane.f32.xlu0 %v1187_v46 }
 0x492   : > { %v1961_v54 = vpop.permute.xlu0 %1960 }
 0x493   : > { %v1979_v24 = vsel %vm11982_vm14, %v1961_v54, %v1931_v10  ;;  %v1980_v25 = vsel %vm11981_vm12, %v1961_v54, %v1932_v33  ;;  %vm11987_vm12 = vcmp.eq.s32.totalorder %v7203_v0, %v12505_v29  ;;  %v12507_v33 = vld [vmem:[#allocation95_spill] sm:$0xff] }
 0x494   : > { %v1995_v40 = vadd.f32 %v1979_v24, %v1659_v17  ;;  %v1996_v46 = vadd.f32 %v1980_v25, %v1660_v16  ;;  %v12506_v17 = vld [vmem:[#allocation75_spill] sm:$0xff]  ;;  %vm12001_vm0 = vcmp.eq.s32.totalorder %v7192_v11, %v12507_v33  ;;  %vm11997_vm11 = vcmp.eq.s32.totalorder %v7203_v0, %v12507_v33  ;;  %v12508_v25 = vld [vmem:[#allocation80_spill] sm:$0xff] }
 0x495   : > { %v7933_v47 = vpop.permute.xlu1 %2516  ;;  %vm11994_vm14 = vcmp.eq.s32.totalorder %v7192_v11, %v12506_v17  ;;  %vm11993_vm9 = vcmp.eq.s32.totalorder %v7203_v0, %v12506_v17 }
 0x496   : > { %v7935_v60 = vpop.permute.xlu0 %2024 }
 0x499   : > { %v1162_v21 = vpop.permute.xlu1 %1161 }
 0x49a   : > { %v7937_v48 = vpop.permute.xlu0 %2072  ;;  %v1193_v51 = vsel %vm12013_vm13, %v1162_v21, 0.0 }
 0x49b   : > { %1194 = vadd.xlane.f32.xlu0 %v1193_v51 }
 0x49d   : > { %v1589_v52 = vpop.permute.xlu1 %1588 }
 0x49e   : > { %v1605_v16 = vsel %vm11986_vm6, %v1589_v52, 0.0  ;;  %v1606_v21 = vsel %vm11987_vm12, %v1589_v52, 0.0  ;;  %vm12000_vm6 = vcmp.eq.s32.totalorder %v7192_v11, %v12508_v25  ;;  %vm11996_vm12 = vcmp.eq.s32.totalorder %v7203_v0, %v12508_v25  ;;  %v2810_v25 = vld [vmem:[%s11720_s3 + $0xd0] sm:$0xff] }
 0x49f   : > { %v2217_v26 = vpop.permute.xlu0 %2216 }
 0x4a0   : > { %v2235_v52 = vsel %vm12001_vm0, %v2217_v26, 0.0  ;;  %v2236_v51 = vsel %vm11997_vm11, %v2217_v26, 0.0  ;;  %v2815_v26 = vld [vmem:[%s11720_s3 + $0xf8] sm:$0xff]  ;;  %vm12009_vm0 = vcmp.eq.s32.totalorder %v7203_v0, %v12515_v50 }
 0x4a1   : > { %v1645_v10 = vpop.permute.xlu1 %1644  ;;  %5652 = vmatprep.subr.mxu0 %v2815_v26  ;;  %v2812_v26 = vld [vmem:[%s11720_s3 + $0xe0] sm:$0xff] }
 0x4a2   : > { %v1661_v54 = vsel %vm11994_vm14, %v1645_v10, %v1605_v16  ;;  %v1662_v24 = vsel %vm11993_vm9, %v1645_v10, %v1606_v21 }
 0x4a3   : > { %v2265_v29 = vpop.permute.xlu0 %2264 }
 0x4a4   : > { %v2283_v16 = vsel %vm12000_vm6, %v2265_v29, %v2235_v52  ;;  %v2284_v21 = vsel %vm11996_vm12, %v2265_v29, %v2236_v51  ;;  %v2799_v52 = vld [vmem:[%s11720_s3 + $0x78] sm:$0xff]  ;;  %v2814_v29 = vld [vmem:[%s11720_s3 + $0xf0] sm:$0xff]  ;;  %v2813_v51 = vld [vmem:[%s11720_s3 + $0xe8] sm:$0xff]  ;;  %vm12011_vm6 = vcmp.eq.s32.totalorder %v7192_v11, %v12515_v50 }
 0x4a5   : > { %v7980_v10 = vadd.f32 %v2283_v16, %v1995_v40  ;;  %v7982_v17 = vadd.f32 %v2284_v21, %v1996_v46  ;;  %v7984_v58 = vpop.permute.xlu1 %1716  ;;  %5653 = vmatpush3.msra.mxu0 %v2799_v52  ;;  %v2798_v46 = vld [vmem:[%s11720_s3 + $0x70] sm:$0xff]  ;;  %v2797_v16 = vld [vmem:[%s11720_s3 + $0x68] sm:$0xff]  ;;  %v12513_v52 = vld [vmem:[#allocation66_spill] sm:$0xff] }
 0x4a6   : > { %12509 = vst [vmem:[#allocation76_spill] sm:$0xff] %v7984_v58  ;;  %5654 = vmatprep.subr.mxu0 %v2814_v29  ;;  %vm12035_vm9 = vcmp.eq.s32.totalorder %v7192_v11, %v12513_v52  ;;  %vm12031_vm14 = vcmp.eq.s32.totalorder %v7203_v0, %v12513_v52  ;;  %v2795_v58 = vld [vmem:[%s11720_s3 + $0x58] sm:$0xff]  ;;  %v12543_v50 = vld [vmem:[#allocation39_spill] sm:$0xff] }
 0x4a7   : > { %v7986_v45 = vpop.permute.xlu0 %2328  ;;  %5655 = vmatpush3.msra.mxu0 %v2798_v46  ;;  %v1175_v46 = vsel %vm12013_vm13, %v7178_v42, 0.0 }
 0x4a8   : > { %12510 = vst [vmem:[#allocation93_spill] sm:$0xff] %v7986_v45  ;;  %5656 = vmatprep.subr.mxu0 %v2813_v51  ;;  %v2796_v51 = vld [vmem:[%s11720_s3 + $0x60] sm:$0xff] }
 0x4a9   : > { %v7988_v28 = vpop.permute.xlu1 %1772  ;;  %5657 = vmatpush3.msra.mxu0 %v2797_v16  ;;  %v2811_v16 = vld [vmem:[%s11720_s3 + $0xd8] sm:$0xff] }
 0x4aa   : > { %12511 = vst [vmem:[#allocation78_spill] sm:$0xff] %v7988_v28  ;;  %v12514_v28 = vld [vmem:[#allocation92_spill] sm:$0xff]  ;;  %5658 = vmatprep.subr.mxu0 %v2812_v26 }
 0x4ab   : > { %v7999_v40 = vpop.permute.xlu0 %2376  ;;  %vm12012_vm12 = vcmp.eq.s32.totalorder %v7192_v11, %v12514_v28  ;;  %vm12010_vm11 = vcmp.eq.s32.totalorder %v7203_v0, %v12514_v28  ;;  %5659 = vmatpush3.msra.mxu0 %v2796_v51 }
 0x4ac   : > { %12512 = vst [vmem:[#allocation115_spill] sm:$0xff] %v7999_v40  ;;  %v12516_v40 = vld [vmem:[#allocation89_spill] sm:$0xff]  ;;  %5660 = vmatprep.subr.mxu0 %v2811_v16 }
 0x4ad   : > { %vm12036_vm8 = vcmp.eq.s32.totalorder %v7192_v11, %v12516_v40  ;;  %vm12032_vm7 = vcmp.eq.s32.totalorder %v7203_v0, %v12516_v40  ;;  %5661 = vmatpush3.msra.mxu0 %v2795_v58  ;;  %v2809_v58 = vld [vmem:[%s11720_s3 + $0xc8] sm:$0xff] }
 0x4ae   : > { %v1917_v21 = vpop.permute.xlu1 %1916  ;;  %v2536_v51 = vsel %vm12032_vm7, %v7595_v53, 0.0  ;;  %5662 = vmatprep.subr.mxu0 %v2810_v25  ;;  %v2808_v25 = vld [vmem:[%s11720_s3 + $0xc0] sm:$0xff]  ;;  %vm12553_vm7 = vcmp.eq.s32.totalorder %v7192_v11, %v12473_v34 }
 0x4af   : > { %v1933_v42 = vsel %vm12012_vm12, %v1917_v21, 0.0  ;;  %v1934_v26 = vsel %vm12010_vm11, %v1917_v21, 0.0 }
 0x4b0   : > { %v2521_v29 = vpop.permute.xlu0 %2520 }
 0x4b2   : > { %1176 = vadd.xlane.f32.xlu1 %v1175_v46  ;;  %v1965_v2 = vpop.permute.xlu1 %1964  ;;  %v2535_v46 = vsel %vm12036_vm8, %v7595_v53, 0.0  ;;  %v2794_v53 = vld [vmem:[%s11720_s3 + $0x50] sm:$0xff]  ;;  %vm12558_vm8 = vcmp.eq.s32.totalorder %v7203_v0, %v12473_v34 }
 0x4b3   : > { %v1981_v33 = vsel %vm12011_vm6, %v1965_v2, %v1933_v42  ;;  %v1982_v21 = vsel %vm12009_vm0, %v1965_v2, %v1934_v26  ;;  %v1184_v26 = vsel %vm12013_vm13, %v7446_v18, 0.0  ;;  %5663 = vmatpush3.msra.mxu0 %v2794_v53 }
 0x4b4   : > { %v8063_v28 = vadd.f32 %v1981_v33, %v1661_v54  ;;  %v8065_v45 = vadd.f32 %v1982_v21, %v1662_v24  ;;  %v2561_v42 = vpop.permute.xlu0 %2560  ;;  %v2793_v33 = vld [vmem:[%s11720_s3 + $0x48] sm:$0xff]  ;;  %v12520_v21 = vld [vmem:[#allocation97_spill] sm:$0xff]  ;;  %5664 = vmatprep.subr.mxu0 %v2809_v58 }
 0x4b5   : > { %v2583_v2 = vsel %vm12035_vm9, %v2561_v42, %v2535_v46  ;;  %v2584_v16 = vsel %vm12031_vm14, %v2561_v42, %v2536_v51  ;;  %vm12029_vm0 = vcmp.eq.s32.totalorder %v7192_v11, %v12520_v21  ;;  %vm12015_vm11 = vcmp.eq.s32.totalorder %v7203_v0, %v12520_v21  ;;  %5665 = vmatpush3.msra.mxu0 %v2793_v33 }
 0x4b6   : > { %v8085_v54 = vadd.f32 %v2583_v2, %v7774_v39  ;;  %v8088_v24 = vadd.f32 %v2584_v16, %v7777_v41  ;;  %v8090_v18 = vpop.permute.xlu1 %2028  ;;  %1185 = vadd.xlane.f32.xlu1 %v1184_v26  ;;  %v12521_v39 = vld [vmem:[#allocation82_spill] sm:$0xff]  ;;  %v2539_v41 = vsel %vm12029_vm0, %v2521_v29, 0.0  ;;  %v2540_v46 = vsel %vm12015_vm11, %v2521_v29, 0.0  ;;  %5666 = vmatprep.subr.mxu0 %v2808_v25  ;;  %v2807_v29 = vld [vmem:[%s11720_s3 + $0xb8] sm:$0xff]  ;;  %v2806_v25 = vld [vmem:[%s11720_s3 + $0xb0] sm:$0xff] }
 0x4b7   : > { %12519 = vst [vmem:[#allocation116_spill] sm:$0xff] %v8090_v18  ;;  %vm12016_vm6 = vcmp.eq.s32.totalorder %v7192_v11, %v12521_v39  ;;  %vm12014_vm12 = vcmp.eq.s32.totalorder %v7203_v0, %v12521_v39  ;;  %v1190_v16 = vsel %vm12013_vm13, %v7841_v8, 0.0  ;;  %v2792_v26 = vld [vmem:[%s11720_s3 + $0x40] sm:$0xff]  ;;  %v2791_v8 = vld [vmem:[%s11720_s3 + $0x38] sm:$0xff]  ;;  %v12542_v18 = vld [vmem:[#allocation112_spill] sm:$0xff]  ;;  %vm12549_vm0 = vcmp.eq.s32.totalorder %v7192_v11, %v12470_v3 }
 0x4b8   : > { %12517 = vst [vmem:[#allocation66_spill] sm:$0xff] %v8085_v54  ;;  %12518 = vst [vmem:[#allocation89_spill] sm:$0xff] %v8088_v24  ;;  %v2569_v51 = vpop.permute.xlu0 %2568  ;;  %5667 = vmatpush3.msra.mxu0 %v2792_v26  ;;  %v12525_v26 = vld [vmem:[#allocation94_spill] sm:$0xff]  ;;  %vm12551_vm14 = vcmp.eq.s32.totalorder %v7203_v0, %v12538_v57 }
 0x4b9   : > { %v2587_v42 = vsel %vm12016_vm6, %v2569_v51, %v2539_v41  ;;  %v2588_v2 = vsel %vm12014_vm12, %v2569_v51, %v2540_v46  ;;  %5668 = vmatprep.subr.mxu0 %v2807_v29  ;;  %v2789_v51 = vld [vmem:[%s11720_s3 + $0x28] sm:$0xff]  ;;  %vm12027_vm13 = vcmp.eq.s32.totalorder %v7192_v11, %v12525_v26  ;;  %vm12023_vm12 = vcmp.eq.s32.totalorder %v7203_v0, %v12525_v26  ;;  %v2803_v29 = vld [vmem:[%s11720_s3 + $0x98] sm:$0xff] }
 0x4ba   : > { %v8124_v53 = vadd.f32 %v2587_v42, %v7980_v10  ;;  %v8127_v58 = vadd.f32 %v2588_v2, %v7982_v17  ;;  %v8129_v33 = vpop.permute.xlu1 %2076  ;;  %1191 = vadd.xlane.f32.xlu1 %v1190_v16  ;;  %v2790_v10 = vld [vmem:[%s11720_s3 + $0x30] sm:$0xff]  ;;  %5669 = vmatpush3.msra.mxu0 %v2791_v8  ;;  %v2805_v17 = vld [vmem:[%s11720_s3 + $0xa8] sm:$0xff]  ;;  %v2804_v42 = vld [vmem:[%s11720_s3 + $0xa0] sm:$0xff] }
 0x4bb   : > { %12524 = vst [vmem:[#allocation118_spill] sm:$0xff] %v8129_v33  ;;  %5670 = vmatprep.subr.mxu0 %v2806_v25  ;;  %v2788_v2 = vld [vmem:[%s11720_s3 + $0x20] sm:$0xff]  ;;  %v12526_v8 = vld [vmem:[#allocation79_spill] sm:$0xff] }
 0x4bc   : > { %12522 = vst [vmem:[#allocation97_spill] sm:$0xff] %v8124_v53  ;;  %12523 = vst [vmem:[#allocation117_spill] sm:$0xff] %v8127_v58  ;;  %v8140_v41 = vpop.permute.xlu0 %2608  ;;  %5671 = vmatpush3.msra.mxu0 %v2790_v10  ;;  %vm12026_vm11 = vcmp.eq.s32.totalorder %v7192_v11, %v12526_v8  ;;  %vm12022_vm6 = vcmp.eq.s32.totalorder %v7203_v0, %v12526_v8  ;;  %v1719_v53 = vsel %vm1535_vm1, %v7771_v59, 0.0 }
 0x4bd   : > { %5672 = vmatprep.subr.mxu0 %v2805_v17  ;;  %v1775_v54 = vsel %vm1495_vm2, %v7810_v12, %v1719_v53 }
 0x4be   : > { %5673 = vmatpush3.msra.mxu0 %v2789_v51  ;;  %v2787_v51 = vld [vmem:[%s11720_s3 + $0x18] sm:$0xff] }
 0x4bf   : > { %v2221_v46 = vpop.permute.xlu1 %2220  ;;  %5674 = vmatprep.subr.mxu0 %v2804_v42  ;;  %v2802_v42 = vld [vmem:[%s11720_s3 + $0x90] sm:$0xff] }
 0x4c0   : > { %v8154_v16 = vpop.permute.xlu0 %2616  ;;  %5675 = vmatpush3.msra.mxu0 %v2788_v2  ;;  %v2237_v25 = vsel %vm12027_vm13, %v2221_v46, 0.0  ;;  %v2238_v10 = vsel %vm12023_vm12, %v2221_v46, 0.0  ;;  %v2786_v2 = vld [vmem:[%s11720_s3 + $0x10] sm:$0xff]  ;;  %vm12547_vm13 = vcmp.eq.s32.totalorder %v7192_v11, %v12476_v27 }
 0x4c1   : > { %5676 = vmatprep.subr.mxu0 %v2803_v29 }
 0x4c2   : > { %5677 = vmatpush3.msra.mxu0 %v2787_v51  ;;  %v12532_v51 = vld [vmem:[#allocation37_spill] sm:$0xff] }
 0x4c3   : > { %v2269_v17 = vpop.permute.xlu1 %2268  ;;  %5678 = vmatprep.subr.mxu0 %v2802_v42  ;;  %v2801_v42 = vld [vmem:[%s11720_s3 + $0x88] sm:$0xff]  ;;  %vm12541_vm12 = vcmp.eq.s32.totalorder %v7203_v0, %v12532_v51  ;;  %v1723_v51 = vsel %vm12547_vm13, %v7785_v30, 0.0 }
 0x4c4   : > { %v2285_v46 = vsel %vm12026_vm11, %v2269_v17, %v2237_v25  ;;  %v2286_v29 = vsel %vm12022_vm6, %v2269_v17, %v2238_v10  ;;  %v8192_v58 = vpop.permute.xlu0 %2624  ;;  %v12529_v25 = vld [vmem:[#allocation21_spill] sm:$0xff]  ;;  %5679 = vmatpush3.msra.mxu0 %v2786_v2  ;;  %v12531_v17 = vld [vmem:[#allocation22_spill] sm:$0xff]  ;;  %v2785_v2 = vld [vmem:[%s11720_s3 + $0x8] sm:$0xff] }
 0x4c5   : > { %v8199_v24 = vadd.f32 %v2285_v46, %v8063_v28  ;;  %v8202_v26 = vadd.f32 %v2286_v29, %v8065_v45  ;;  %v2031_v10 = vsel %vm1871_vm3, %v12529_v25, 0.0  ;;  %v1720_v45 = vsel %vm1536_vm15, %v7771_v59, 0.0  ;;  %v2800_v46 = vld [vmem:[%s11720_s3 + $0x80] sm:$0xff]  ;;  %v12534_v29 = vld [vmem:[#allocation41_spill] sm:$0xff]  ;;  %5680 = vmatprep.subr.mxu0 %v2801_v42 }
 0x4c6   : > { %v2079_v8 = vsel %vm1831_vm5, %v12531_v17, %v2031_v10  ;;  %vm12033_vm1 = vcmp.eq.s32.totalorder %v7192_v11, %v12534_v29  ;;  %vm12038_vm15 = vcmp.eq.s32.totalorder %v7203_v0, %v12534_v29  ;;  %v1776_v22 = vsel %vm1496_vm10, %v7810_v12, %v1720_v45  ;;  %v2784_v59 = vld [vmem:[%s11720_s3] sm:$0xff]  ;;  %5681 = vmatpush3.msra.mxu0 %v2785_v2 }
 0x4c7   : > { %12527 = vst [vmem:[#allocation119_spill] sm:$0xff] %v8199_v24  ;;  %12528 = vst [vmem:[#allocation120_spill] sm:$0xff] %v8202_v26  ;;  %v8212_v33 = vpop.permute.xlu1 %2332  ;;  %v2095_v28 = vadd.f32 %v2079_v8, %v1775_v54  ;;  %v12535_v54 = vld [vmem:[#allocation50_spill] sm:$0xff]  ;;  %v12536_v8 = vld [vmem:[#allocation57_spill] sm:$0xff]  ;;  %v2032_v10 = vsel %vm1872_vm4, %v12529_v25, 0.0  ;;  %vm12539_vm10 = vcmp.eq.s32.totalorder %v7192_v11, %v12538_v57  ;;  %vm12544_vm4 = vcmp.eq.s32.totalorder %v7192_v11, %v12543_v50 }
 0x4c8   : > { %12533 = vst [vmem:[#allocation21_spill] sm:$0xff] %v8212_v33  ;;  %v8218_v53 = vpop.permute.xlu0 %2632  ;;  %vm12042_vm2 = vcmp.eq.s32.totalorder %v7192_v11, %v12535_v54  ;;  %vm12041_vm3 = vcmp.eq.s32.totalorder %v7192_v11, %v12536_v8  ;;  %v12537_v33 = vld [vmem:[#allocation110_spill] sm:$0xff]  ;;  %vm12040_vm5 = vcmp.eq.s32.totalorder %v7203_v0, %v12536_v8  ;;  %v2080_v42 = vsel %vm12541_vm12, %v12531_v17, %v2032_v10  ;;  %v12555_v57 = vld [vmem:[#allocation25_spill] sm:$0xff] }
 0x4c9   : > { %v2335_v12 = vsel %vm12539_vm10, %v12537_v33, 0.0  ;;  %v12540_v45 = vld [vmem:[#allocation58_spill] sm:$0xff]  ;;  %5682 = vmatprep.subr.mxu0 %v2800_v46  ;;  %v2096_v17 = vadd.f32 %v2080_v42, %v1776_v22  ;;  %v1779_v26 = vsel %vm12549_vm0, %v7815_v55, %v1723_v51  ;;  %vm12045_vm13 = vcmp.eq.s32.totalorder %v7203_v0, %v12535_v54  ;;  %v12552_v42 = vld [vmem:[#allocation32_spill] sm:$0xff] }
 0x4ca   : > { %vm12030_vm6 = vcmp.eq.s32.totalorder %v7192_v11, %v12540_v45  ;;  %v2383_v25 = vsel %vm12544_vm4, %v12542_v18, %v2335_v12  ;;  %v12546_v2 = vld [vmem:[#allocation42_spill] sm:$0xff]  ;;  %5683 = vmatpush3.msra.mxu0 %v2784_v59  ;;  %vm12034_vm12 = vcmp.eq.s32.totalorder %v7203_v0, %v12540_v45  ;;  %v2336_v59 = vsel %vm12551_vm14, %v12537_v33, 0.0 }
 0x4cb   : > { %v8264_v39 = vpop.permute.xlu1 %2380  ;;  %vm2441_vm10 = vcmp.eq.s32.totalorder %v7192_v11, %v12546_v2  ;;  %vm2442_vm11 = vcmp.eq.s32.totalorder %v7203_v0, %v12546_v2  ;;  %v2639_v10 = vsel %vm12030_vm6, %v8140_v41, 0.0  ;;  %v2399_v12 = vadd.f32 %v2383_v25, %v2095_v28  ;;  %v12548_v46 = vld [vmem:[#allocation74_spill] sm:$0xff]  ;;  %v12550_v28 = vld [vmem:[#allocation73_spill] sm:$0xff] }
 0x4cc   : > { %12545 = vst [vmem:[#allocation54_spill] sm:$0xff] %v8264_v39  ;;  %v2657_v39 = vpop.permute.xlu0 %2656  ;;  %vm12039_vm4 = vcmp.eq.s32.totalorder %v7192_v11, %v12548_v46  ;;  %vm12044_vm6 = vcmp.eq.s32.totalorder %v7192_v11, %v12550_v28  ;;  %v2035_v25 = vsel %vm12553_vm7, %v12552_v42, 0.0  ;;  %v2640_v51 = vsel %vm12034_vm12, %v8140_v41, 0.0 }
 0x4cd   : > { %v2687_v22 = vsel %vm12033_vm1, %v2657_v39, %v2639_v10  ;;  %vm2486_vm0 = vcmp.eq.s32.totalorder %v7203_v0, %v12550_v28  ;;  %vm12043_vm1 = vcmp.eq.s32.totalorder %v7203_v0, %v12548_v46  ;;  %vm12554_vm14 = vcmp.eq.s32.totalorder %v7203_v0, %v12543_v50 }
 0x4ce   : > { %v2703_v10 = vadd.f32 %v2687_v22, %v2399_v12  ;;  %v2384_v33 = vsel %vm12554_vm14, %v12542_v18, %v2336_v59  ;;  %vm12556_vm7 = vcmp.eq.s32.totalorder %v7192_v11, %v12475_v49  ;;  %v2688_v41 = vsel %vm12038_vm15, %v2657_v39, %v2640_v51  ;;  %v12557_v12 = vld [vmem:[#allocation49_spill] sm:$0xff] }
 0x4cf   : > { %v2083_v24 = vsel %vm12556_vm7, %v12555_v57, %v2035_v25  ;;  %vm2445_vm12 = vcmp.eq.s32.totalorder %v7192_v11, %v12557_v12  ;;  %vm2446_vm9 = vcmp.eq.s32.totalorder %v7203_v0, %v12557_v12  ;;  %v2036_v18 = vsel %vm12558_vm8, %v12552_v42, 0.0  ;;  %v12560_v51 = vld [vmem:[#allocation105_spill] sm:$0xff] }
 0x4d0   : > { %vm12559_vm14 = vcmp.eq.s32.totalorder %v7203_v0, %v12476_v27  ;;  %v2099_v22 = vadd.f32 %v2083_v24, %v1779_v26  ;;  %v2400_v59 = vadd.f32 %v2384_v33, %v2096_v17  ;;  %v8332_v25 = vpop.permute.xlu1 %2524  ;;  %2719 = vrot.lane.b32.xlu0 %v2703_v10, %s6100_s13  ;;  %v2665_v39 = vpop.permute.xlu0 %2664  ;;  %v2529_v29 = vsel %vm12041_vm3, %v12560_v51, 0.0  ;;  %v12563_v24 = vld [vmem:[#allocation27_spill] sm:$0xff]  ;;  %v12566_v10 = vld [vmem:[#allocation88_spill] sm:$0xff]  ;;  %v12570_v33 = vld [vmem:[#allocation86_spill] sm:$0xff] }
 0x4d1   : > { %v1724_v50 = vsel %vm12559_vm14, %v7785_v30, 0.0  ;;  %v2530_v34 = vsel %vm12040_vm5, %v12560_v51, 0.0  ;;  %vm12561_vm8 = vcmp.eq.s32.totalorder %v7203_v0, %v12475_v49  ;;  %vm12562_vm7 = vcmp.eq.s32.totalorder %v7203_v0, %v12470_v3  ;;  %v12567_v3 = vld [vmem:[#allocation33_spill] sm:$0xff] }
 0x4d2   : > { %v2084_v27 = vsel %vm12561_vm8, %v12555_v57, %v2036_v18  ;;  %v1780_v30 = vsel %vm12562_vm7, %v7815_v55, %v1724_v50  ;;  %vm12564_vm14 = vcmp.eq.s32.totalorder %v7192_v11, %v12474_v35  ;;  %vm12565_vm15 = vcmp.eq.s32.totalorder %v7203_v0, %v12474_v35  ;;  %v12572_v18 = vld [vmem:[#allocation65_spill] sm:$0xff] }
 0x4d3   : > { %v2339_v26 = vsel %vm12564_vm14, %v12563_v24, 0.0  ;;  %v2340_v17 = vsel %vm12565_vm15, %v12563_v24, 0.0  ;;  %v2643_v49 = vsel %vm12039_vm4, %v8154_v16, 0.0  ;;  %v2704_v42 = vadd.f32 %v2688_v41, %v2400_v59 }
 0x4d4   : > { %vm2489_vm8 = vcmp.eq.s32.totalorder %v7192_v11, %v12566_v10  ;;  %vm2490_vm7 = vcmp.eq.s32.totalorder %v7203_v0, %v12566_v10  ;;  %vm12568_vm14 = vcmp.eq.s32.totalorder %v7192_v11, %v12471_v14  ;;  %vm12569_vm15 = vcmp.eq.s32.totalorder %v7203_v0, %v12471_v14  ;;  %v2549_v24 = vpop.permute.xlu1 %2548  ;;  %v12710_v10 = vld [vmem:[#allocation94_spill] sm:$0xff] }
 0x4d5   : > { %v2387_v55 = vsel %vm12568_vm14, %v12567_v3, %v2339_v26  ;;  %v2388_v35 = vsel %vm12569_vm15, %v12567_v3, %v2340_v17  ;;  %vm12571_vm4 = vcmp.eq.s32.totalorder %v7192_v11, %v12570_v33  ;;  %v2691_v41 = vsel %vm12042_vm2, %v2665_v39, %v2643_v49  ;;  %2735 = vrot.lane.b32.xlu0 %v2704_v42, %s6100_s13  ;;  %v2673_v26 = vpop.permute.xlu0 %2672  ;;  %v12575_v17 = vld [vmem:[#allocation62_spill] sm:$0xff] }
 0x4d6   : > { %v2039_v57 = vsel %vm12571_vm4, %v7513_v23, 0.0  ;;  %vm2449_vm5 = vcmp.eq.s32.totalorder %v7192_v11, %v12572_v18  ;;  %vm12046_vm14 = vcmp.eq.s32.totalorder %v7203_v0, %v12572_v18  ;;  %vm12573_vm3 = vcmp.eq.s32.totalorder %v7203_v0, %v12570_v33  ;;  %v12578_v33 = vld [vmem:[#allocation96_spill] sm:$0xff] }
 0x4d7   : > { %v2040_v14 = vsel %vm12573_vm3, %v7513_v23, 0.0  ;;  %vm12574_vm15 = vcmp.eq.s32.totalorder %v7192_v11, %v12481_v5  ;;  %v2100_v59 = vadd.f32 %v2084_v27, %v1780_v30  ;;  %v2403_v51 = vadd.f32 %v2387_v55, %v2099_v22 }
 0x4d8   : > { %v1727_v50 = vsel %vm12574_vm15, %v7805_v38, 0.0  ;;  %vm12576_vm4 = vcmp.eq.s32.totalorder %v7192_v11, %v12575_v17  ;;  %vm12577_vm3 = vcmp.eq.s32.totalorder %v7192_v11, %v12480_v4  ;;  %v2577_v3 = vsel %vm2441_vm10, %v2549_v24, %v2529_v29 }
 0x4d9   : > { %v2087_v49 = vsel %vm12576_vm4, %v7522_v15, %v2039_v57  ;;  %v1783_v23 = vsel %vm12577_vm3, %v7818_v13, %v1727_v50  ;;  %v2578_v22 = vsel %vm2442_vm11, %v2549_v24, %v2530_v34  ;;  %v2644_v27 = vsel %vm12043_vm1, %v8154_v16, 0.0  ;;  %v12581_v34 = vld [vmem:[#allocation81_spill] sm:$0xff] }
 0x4da   : > { %v2707_v30 = vadd.f32 %v2691_v41, %v2403_v51  ;;  %v8414_v42 = vadd.f32 %v2577_v3, %v7649_v36  ;;  %v8417_v55 = vadd.f32 %v2578_v22, %v7652_v6  ;;  %vm2493_vm15 = vcmp.eq.s32.totalorder %v7192_v11, %v12578_v33  ;;  %v2557_v41 = vpop.permute.xlu1 %2556 }
 0x4db   : > { %vm12048_vm4 = vcmp.eq.s32.totalorder %v7203_v0, %v12578_v33  ;;  %vm12579_vm3 = vcmp.eq.s32.totalorder %v7203_v0, %v12575_v17  ;;  %v2533_v36 = vsel %vm12044_vm6, %v7598_v44, 0.0  ;;  %vm12580_vm2 = vcmp.eq.s32.totalorder %v7203_v0, %v12481_v5 }
 0x4dc   : > { %v2088_v29 = vsel %vm12579_vm3, %v7522_v15, %v2040_v14  ;;  %v1728_v6 = vsel %vm12580_vm2, %v7805_v38, 0.0  ;;  %v2692_v16 = vsel %vm12045_vm13, %v2665_v39, %v2644_v27  ;;  %vm12049_vm1 = vcmp.eq.s32.totalorder %v7192_v11, %v12581_v34  ;;  %2723 = vrot.lane.b32.xlu0 %v2707_v30, %s6100_s13  ;;  %v2681_v39 = vpop.permute.xlu0 %2680 }
 0x4dd   : > { %vm12047_vm3 = vcmp.eq.s32.totalorder %v7203_v0, %v12581_v34  ;;  %v2534_v15 = vsel %vm2486_vm0, %v7598_v44, 0.0  ;;  %vm12582_vm6 = vcmp.eq.s32.totalorder %v7203_v0, %v12480_v4  ;;  %v2103_v38 = vadd.f32 %v2087_v49, %v1783_v23 }
 0x4de   : > { %v1784_v5 = vsel %vm12582_vm6, %v7818_v13, %v1728_v6  ;;  %v2404_v57 = vadd.f32 %v2388_v35, %v2100_v59  ;;  %vm12583_vm2 = vcmp.eq.s32.totalorder %v7192_v11, %v6971_v31  ;;  %vm12584_vm13 = vcmp.eq.s32.totalorder %v7203_v0, %v6971_v31  ;;  %v2565_v3 = vpop.permute.xlu1 %2564 }
 0x4df   : > { %v2343_v14 = vsel %vm12583_vm2, %v7582_v20, 0.0  ;;  %v2344_v44 = vsel %vm12584_vm13, %v7582_v20, 0.0  ;;  %v2581_v4 = vsel %vm2445_vm12, %v2557_v41, %v2533_v36  ;;  %v2582_v13 = vsel %vm2446_vm9, %v2557_v41, %v2534_v15  ;;  %v12586_v20 = vld [vmem:[#allocation64_spill] sm:$0xff] }
 0x4e0   : > { %vm12585_vm6 = vcmp.eq.s32.totalorder %v7192_v11, %v12516_v40  ;;  %v2708_v50 = vadd.f32 %v2692_v16, %v2404_v57  ;;  %v8470_v59 = vadd.f32 %v2581_v4, %v7577_v32  ;;  %v8473_v31 = vadd.f32 %v2582_v13, %v7579_v62  ;;  %v2818_v15 = vpop.permute.xlu0 %2817  ;;  %v12597_v57 = vld [vmem:[#allocation93_spill] sm:$0xff]  ;;  %v12603_v4 = vld [vmem:[#allocation11_spill] sm:$0xff] }
 0x4e1   : > { %v2647_v35 = vsel %vm12585_vm6, %v8192_v58, 0.0  ;;  %vm12587_vm13 = vcmp.eq.s32.totalorder %v7192_v11, %v12586_v20  ;;  %vm12588_vm2 = vcmp.eq.s32.totalorder %v7203_v0, %v12586_v20  ;;  %v2104_v17 = vadd.f32 %v2088_v29, %v1784_v5 }
 0x4e2   : > { %v2391_v51 = vsel %vm12587_vm13, %v7588_v37, %v2343_v14  ;;  %v2392_v24 = vsel %vm12588_vm2, %v7588_v37, %v2344_v44  ;;  %vm12589_vm6 = vcmp.eq.s32.totalorder %v7192_v11, %v12513_v52  ;;  %v2537_v32 = vsel %vm2489_vm8, %v7933_v47, 0.0  ;;  %2739 = vrot.lane.b32.xlu0 %v2708_v50, %s6100_s13 }
 0x4e3   : > { %v2695_v49 = vsel %vm12589_vm6, %v2673_v26, %v2647_v35  ;;  %v2538_v62 = vsel %vm2490_vm7, %v7933_v47, 0.0  ;;  %vm12590_vm13 = vcmp.eq.s32.totalorder %v7192_v11, %v12503_v61  ;;  %v2407_v23 = vadd.f32 %v2391_v51, %v2103_v38  ;;  %v12605_v51 = vld [vmem:[#allocation119_spill] sm:$0xff] }
 0x4e4   : > { %v2043_v37 = vsel %vm12590_vm13, %v7935_v60, 0.0  ;;  %vm12591_vm2 = vcmp.eq.s32.totalorder %v7192_v11, %v12494_v43  ;;  %vm12592_vm6 = vcmp.eq.s32.totalorder %v7192_v11, %v12504_v9  ;;  %v2585_v47 = vsel %vm2449_vm5, %v2565_v3, %v2537_v32 }
 0x4e5   : > { %v1731_v22 = vsel %vm12591_vm2, %v7872_v1, 0.0  ;;  %v2091_v27 = vsel %vm12592_vm6, %v7937_v48, %v2043_v37  ;;  %v2586_v30 = vsel %vm12046_vm14, %v2565_v3, %v2538_v62  ;;  %vm12593_vm13 = vcmp.eq.s32.totalorder %v7203_v0, %v12516_v40  ;;  %v12608_v62 = vld [vmem:[#allocation82_spill] sm:$0xff] }
 0x4e6   : > { %v2648_v29 = vsel %vm12593_vm13, %v8192_v58, 0.0  ;;  %v2711_v36 = vadd.f32 %v2695_v49, %v2407_v23  ;;  %v8518_v6 = vadd.f32 %v2585_v47, %v7899_v56  ;;  %v8521_v16 = vadd.f32 %v2586_v30, %v7901_v19  ;;  %v12598_v19 = vld [vmem:[#allocation95_spill] sm:$0xff] }
 0x4e7   : > { %vm12594_vm2 = vcmp.eq.s32.totalorder %v7192_v11, %v12495_v7  ;;  %vm12595_vm6 = vcmp.eq.s32.totalorder %v7203_v0, %v12503_v61  ;;  %v2408_v40 = vadd.f32 %v2392_v24, %v2104_v17  ;;  %vm12596_vm13 = vcmp.eq.s32.totalorder %v7203_v0, %v12513_v52  ;;  %v2573_v61 = vpop.permute.xlu1 %2572  ;;  %v12600_v52 = vld [vmem:[#allocation115_spill] sm:$0xff]  ;;  %v12606_v17 = vld [vmem:[#allocation120_spill] sm:$0xff] }
 0x4e8   : > { %v1787_v5 = vsel %vm12594_vm2, %v7897_v63, %v1731_v22  ;;  %v2044_v38 = vsel %vm12595_vm6, %v7935_v60, 0.0  ;;  %v2696_v56 = vsel %vm12596_vm13, %v2673_v26, %v2648_v29  ;;  %vm12599_vm14 = vcmp.eq.s32.totalorder %v7192_v11, %v12598_v19  ;;  %2727 = vrot.lane.b32.xlu0 %v2711_v36, %s6100_s13  ;;  %v12601_v26 = vld [vmem:[#allocation80_spill] sm:$0xff] }
 0x4e9   : > { %v2107_v58 = vadd.f32 %v2091_v27, %v1787_v5  ;;  %v2347_v41 = vsel %vm12599_vm14, %v12597_v57, 0.0  ;;  %v2541_v14 = vsel %vm2493_vm15, %v8332_v25, 0.0  ;;  %v2542_v60 = vsel %vm12048_vm4, %v8332_v25, 0.0 }
 0x4ea   : > { %vm12602_vm2 = vcmp.eq.s32.totalorder %v7192_v11, %v12601_v26  ;;  %v2848_v13 = vadd.f32 %v2818_v15, %v12603_v4  ;;  %v2589_v35 = vsel %vm12049_vm1, %v2573_v61, %v2541_v14  ;;  %v2590_v50 = vsel %vm12047_vm3, %v2573_v61, %v2542_v60  ;;  %v12627_v61 = vld [vmem:[#allocation108_spill] sm:$0xff] }
 0x4eb   : > { %v2395_v44 = vsel %vm12602_vm2, %v12600_v52, %v2347_v41  ;;  %vm12604_vm14 = vcmp.eq.s32.totalorder %v7192_v11, %v12520_v21  ;;  %v2712_v20 = vadd.f32 %v2696_v56, %v2408_v40  ;;  %v8563_v24 = vadd.f32 %v2589_v35, %v12605_v51  ;;  %v2613_v27 = vpop.permute.xlu1 %2612  ;;  %v12616_v40 = vld [vmem:[#allocation18_spill] sm:$0xff]  ;;  %v12620_v56 = vld [vmem:[#allocation20_spill] sm:$0xff]  ;;  %v12624_v41 = vld [vmem:[#allocation51_spill] sm:$0xff] }
 0x4ec   : > { %v2651_v25 = vsel %vm12604_vm14, %v8218_v53, 0.0  ;;  %v8566_v49 = vadd.f32 %v2590_v50, %v12606_v17  ;;  %vm12607_vm6 = vcmp.eq.s32.totalorder %v7203_v0, %v12504_v9  ;;  %vm12609_vm13 = vcmp.eq.s32.totalorder %v7192_v11, %v12608_v62  ;;  %v12632_v50 = vld [vmem:[#allocation106_spill] sm:$0xff]  ;;  %v12635_v51 = vld [vmem:[#allocation111_spill] sm:$0xff]  ;;  %v12636_v17 = vld [vmem:[#allocation40_spill] sm:$0xff] }
 0x4ed   : > { %v2092_v32 = vsel %vm12607_vm6, %v7937_v48, %v2044_v38  ;;  %v2699_v37 = vsel %vm12609_vm13, %v2681_v39, %v2651_v25  ;;  %vm12610_vm2 = vcmp.eq.s32.totalorder %v7203_v0, %v12494_v43  ;;  %vm12611_vm14 = vcmp.eq.s32.totalorder %v7203_v0, %v12598_v19  ;;  %2743 = vrot.lane.b32.xlu0 %v2712_v20, %s6100_s13  ;;  %v12623_v19 = vld [vmem:[#allocation103_spill] sm:$0xff]  ;;  %v12633_v25 = vld [vmem:[#allocation36_spill] sm:$0xff] }
 0x4ee   : > { %v1732_v23 = vsel %vm12610_vm2, %v7872_v1, 0.0  ;;  %v2348_v3 = vsel %vm12611_vm14, %v12597_v57, 0.0  ;;  %v2411_v22 = vadd.f32 %v2395_v44, %v2107_v58  ;;  %vm12612_vm6 = vcmp.eq.s32.totalorder %v7203_v0, %v12495_v7  ;;  %v12621_v58 = vld [vmem:[#allocation38_spill] sm:$0xff] }
 0x4ef   : > { %v1788_v48 = vsel %vm12612_vm6, %v7897_v63, %v1732_v23  ;;  %vm12613_vm13 = vcmp.eq.s32.totalorder %v7203_v0, %v12601_v26  ;;  %v5484_v1 = vadd.f32 -0.5, %v2848_v13  ;;  %vm12614_vm2 = vcmp.eq.s32.totalorder %v7203_v0, %v12520_v21  ;;  %v8599_v7 = vpop.permute.xlu1 %2620  ;;  %v12617_v21 = vld [vmem:[#allocation53_spill] sm:$0xff]  ;;  %v12630_v13 = vld [vmem:[#allocation7_spill] sm:$0xff] }
 0x4f0   : > { %v2396_v43 = vsel %vm12613_vm13, %v12600_v52, %v2348_v3  ;;  %v2108_v9 = vadd.f32 %v2092_v32, %v1788_v48  ;;  %v2652_v47 = vsel %vm12614_vm2, %v8218_v53, 0.0  ;;  %v2715_v30 = vadd.f32 %v2699_v37, %v2411_v22  ;;  %v12628_v52 = vld [vmem:[#allocation55_spill] sm:$0xff] }
 0x4f1   : > { %vm12615_vm14 = vcmp.eq.s32.totalorder %v7203_v0, %v12608_v62  ;;  %v2912_v63 = vfloor.f32 %v5484_v1  ;;  %vm12618_vm6 = vcmp.eq.s32.totalorder %v7192_v11, %v12617_v21  ;;  %vm12619_vm13 = vcmp.eq.s32.totalorder %v7203_v0, %v12617_v21 }
 0x4f2   : > { %v2700_v29 = vsel %vm12615_vm14, %v2681_v39, %v2652_v47  ;;  %v2412_v36 = vadd.f32 %v2396_v43, %v2108_v9  ;;  %2731 = vrot.lane.b32.xlu0 %v2715_v30, %s6100_s13  ;;  %v2033_v53 = vsel %vm12618_vm6, %v12616_v40, 0.0  ;;  %v2034_v39 = vsel %vm12619_vm13, %v12616_v40, 0.0  ;;  %v12641_v9 = vld [vmem:[#allocation26_spill] sm:$0xff]  ;;  %v12642_v47 = vld [vmem:[#allocation69_spill] sm:$0xff] }
 0x4f3   : > { %v8602_v5 = vpop.permute.xlu1 %2628  ;;  %v5800_v38 = vtrunc.f32 %v2912_v63  ;;  %vm12622_vm2 = vcmp.eq.s32.totalorder %v7192_v11, %v12621_v58  ;;  %vm12625_vm14 = vcmp.eq.s32.totalorder %v7192_v11, %v12624_v41  ;;  %vm12626_vm3 = vcmp.eq.s32.totalorder %v7203_v0, %v12621_v58 }
 0x4f4   : > { %v2716_v15 = vadd.f32 %v2700_v29, %v2412_v36  ;;  %v2081_v57 = vsel %vm12622_vm2, %v12620_v56, %v2033_v53  ;;  %v1721_v14 = vsel %vm12625_vm14, %v12623_v19, 0.0  ;;  %v2082_v60 = vsel %vm12626_vm3, %v12620_v56, %v2034_v39  ;;  %v12647_v53 = vld [vmem:[#allocation29_spill] sm:$0xff] }
 0x4f5   : > { %vm12629_vm6 = vcmp.eq.s32.totalorder %v7192_v11, %v12628_v52  ;;  %vm12631_vm13 = vcmp.eq.s32.totalorder %v7203_v0, %v12624_v41  ;;  %vm12634_vm2 = vcmp.eq.s32.totalorder %v7192_v11, %v12633_v25  ;;  %vm12637_vm3 = vcmp.eq.s32.totalorder %v7192_v11, %v12636_v17  ;;  %v12648_v39 = vld [vmem:[#allocation45_spill] sm:$0xff]  ;;  %v12651_v41 = vld [vmem:[#allocation67_spill] sm:$0xff] }
 0x4f6   : > { %2747 = vrot.lane.b32.xlu0 %v2716_v15, %s6100_s13  ;;  %v2337_v26 = vsel %vm12629_vm6, %v12627_v61, 0.0  ;;  %v1722_v35 = vsel %vm12631_vm13, %v12623_v19, 0.0  ;;  %v1777_v20 = vsel %vm12634_vm2, %v12632_v50, %v1721_v14  ;;  %v8644_v62 = vcvt.f32.s32 %v5800_v38  ;;  %v12645_v15 = vld [vmem:[#allocation9_spill] sm:$0xff] }
 0x4f7   : > { %v8629_v44 = vpop.permute.xlu1 %2636  ;;  %v2385_v32 = vsel %vm12637_vm3, %v12635_v51, %v2337_v26  ;;  %vm12638_vm14 = vcmp.eq.s32.totalorder %v7203_v0, %v12633_v25  ;;  %v2097_v23 = vadd.f32 %v2081_v57, %v1777_v20  ;;  %vm12639_vm6 = vcmp.eq.s32.totalorder %v7203_v0, %v12628_v52  ;;  %v12650_v19 = vld [vmem:[#allocation113_spill] sm:$0xff]  ;;  %v12658_v26 = vld [vmem:[#allocation35_spill] sm:$0xff] }
 0x4f8   : > { %v1778_v37 = vsel %vm12638_vm14, %v12632_v50, %v1722_v35  ;;  %v2338_v22 = vsel %vm12639_vm6, %v12627_v61, 0.0  ;;  %vm12640_vm13 = vcmp.eq.s32.totalorder %v7203_v0, %v12636_v17  ;;  %vm12643_vm2 = vcmp.eq.s32.totalorder %v7192_v11, %v12642_v47  ;;  %v12659_v35 = vld [vmem:[#allocation43_spill] sm:$0xff] }
 0x4f9   : > { %v2098_v3 = vadd.f32 %v2082_v60, %v1778_v37  ;;  %v2386_v48 = vsel %vm12640_vm13, %v12635_v51, %v2338_v22  ;;  %v2401_v43 = vadd.f32 %v2385_v32, %v2097_v23  ;;  %v2037_v30 = vsel %vm12643_vm2, %v12641_v9, 0.0  ;;  %v12653_v60 = vld [vmem:[#allocation28_spill] sm:$0xff]  ;;  %v12661_v25 = vld [vmem:[#allocation31_spill] sm:$0xff]  ;;  %v12664_v32 = vld [vmem:[#allocation2_spill] sm:$0xff] }
 0x4fa   : > { %2837 = vperm.xlu0 %5971, %v12630_v13   ;;  %vm12644_vm3 = vcmp.eq.s32.totalorder %v7192_v11, %v12536_v8  ;;  %vm2960_vm14 = vcmp.ge.s32.totalorder %v8644_v62, 0  ;;  %vm2968_vm6 = vcmp.lt.s32.totalorder %v8644_v62, 16  ;;  %vm3000_vm13 = vcmp.ge.s32.totalorder %v8644_v62, 4294967295  ;;  %v12662_v20 = vld [vmem:[#allocation47_spill] sm:$0xff] }
 0x4fb   : > { %v2641_v29 = vsel %vm12644_vm3, %v2613_v27, 0.0  ;;  %v2661_v36 = vpop.permute.xlu1 %2660  ;;  %vm3008_vm4 = vcmp.lt.s32.totalorder %v8644_v62, 15  ;;  %vm12646_vm2 = vcmp.eq.s32.totalorder %v7203_v0, %v12536_v8  ;;  %vm12649_vm3 = vcmp.eq.s32.totalorder %v7192_v11, %v12648_v39  ;;  %v12654_v8 = vld [vmem:[#allocation71_spill] sm:$0xff]  ;;  %vm8691_vm1 = vmand %vm2960_vm14, %vm2968_vm6 }
 0x4fc   : > { %v2689_v38 = vsel %vm2441_vm10, %v2661_v36, %v2641_v29  ;;  %v2642_v40 = vsel %vm12646_vm2, %v2613_v27, 0.0  ;;  %v2085_v56 = vsel %vm12649_vm3, %v12647_v53, %v2037_v30  ;;  %v2402_v57 = vadd.f32 %v2386_v48, %v2098_v3  ;;  %vm3016_vm14 = vmand %vm3000_vm13, %vm3008_vm4 }
 0x4fd   : > { %v2705_v21 = vadd.f32 %v2689_v38, %v2401_v43  ;;  %v2690_v58 = vsel %vm2442_vm11, %v2661_v36, %v2642_v40  ;;  %vm12652_vm10 = vcmp.eq.s32.totalorder %v7192_v11, %v12651_v41  ;;  %vm12655_vm2 = vcmp.eq.s32.totalorder %v7192_v11, %v12654_v8 }
 0x4fe   : > { %2845 = vperm.xlu0 %5971, %v12645_v15   ;;  %v1725_v14 = vsel %vm12652_vm10, %v12650_v19, 0.0  ;;  %v2341_v27 = vsel %vm12655_vm2, %v12653_v60, 0.0  ;;  %v6110_v2 = vmov 3   ;;  %vm12660_vm11 = vcmp.eq.s32.totalorder %v7192_v11, %v12659_v35 }
 0x4ff   : > { %v2669_v52 = vpop.permute.xlu1 %2668  ;;  %2721 = vrot.lane.b32.xlu1 %v2705_v21, %s6100_s13  ;;  %v1781_v50 = vsel %vm12660_vm11, %v12658_v26, %v1725_v14  ;;  %vm12663_vm3 = vcmp.eq.s32.totalorder %v7192_v11, %v12662_v20  ;;  %v2928_v17 = vsub.f32 %v5484_v1, %v2912_v63  ;;  %vm12665_vm6 = vcmp.eq.s32.totalorder %v7203_v0, %v12642_v47  ;;  %v12677_v14 = vld [vmem:[#allocation60_spill] sm:$0xff] }
 0x500   : > { %v2389_v51 = vsel %vm12663_vm3, %v12661_v25, %v2341_v27  ;;  %v2038_v37 = vsel %vm12665_vm6, %v12641_v9, 0.0  ;;  %v2101_v23 = vadd.f32 %v2085_v56, %v1781_v50  ;;  %vm12666_vm10 = vcmp.eq.s32.totalorder %v7192_v11, %v12550_v28  ;;  %v12674_v56 = vld [vmem:[#allocation68_spill] sm:$0xff] }
 0x501   : > { %v2645_v3 = vsel %vm12666_vm10, %v8599_v7, 0.0  ;;  %v2706_v22 = vadd.f32 %v2690_v58, %v2402_v57  ;;  %vm12667_vm2 = vcmp.eq.s32.totalorder %v7203_v0, %v12651_v41  ;;  %vm12668_vm4 = vcmp.eq.s32.totalorder %v7203_v0, %v12648_v39  ;;  %v12675_v58 = vld [vmem:[#allocation85_spill] sm:$0xff]  ;;  %v12680_v50 = vld [vmem:[#allocation72_spill] sm:$0xff] }
 0x502   : > { %5974 = vset.pattern.permute.xlu0 %v6110_v2  ;;  %v1726_v1 = vsel %vm12667_vm2, %v12650_v19, 0.0  ;;  %v2086_v63 = vsel %vm12668_vm4, %v12647_v53, %v2038_v37  ;;  %v2693_v48 = vsel %vm2445_vm12, %v2669_v52, %v2645_v3  ;;  %vm12669_vm13 = vcmp.eq.s32.totalorder %v7203_v0, %v12654_v8  ;;  %v12673_v53 = vld [vmem:[#allocation6_spill] sm:$0xff]  ;;  %v12687_v37 = vld [vmem:[#allocation59_spill] sm:$0xff] }
 0x503   : > { %2869 = vperm.xlu0 %5974, %v12664_v32   ;;  %v2342_v43 = vsel %vm12669_vm13, %v12653_v60, 0.0  ;;  %v2405_v9 = vadd.f32 %v2389_v51, %v2101_v23  ;;  %v12670_v47 = vmov 0.0   ;;  %v2677_v36 = vpop.permute.xlu1 %2676  ;;  %2737 = vrot.lane.b32.xlu1 %v2706_v22, %s6100_s13  ;;  %vm12671_vm11 = vcmp.eq.s32.totalorder %v7203_v0, %v12659_v35  ;;  %v12678_v60 = vld [vmem:[#allocation61_spill] sm:$0xff]  ;;  %v12690_v23 = vld [vmem:[#allocation63_spill] sm:$0xff]  ;;  %v12692_v22 = vld [vmem:[#allocation8_spill] sm:$0xff] }
 0x504   : > { %v5500_v30 = vsel %vm8691_vm1, 1.0, %v12670_v47  ;;  %v5508_v29 = vsel %vm3016_vm14, 1.0, %v12670_v47  ;;  %v1782_v38 = vsel %vm12671_vm11, %v12658_v26, %v1726_v1  ;;  %vm12672_vm12 = vcmp.eq.s32.totalorder %v7203_v0, %v12662_v20  ;;  %v12684_v20 = vld [vmem:[#allocation87_spill] sm:$0xff] }
 0x505   : > { %v2390_v40 = vsel %vm12672_vm12, %v12661_v25, %v2342_v43  ;;  %v3120_v21 = vsub.f32 1.0, %v2928_v17  ;;  %v2102_v39 = vadd.f32 %v2086_v63, %v1782_v38  ;;  %vm12676_vm1 = vcmp.eq.s32.totalorder %v7192_v11, %v12675_v58  ;;  %v12681_v25 = vld [vmem:[#allocation83_spill] sm:$0xff] }
 0x506   : > { %v2041_v57 = vsel %vm12676_vm1, %v12674_v56, 0.0  ;;  %v2646_v19 = vsel %vm2486_vm0, %v8599_v7, 0.0  ;;  %v2709_v41 = vadd.f32 %v2693_v48, %v2405_v9  ;;  %vm12679_vm3 = vcmp.eq.s32.totalorder %v7192_v11, %v12678_v60  ;;  %v12683_v7 = vld [vmem:[#allocation84_spill] sm:$0xff] }
 0x507   : > { %2881 = vperm.xlu0 %5974, %v12673_v53   ;;  %v2089_v8 = vsel %vm12679_vm3, %v12677_v14, %v2041_v57  ;;  %v8759_v27 = vmul.f32 %v5500_v30, %v3120_v21  ;;  %v8761_v61 = vmul.f32 %v5508_v29, %v2928_v17  ;;  %v2694_v26 = vsel %vm2446_vm9, %v2669_v52, %v2646_v19  ;;  %v2685_v32 = vpop.permute.xlu1 %2684  ;;  %v12686_v17 = vld [vmem:[#allocation46_spill] sm:$0xff]  ;;  %v12689_v52 = vld [vmem:[#allocation91_spill] sm:$0xff]  ;;  %v12699_v19 = vld [vmem:[#allocation116_spill] sm:$0xff] }
 0x508   : > { %v2406_v35 = vadd.f32 %v2390_v40, %v2102_v39  ;;  %vm12682_vm14 = vcmp.eq.s32.totalorder %v7192_v11, %v12681_v25  ;;  %vm12685_vm0 = vcmp.eq.s32.totalorder %v7192_v11, %v12684_v20  ;;  %2725 = vrot.lane.b32.xlu1 %v2709_v41, %s6100_s13  ;;  %vm12688_vm6 = vcmp.eq.s32.totalorder %v7192_v11, %v12687_v37  ;;  %v12700_v41 = vld [vmem:[#allocation92_spill] sm:$0xff] }
 0x509   : > { %v1729_v28 = vsel %vm12682_vm14, %v12680_v50, 0.0  ;;  %v2345_v51 = vsel %vm12685_vm0, %v12683_v7, 0.0  ;;  %vm12691_vm9 = vcmp.eq.s32.totalorder %v7192_v11, %v12690_v23  ;;  %vm12693_vm10 = vcmp.eq.s32.totalorder %v7203_v0, %v12675_v58 }
 0x50a   : > { %v1785_v12 = vsel %vm12688_vm6, %v12686_v17, %v1729_v28  ;;  %v2393_v3 = vsel %vm12691_vm9, %v12689_v52, %v2345_v51  ;;  %v2042_v1 = vsel %vm12693_vm10, %v12674_v56, 0.0  ;;  %v2649_v48 = vsel %vm2489_vm8, %v8602_v5, 0.0 }
 0x50b   : > { %2889 = vperm.xlu0 %5974, %v12692_v22   ;;  %v2105_v63 = vadd.f32 %v2089_v8, %v1785_v12  ;;  %v2710_v43 = vadd.f32 %v2694_v26, %v2406_v35  ;;  %vm12694_vm2 = vcmp.eq.s32.totalorder %v7203_v0, %v12678_v60  ;;  %v2697_v30 = vsel %vm2449_vm5, %v2677_v36, %v2649_v48  ;;  %v2822_v58 = vpop.permute.xlu1 %2821  ;;  %v12702_v26 = vld [vmem:[#allocation118_spill] sm:$0xff]  ;;  %v12703_v35 = vld [vmem:[#allocation77_spill] sm:$0xff]  ;;  %v12713_v12 = vld [vmem:[#allocation75_spill] sm:$0xff] }
 0x50c   : > { %v2090_v9 = vsel %vm12694_vm2, %v12677_v14, %v2042_v1  ;;  %v3168_v29 = vadd.f32 %v8761_v61, %v8759_v27  ;;  %vm12695_vm4 = vcmp.eq.s32.totalorder %v7203_v0, %v12681_v25  ;;  %vm12696_vm8 = vcmp.eq.s32.totalorder %v7203_v0, %v12684_v20  ;;  %v12707_v20 = vld [vmem:[#allocation90_spill] sm:$0xff] }
 0x50d   : > { %v1730_v38 = vsel %vm12695_vm4, %v12680_v50, 0.0  ;;  %v2346_v40 = vsel %vm12696_vm8, %v12683_v7, 0.0  ;;  %v2409_v21 = vadd.f32 %v2393_v3, %v2105_v63  ;;  %2741 = vrot.lane.b32.xlu1 %v2710_v43, %s6100_s13  ;;  %vm12697_vm5 = vcmp.eq.s32.totalorder %v7203_v0, %v12687_v37  ;;  %v12706_v7 = vld [vmem:[#allocation76_spill] sm:$0xff]  ;;  %v12712_v37 = vld [vmem:[#allocation78_spill] sm:$0xff] }
 0x50e   : > { %v1786_v39 = vsel %vm12697_vm5, %v12686_v17, %v1730_v38  ;;  %vm12698_vm13 = vcmp.eq.s32.totalorder %v7203_v0, %v12690_v23  ;;  %vm12701_vm11 = vcmp.eq.s32.totalorder %v7192_v11, %v12700_v41  ;;  %v2650_v60 = vsel %vm2490_vm7, %v8602_v5, 0.0  ;;  %v12709_v17 = vld [vmem:[#allocation21_spill] sm:$0xff]  ;;  %v12717_v23 = vld [vmem:[#allocation79_spill] sm:$0xff] }
 0x50f   : > { %v2394_v56 = vsel %vm12698_vm13, %v12689_v52, %v2346_v40  ;;  %3184 = vrot.lane.b32.xlu0 %v3168_v29, %s6100_s13  ;;  %v2106_v57 = vadd.f32 %v2090_v9, %v1786_v39  ;;  %v2045_v14 = vsel %vm12701_vm11, %v12699_v19, 0.0  ;;  %v2713_v8 = vadd.f32 %v2697_v30, %v2409_v21  ;;  %v2826_v1 = vpop.permute.xlu1 %2825  ;;  %v12719_v9 = vld [vmem:[#allocation13_spill] sm:$0xff] }
 0x510   : > { %vm12704_vm12 = vcmp.eq.s32.totalorder %v7192_v11, %v12703_v35  ;;  %vm12705_vm1 = vcmp.eq.s32.totalorder %v7203_v0, %v12572_v18  ;;  %vm12708_vm3 = vcmp.eq.s32.totalorder %v7192_v11, %v12707_v20  ;;  %vm12711_vm7 = vcmp.eq.s32.totalorder %v7192_v11, %v12710_v10 }
 0x511   : > { %v2093_v50 = vsel %vm12704_vm12, %v12702_v26, %v2045_v14  ;;  %v2698_v25 = vsel %vm12705_vm1, %v2677_v36, %v2650_v60  ;;  %v2410_v28 = vadd.f32 %v2394_v56, %v2106_v57  ;;  %v1733_v51 = vsel %vm12708_vm3, %v12706_v7, 0.0  ;;  %2729 = vrot.lane.b32.xlu1 %v2713_v8, %s6100_s13  ;;  %v12716_v36 = vld [vmem:[#allocation54_spill] sm:$0xff] }
 0x512   : > { %v2349_v5 = vsel %vm12711_vm7, %v12709_v17, 0.0  ;;  %vm12714_vm14 = vcmp.eq.s32.totalorder %v7192_v11, %v12713_v12  ;;  %vm12715_vm0 = vcmp.eq.s32.totalorder %v7203_v0, %v12700_v41  ;;  %vm12718_vm6 = vcmp.eq.s32.totalorder %v7192_v11, %v12717_v23 }
 0x513   : > { %v1789_v52 = vsel %vm12714_vm14, %v12712_v37, %v1733_v51  ;;  %v2046_v18 = vsel %vm12715_vm0, %v12699_v19, 0.0  ;;  %v2397_v3 = vsel %vm12718_vm6, %v12716_v36, %v2349_v5  ;;  %v2653_v48 = vsel %vm2493_vm15, %v8629_v44, 0.0 }
 0x514   : > { %v2109_v63 = vadd.f32 %v2093_v50, %v1789_v52  ;;  %v2714_v43 = vadd.f32 %v2698_v25, %v2410_v28  ;;  %v2850_v30 = vadd.f32 %v2826_v1, %v12719_v9  ;;  %vm12720_vm9 = vcmp.eq.s32.totalorder %v7203_v0, %v12703_v35  ;;  %v12728_v50 = vld [vmem:[#allocation10_spill] sm:$0xff]  ;;  %v2830_v28 = vpop.permute.xlu0 %2829 }
 0x515   : > { %v2094_v29 = vsel %vm12720_vm9, %v12702_v26, %v2046_v18  ;;  %vm12721_vm10 = vcmp.eq.s32.totalorder %v7192_v11, %v12581_v34  ;;  %vm12722_vm2 = vcmp.eq.s32.totalorder %v7203_v0, %v12707_v20  ;;  %vm12723_vm15 = vcmp.eq.s32.totalorder %v7203_v0, %v12710_v10  ;;  %v12729_v10 = vld [vmem:[#allocation12_spill] sm:$0xff] }
 0x516   : > { %v2701_v38 = vsel %vm12721_vm10, %v2685_v32, %v2653_v48  ;;  %v1734_v40 = vsel %vm12722_vm2, %v12706_v7, 0.0  ;;  %v2350_v21 = vsel %vm12723_vm15, %v12709_v17, 0.0  ;;  %v2413_v39 = vadd.f32 %v2397_v3, %v2109_v63  ;;  %2745 = vrot.lane.b32.xlu1 %v2714_v43, %s6100_s13  ;;  %v12730_v63 = vld [vmem:[#allocation4_spill] sm:$0xff]  ;;  %v12731_v48 = vld [vmem:[#allocation3_spill] sm:$0xff]  ;;  %v12733_v43 = vld [vmem:[#allocation5_spill] sm:$0xff] }
 0x517   : > { %v5486_v56 = vadd.f32 -0.5, %v2850_v30  ;;  %vm12724_vm4 = vcmp.eq.s32.totalorder %v7203_v0, %v12713_v12  ;;  %vm12725_vm8 = vcmp.eq.s32.totalorder %v7203_v0, %v12717_v23  ;;  %vm12726_vm5 = vcmp.eq.s32.totalorder %v7203_v0, %v12578_v33 }
 0x518   : > { %v1790_v57 = vsel %vm12724_vm4, %v12712_v37, %v1734_v40  ;;  %v2398_v19 = vsel %vm12725_vm8, %v12716_v36, %v2350_v21  ;;  %v2654_v14 = vsel %vm12726_vm5, %v8629_v44, 0.0  ;;  %v2717_v60 = vadd.f32 %v2701_v38, %v2413_v39 }
 0x519   : > { %v2110_v41 = vadd.f32 %v2094_v29, %v1790_v57  ;;  %v2914_v8 = vfloor.f32 %v5486_v56  ;;  %vm12727_vm13 = vcmp.eq.s32.totalorder %v7203_v0, %v12581_v34  ;;  %v2849_v25 = vadd.f32 %v2822_v58, %v12728_v50 }
 0x51a   : > { %v2702_v26 = vsel %vm12727_vm13, %v2685_v32, %v2654_v14  ;;  %2733 = vrot.lane.b32.xlu1 %v2717_v60, %s6100_s13  ;;  %v2851_v33 = vadd.f32 %v2830_v28, %v12729_v10 }
 0x51b   : > { %v2414_v35 = vadd.f32 %v2398_v19, %v2110_v41  ;;  %v5804_v7 = vtrunc.f32 %v2914_v8  ;;  %v2930_v51 = vsub.f32 %v5486_v56, %v2914_v8  ;;  %v5485_v44 = vadd.f32 -0.5, %v2849_v25 }
 0x51c   : > { %v5487_v37 = vadd.f32 -0.5, %v2851_v33  ;;  %v12742_v33 = vld [vmem:[#allocation41_spill] sm:$0xff] }
 0x51d   : > { %v2718_v20 = vadd.f32 %v2702_v26, %v2414_v35  ;;  %v8893_v17 = vcvt.f32.s32 %v5804_v7  ;;  %v3122_v34 = vsub.f32 1.0, %v2930_v51  ;;  %v2913_v12 = vfloor.f32 %v5485_v44 }
 0x51e   : > { %v2915_v36 = vfloor.f32 %v5487_v37 }
 0x51f   : > { %2749 = vrot.lane.b32.xlu1 %v2718_v20, %s6100_s13  ;;  %vm2962_vm11 = vcmp.ge.s32.totalorder %v8893_v17, 0  ;;  %vm2970_vm12 = vcmp.lt.s32.totalorder %v8893_v17, 16  ;;  %vm3002_vm1 = vcmp.ge.s32.totalorder %v8893_v17, 4294967295  ;;  %vm3010_vm3 = vcmp.lt.s32.totalorder %v8893_v17, 15 }
 0x520   : > { %vm2978_vm7 = vmand %vm2962_vm11, %vm2970_vm12  ;;  %v5802_v23 = vtrunc.f32 %v2913_v12  ;;  %v5806_v3 = vtrunc.f32 %v2915_v36  ;;  %v2931_v38 = vsub.f32 %v5487_v37, %v2915_v36 }
 0x521   : > { %v5502_v32 = vsel %vm2978_vm7, 1.0, %v12670_v47  ;;  %vm3018_vm14 = vmand %vm3002_vm1, %vm3010_vm3  ;;  %vm12739_vm1 = vcmp.eq.s32.totalorder %v7192_v11, %v12540_v45  ;;  %vm12740_vm3 = vcmp.eq.s32.totalorder %v7203_v0, %v12540_v45  ;;  %vm12094_vm7 = vcmp.lt.s32.totalorder %v7192_v11, 16 }
 0x522   : > { %v5510_v58 = vsel %vm3018_vm14, 1.0, %v12670_v47  ;;  %v8903_v5 = vmul.f32 %v5502_v32, %v3122_v34  ;;  %v8913_v1 = vcvt.f32.s32 %v5802_v23  ;;  %v3123_v41 = vsub.f32 1.0, %v2931_v38  ;;  %v12745_v32 = vld [vmem:[#allocation34_spill] sm:$0xff] }
 0x523   : > { %2833 = vperm.xlu1 %5972, %v12673_v53   ;;  %v8906_v52 = vmul.f32 %v5510_v58, %v2930_v51  ;;  %v8916_v53 = vcvt.f32.s32 %v5806_v3  ;;  %v12741_v51 = vld [vmem:[#allocation30_spill] sm:$0xff]  ;;  %vm12743_vm14 = vcmp.eq.s32.totalorder %v7192_v11, %v12742_v33 }
 0x524   : > { %vm2961_vm0 = vcmp.ge.s32.totalorder %v8913_v1, 0  ;;  %vm2969_vm6 = vcmp.lt.s32.totalorder %v8913_v1, 16  ;;  %vm3001_vm9 = vcmp.ge.s32.totalorder %v8913_v1, 4294967295  ;;  %vm3009_vm10 = vcmp.lt.s32.totalorder %v8913_v1, 15 }
 0x525   : > { %v3170_v18 = vadd.f32 %v8906_v52, %v8903_v5  ;;  %vm2977_vm2 = vmand %vm2961_vm0, %vm2969_vm6  ;;  %vm2963_vm15 = vcmp.ge.s32.totalorder %v8916_v53, 0  ;;  %vm2971_vm4 = vcmp.lt.s32.totalorder %v8916_v53, 16  ;;  %vm3003_vm5 = vcmp.ge.s32.totalorder %v8916_v53, 4294967295 }
 0x526   : > { %vm3017_vm8 = vmand %vm3001_vm9, %vm3009_vm10  ;;  %vm3011_vm13 = vcmp.lt.s32.totalorder %v8916_v53, 15  ;;  %v5501_v30 = vsel %vm2977_vm2, 1.0, %v12670_v47  ;;  %vm12744_vm0 = vcmp.eq.s32.totalorder %v7203_v0, %v12742_v33  ;;  %vm12751_vm6 = vcmp.eq.s32.totalorder %v7203_v0, %v12548_v46 }
 0x527   : > { %2841 = vperm.xlu1 %5972, %v12692_v22   ;;  %3188 = vrot.lane.b32.xlu0 %v3170_v18, %s6100_s13  ;;  %v8923_v22 = vpop.xlane.xlu0 %1173  ;;  %vm2979_vm11 = vmand %vm2963_vm15, %vm2971_vm4  ;;  %v5509_v29 = vsel %vm3017_vm8, 1.0, %v12670_v47  ;;  %vm12753_vm9 = vcmp.eq.s32.totalorder %v7192_v11, %v12548_v46  ;;  %vm12755_vm10 = vcmp.eq.s32.totalorder %v7203_v0, %v12535_v54  ;;  %vm12758_vm2 = vcmp.eq.s32.totalorder %v7192_v11, %v12535_v54 }
 0x528   : > { %12732 = vst [vmem:[#allocation22_spill] sm:$0xff] %v8923_v22  ;;  %vm3019_vm12 = vmand %vm3003_vm5, %vm3011_vm13  ;;  %v5503_v57 = vsel %vm2979_vm11, 1.0, %v12670_v47  ;;  %v12783_v22 = vld [vmem:[#allocation98_spill] sm:$0xff] }
 0x529   : > { %v5511_v19 = vsel %vm3019_vm12, 1.0, %v12670_v47  ;;  %v8942_v14 = vmul.f32 %v5503_v57, %v3123_v41  ;;  %v12750_v41 = vld [vmem:[#allocation48_spill] sm:$0xff] }
 0x52a   : > { %v8944_v60 = vmul.f32 %v5511_v19, %v2931_v38 }
 0x52b   : > { %5973 = vset.pattern.permute.xlu1 %v6110_v2  ;;  %v2929_v2 = vsub.f32 %v5485_v44, %v2913_v12  ;;  %v8933_v21 = vpop.xlane.xlu0 %1182  ;;  %v12746_v12 = vld [vmem:[#allocation44_spill] sm:$0xff] }
 0x52c   : > { %2865 = vperm.xlu1 %5973, %v12730_v63   ;;  %12734 = vst [vmem:[#allocation37_spill] sm:$0xff] %v8933_v21  ;;  %v3171_v26 = vadd.f32 %v8944_v60, %v8942_v14 }
 0x52d   : > { %v3121_v40 = vsub.f32 1.0, %v2929_v2  ;;  %v8937_v56 = vmul.f32 %v5509_v29, %v2929_v2 }
 0x52f   : > { %v8935_v39 = vmul.f32 %v5501_v30, %v3121_v40  ;;  %v8948_v8 = vpop.xlane.xlu0 %1179 }
 0x530   : > { %2873 = vperm.xlu1 %5973, %v12731_v48   ;;  %12735 = vst [vmem:[#allocation50_spill] sm:$0xff] %v8948_v8 }
 0x533   : > { %v8954_v35 = vpop.xlane.xlu0 %1188 }
 0x534   : > { %2877 = vperm.xlu1 %5973, %v12733_v43   ;;  %12736 = vst [vmem:[#allocation57_spill] sm:$0xff] %v8954_v35 }
 0x537   : > { %v8956_v25 = vpop.xlane.xlu0 %1194 }
 0x538   : > { %2885 = vperm.xlu1 %5973, %v12630_v13   ;;  %v3169_v13 = vadd.f32 %v8937_v56, %v8935_v39  ;;  %12737 = vst [vmem:[#allocation110_spill] sm:$0xff] %v8956_v25 }
 0x53b   : > { %v8981_v43 = vpop.xlane.xlu1 %1176 }
 0x53c   : > { %2893 = vperm.xlu1 %5973, %v12645_v15   ;;  %v12738_v15 = vld [vmem:[#allocation23_spill] sm:$0xff]  ;;  %12747 = vst [vmem:[#allocation56_spill] sm:$0xff] %v8981_v43 }
 0x53d   : > { %v2527_v28 = vsel %vm12739_vm1, %v12738_v15, 0.0  ;;  %v2528_v7 = vsel %vm12740_vm3, %v12738_v15, 0.0  ;;  %v12752_v15 = vld [vmem:[#allocation14_spill] sm:$0xff] }
 0x53e   : > { %v2575_v44 = vsel %vm12743_vm14, %v12741_v51, %v2527_v28  ;;  %v2576_v34 = vsel %vm12744_vm0, %v12741_v51, %v2528_v7  ;;  %v2531_v7 = vsel %vm12753_vm9, %v12750_v41, 0.0 }
 0x53f   : > { %v2591_v58 = vadd.f32 %v2575_v44, %v12745_v32  ;;  %v2592_v18 = vadd.f32 %v2576_v34, %v12746_v12  ;;  %v8983_v29 = vpop.xlane.xlu1 %1185  ;;  %v12756_v12 = vld [vmem:[#allocation70_spill] sm:$0xff] }
 0x540   : > { %3186 = vrot.lane.b32.xlu1 %v3169_v13, %s6100_s13  ;;  %12748 = vst [vmem:[#allocation58_spill] sm:$0xff] %v8983_v29  ;;  %v2532_v13 = vsel %vm12751_vm6, %v12750_v41, 0.0 }
 0x542   : > { %v2720_v20 = vpop.permute.xlu0 %2719 }
 0x543   : > { %v8987_v40 = vpop.xlane.xlu1 %1191 }
 0x544   : > { %3190 = vrot.lane.b32.xlu1 %v3171_v26, %s6100_s13  ;;  %12749 = vst [vmem:[#allocation112_spill] sm:$0xff] %v8987_v40 }
 0x547   : > { %v2736_v37 = vpop.permute.xlu0 %2735 }
 0x548   : > { %v2752_v45 = vsel %vm12094_vm7, %v2720_v20, %v2736_v37  ;;  %v2760_v36 = vsel %vm12094_vm7, %v2736_v37, %v2720_v20  ;;  %v12754_v20 = vld [vmem:[#allocation114_spill] sm:$0xff] }
 0x549   : > { %v2768_v23 = vadd.f32 %v2760_v36, %v2591_v58  ;;  %v2769_v3 = vadd.f32 %v2752_v45, %v2592_v18  ;;  %v2580_v51 = vsel %vm12755_vm10, %v12754_v20, %v2532_v13  ;;  %v12757_v45 = vld [vmem:[#allocation17_spill] sm:$0xff]  ;;  %v2579_v41 = vsel %vm12758_vm2, %v12754_v20, %v2531_v7 }
 0x54a   : > { %v2596_v46 = vadd.f32 %v2580_v51, %v12756_v12 }
 0x54b   : > { %5106 = vmatprep.mubr.f32.mxu0 %v2769_v3 }
 0x54c   : > { %5107 = vmatmul.mubr.f32.vlgmr.msra.gmra.mxu0 %v2768_v23 }
 0x54e   : > { %v2724_v63 = vpop.permute.xlu0 %2723 }
 0x554   : > { %v2740_v48 = vpop.permute.xlu0 %2739 }
 0x555   : > { %v2754_v34 = vsel %vm12094_vm7, %v2724_v63, %v2740_v48  ;;  %v2762_v13 = vsel %vm12094_vm7, %v2740_v48, %v2724_v63 }
 0x556   : > { %v2773_v51 = vadd.f32 %v2754_v34, %v2596_v46 }
 0x55a   : > { %v2728_v2 = vpop.permute.xlu0 %2727 }
 0x55f   : > { %v2744_v30 = vpop.permute.xlu0 %2743 }
 0x560   : > { %v2756_v54 = vsel %vm12094_vm7, %v2728_v2, %v2744_v30 }
 0x564   : > { %v8985_v38 = vpop.permute.xlu0 %2731 }
 0x568   : > { %v8989_v57 = vpop.permute.xlu0 %2747 }
 0x571   : > { %v2722_v19 = vpop.permute.xlu1 %2721 }
 0x575   : > { %v2838_v26 = vpop.permute.xlu0 %2837  ;;  %v2738_v44 = vpop.permute.xlu1 %2737 }
 0x576   : > { %v2853_v28 = vadd.f32 %v2838_v26, %v12752_v15  ;;  %v2753_v32 = vsel %vm12094_vm7, %v2722_v19, %v2738_v44  ;;  %v2761_v58 = vsel %vm12094_vm7, %v2738_v44, %v2722_v19 }
 0x577   : > { %v2771_v23 = vadd.f32 %v2753_v32, %v8417_v55  ;;  %v2770_v3 = vadd.f32 %v2761_v58, %v8414_v42 }
 0x578   : > { %v5489_v33 = vadd.f32 -0.5, %v2853_v28 }
 0x579   : > { %v2846_v37 = vpop.permute.xlu0 %2845  ;;  %5111 = vmatprep.mubr.f32.mxu0 %v2771_v23  ;;  %v2764_v23 = vsel %vm12094_vm7, %v2744_v30, %v2728_v2 }
 0x57a   : > { %v2917_v18 = vfloor.f32 %v5489_v33  ;;  %v2855_v36 = vadd.f32 %v2846_v37, %v12757_v45  ;;  %v2726_v28 = vpop.permute.xlu1 %2725  ;;  %5112 = vmatmul.mubr.f32.gmra.mxu0 %v2770_v3  ;;  %v12759_v37 = vld [vmem:[#allocation52_spill] sm:$0xff] }
 0x57b   : > { %v2595_v12 = vadd.f32 %v2579_v41, %v12759_v37  ;;  %5116 = vmatprep.mubr.f32.mxu0 %v2773_v51 }
 0x57c   : > { %v5810_v26 = vtrunc.f32 %v2917_v18  ;;  %v5491_v19 = vadd.f32 -0.5, %v2855_v36  ;;  %v2933_v44 = vsub.f32 %v5489_v33, %v2917_v18 }
 0x57d   : > { %v2772_v63 = vadd.f32 %v2762_v13, %v2595_v12  ;;  %v12760_v12 = vld [vmem:[#allocation89_spill] sm:$0xff] }
 0x57e   : > { %v9021_v55 = vcvt.f32.s32 %v5810_v26  ;;  %v2919_v42 = vfloor.f32 %v5491_v19  ;;  %v2870_v32 = vpop.permute.xlu0 %2869  ;;  %v3125_v20 = vsub.f32 1.0, %v2933_v44 }
 0x57f   : > { %v2897_v7 = vadd.f32 %v2870_v32, %v12728_v50  ;;  %v2742_v48 = vpop.permute.xlu1 %2741  ;;  %5117 = vmatmul.mubr.f32.gmra.mxu0 %v2772_v63  ;;  %v12762_v63 = vld [vmem:[#allocation66_spill] sm:$0xff] }
 0x580   : > { %vm2965_vm15 = vcmp.ge.s32.totalorder %v9021_v55, 0  ;;  %vm2973_vm4 = vcmp.lt.s32.totalorder %v9021_v55, 16  ;;  %vm3005_vm8 = vcmp.ge.s32.totalorder %v9021_v55, 4294967295  ;;  %vm3013_vm5 = vcmp.lt.s32.totalorder %v9021_v55, 15 }
 0x581   : > { %vm2981_vm13 = vmand %vm2965_vm15, %vm2973_vm4  ;;  %v5814_v33 = vtrunc.f32 %v2919_v42  ;;  %v5493_v34 = vadd.f32 -0.5, %v2897_v7  ;;  %v2755_v58 = vsel %vm12094_vm7, %v2726_v28, %v2742_v48  ;;  %v2935_v46 = vsub.f32 %v5491_v19, %v2919_v42 }
 0x582   : > { %v5505_v50 = vsel %vm2981_vm13, 1.0, %v12670_v47  ;;  %vm3021_vm11 = vmand %vm3005_vm8, %vm3013_vm5  ;;  %v2763_v18 = vsel %vm12094_vm7, %v2742_v48, %v2726_v28  ;;  %v2775_v36 = vadd.f32 %v2755_v58, %v8473_v31  ;;  %v2777_v28 = vadd.f32 %v2756_v54, %v12760_v12 }
 0x583   : > { %v5513_v3 = vsel %vm3021_vm11, 1.0, %v12670_v47  ;;  %v9039_v41 = vmul.f32 %v5505_v50, %v3125_v20  ;;  %v9041_v13 = vcvt.f32.s32 %v5814_v33  ;;  %v2921_v51 = vfloor.f32 %v5493_v34  ;;  %v2730_v37 = vpop.permute.xlu1 %2729 }
 0x584   : > { %v9043_v26 = vmul.f32 %v5513_v3, %v2933_v44  ;;  %5121 = vmatprep.mubr.f32.mxu0 %v2775_v36  ;;  %v2774_v19 = vadd.f32 %v2763_v18, %v8470_v59  ;;  %v3127_v31 = vsub.f32 1.0, %v2935_v46  ;;  %v2776_v48 = vadd.f32 %v2764_v23, %v12762_v63 }
 0x585   : > { %vm2967_vm12 = vcmp.ge.s32.totalorder %v9041_v13, 0  ;;  %vm2975_vm1 = vcmp.lt.s32.totalorder %v9041_v13, 16  ;;  %vm3007_vm3 = vcmp.ge.s32.totalorder %v9041_v13, 4294967295  ;;  %vm3015_vm14 = vcmp.lt.s32.totalorder %v9041_v13, 15 }
 0x586   : > { %vm2983_vm0 = vmand %vm2967_vm12, %vm2975_vm1  ;;  %v5818_v2 = vtrunc.f32 %v2921_v51  ;;  %5122 = vmatmul.mubr.f32.gmra.mxu0 %v2774_v19  ;;  %v3173_v30 = vadd.f32 %v9043_v26, %v9039_v41  ;;  %v2937_v59 = vsub.f32 %v5493_v34, %v2921_v51  ;;  %v2758_v50 = vsel %vm12094_vm7, %v8985_v38, %v8989_v57  ;;  %v2882_v19 = vpop.permute.xlu0 %2881 }
 0x587   : > { %v5507_v44 = vsel %vm2983_vm0, 1.0, %v12670_v47  ;;  %vm3023_vm6 = vmand %vm3007_vm3, %vm3015_vm14  ;;  %5126 = vmatprep.mubr.f32.mxu0 %v2777_v28  ;;  %v2766_v28 = vsel %vm12094_vm7, %v8989_v57, %v8985_v38 }
 0x588   : > { %v5515_v42 = vsel %vm3023_vm6, 1.0, %v12670_v47  ;;  %v9055_v32 = vmul.f32 %v5507_v44, %v3127_v31  ;;  %v9057_v54 = vcvt.f32.s32 %v5818_v2  ;;  %3194 = vrot.lane.b32.xlu1 %v3173_v30, %s6100_s13  ;;  %v2746_v7 = vpop.permute.xlu1 %2745  ;;  %v3145_v34 = vsub.f32 1.0, %v2937_v59  ;;  %v12763_v31 = vld [vmem:[#allocation117_spill] sm:$0xff] }
 0x589   : > { %v9061_v20 = vmul.f32 %v5515_v42, %v2935_v46  ;;  %v2757_v33 = vsel %vm12094_vm7, %v2730_v37, %v2746_v7  ;;  %v2765_v58 = vsel %vm12094_vm7, %v2746_v7, %v2730_v37  ;;  %v2781_v2 = vadd.f32 %v2758_v50, %v12763_v31  ;;  %v12765_v7 = vld [vmem:[#allocation97_spill] sm:$0xff] }
 0x58a   : > { %12761 = vst [vmem:[#allocation39_spill] sm:$0xff] %v9057_v54  ;;  %vm3041_vm9 = vcmp.ge.s32.totalorder %v9057_v54, 0  ;;  %vm3049_vm10 = vcmp.lt.s32.totalorder %v9057_v54, 16  ;;  %vm3081_vm2 = vcmp.ge.s32.totalorder %v9057_v54, 4294967295  ;;  %vm3089_vm15 = vcmp.lt.s32.totalorder %v9057_v54, 15  ;;  %5127 = vmatmul.mubr.f32.gmra.mxu0 %v2776_v48 }
 0x58b   : > { %vm3057_vm4 = vmand %vm3041_vm9, %vm3049_vm10  ;;  %v3175_v18 = vadd.f32 %v9061_v20, %v9055_v32  ;;  %v2779_v23 = vadd.f32 %v2757_v33, %v8521_v16  ;;  %v2778_v12 = vadd.f32 %v2765_v58, %v8518_v6  ;;  %v12764_v16 = vld [vmem:[#allocation15_spill] sm:$0xff]  ;;  %v2780_v38 = vadd.f32 %v2766_v28, %v12765_v7  ;;  %v2890_v33 = vpop.permute.xlu0 %2889  ;;  %v12766_v58 = vld [vmem:[#allocation16_spill] sm:$0xff] }
 0x58c   : > { %v5517_v46 = vsel %vm3057_vm4, 1.0, %v12670_v47  ;;  %vm3097_vm8 = vmand %vm3081_vm2, %vm3089_vm15  ;;  %v2734_v36 = vpop.permute.xlu1 %2733  ;;  %v2900_v30 = vadd.f32 %v2882_v19, %v12764_v16  ;;  %v2902_v50 = vadd.f32 %v2890_v33, %v12766_v58 }
 0x58d   : > { %v5525_v3 = vsel %vm3097_vm8, 1.0, %v12670_v47  ;;  %v9080_v51 = vmul.f32 %v5517_v46, %v3145_v34  ;;  %3198 = vrot.lane.b32.xlu1 %v3175_v18, %s6100_s13  ;;  %5131 = vmatprep.mubr.f32.mxu0 %v2779_v23 }
 0x58e   : > { %v9082_v37 = vmul.f32 %v5525_v3, %v2937_v59  ;;  %5132 = vmatmul.mubr.f32.gmra.mxu0 %v2778_v12  ;;  %v5496_v63 = vadd.f32 -0.5, %v2900_v30  ;;  %v5498_v23 = vadd.f32 -0.5, %v2902_v50 }
 0x58f   : > { %5136 = vmatprep.mubr.f32.mxu0 %v2781_v2 }
 0x590   : > { %v3217_v59 = vadd.f32 %v9082_v37, %v9080_v51  ;;  %v2924_v34 = vfloor.f32 %v5496_v63 }
 0x591   : > { %v2750_v44 = vpop.permute.xlu1 %2749 }
 0x592   : > { %v2759_v42 = vsel %vm12094_vm7, %v2734_v36, %v2750_v44  ;;  %v2767_v6 = vsel %vm12094_vm7, %v2750_v44, %v2734_v36  ;;  %3234 = vrot.lane.b32.xlu1 %v3217_v59, %s6097_s12  ;;  %5137 = vmatmul.mubr.f32.gmra.mxu0 %v2780_v38  ;;  %v5824_v46 = vtrunc.f32 %v2924_v34  ;;  %v9109_v30 = vsub.f32 %v5496_v63, %v2924_v34 }
 0x593   : > { %v2783_v57 = vadd.f32 %v2759_v42, %v8566_v49  ;;  %v2782_v48 = vadd.f32 %v2767_v6, %v8563_v24  ;;  %v2926_v49 = vfloor.f32 %v5498_v23 }
 0x594   : > { %v9104_v3 = vcvt.f32.s32 %v5824_v46 }
 0x595   : > { %5141 = vmatprep.mubr.f32.mxu0 %v2783_v57  ;;  %v9113_v44 = vsub.f32 %v5498_v23, %v2926_v49  ;;  %v5828_v59 = vtrunc.f32 %v2926_v49 }
 0x596   : > { %5142 = vmatmul.mubr.f32.gmra.mxu0 %v2782_v48  ;;  %12767 = vst [vmem:[#allocation42_spill] sm:$0xff] %v9104_v3  ;;  %vm3044_vm5 = vcmp.ge.s32.totalorder %v9104_v3, 0  ;;  %vm3052_vm13 = vcmp.lt.s32.totalorder %v9104_v3, 16  ;;  %vm3084_vm11 = vcmp.ge.s32.totalorder %v9104_v3, 4294967295  ;;  %vm3092_vm12 = vcmp.lt.s32.totalorder %v9104_v3, 15 }
 0x597   : > { %vm9117_vm1 = vmand %vm3044_vm5, %vm3052_vm13  ;;  %v3148_v48 = vsub.f32 1.0, %v9109_v30  ;;  %v9131_v50 = vcvt.f32.s32 %v5828_v59 }
 0x598   : > { %vm9122_vm3 = vmand %vm3084_vm11, %vm3092_vm12 }
 0x599   : > { %12772 = vst [vmem:[#allocation74_spill] sm:$0xff] %v9131_v50  ;;  %vm3046_vm11 = vcmp.ge.s32.totalorder %v9131_v50, 0 }
 0x59e   : > { %v2834_v18 = vpop.permute.xlu1 %2833 }
 0x59f   : > { %v2852_v36 = vadd.f32 %v2834_v18, %v12764_v16 }
 0x5a1   : > { %v5488_v19 = vadd.f32 -0.5, %v2852_v36  ;;  %v5520_v36 = vsel %vm9117_vm1, 1.0, %v12670_v47  ;;  %vm3054_vm1 = vcmp.lt.s32.totalorder %v9131_v50, 16 }
 0x5a2   : > { %v2842_v12 = vpop.permute.xlu1 %2841 }
 0x5a3   : > { %v2916_v28 = vfloor.f32 %v5488_v19  ;;  %v2854_v31 = vadd.f32 %v2842_v12, %v12766_v58 }
 0x5a5   : > { %v5808_v24 = vtrunc.f32 %v2916_v28  ;;  %v5490_v2 = vadd.f32 -0.5, %v2854_v31  ;;  %v2932_v16 = vsub.f32 %v5488_v19, %v2916_v28  ;;  %v9146_v28 = vsel %vm9122_vm3, 1.0, %v12670_v47 }
 0x5a6   : > { %vm3086_vm3 = vcmp.ge.s32.totalorder %v9131_v50, 4294967295 }
 0x5a7   : > { %v9115_v42 = vcvt.f32.s32 %v5808_v24  ;;  %v2918_v6 = vfloor.f32 %v5490_v2  ;;  %v2866_v7 = vpop.permute.xlu1 %2865  ;;  %v3124_v33 = vsub.f32 1.0, %v2932_v16 }
 0x5a8   : > { %v2896_v57 = vadd.f32 %v2866_v7, %v12603_v4 }
 0x5a9   : > { %vm2964_vm14 = vcmp.ge.s32.totalorder %v9115_v42, 0  ;;  %vm2972_vm0 = vcmp.lt.s32.totalorder %v9115_v42, 16  ;;  %vm3004_vm6 = vcmp.ge.s32.totalorder %v9115_v42, 4294967295  ;;  %vm3012_vm9 = vcmp.lt.s32.totalorder %v9115_v42, 15 }
 0x5aa   : > { %vm2980_vm10 = vmand %vm2964_vm14, %vm2972_vm0  ;;  %v5812_v34 = vtrunc.f32 %v2918_v6  ;;  %v5492_v58 = vadd.f32 -0.5, %v2896_v57  ;;  %v2934_v18 = vsub.f32 %v5490_v2, %v2918_v6 }
 0x5ab   : > { %v5504_v46 = vsel %vm2980_vm10, 1.0, %v12670_v47  ;;  %vm3020_vm2 = vmand %vm3004_vm6, %vm3012_vm9  ;;  %v2874_v23 = vpop.permute.xlu1 %2873 }
 0x5ac   : > { %v5512_v19 = vsel %vm3020_vm2, 1.0, %v12670_v47  ;;  %v9139_v12 = vmul.f32 %v5504_v46, %v3124_v33  ;;  %v9141_v49 = vcvt.f32.s32 %v5812_v34  ;;  %v2920_v24 = vfloor.f32 %v5492_v58 }
 0x5ad   : > { %v9148_v31 = vmul.f32 %v5512_v19, %v2932_v16  ;;  %v2898_v2 = vadd.f32 %v2874_v23, %v12719_v9  ;;  %v3126_v59 = vsub.f32 1.0, %v2934_v18  ;;  %vm3094_vm2 = vcmp.lt.s32.totalorder %v9131_v50, 15 }
 0x5ae   : > { %vm2966_vm15 = vcmp.ge.s32.totalorder %v9141_v49, 0  ;;  %vm2974_vm4 = vcmp.lt.s32.totalorder %v9141_v49, 16  ;;  %vm3006_vm8 = vcmp.ge.s32.totalorder %v9141_v49, 4294967295  ;;  %vm3014_vm5 = vcmp.lt.s32.totalorder %v9141_v49, 15 }
 0x5af   : > { %vm2982_vm13 = vmand %vm2966_vm15, %vm2974_vm4  ;;  %v5816_v6 = vtrunc.f32 %v2920_v24  ;;  %v5494_v7 = vadd.f32 -0.5, %v2898_v2  ;;  %v2878_v38 = vpop.permute.xlu1 %2877  ;;  %v3172_v16 = vadd.f32 %v9148_v31, %v9139_v12  ;;  %v2936_v57 = vsub.f32 %v5492_v58, %v2920_v24 }
 0x5b0   : > { %v5506_v9 = vsel %vm2982_vm13, 1.0, %v12670_v47  ;;  %vm3022_vm12 = vmand %vm3006_vm8, %vm3014_vm5  ;;  %v2899_v63 = vadd.f32 %v2878_v38, %v12729_v10 }
 0x5b1   : > { %v5514_v33 = vsel %vm3022_vm12, 1.0, %v12670_v47  ;;  %v9162_v34 = vmul.f32 %v5506_v9, %v3126_v59  ;;  %v9164_v46 = vcvt.f32.s32 %v5816_v6  ;;  %3192 = vrot.lane.b32.xlu0 %v3172_v16, %s6100_s13  ;;  %v2922_v19 = vfloor.f32 %v5494_v7  ;;  %vm9190_vm4 = vmand %vm3046_vm11, %vm3054_vm1 }
 0x5b2   : > { %v9168_v23 = vmul.f32 %v5514_v33, %v2934_v18  ;;  %v5495_v2 = vadd.f32 -0.5, %v2899_v63  ;;  %v3144_v58 = vsub.f32 1.0, %v2936_v57  ;;  %v9179_v9 = vmul.f32 %v5520_v36, %v3148_v48  ;;  %vm9201_vm8 = vmand %vm3086_vm3, %vm3094_vm2 }
 0x5b3   : > { %12773 = vst [vmem:[#allocation73_spill] sm:$0xff] %v9164_v46  ;;  %vm3040_vm14 = vcmp.ge.s32.totalorder %v9164_v46, 0  ;;  %vm3048_vm0 = vcmp.lt.s32.totalorder %v9164_v46, 16  ;;  %vm3080_vm6 = vcmp.ge.s32.totalorder %v9164_v46, 4294967295  ;;  %vm3088_vm9 = vcmp.lt.s32.totalorder %v9164_v46, 15  ;;  %v2886_v10 = vpop.permute.xlu1 %2885  ;;  %v12788_v46 = vld [vmem:[#allocation109_spill] sm:$0xff] }
 0x5b4   : > { %vm3056_vm10 = vmand %vm3040_vm14, %vm3048_vm0  ;;  %v5820_v24 = vtrunc.f32 %v2922_v19  ;;  %v2923_v59 = vfloor.f32 %v5495_v2  ;;  %v2901_v6 = vadd.f32 %v2886_v10, %v12752_v15  ;;  %v2938_v38 = vsub.f32 %v5494_v7, %v2922_v19 }
 0x5b5   : > { %v5516_v18 = vsel %vm3056_vm10, 1.0, %v12670_v47  ;;  %vm3096_vm15 = vmand %vm3080_vm6, %vm3088_vm9  ;;  %v3174_v16 = vadd.f32 %v9168_v23, %v9162_v34 }
 0x5b6   : > { %v5524_v63 = vsel %vm3096_vm15, 1.0, %v12670_v47  ;;  %v9182_v33 = vmul.f32 %v5516_v18, %v3144_v58  ;;  %v9184_v4 = vcvt.f32.s32 %v5820_v24  ;;  %v2939_v19 = vsub.f32 %v5495_v2, %v2923_v59 }
 0x5b7   : > { %v9194_v7 = vmul.f32 %v5524_v63, %v2936_v57  ;;  %v5822_v10 = vtrunc.f32 %v2923_v59  ;;  %v5497_v48 = vadd.f32 -0.5, %v2901_v6  ;;  %3196 = vrot.lane.b32.xlu0 %v3174_v16, %s6100_s13  ;;  %v2894_v36 = vpop.permute.xlu1 %2893  ;;  %v3146_v57 = vsub.f32 1.0, %v2938_v38 }
 0x5b8   : > { %12774 = vst [vmem:[#allocation32_spill] sm:$0xff] %v9184_v4  ;;  %vm3042_vm5 = vcmp.ge.s32.totalorder %v9184_v4, 0  ;;  %vm3050_vm13 = vcmp.lt.s32.totalorder %v9184_v4, 16  ;;  %vm3082_vm11 = vcmp.ge.s32.totalorder %v9184_v4, 4294967295  ;;  %vm3090_vm12 = vcmp.lt.s32.totalorder %v9184_v4, 15 }
 0x5b9   : > { %vm3058_vm1 = vmand %vm3042_vm5, %vm3050_vm13  ;;  %v9209_v2 = vcvt.f32.s32 %v5822_v10  ;;  %v2925_v24 = vfloor.f32 %v5497_v48  ;;  %v2903_v59 = vadd.f32 %v2894_v36, %v12757_v45  ;;  %v9214_v6 = vmul.f32 %v9146_v28, %v9109_v30 }
 0x5ba   : > { %v5522_v18 = vsel %vm9190_vm4, 1.0, %v12670_v47  ;;  %v5518_v16 = vsel %vm3058_vm1, 1.0, %v12670_v47  ;;  %vm3098_vm3 = vmand %vm3082_vm11, %vm3090_vm12  ;;  %v3216_v63 = vadd.f32 %v9194_v7, %v9182_v33  ;;  %v3147_v30 = vsub.f32 1.0, %v2939_v19 }
 0x5bb   : > { %12779 = vst [vmem:[#allocation25_spill] sm:$0xff] %v9209_v2  ;;  %v5526_v10 = vsel %vm3098_vm3, 1.0, %v12670_v47  ;;  %v9223_v40 = vmul.f32 %v5518_v16, %v3146_v57  ;;  %vm3043_vm14 = vcmp.ge.s32.totalorder %v9209_v2, 0  ;;  %vm3051_vm0 = vcmp.lt.s32.totalorder %v9209_v2, 16 }
 0x5bc   : > { %v9227_v45 = vmul.f32 %v5526_v10, %v2938_v38  ;;  %vm3059_vm6 = vmand %vm3043_vm14, %vm3051_vm0  ;;  %vm3083_vm9 = vcmp.ge.s32.totalorder %v9209_v2, 4294967295  ;;  %vm3091_vm10 = vcmp.lt.s32.totalorder %v9209_v2, 15  ;;  %3232 = vrot.lane.b32.xlu0 %v3216_v63, %s6097_s12  ;;  %v5530_v28 = vsel %vm9201_vm8, 1.0, %v12670_v47 }
 0x5bd   : > { %v5519_v15 = vsel %vm3059_vm6, 1.0, %v12670_v47  ;;  %vm3099_vm2 = vmand %vm3083_vm9, %vm3091_vm10  ;;  %v5826_v36 = vtrunc.f32 %v2925_v24  ;;  %v5499_v57 = vadd.f32 -0.5, %v2903_v59  ;;  %v2941_v10 = vsub.f32 %v5497_v48, %v2925_v24 }
 0x5be   : > { %v5527_v38 = vsel %vm3099_vm2, 1.0, %v12670_v47  ;;  %v9237_v16 = vmul.f32 %v5519_v15, %v3147_v30  ;;  %v3218_v25 = vadd.f32 %v9227_v45, %v9223_v40  ;;  %v12781_v58 = vsub.f32 1.0, %v9113_v44 }
 0x5bf   : > { %v9241_v29 = vmul.f32 %v5527_v38, %v2939_v19  ;;  %v9243_v63 = vcvt.f32.s32 %v5826_v36  ;;  %v2927_v35 = vfloor.f32 %v5499_v57  ;;  %v9250_v21 = vmul.f32 %v5530_v28, %v9113_v44 }
 0x5c0   : > { %v9247_v8 = vmul.f32 %v5522_v18, %v12781_v58  ;;  %3236 = vrot.lane.b32.xlu0 %v3218_v25, %s6097_s12  ;;  %v3149_v19 = vsub.f32 1.0, %v2941_v10  ;;  %v3220_v44 = vadd.f32 %v9214_v6, %v9179_v9  ;;  %vm12791_vm9 = vcmask 31744  }
 0x5c1   : > { %12780 = vst [vmem:[#allocation49_spill] sm:$0xff] %v9243_v63  ;;  %vm3045_vm15 = vcmp.ge.s32.totalorder %v9243_v63, 0  ;;  %vm3053_vm4 = vcmp.lt.s32.totalorder %v9243_v63, 16  ;;  %vm3085_vm8 = vcmp.ge.s32.totalorder %v9243_v63, 4294967295  ;;  %vm3093_vm5 = vcmp.lt.s32.totalorder %v9243_v63, 15  ;;  %vm12792_vm10 = vmmov %vm12791_vm9 }
 0x5c2   : > { %vm3061_vm13 = vmand %vm3045_vm15, %vm3053_vm4  ;;  %v5830_v48 = vtrunc.f32 %v2927_v35  ;;  %v3219_v24 = vadd.f32 %v9241_v29, %v9237_v16  ;;  %v2943_v25 = vsub.f32 %v5499_v57, %v2927_v35  ;;  %v3222_v36 = vadd.f32 %v9250_v21, %v9247_v8 }
 0x5c3   : > { %v5521_v59 = vsel %vm3061_vm13, 1.0, %v12670_v47  ;;  %vm3101_vm11 = vmand %vm3085_vm8, %vm3093_vm5 }
 0x5c4   : > { %v5529_v18 = vsel %vm3101_vm11, 1.0, %v12670_v47  ;;  %v9263_v30 = vmul.f32 %v5521_v59, %v3149_v19  ;;  %v9265_v28 = vcvt.f32.s32 %v5830_v48  ;;  %3238 = vrot.lane.b32.xlu1 %v3219_v24, %s6097_s12  ;;  %3240 = vrot.lane.b32.xlu0 %v3220_v44, %s6097_s12  ;;  %v3151_v35 = vsub.f32 1.0, %v2943_v25  ;;  %v3187_v24 = vpop.permute.xlu1 %3186  ;;  %vm12793_vm2 = vmmov %vm12791_vm9 }
 0x5c5   : > { %v9269_v15 = vmul.f32 %v5529_v18, %v2941_v10  ;;  %v3209_v43 = vmul.f32 %v3187_v24, %v12783_v22  ;;  %v12786_v24 = vld [vmem:[#allocation101_spill] sm:$0xff]  ;;  %vm12794_vm15 = vmmov %vm12793_vm2 }
 0x5c6   : > { %12782 = vst [vmem:[#allocation105_spill] sm:$0xff] %v9265_v28  ;;  %vm3047_vm12 = vcmp.ge.s32.totalorder %v9265_v28, 0  ;;  %vm3055_vm1 = vcmp.lt.s32.totalorder %v9265_v28, 16  ;;  %vm3087_vm3 = vcmp.ge.s32.totalorder %v9265_v28, 4294967295  ;;  %vm3095_vm14 = vcmp.lt.s32.totalorder %v9265_v28, 15  ;;  %vm12795_vm4 = vmmov %vm12793_vm2 }
 0x5c7   : > { %vm3063_vm0 = vmand %vm3047_vm12, %vm3055_vm1  ;;  %v3221_v57 = vadd.f32 %v9269_v15, %v9263_v30 }
 0x5c8   : > { %v5523_v38 = vsel %vm3063_vm0, 1.0, %v12670_v47  ;;  %vm3103_vm6 = vmand %vm3087_vm3, %vm3095_vm14  ;;  %3244 = vrot.lane.b32.xlu0 %v3222_v36, %s6097_s12  ;;  %v3191_v44 = vpop.permute.xlu1 %3190 }
 0x5c9   : > { %v5531_v10 = vsel %vm3103_vm6, 1.0, %v12670_v47  ;;  %v9282_v58 = vmul.f32 %v5523_v38, %v3151_v35  ;;  %3242 = vrot.lane.b32.xlu1 %v3221_v57, %s6097_s12  ;;  %v3185_v47 = vpop.permute.xlu0 %3184  ;;  %v12784_v38 = vld [vmem:[#allocation99_spill] sm:$0xff]  ;;  %v3211_v22 = vmul.f32 %v3191_v44, %v12786_v24  ;;  %vm12796_vm8 = vmmov %vm12793_vm2 }
 0x5ca   : > { %v9285_v19 = vmul.f32 %v5531_v10, %v2943_v25  ;;  %v3208_v10 = vmul.f32 %v3185_v47, %v12784_v38  ;;  %vm12797_vm5 = vmmov %vm12793_vm2 }
 0x5cb   : > { %vm12798_vm13 = vmmov %vm12793_vm2 }
 0x5cc   : > { %v3223_v48 = vadd.f32 %v9285_v19, %v9282_v58 }
 0x5cd   : > { %v3189_v35 = vpop.permute.xlu0 %3188 }
 0x5ce   : > { %3246 = vrot.lane.b32.xlu1 %v3223_v48, %s6097_s12  ;;  %v12785_v48 = vld [vmem:[#allocation100_spill] sm:$0xff] }
 0x5cf   : > { %v3210_v50 = vmul.f32 %v3189_v35, %v12785_v48 }
 0x5fa   : > { %v3195_v59 = vpop.permute.xlu1 %3194 }
 0x5ff   : > { %v3199_v18 = vpop.permute.xlu1 %3198 }
 0x604   : > { %v3235_v36 = vpop.permute.xlu1 %3234 }
 0x605   : > { %v3257_v0 = vmul.f32 %v3235_v36, %v3209_v43  ;;  %v12787_v43 = vld [vmem:[#allocation102_spill] sm:$0xff] }
 0x607   : > { %3274 = vrot.lane.b32.xlu1 %v3257_v0, %s6111_s15 }
 0x623   : > { %v3193_v25 = vpop.permute.xlu0 %3192 }
 0x624   : > { %v3212_v36 = vmul.f32 %v3193_v25, %v12787_v43 }
 0x629   : > { %v3197_v57 = vpop.permute.xlu0 %3196 }
 0x62a   : > { %v3214_v47 = vmul.f32 %v3197_v57, %v12788_v46 }
 0x62e   : > { %v3233_v11 = vpop.permute.xlu0 %3232 }
 0x62f   : > { %v3256_v28 = vmul.f32 %v3233_v11, %v3208_v10  ;;  %v12789_v11 = vld [vmem:[#allocation19_spill] sm:$0xff] }
 0x631   : > { %3272 = vrot.lane.b32.xlu0 %v3256_v28, %s6111_s15  ;;  %v3213_v28 = vmul.f32 %v3195_v59, %v12789_v11 }
 0x632   : > { %v3237_v63 = vpop.permute.xlu0 %3236 }
 0x633   : > { %v3258_v3 = vmul.f32 %v3237_v63, %v3210_v50 }
 0x635   : > { %3276 = vrot.lane.b32.xlu0 %v3258_v3, %s6111_s15  ;;  %v12790_v3 = vld [vmem:[#allocation24_spill] sm:$0xff] }
 0x636   : > { %v3239_v0 = vpop.permute.xlu1 %3238  ;;  %v3241_v2 = vpop.permute.xlu0 %3240  ;;  %v3215_v25 = vmul.f32 %v3199_v18, %v12790_v3 }
 0x637   : > { %v3259_v4 = vmul.f32 %v3239_v0, %v3211_v22  ;;  %v3260_v54 = vmul.f32 %v3241_v2, %v3212_v36 }
 0x639   : > { %3278 = vrot.lane.b32.xlu1 %v3259_v4, %s6111_s15  ;;  %3280 = vrot.lane.b32.xlu0 %v3260_v54, %s6111_s15 }
 0x63a   : > { %v3245_v35 = vpop.permute.xlu0 %3244 }
 0x63b   : > { %v3243_v50 = vpop.permute.xlu1 %3242  ;;  %v3262_v63 = vmul.f32 %v3245_v35, %v3214_v47 }
 0x63c   : > { %v3261_v44 = vmul.f32 %v3243_v50, %v3213_v28 }
 0x63d   : > { %3284 = vrot.lane.b32.xlu0 %v3262_v63, %s6111_s15 }
 0x63e   : > { %3282 = vrot.lane.b32.xlu1 %v3261_v44, %s6111_s15 }
 0x640   : > { %v3247_v22 = vpop.permute.xlu1 %3246 }
 0x641   : > { %v3263_v2 = vmul.f32 %v3247_v22, %v3215_v25 }
 0x643   : > { %3286 = vrot.lane.b32.xlu1 %v3263_v2, %s6111_s15 }
 0x679   : > { %v3275_v57 = vpop.permute.xlu1 %3274 }
 0x67a   : > { %v3299_v4 = vsel %vm12791_vm9, %v3275_v57, 0.0  ;;  %v12807_v57 = vld [vmem:[#allocation73_spill] sm:$0xff] }
 0x67b   : > { %3300 = vadd.xlane.f32.xlu1 %v3299_v4  ;;  %v3504_v4 = vmul.u32 16, %v12807_v57 }
 0x6a3   : > { %v3273_v54 = vpop.permute.xlu0 %3272 }
 0x6a4   : > { %v3296_v59 = vsel %vm12792_vm10, %v3273_v54, 0.0 }
 0x6a5   : > { %3297 = vadd.xlane.f32.xlu0 %v3296_v59 }
 0x6a7   : > { %v3277_v10 = vpop.permute.xlu0 %3276 }
 0x6a8   : > { %v3302_v36 = vsel %vm12793_vm2, %v3277_v10, 0.0  ;;  %v12808_v10 = vld [vmem:[#allocation39_spill] sm:$0xff] }
 0x6a9   : > { %3303 = vadd.xlane.f32.xlu0 %v3302_v36  ;;  %v3505_v36 = vmul.u32 16, %v12808_v10  ;;  %v12811_v10 = vld [vmem:[#allocation42_spill] sm:$0xff] }
 0x6ab   : > { %v3279_v0 = vpop.permute.xlu1 %3278  ;;  %v3281_v47 = vpop.permute.xlu0 %3280 }
 0x6ac   : > { %v3305_v18 = vsel %vm12794_vm15, %v3279_v0, 0.0  ;;  %v3308_v28 = vsel %vm12795_vm4, %v3281_v47, 0.0 }
 0x6ad   : > { %3306 = vadd.xlane.f32.xlu0 %v3305_v18  ;;  %3309 = vadd.xlane.f32.xlu1 %v3308_v28  ;;  %v12809_v28 = vld [vmem:[#allocation32_spill] sm:$0xff] }
 0x6af   : > { %v3285_v35 = vpop.permute.xlu0 %3284 }
 0x6b0   : > { %v3283_v50 = vpop.permute.xlu1 %3282  ;;  %v3314_v63 = vsel %vm12796_vm8, %v3285_v35, 0.0  ;;  %v3506_v35 = vmul.u32 16, %v12809_v28 }
 0x6b1   : > { %v3311_v44 = vsel %vm12797_vm5, %v3283_v50, 0.0  ;;  %3315 = vadd.xlane.f32.xlu1 %v3314_v63  ;;  %v12810_v63 = vld [vmem:[#allocation25_spill] sm:$0xff] }
 0x6b2   : > { %3312 = vadd.xlane.f32.xlu0 %v3311_v44  ;;  %v3507_v44 = vmul.u32 16, %v12810_v63  ;;  %v12812_v63 = vld [vmem:[#allocation49_spill] sm:$0xff] }
 0x6b5   : > { %v3287_v25 = vpop.permute.xlu1 %3286 }
 0x6b6   : > { %v3317_v22 = vsel %vm12798_vm13, %v3287_v25, 0.0 }
 0x6b7   : > { %3318 = vadd.xlane.f32.xlu0 %v3317_v22 }
 0x6c2   : > { %3336 = vrot.lane.b32.xlu1 %v9182_v33, %s6097_s12 }
 0x6c6   : > { %3340 = vrot.lane.b32.xlu1 %v9223_v40, %s6097_s12 }
 0x6ca   : > { %3342 = vrot.lane.b32.xlu1 %v9237_v16, %s6097_s12 }
 0x6cd   : > { %3338 = vrot.lane.b32.xlu0 %v9080_v51, %s6097_s12 }
 0x6ce   : > { %3346 = vrot.lane.b32.xlu1 %v9263_v30, %s6097_s12 }
 0x6d1   : > { %3344 = vrot.lane.b32.xlu0 %v9179_v9, %s6097_s12 }
 0x6d2   : > { %3350 = vrot.lane.b32.xlu1 %v9282_v58, %s6097_s12 }
 0x6d5   : > { %3348 = vrot.lane.b32.xlu0 %v9247_v8, %s6097_s12 }
 0x6d6   : > { %3378 = vrot.lane.b32.xlu1 %v8935_v39, %s6100_s13 }
 0x6d9   : > { %3376 = vrot.lane.b32.xlu0 %v8759_v27, %s6100_s13  ;;  %v6112_v27 = vmov 12  }
 0x6da   : > { %3382 = vrot.lane.b32.xlu1 %v8942_v14, %s6100_s13  ;;  %5975 = vset.pattern.permute.xlu0 %v6112_v27 }
 0x6db   : > { %5976 = vset.pattern.permute.xlu1 %v6112_v27 }
 0x6dd   : > { %3380 = vrot.lane.b32.xlu0 %v8903_v5, %s6100_s13 }
 0x6de   : > { %3386 = vrot.lane.b32.xlu1 %v9039_v41, %s6100_s13 }
 0x6e1   : > { %3384 = vrot.lane.b32.xlu0 %v9139_v12, %s6100_s13 }
 0x6e2   : > { %3390 = vrot.lane.b32.xlu1 %v9055_v32, %s6100_s13 }
 0x6e5   : > { %3388 = vrot.lane.b32.xlu0 %v9162_v34, %s6100_s13 }
 0x6e6   : > { %3418 = vrot.lane.b32.xlu1 %v8937_v56, %s6100_s13 }
 0x6e9   : > { %3416 = vrot.lane.b32.xlu0 %v8761_v61, %s6100_s13 }
 0x6ea   : > { %3422 = vrot.lane.b32.xlu1 %v8944_v60, %s6100_s13 }
 0x6ed   : > { %3420 = vrot.lane.b32.xlu0 %v8906_v52, %s6100_s13 }
 0x6ee   : > { %3426 = vrot.lane.b32.xlu1 %v9043_v26, %s6100_s13 }
 0x6f1   : > { %3424 = vrot.lane.b32.xlu0 %v9148_v31, %s6100_s13 }
 0x6f2   : > { %3430 = vrot.lane.b32.xlu1 %v9061_v20, %s6100_s13 }
 0x6f5   : > { %3428 = vrot.lane.b32.xlu0 %v9168_v23, %s6100_s13 }
 0x6f6   : > { %3458 = vrot.lane.b32.xlu1 %v9082_v37, %s6097_s12 }
 0x6f9   : > { %3456 = vrot.lane.b32.xlu0 %v9194_v7, %s6097_s12 }
 0x6fa   : > { %3462 = vrot.lane.b32.xlu1 %v9241_v29, %s6097_s12 }
 0x6fd   : > { %3460 = vrot.lane.b32.xlu0 %v9227_v45, %s6097_s12 }
 0x6fe   : > { %3466 = vrot.lane.b32.xlu1 %v9269_v15, %s6097_s12 }
 0x701   : > { %3464 = vrot.lane.b32.xlu0 %v9214_v6, %s6097_s12 }
 0x702   : > { %3470 = vrot.lane.b32.xlu1 %v9285_v19, %s6097_s12 }
 0x705   : > { %3468 = vrot.lane.b32.xlu0 %v9250_v21, %s6097_s12 }
 0x706   : > { %3514 = vrot.lane.b32.xlu1 %v8913_v1, %s6097_s12 }
 0x709   : > { %3512 = vrot.lane.b32.xlu0 %v8644_v62, %s6097_s12  ;;  %v9396_v62 = vpop.xlane.xlu1 %3300 }
 0x70a   : > { %3518 = vrot.lane.b32.xlu1 %v8916_v53, %s6097_s12  ;;  %12800 = vst [vmem:[#allocation88_spill] sm:$0xff] %v9396_v62 }
 0x70d   : > { %3516 = vrot.lane.b32.xlu0 %v8893_v17, %s6097_s12 }
 0x70e   : > { %3522 = vrot.lane.b32.xlu1 %v9021_v55, %s6097_s12 }
 0x711   : > { %3520 = vrot.lane.b32.xlu0 %v9115_v42, %s6097_s12 }
 0x712   : > { %3526 = vrot.lane.b32.xlu1 %v9041_v13, %s6097_s12 }
 0x715   : > { %3524 = vrot.lane.b32.xlu0 %v9141_v49, %s6097_s12 }
 0x72e   : > { %v9394_v61 = vpop.xlane.xlu0 %3297 }
 0x72f   : > { %12799 = vst [vmem:[#allocation27_spill] sm:$0xff] %v9394_v61 }
 0x732   : > { %v9398_v5 = vpop.xlane.xlu0 %3303 }
 0x733   : > { %12801 = vst [vmem:[#allocation33_spill] sm:$0xff] %v9398_v5 }
 0x736   : > { %v9400_v52 = vpop.xlane.xlu1 %3309  ;;  %v9402_v17 = vpop.xlane.xlu0 %3306 }
 0x737   : > { %12802 = vst [vmem:[#allocation86_spill] sm:$0xff] %v9400_v52  ;;  %12803 = vst [vmem:[#allocation65_spill] sm:$0xff] %v9402_v17 }
 0x73a   : > { %v9404_v1 = vpop.xlane.xlu1 %3315 }
 0x73b   : > { %12804 = vst [vmem:[#allocation62_spill] sm:$0xff] %v9404_v1  ;;  %v9406_v53 = vpop.xlane.xlu0 %3312  ;;  %v3508_v1 = vmul.u32 16, %v12811_v10 }
 0x73c   : > { %12805 = vst [vmem:[#allocation96_spill] sm:$0xff] %v9406_v53 }
 0x73e   : > { %v9408_v21 = vpop.permute.xlu1 %3336 }
 0x740   : > { %v9410_v39 = vpop.xlane.xlu0 %3318 }
 0x741   : > { %12806 = vst [vmem:[#allocation81_spill] sm:$0xff] %v9410_v39 }
 0x742   : > { %v9412_v56 = vpop.permute.xlu1 %3340 }
 0x744   : > { %v9414_v14 = vpop.permute.xlu0 %3338 }
 0x746   : > { %v9416_v60 = vpop.permute.xlu1 %3342 }
 0x748   : > { %v9418_v8 = vpop.permute.xlu0 %3344 }
 0x74a   : > { %v9420_v29 = vpop.permute.xlu1 %3346 }
 0x74c   : > { %v9422_v40 = vpop.permute.xlu0 %3348 }
 0x74e   : > { %v9424_v55 = vpop.permute.xlu1 %3350 }
 0x750   : > { %v9426_v41 = vpop.permute.xlu0 %3376 }
 0x752   : > { %v9428_v13 = vpop.permute.xlu1 %3378 }
 0x754   : > { %v9430_v26 = vpop.permute.xlu0 %3380 }
 0x756   : > { %v9432_v32 = vpop.permute.xlu1 %3382 }
 0x758   : > { %v9434_v20 = vpop.permute.xlu0 %3384 }
 0x75a   : > { %v9436_v51 = vpop.permute.xlu1 %3386 }
 0x75c   : > { %v9438_v37 = vpop.permute.xlu0 %3388 }
 0x75e   : > { %v9440_v42 = vpop.permute.xlu1 %3390 }
 0x760   : > { %v9442_v12 = vpop.permute.xlu0 %3416 }
 0x762   : > { %v9444_v49 = vpop.permute.xlu1 %3418 }
 0x764   : > { %v9446_v31 = vpop.permute.xlu0 %3420 }
 0x766   : > { %v9448_v34 = vpop.permute.xlu1 %3422 }
 0x768   : > { %v9450_v23 = vpop.permute.xlu0 %3424 }
 0x76a   : > { %v9452_v9 = vpop.permute.xlu1 %3426 }
 0x76c   : > { %v9454_v33 = vpop.permute.xlu0 %3428 }
 0x76e   : > { %v9456_v7 = vpop.permute.xlu1 %3430 }
 0x770   : > { %v9458_v6 = vpop.permute.xlu0 %3456 }
 0x772   : > { %v9460_v45 = vpop.permute.xlu1 %3458 }
 0x774   : > { %v9462_v16 = vpop.permute.xlu0 %3460 }
 0x776   : > { %v9464_v30 = vpop.permute.xlu1 %3462 }
 0x778   : > { %v9466_v15 = vpop.permute.xlu0 %3464 }
 0x77a   : > { %v9468_v58 = vpop.permute.xlu1 %3466 }
 0x77c   : > { %v9470_v19 = vpop.permute.xlu0 %3468 }
 0x77e   : > { %v9472_v2 = vpop.permute.xlu1 %3470 }
 0x780   : > { %v3513_v54 = vpop.permute.xlu0 %3512 }
 0x781   : > { %v3528_v59 = vadd.s32 %v3513_v54, %v3504_v4 }
 0x782   : > { %v3515_v0 = vpop.permute.xlu1 %3514 }
 0x783   : > { %vm3536_vm11 = vcmp.lt.s32.totalorder %v3528_v59, 0  ;;  %v3544_v47 = vadd.s32 256, %v3528_v59  ;;  %v3529_v18 = vadd.s32 %v3515_v0, %v3505_v36 }
 0x784   : > { %v3517_v50 = vpop.permute.xlu0 %3516 }
 0x785   : > { %vm3537_vm12 = vcmp.lt.s32.totalorder %v3529_v18, 0  ;;  %v3545_v25 = vadd.s32 256, %v3529_v18  ;;  %v3530_v22 = vadd.s32 %v3517_v50, %v3506_v35  ;;  %v9478_v27 = vsel %vm3536_vm11, %v3544_v47, %v3528_v59  ;;  %v12813_v47 = vld [vmem:[#allocation74_spill] sm:$0xff] }
 0x786   : > { %3593 = vperm.xlu0 %5975, %v9478_v27   ;;  %v3519_v57 = vpop.permute.xlu1 %3518  ;;  %v3509_v35 = vmul.u32 16, %v12812_v63  ;;  %v3510_v50 = vmul.u32 16, %v12813_v47 }
 0x787   : > { %v3546_v4 = vadd.s32 256, %v3530_v22  ;;  %v3531_v54 = vadd.s32 %v3519_v57, %v3507_v44  ;;  %v9482_v39 = vsel %vm3537_vm12, %v3545_v25, %v3529_v18  ;;  %vm3538_vm1 = vcmp.lt.s32.totalorder %v3530_v22, 0  ;;  %v12814_v57 = vld [vmem:[#allocation105_spill] sm:$0xff] }
 0x788   : > { %v3521_v36 = vpop.permute.xlu0 %3520  ;;  %3596 = vperm.xlu1 %5976, %v9482_v39   ;;  %v3511_v10 = vmul.u32 16, %v12814_v57  ;;  %v3561_v63 = vadd.s32 1, %v9482_v39 }
 0x789   : > { %vm3539_vm3 = vcmp.lt.s32.totalorder %v3531_v54, 0  ;;  %v3547_v0 = vadd.s32 256, %v3531_v54  ;;  %v3532_v28 = vadd.s32 %v3521_v36, %v3508_v1  ;;  %v9489_v44 = vsel %vm3538_vm1, %v3546_v4, %v3530_v22 }
 0x78a   : > { %v3523_v59 = vpop.permute.xlu1 %3522  ;;  %v5533_v47 = vadd.s32 4294967040, %v3561_v63  ;;  %v3562_v57 = vadd.s32 1, %v9489_v44  ;;  %vm3569_vm10 = vcmp.ge.s32.totalorder %v3561_v63, 256 }
 0x78b   : > { %v3548_v52 = vadd.s32 256, %v3532_v28  ;;  %v3533_v53 = vadd.s32 %v3523_v59, %v3509_v35  ;;  %v9487_v5 = vsel %vm3539_vm3, %v3547_v0, %v3531_v54  ;;  %vm3540_vm14 = vcmp.lt.s32.totalorder %v3532_v28, 0 }
 0x78c   : > { %v3525_v18 = vpop.permute.xlu0 %3524  ;;  %3602 = vperm.xlu0 %5975, %v9487_v5   ;;  %3599 = vperm.xlu1 %5976, %v9489_v44   ;;  %v3560_v35 = vadd.s32 1, %v9478_v27  ;;  %vm3570_vm4 = vcmp.ge.s32.totalorder %v3562_v57, 256 }
 0x78d   : > { %vm3541_vm0 = vcmp.lt.s32.totalorder %v3533_v53, 0  ;;  %v3549_v25 = vadd.s32 256, %v3533_v53  ;;  %v3534_v1 = vadd.s32 %v3525_v18, %v3510_v50  ;;  %v9498_v4 = vsel %vm3540_vm14, %v3548_v52, %v3532_v28 }
 0x78e   : > { %v3527_v36 = vpop.permute.xlu1 %3526  ;;  %v5532_v50 = vadd.s32 4294967040, %v3560_v35  ;;  %v3563_v18 = vadd.s32 1, %v9487_v5  ;;  %vm3568_vm2 = vcmp.ge.s32.totalorder %v3560_v35, 256  ;;  %v9510_v52 = vsel %vm3569_vm10, %v5533_v47, %v3561_v63 }
 0x78f   : > { %v3550_v54 = vadd.s32 256, %v3534_v1  ;;  %v3535_v0 = vadd.s32 %v3527_v36, %v3511_v10  ;;  %v9496_v22 = vsel %vm3541_vm0, %v3549_v25, %v3533_v53  ;;  %vm3542_vm6 = vcmp.lt.s32.totalorder %v3534_v1, 0 }
 0x790   : > { %3608 = vperm.xlu0 %5975, %v9496_v22   ;;  %3605 = vperm.xlu1 %5976, %v9498_v4   ;;  %v9512_v53 = vsel %vm3568_vm2, %v5532_v50, %v3560_v35  ;;  %v5535_v28 = vadd.s32 4294967040, %v3563_v18  ;;  %v5534_v25 = vadd.s32 4294967040, %v3562_v57  ;;  %vm3571_vm15 = vcmp.ge.s32.totalorder %v3563_v18, 256 }
 0x791   : > { %vm3543_vm9 = vcmp.lt.s32.totalorder %v3535_v0, 0  ;;  %v3551_v59 = vadd.s32 256, %v3535_v0  ;;  %v9506_v10 = vsel %vm3542_vm6, %v3550_v54, %v3534_v1  ;;  %v3565_v36 = vadd.s32 1, %v9496_v22 }
 0x792   : > { %v9518_v1 = vsel %vm3571_vm15, %v5535_v28, %v3563_v18  ;;  %v9520_v54 = vsel %vm3570_vm4, %v5534_v25, %v3562_v57  ;;  %v3566_v47 = vadd.s32 1, %v9506_v10 }
 0x793   : > { %v9504_v17 = vsel %vm3543_vm9, %v3551_v59, %v3535_v0  ;;  %v3564_v0 = vadd.s32 1, %v9498_v4  ;;  %v5537_v63 = vadd.s32 4294967040, %v3565_v36  ;;  %vm3573_vm8 = vcmp.ge.s32.totalorder %v3565_v36, 256 }
 0x794   : > { %12815 = vst [vmem:[#allocation64_spill] sm:$0xff] %v9504_v17  ;;  %3614 = vperm.xlu0 %5975, %v9504_v17   ;;  %3611 = vperm.xlu1 %5976, %v9506_v10   ;;  %v3567_v35 = vadd.s32 1, %v9504_v17  ;;  %v5538_v28 = vadd.s32 4294967040, %v3566_v47  ;;  %vm3574_vm11 = vcmp.ge.s32.totalorder %v3566_v47, 256 }
 0x795   : > { %v5536_v59 = vadd.s32 4294967040, %v3564_v0  ;;  %vm3572_vm5 = vcmp.ge.s32.totalorder %v3564_v0, 256  ;;  %v9526_v50 = vsel %vm3573_vm8, %v5537_v63, %v3565_v36  ;;  %v3360_v36 = vmul.f32 %v9408_v21, %v12784_v38 }
 0x796   : > { %v5539_v18 = vadd.s32 4294967040, %v3567_v35  ;;  %vm3575_vm13 = vcmp.ge.s32.totalorder %v3567_v35, 256  ;;  %v9534_v25 = vsel %vm3574_vm11, %v5538_v28, %v3566_v47  ;;  %v3362_v47 = vmul.f32 %v9412_v56, %v12785_v48 }
 0x797   : > { %v9528_v61 = vsel %vm3572_vm5, %v5536_v59, %v3564_v0  ;;  %v12817_v0 = vld [vmem:[#allocation98_spill] sm:$0xff]  ;;  %v9543_v59 = vmul.f32 %v9442_v12, %v3360_v36  ;;  %v3363_v28 = vmul.f32 %v9416_v60, %v12786_v24  ;;  %v9577_v60 = vmul.f32 %v9426_v41, %v3360_v36 }
 0x798   : > { %3636 = vperm.xlu0 %5975, %v9510_v52   ;;  %3633 = vperm.xlu1 %5976, %v9512_v53   ;;  %v9532_v57 = vsel %vm3575_vm13, %v5539_v18, %v3567_v35  ;;  %v3361_v63 = vmul.f32 %v9414_v14, %v12817_v0  ;;  %v6113_v35 = vmov 20   ;;  %v3364_v18 = vmul.f32 %v9418_v8, %v12787_v43 }
 0x799   : > { %12816 = vst [vmem:[#allocation93_spill] sm:$0xff] %v9532_v57  ;;  %12818 = vst [vmem:[#allocation95_spill] sm:$0xff] %v9543_v59  ;;  %v9555_v21 = vmul.f32 %v9446_v31, %v3362_v47  ;;  %v9567_v56 = vmul.f32 %v9448_v34, %v3363_v28 }
 0x79a   : > { %v9546_v62 = vmul.f32 %v9444_v49, %v3361_v63  ;;  %v9558_v14 = vmul.f32 %v9450_v23, %v3364_v18  ;;  %12824 = vst [vmem:[#allocation82_spill] sm:$0xff] %v9577_v60  ;;  %v9595_v36 = vmul.f32 %v9428_v13, %v3361_v63 }
 0x79b   : > { %12820 = vst [vmem:[#allocation80_spill] sm:$0xff] %v9555_v21  ;;  %12822 = vst [vmem:[#allocation119_spill] sm:$0xff] %v9567_v56 }
 0x79c   : > { %3642 = vperm.xlu0 %5975, %v9518_v1   ;;  %3639 = vperm.xlu1 %5976, %v9520_v54   ;;  %12819 = vst [vmem:[#allocation115_spill] sm:$0xff] %v9546_v62  ;;  %12821 = vst [vmem:[#allocation11_spill] sm:$0xff] %v9558_v14 }
 0x79d   : > { %12828 = vst [vmem:[#allocation38_spill] sm:$0xff] %v9595_v36 }
 0x7a0   : > { %3648 = vperm.xlu0 %5975, %v9526_v50   ;;  %3645 = vperm.xlu1 %5976, %v9528_v61  }
 0x7a4   : > { %3654 = vperm.xlu0 %5975, %v9532_v57   ;;  %3651 = vperm.xlu1 %5976, %v9534_v25  }
 0x7a8   : > { %5978 = vset.pattern.permute.xlu0 %v6113_v35  ;;  %5977 = vset.pattern.permute.xlu1 %v6113_v35  ;;  %v3366_v35 = vmul.f32 %v9422_v40, %v12788_v46 }
 0x7a9   : > { %3679 = vperm.xlu0 %5978, %v9546_v62   ;;  %3674 = vperm.xlu1 %5977, %v9543_v59   ;;  %v3365_v59 = vmul.f32 %v9420_v29, %v12789_v11 }
 0x7aa   : > { %v9570_v8 = vmul.f32 %v9454_v33, %v3366_v35 }
 0x7ab   : > { %v9580_v40 = vmul.f32 %v9452_v9, %v3365_v59  ;;  %v9613_v63 = vmul.f32 %v9436_v51, %v3365_v59 }
 0x7ac   : > { %12823 = vst [vmem:[#allocation120_spill] sm:$0xff] %v9570_v8 }
 0x7ad   : > { %3694 = vperm.xlu0 %5978, %v9558_v14   ;;  %3684 = vperm.xlu1 %5977, %v9555_v21   ;;  %12825 = vst [vmem:[#allocation18_spill] sm:$0xff] %v9580_v40  ;;  %v3367_v14 = vmul.f32 %v9424_v55, %v12790_v3  ;;  %v9587_v21 = vmul.f32 %v9430_v26, %v3362_v47  ;;  %12831 = vst [vmem:[#allocation108_spill] sm:$0xff] %v9613_v63 }
 0x7ae   : > { %v9603_v55 = vmul.f32 %v9432_v32, %v3363_v28  ;;  %v9606_v47 = vmul.f32 %v9438_v37, %v3366_v35  ;;  %v3482_v28 = vmul.f32 %v9462_v16, %v12785_v48  ;;  %v3483_v16 = vmul.f32 %v9464_v30, %v12786_v24 }
 0x7af   : > { %12826 = vst [vmem:[#allocation53_spill] sm:$0xff] %v9587_v21  ;;  %v9590_v29 = vmul.f32 %v9456_v7, %v3367_v14  ;;  %v9623_v35 = vmul.f32 %v9440_v42, %v3367_v14 }
 0x7b0   : > { %12829 = vst [vmem:[#allocation103_spill] sm:$0xff] %v9603_v55  ;;  %12830 = vst [vmem:[#allocation51_spill] sm:$0xff] %v9606_v47 }
 0x7b1   : > { %3704 = vperm.xlu0 %5978, %v9570_v8   ;;  %3689 = vperm.xlu1 %5977, %v9567_v56   ;;  %12827 = vst [vmem:[#allocation20_spill] sm:$0xff] %v9590_v29  ;;  %v9598_v8 = vmul.f32 %v9434_v20, %v3364_v18  ;;  %12832 = vst [vmem:[#allocation55_spill] sm:$0xff] %v9623_v35  ;;  %v12846_v56 = vld [vmem:[#allocation107_spill] sm:$0xff] }
 0x7b5   : > { %3730 = vperm.xlu0 %5978, %v9577_v60   ;;  %3699 = vperm.xlu1 %5977, %v9580_v40   ;;  %v3480_v40 = vmul.f32 %v9458_v6, %v12784_v38  ;;  %v3481_v38 = vmul.f32 %v9460_v45, %v12817_v0  ;;  %v9628_v6 = vmul.f32 %v3482_v28, %v9446_v31 }
 0x7b6   : > { %v3486_v31 = vmul.f32 %v9470_v19, %v12788_v46 }
 0x7b7   : > { %v9616_v18 = vmul.f32 %v3480_v40, %v9442_v12  ;;  %v3484_v12 = vmul.f32 %v9466_v15, %v12787_v43  ;;  %v9635_v48 = vmul.f32 %v3481_v38, %v9444_v49  ;;  %v9647_v43 = vmul.f32 %v3483_v16, %v9448_v34 }
 0x7b8   : > { %v3485_v49 = vmul.f32 %v9468_v58, %v12789_v11  ;;  %v9652_v45 = vmul.f32 %v3486_v31, %v9454_v33  ;;  %v9657_v24 = vmul.f32 %v3480_v40, %v9426_v41  ;;  %v3487_v34 = vmul.f32 %v9472_v2, %v12790_v3 }
 0x7b9   : > { %3740 = vperm.xlu0 %5978, %v9587_v21   ;;  %3709 = vperm.xlu1 %5977, %v9590_v29   ;;  %v9640_v59 = vmul.f32 %v3484_v12, %v9450_v23  ;;  %v9667_v11 = vmul.f32 %v3482_v28, %v9430_v26  ;;  %v9675_v41 = vmul.f32 %v3481_v38, %v9428_v13  ;;  %v12074_v33 = vmov 15  }
 0x7ba   : > { %v9660_v46 = vmul.f32 %v3485_v49, %v9452_v9  ;;  %v9670_v23 = vmul.f32 %v3487_v34, %v9456_v7  ;;  %v9678_v9 = vmul.f32 %v3484_v12, %v9434_v20  ;;  %v9683_v3 = vmul.f32 %v3483_v16, %v9432_v32 }
 0x7bb   : > { %v9686_v26 = vmul.f32 %v3486_v31, %v9438_v37  ;;  %v9691_v13 = vmul.f32 %v3485_v49, %v9436_v51  ;;  %v9697_v32 = vmul.f32 %v3487_v34, %v9440_v42  ;;  %v12082_v20 = vmov 14  }
 0x7bc   : > { %12833 = vst [vmem:[#allocation7_spill] sm:$0xff] %v9670_v23  ;;  %v6116_v37 = vmov 13   ;;  %v12072_v7 = vmov 21   ;;  %v12076_v28 = vmov 22   ;;  %v12847_v21 = vmov 22  }
 0x7bd   : > { %3750 = vperm.xlu0 %5978, %v9598_v8   ;;  %3735 = vperm.xlu1 %5977, %v9595_v36   ;;  %12834 = vst [vmem:[#allocation106_spill] sm:$0xff] %v9697_v32 }
 0x7c1   : > { %3760 = vperm.xlu0 %5978, %v9606_v47   ;;  %3745 = vperm.xlu1 %5977, %v9603_v55  }
 0x7c5   : > { %3802 = vperm.xlu0 %5978, %v9616_v18   ;;  %3755 = vperm.xlu1 %5977, %v9613_v63  }
 0x7c9   : > { %3812 = vperm.xlu0 %5978, %v9628_v6   ;;  %3765 = vperm.xlu1 %5977, %v9623_v35  }
 0x7cd   : > { %3822 = vperm.xlu0 %5978, %v9640_v59   ;;  %3807 = vperm.xlu1 %5977, %v9635_v48  }
 0x7d1   : > { %3832 = vperm.xlu0 %5978, %v9652_v45   ;;  %3817 = vperm.xlu1 %5977, %v9647_v43  }
 0x7d5   : > { %3858 = vperm.xlu0 %5978, %v9657_v24   ;;  %3827 = vperm.xlu1 %5977, %v9660_v46  }
 0x7d9   : > { %3868 = vperm.xlu0 %5978, %v9667_v11   ;;  %3837 = vperm.xlu1 %5977, %v9670_v23  }
 0x7dd   : > { %3878 = vperm.xlu0 %5978, %v9678_v9   ;;  %3863 = vperm.xlu1 %5977, %v9675_v41  }
 0x7e1   : > { %3888 = vperm.xlu0 %5978, %v9686_v26   ;;  %3873 = vperm.xlu1 %5977, %v9683_v3  }
 0x7e5   : > { %5989 = vset.pattern.permute.xlu0 %v12074_v33  ;;  %3883 = vperm.xlu1 %5977, %v9691_v13  }
 0x7e6   : > { %4540 = vperm.xlu0 %5989, %v9482_v39  }
 0x7e9   : > { %3893 = vperm.xlu1 %5977, %v9697_v32  }
 0x7ea   : > { %5992 = vset.pattern.permute.xlu0 %v12082_v20 }
 0x7eb   : > { %4279 = vperm.xlu0 %5992, %v9520_v54  }
 0x7ed   : > { %5979 = vset.pattern.permute.xlu1 %v6116_v37 }
 0x7ee   : > { %3932 = vperm.xlu1 %5979, %v9482_v39  }
 0x7ef   : > { %5993 = vset.pattern.permute.xlu0 %v6116_v37  ;;  %v12084_v37 = vmov 23  }
 0x7f0   : > { %3929 = vperm.xlu0 %5993, %v9478_v27  }
 0x7f2   : > { %3935 = vperm.xlu1 %5979, %v9489_v44  }
 0x7f4   : > { %3938 = vperm.xlu0 %5993, %v9487_v5  }
 0x7f6   : > { %3941 = vperm.xlu1 %5979, %v9498_v4  }
 0x7f8   : > { %3944 = vperm.xlu0 %5993, %v9496_v22  }
 0x7fa   : > { %3947 = vperm.xlu1 %5979, %v9506_v10  }
 0x7fc   : > { %3950 = vperm.xlu0 %5993, %v9504_v17  }
 0x7fe   : > { %3969 = vperm.xlu1 %5979, %v9512_v53  }
 0x800   : > { %3972 = vperm.xlu0 %5993, %v9510_v52  }
 0x801   : > { %v9713_v51 = vpop.permute.xlu0 %3593 }
 0x802   : > { %3975 = vperm.xlu1 %5979, %v9520_v54   ;;  %vm3617_vm14 = vcmp.eq.s32.totalorder %v12846_v56, %v9713_v51 }
 0x803   : > { %v9715_v42 = vpop.permute.xlu1 %3596 }
 0x804   : > { %3978 = vperm.xlu0 %5993, %v9518_v1   ;;  %vm12102_vm15 = vcmp.eq.s32.totalorder %v12846_v56, %v9715_v42 }
 0x806   : > { %5980 = vset.pattern.permute.xlu1 %v12072_v7 }
 0x807   : > { %v9719_v30 = vpop.permute.xlu1 %3599  ;;  %4121 = vperm.xlu1 %5980, %v9616_v18   ;;  %v9722_v15 = vpop.permute.xlu0 %3602 }
 0x808   : > { %12835 = vst [vmem:[#allocation36_spill] sm:$0xff] %v9722_v15  ;;  %3981 = vperm.xlu0 %5993, %v9528_v61   ;;  %vm12101_vm10 = vcmp.eq.s32.totalorder %v12846_v56, %v9719_v30 }
 0x80b   : > { %v9725_v58 = vpop.permute.xlu1 %3605  ;;  %5981 = vset.pattern.permute.xlu1 %v12082_v20  ;;  %v9728_v19 = vpop.permute.xlu0 %3608 }
 0x80c   : > { %12836 = vst [vmem:[#allocation111_spill] sm:$0xff] %v9725_v58  ;;  %12837 = vst [vmem:[#allocation40_spill] sm:$0xff] %v9728_v19  ;;  %3984 = vperm.xlu0 %5993, %v9526_v50   ;;  %4273 = vperm.xlu1 %5981, %v9512_v53   ;;  %vm12104_vm8 = vcmp.eq.s32.totalorder %v12846_v56, %v9725_v58 }
 0x80f   : > { %v9732_v2 = vpop.permute.xlu1 %3611  ;;  %v9734_v0 = vpop.permute.xlu0 %3614 }
 0x810   : > { %12838 = vst [vmem:[#allocation26_spill] sm:$0xff] %v9732_v2  ;;  %12839 = vst [vmem:[#allocation69_spill] sm:$0xff] %v9734_v0  ;;  %3987 = vperm.xlu0 %5993, %v9534_v25   ;;  %4233 = vperm.xlu1 %5981, %v9478_v27  }
 0x813   : > { %v9738_v14 = vpop.permute.xlu1 %3633  ;;  %v9740_v40 = vpop.permute.xlu0 %3636 }
 0x814   : > { %3990 = vperm.xlu0 %5993, %v9532_v57   ;;  %5982 = vset.pattern.permute.xlu1 %v12076_v28  ;;  %vm3657_vm1 = vcmp.eq.s32.totalorder %v12846_v56, %v9738_v14  ;;  %vm3659_vm13 = vcmp.eq.s32.totalorder %v12846_v56, %v9740_v40 }
 0x815   : > { %4473 = vperm.xlu1 %5982, %v9657_v24  }
 0x817   : > { %v9745_v38 = vpop.permute.xlu1 %3639  ;;  %v9747_v12 = vpop.permute.xlu0 %3642 }
 0x818   : > { %12840 = vst [vmem:[#allocation9_spill] sm:$0xff] %v9747_v12  ;;  %6013 = vset.pattern.permute.xlu0 %v12076_v28  ;;  %vm3661_vm6 = vcmp.eq.s32.totalorder %v12846_v56, %v9745_v38 }
 0x819   : > { %4425 = vperm.xlu0 %6013, %v9616_v18   ;;  %5983 = vset.pattern.permute.xlu1 %v12074_v33 }
 0x81a   : > { %4577 = vperm.xlu1 %5983, %v9512_v53  }
 0x81b   : > { %v9753_v16 = vpop.permute.xlu1 %3645  ;;  %v9755_v31 = vpop.permute.xlu0 %3648 }
 0x81c   : > { %12841 = vst [vmem:[#allocation29_spill] sm:$0xff] %v9753_v16  ;;  %12842 = vst [vmem:[#allocation45_spill] sm:$0xff] %v9755_v31  ;;  %vm12099_vm7 = vcmp.eq.s32.totalorder %v12846_v56, %v9753_v16 }
 0x81d   : > { %4477 = vperm.xlu0 %6013, %v9675_v41  }
 0x81e   : > { %4537 = vperm.xlu1 %5983, %v9478_v27  }
 0x81f   : > { %v9759_v49 = vpop.permute.xlu1 %3651  ;;  %v9761_v34 = vpop.permute.xlu0 %3654 }
 0x820   : > { %12843 = vst [vmem:[#allocation113_spill] sm:$0xff] %v9759_v49  ;;  %12844 = vst [vmem:[#allocation67_spill] sm:$0xff] %v9761_v34 }
 0x821   : > { %4433 = vperm.xlu0 %6013, %v9628_v6  }
 0x822   : > { %5984 = vset.pattern.permute.xlu1 %v12084_v37 }
 0x823   : > { %4729 = vperm.xlu1 %5984, %v9616_v18   ;;  %v12845_v18 = vld [vmem:[#allocation104_spill] sm:$0xff] }
 0x824   : > { %v3675_v53 = vpop.permute.xlu1 %3674  ;;  %v3680_v7 = vpop.permute.xlu0 %3679  ;;  %vm3656_vm12 = vcmp.eq.s32.totalorder %v12845_v18, %v9738_v14  ;;  %vm3616_vm3 = vcmp.eq.s32.totalorder %v12845_v18, %v9713_v51  ;;  %vm3660_vm0 = vcmp.eq.s32.totalorder %v12845_v18, %v9745_v38  ;;  %vm12106_vm9 = vcmp.eq.s32.totalorder %v12845_v18, %v9719_v30 }
 0x825   : > { %4501 = vperm.xlu0 %6013, %v9697_v32   ;;  %vm12105_vm2 = vcmp.eq.s32.totalorder %v12845_v18, %v9715_v42  ;;  %vm12103_vm4 = vcmp.eq.s32.totalorder %v12845_v18, %v9725_v58  ;;  %vm3658_vm5 = vcmp.eq.s32.totalorder %v12845_v18, %v9740_v40  ;;  %vm12100_vm11 = vcmp.eq.s32.totalorder %v12845_v18, %v9753_v16 }
 0x827   : > { %5985 = vset.pattern.permute.xlu1 %v12082_v20  ;;  %v3712_v20 = vsel %vm3656_vm12, %v3675_v53, 0.0 }
 0x828   : > { %v3685_v33 = vpop.permute.xlu1 %3684  ;;  %v3695_v28 = vpop.permute.xlu0 %3694  ;;  %4276 = vperm.xlu1 %5985, %v9510_v52  }
 0x829   : > { %6018 = vset.pattern.permute.xlu0 %v12084_v37 }
 0x82a   : > { %4777 = vperm.xlu0 %6018, %v9657_v24  }
 0x82c   : > { %v3690_v27 = vpop.permute.xlu1 %3689  ;;  %v3705_v29 = vpop.permute.xlu0 %3704  ;;  %4236 = vperm.xlu1 %5985, %v9482_v39   ;;  %v3713_v39 = vsel %vm3657_vm1, %v3675_v53, 0.0 }
 0x82e   : > { %4785 = vperm.xlu0 %6018, %v9667_v11  }
 0x830   : > { %v9787_v37 = vpop.permute.xlu1 %3699  ;;  %v3731_v35 = vpop.permute.xlu0 %3730  ;;  %5986 = vset.pattern.permute.xlu1 %v12847_v21 }
 0x831   : > { %v9793_v47 = vsel %vm3616_vm3, %v3731_v35, %v3712_v20  ;;  %v9798_v17 = vsel %vm3617_vm14, %v3731_v35, %v3713_v39  ;;  %4429 = vperm.xlu1 %5986, %v9635_v48   ;;  %v3716_v35 = vsel %vm3660_vm0, %v3685_v33, 0.0  ;;  %v3717_v20 = vsel %vm3661_vm6, %v3685_v33, 0.0 }
 0x832   : > { %12848 = vst [vmem:[#allocation28_spill] sm:$0xff] %v9793_v47  ;;  %12849 = vst [vmem:[#allocation71_spill] sm:$0xff] %v9798_v17  ;;  %4789 = vperm.xlu0 %6018, %v9683_v3   ;;  %v12852_v33 = vmov 15  }
 0x834   : > { %v9816_v53 = vpop.permute.xlu1 %3709  ;;  %v3741_v39 = vpop.permute.xlu0 %3740 }
 0x835   : > { %v9823_v17 = vsel %vm12106_vm9, %v3741_v39, %v3716_v35  ;;  %v9828_v47 = vsel %vm12101_vm10, %v3741_v39, %v3717_v20  ;;  %5987 = vset.pattern.permute.xlu1 %v12852_v33  ;;  %v3714_v35 = vsel %vm3658_vm5, %v3680_v7, 0.0  ;;  %v3715_v20 = vsel %vm3659_vm13, %v3680_v7, 0.0 }
 0x836   : > { %12850 = vst [vmem:[#allocation35_spill] sm:$0xff] %v9823_v17  ;;  %12851 = vst [vmem:[#allocation43_spill] sm:$0xff] %v9828_v47  ;;  %4793 = vperm.xlu0 %6018, %v9678_v9   ;;  %4580 = vperm.xlu1 %5987, %v9510_v52   ;;  %v3720_v39 = vsel %vm12100_vm11, %v3695_v28, 0.0  ;;  %v3721_v47 = vsel %vm12099_vm7, %v3695_v28, 0.0  ;;  %vm3622_vm7 = vcmp.eq.s32.totalorder %v12845_v18, %v9722_v15 }
 0x837   : > { %vm12111_vm11 = vcmp.eq.s32.totalorder %v12846_v56, %v9722_v15  ;;  %vm12112_vm10 = vcmp.eq.s32.totalorder %v12845_v18, %v9732_v2  ;;  %vm12110_vm9 = vcmp.eq.s32.totalorder %v12846_v56, %v9759_v49 }
 0x838   : > { %v3736_v17 = vpop.permute.xlu1 %3735  ;;  %v3751_v57 = vpop.permute.xlu0 %3750 }
 0x839   : > { %v9862_v52 = vsel %vm12105_vm2, %v3736_v17, %v3714_v35  ;;  %v9867_v63 = vsel %vm12102_vm15, %v3736_v17, %v3715_v20  ;;  %v9872_v7 = vsel %vm12103_vm4, %v3751_v57, %v3720_v39  ;;  %v9877_v28 = vsel %vm12104_vm8, %v3751_v57, %v3721_v47 }
 0x83a   : > { %12853 = vst [vmem:[#allocation31_spill] sm:$0xff] %v9862_v52  ;;  %12854 = vst [vmem:[#allocation47_spill] sm:$0xff] %v9867_v63  ;;  %vm12114_vm15 = vcmp.eq.s32.totalorder %v12846_v56, %v9732_v2  ;;  %4797 = vperm.xlu0 %6018, %v9691_v13   ;;  %vm3662_vm4 = vcmp.eq.s32.totalorder %v12845_v18, %v9747_v12  ;;  %vm12109_vm8 = vcmp.eq.s32.totalorder %v12846_v56, %v9747_v12  ;;  %v12857_v17 = vmov 21  }
 0x83b   : > { %12855 = vst [vmem:[#allocation2_spill] sm:$0xff] %v9872_v7  ;;  %12856 = vst [vmem:[#allocation6_spill] sm:$0xff] %v9877_v28  ;;  %vm12115_vm2 = vcmp.eq.s32.totalorder %v12845_v18, %v9759_v49  ;;  %5988 = vset.pattern.permute.xlu1 %v12857_v17  ;;  %v3718_v57 = vsel %vm3662_vm4, %v3690_v27, 0.0  ;;  %v3719_v47 = vsel %vm12109_vm8, %v3690_v27, 0.0  ;;  %v3725_v20 = vsel %vm12110_vm9, %v3705_v29, 0.0 }
 0x83c   : > { %v3724_v35 = vsel %vm12115_vm2, %v3705_v29, 0.0  ;;  %4129 = vperm.xlu1 %5988, %v9628_v6   ;;  %v3746_v39 = vpop.permute.xlu1 %3745  ;;  %v3761_v28 = vpop.permute.xlu0 %3760  ;;  %vm12113_vm8 = vcmp.eq.s32.totalorder %v12845_v18, %v9755_v31  ;;  %vm12189_vm9 = vcmp.eq.s32.totalorder %v12846_v56, %v9755_v31  ;;  %vm12183_vm2 = vcmp.eq.s32.totalorder %v12845_v18, %v9734_v0 }
 0x83d   : > { %v9913_v7 = vsel %vm3622_vm7, %v3746_v39, %v3718_v57  ;;  %v9918_v27 = vsel %vm12111_vm11, %v3746_v39, %v3719_v47  ;;  %v9923_v58 = vsel %vm12112_vm10, %v3761_v28, %v3724_v35  ;;  %v9928_v29 = vsel %vm12114_vm15, %v3761_v28, %v3725_v20 }
 0x83e   : > { %12858 = vst [vmem:[#allocation68_spill] sm:$0xff] %v9913_v7  ;;  %12859 = vst [vmem:[#allocation85_spill] sm:$0xff] %v9918_v27  ;;  %4801 = vperm.xlu0 %6018, %v9686_v26   ;;  %vm12116_vm11 = vcmp.eq.s32.totalorder %v12845_v18, %v9728_v19  ;;  %vm12188_vm10 = vcmp.eq.s32.totalorder %v12846_v56, %v9728_v19  ;;  %v3722_v28 = vsel %vm12113_vm8, %v9787_v37, 0.0  ;;  %v3723_v57 = vsel %vm12189_vm9, %v9787_v37, 0.0  ;;  %v12868_v27 = vld [vmem:[#allocation80_spill] sm:$0xff] }
 0x83f   : > { %12860 = vst [vmem:[#allocation60_spill] sm:$0xff] %v9923_v58  ;;  %12861 = vst [vmem:[#allocation61_spill] sm:$0xff] %v9928_v29  ;;  %v12862_v47 = vmov 23   ;;  %vm12184_vm8 = vcmp.eq.s32.totalorder %v12845_v18, %v9761_v34  ;;  %vm12162_vm15 = vcmp.eq.s32.totalorder %v12846_v56, %v9761_v34 }
 0x840   : > { %5990 = vset.pattern.permute.xlu1 %v12862_v47  ;;  %v3756_v35 = vpop.permute.xlu1 %3755  ;;  %v9948_v20 = vpop.permute.xlu0 %3802  ;;  %v3726_v37 = vsel %vm12184_vm8, %v9816_v53, 0.0 }
 0x841   : > { %4733 = vperm.xlu1 %5990, %v9635_v48   ;;  %v9954_v39 = vsel %vm12116_vm11, %v3756_v35, %v3722_v28  ;;  %v9959_v29 = vsel %vm12188_vm10, %v3756_v35, %v3723_v57  ;;  %vm12161_vm11 = vcmp.eq.s32.totalorder %v12846_v56, %v9734_v0  ;;  %v3727_v28 = vsel %vm12162_vm15, %v9816_v53, 0.0 }
 0x842   : > { %12863 = vst [vmem:[#allocation72_spill] sm:$0xff] %v9954_v39  ;;  %12864 = vst [vmem:[#allocation83_spill] sm:$0xff] %v9959_v29  ;;  %4757 = vperm.xlu0 %6018, %v9670_v23  }
 0x844   : > { %v3766_v57 = vpop.permute.xlu1 %3765  ;;  %v9978_v35 = vpop.permute.xlu0 %3812 }
 0x845   : > { %5991 = vset.pattern.permute.xlu1 %v12857_v17  ;;  %v9984_v58 = vsel %vm12183_vm2, %v3766_v57, %v3726_v37  ;;  %v9989_v29 = vsel %vm12161_vm11, %v3766_v57, %v3727_v28  ;;  %v12871_v28 = vmov 14  }
 0x846   : > { %12865 = vst [vmem:[#allocation84_spill] sm:$0xff] %v9984_v58  ;;  %12866 = vst [vmem:[#allocation87_spill] sm:$0xff] %v9989_v29  ;;  %4177 = vperm.xlu1 %5991, %v9667_v11   ;;  %4621 = vperm.xlu0 %6018, %v9546_v62  }
 0x848   : > { %v9993_v53 = vpop.permute.xlu1 %3807  ;;  %v9995_v39 = vpop.permute.xlu0 %3822 }
 0x849   : > { %12867 = vst [vmem:[#allocation46_spill] sm:$0xff] %v9995_v39  ;;  %v3843_v14 = vsel %vm3659_vm13, %v9993_v53, 0.0 }
 0x84a   : > { %5994 = vset.pattern.permute.xlu1 %v12862_v47  ;;  %4625 = vperm.xlu0 %6018, %v12868_v27  }
 0x84b   : > { %4781 = vperm.xlu1 %5994, %v9675_v41  }
 0x84c   : > { %v10000_v37 = vpop.permute.xlu1 %3817  ;;  %v10002_v58 = vpop.permute.xlu0 %3832 }
 0x84d   : > { %12869 = vst [vmem:[#allocation59_spill] sm:$0xff] %v10000_v37  ;;  %12870 = vst [vmem:[#allocation91_spill] sm:$0xff] %v10002_v58 }
 0x84e   : > { %6029 = vset.pattern.permute.xlu0 %v12857_v17 }
 0x84f   : > { %5995 = vset.pattern.permute.xlu1 %v12871_v28  ;;  %4169 = vperm.xlu0 %6029, %v9657_v24  }
 0x850   : > { %4239 = vperm.xlu1 %5995, %v9489_v44   ;;  %v10008_v57 = vpop.permute.xlu1 %3827  ;;  %v10010_v29 = vpop.permute.xlu0 %3858 }
 0x851   : > { %12872 = vst [vmem:[#allocation63_spill] sm:$0xff] %v10008_v57 }
 0x853   : > { %4125 = vperm.xlu0 %6029, %v9635_v48  }
 0x854   : > { %5996 = vset.pattern.permute.xlu1 %v12847_v21  ;;  %v10014_v7 = vpop.permute.xlu1 %3837  ;;  %v10016_v0 = vpop.permute.xlu0 %3868 }
 0x855   : > { %12873 = vst [vmem:[#allocation8_spill] sm:$0xff] %v10014_v7  ;;  %4481 = vperm.xlu1 %5996, %v9667_v11  }
 0x857   : > { %4173 = vperm.xlu0 %6029, %v9675_v41  }
 0x858   : > { %v10020_v34 = vpop.permute.xlu1 %3863  ;;  %v10022_v24 = vpop.permute.xlu0 %3878 }
 0x859   : > { %12874 = vst [vmem:[#allocation116_spill] sm:$0xff] %v10022_v24  ;;  %5997 = vset.pattern.permute.xlu1 %v12852_v33 }
 0x85a   : > { %4583 = vperm.xlu1 %5997, %v9520_v54  }
 0x85b   : > { %4133 = vperm.xlu0 %6029, %v9647_v43  }
 0x85c   : > { %v10027_v48 = vpop.permute.xlu1 %3873  ;;  %v10029_v2 = vpop.permute.xlu0 %3888 }
 0x85d   : > { %12875 = vst [vmem:[#allocation92_spill] sm:$0xff] %v10027_v48  ;;  %12876 = vst [vmem:[#allocation118_spill] sm:$0xff] %v10029_v2 }
 0x85e   : > { %4543 = vperm.xlu1 %5997, %v9489_v44  }
 0x85f   : > { %4181 = vperm.xlu0 %6029, %v9683_v3  }
 0x860   : > { %v10033_v11 = vpop.permute.xlu1 %3883 }
 0x861   : > { %12877 = vst [vmem:[#allocation77_spill] sm:$0xff] %v10033_v11  ;;  %v10035_v41 = vpop.permute.xlu0 %4540 }
 0x862   : > { %5998 = vset.pattern.permute.xlu1 %v12862_v47 }
 0x863   : > { %4737 = vperm.xlu1 %5998, %v9628_v6   ;;  %4137 = vperm.xlu0 %6029, %v9640_v59  }
 0x864   : > { %v10040_v54 = vpop.permute.xlu1 %3893 }
 0x865   : > { %12878 = vst [vmem:[#allocation76_spill] sm:$0xff] %v10040_v54 }
 0x866   : > { %v10042_v7 = vpop.permute.xlu0 %4279 }
 0x867   : > { %12879 = vst [vmem:[#allocation90_spill] sm:$0xff] %v10042_v7  ;;  %5999 = vset.pattern.permute.xlu1 %v12871_v28  ;;  %4185 = vperm.xlu0 %6029, %v9678_v9  }
 0x868   : > { %4282 = vperm.xlu1 %5999, %v9518_v1  }
 0x869   : > { %v10047_v44 = vpop.permute.xlu1 %3932 }
 0x86b   : > { %4141 = vperm.xlu0 %6029, %v9660_v46   ;;  %v10050_v2 = vpop.permute.xlu0 %3929 }
 0x86c   : > { %12880 = vst [vmem:[#allocation21_spill] sm:$0xff] %v10050_v2  ;;  %4242 = vperm.xlu1 %5999, %v9487_v5   ;;  %vm12173_vm13 = vcmp.eq.s32.totalorder %v12846_v56, %v10050_v2 }
 0x86d   : > { %v10053_v6 = vpop.permute.xlu1 %3935 }
 0x86e   : > { %12881 = vst [vmem:[#allocation94_spill] sm:$0xff] %v10053_v6  ;;  %vm3956_vm8 = vcmp.eq.s32.totalorder %v12845_v18, %v10053_v6 }
 0x86f   : > { %4189 = vperm.xlu0 %6029, %v9691_v13   ;;  %v10056_v54 = vpop.permute.xlu0 %3938 }
 0x870   : > { %12882 = vst [vmem:[#allocation78_spill] sm:$0xff] %v10056_v54  ;;  %6000 = vset.pattern.permute.xlu1 %v12847_v21 }
 0x871   : > { %4437 = vperm.xlu1 %6000, %v9647_v43   ;;  %v10060_v49 = vpop.permute.xlu1 %3941 }
 0x872   : > { %12883 = vst [vmem:[#allocation75_spill] sm:$0xff] %v10060_v49 }
 0x873   : > { %4145 = vperm.xlu0 %6029, %v9652_v45   ;;  %v10063_v58 = vpop.permute.xlu0 %3944 }
 0x874   : > { %12884 = vst [vmem:[#allocation54_spill] sm:$0xff] %v10063_v58 }
 0x875   : > { %4485 = vperm.xlu1 %6000, %v9683_v3   ;;  %v10066_v19 = vpop.permute.xlu1 %3947 }
 0x876   : > { %12885 = vst [vmem:[#allocation79_spill] sm:$0xff] %v10066_v19 }
 0x877   : > { %4193 = vperm.xlu0 %6029, %v9686_v26   ;;  %v10069_v11 = vpop.permute.xlu0 %3950 }
 0x878   : > { %12886 = vst [vmem:[#allocation13_spill] sm:$0xff] %v10069_v11 }
 0x879   : > { %6001 = vset.pattern.permute.xlu1 %v12852_v33  ;;  %v10072_v31 = vpop.permute.xlu1 %3969 }
 0x87a   : > { %12887 = vst [vmem:[#allocation10_spill] sm:$0xff] %v10072_v31  ;;  %4586 = vperm.xlu1 %6001, %v9518_v1  }
 0x87b   : > { %4149 = vperm.xlu0 %6029, %v9670_v23   ;;  %v10076_v57 = vpop.permute.xlu0 %3972 }
 0x87c   : > { %vm3995_vm2 = vcmp.eq.s32.totalorder %v12846_v56, %v10076_v57 }
 0x87d   : > { %v10078_v27 = vpop.permute.xlu1 %3975 }
 0x87e   : > { %12888 = vst [vmem:[#allocation12_spill] sm:$0xff] %v10078_v27  ;;  %4546 = vperm.xlu1 %6001, %v9487_v5   ;;  %vm3996_vm10 = vcmp.eq.s32.totalorder %v12845_v18, %v10078_v27 }
 0x87f   : > { %4197 = vperm.xlu0 %6029, %v9697_v32   ;;  %v10082_v3 = vpop.permute.xlu0 %3978 }
 0x880   : > { %12889 = vst [vmem:[#allocation4_spill] sm:$0xff] %v10082_v3 }
 0x882   : > { %6002 = vset.pattern.permute.xlu1 %v12862_v47  ;;  %v10085_v11 = vpop.permute.xlu1 %4121 }
 0x883   : > { %4741 = vperm.xlu1 %6002, %v9647_v43   ;;  %4057 = vperm.xlu0 %6029, %v9577_v60   ;;  %v10089_v1 = vpop.permute.xlu0 %3981 }
 0x884   : > { %12890 = vst [vmem:[#allocation3_spill] sm:$0xff] %v10089_v1 }
 0x887   : > { %6003 = vset.pattern.permute.xlu1 %v12871_v28  ;;  %4013 = vperm.xlu0 %6029, %v9546_v62   ;;  %v10093_v24 = vpop.permute.xlu0 %3984  ;;  %v10096_v5 = vpop.permute.xlu1 %4273 }
 0x888   : > { %12891 = vst [vmem:[#allocation5_spill] sm:$0xff] %v10093_v24  ;;  %4285 = vperm.xlu1 %6003, %v9528_v61   ;;  %12892 = vst [vmem:[#allocation23_spill] sm:$0xff] %v10096_v5 }
 0x88b   : > { %4061 = vperm.xlu0 %6029, %v9595_v36   ;;  %v10099_v16 = vpop.permute.xlu0 %3987  ;;  %v10102_v43 = vpop.permute.xlu1 %4233 }
 0x88c   : > { %12893 = vst [vmem:[#allocation30_spill] sm:$0xff] %v10099_v16  ;;  %4245 = vperm.xlu1 %6003, %v9498_v4   ;;  %12894 = vst [vmem:[#allocation41_spill] sm:$0xff] %v10102_v43 }
 0x88f   : > { %4069 = vperm.xlu0 %6029, %v9603_v55   ;;  %v10105_v39 = vpop.permute.xlu0 %3990 }
 0x890   : > { %12895 = vst [vmem:[#allocation34_spill] sm:$0xff] %v10105_v39  ;;  %6004 = vset.pattern.permute.xlu1 %v12847_v21  ;;  %v10109_v62 = vpop.permute.xlu1 %4473 }
 0x891   : > { %4441 = vperm.xlu1 %6004, %v9640_v59  }
 0x894   : > { %v4426_v60 = vpop.permute.xlu0 %4425 }
 0x895   : > { %4489 = vperm.xlu1 %6004, %v9678_v9   ;;  %v10112_v36 = vpop.permute.xlu1 %4577 }
 0x896   : > { %12896 = vst [vmem:[#allocation44_spill] sm:$0xff] %v10112_v36 }
 0x898   : > { %v10114_v63 = vpop.permute.xlu0 %4477 }
 0x899   : > { %6005 = vset.pattern.permute.xlu1 %v12852_v33  ;;  %v10118_v55 = vpop.permute.xlu1 %4537 }
 0x89a   : > { %4589 = vperm.xlu1 %6005, %v9528_v61   ;;  %12897 = vst [vmem:[#allocation48_spill] sm:$0xff] %v10118_v55 }
 0x89c   : > { %v10120_v39 = vpop.permute.xlu0 %4433 }
 0x89e   : > { %4549 = vperm.xlu1 %6005, %v9498_v4   ;;  %v10123_v52 = vpop.permute.xlu1 %4729 }
 0x8a0   : > { %v10125_v17 = vpop.permute.xlu0 %4501 }
 0x8a1   : > { %12898 = vst [vmem:[#allocation14_spill] sm:$0xff] %v10125_v17 }
 0x8a2   : > { %6006 = vset.pattern.permute.xlu1 %v12862_v47 }
 0x8a3   : > { %4745 = vperm.xlu1 %6006, %v9640_v59   ;;  %v10129_v9 = vpop.permute.xlu1 %4276 }
 0x8a4   : > { %12899 = vst [vmem:[#allocation114_spill] sm:$0xff] %v10129_v9 }
 0x8a5   : > { %v10131_v32 = vpop.permute.xlu0 %4777 }
 0x8a7   : > { %6007 = vset.pattern.permute.xlu1 %v12871_v28  ;;  %v10135_v61 = vpop.permute.xlu1 %4236 }
 0x8a8   : > { %4288 = vperm.xlu1 %6007, %v9526_v50   ;;  %12900 = vst [vmem:[#allocation70_spill] sm:$0xff] %v10135_v61 }
 0x8a9   : > { %v10137_v15 = vpop.permute.xlu0 %4785 }
 0x8ac   : > { %4248 = vperm.xlu1 %6007, %v9496_v22   ;;  %v10140_v4 = vpop.permute.xlu1 %4429 }
 0x8ad   : > { %v10142_v17 = vpop.permute.xlu0 %4789 }
 0x8ae   : > { %12901 = vst [vmem:[#allocation17_spill] sm:$0xff] %v10142_v17 }
 0x8b0   : > { %6008 = vset.pattern.permute.xlu1 %v12847_v21 }
 0x8b1   : > { %4445 = vperm.xlu1 %6008, %v9660_v46   ;;  %v10146_v59 = vpop.permute.xlu0 %4793  ;;  %v10148_v48 = vpop.permute.xlu1 %4580 }
 0x8b2   : > { %12902 = vst [vmem:[#allocation52_spill] sm:$0xff] %v10146_v59  ;;  %vm4602_vm11 = vcmp.eq.s32.totalorder %v12845_v18, %v10148_v48  ;;  %vm12187_vm15 = vcmp.eq.s32.totalorder %v12846_v56, %v10148_v48 }
 0x8b5   : > { %4493 = vperm.xlu1 %6008, %v9691_v13   ;;  %v10151_v12 = vpop.permute.xlu0 %4797 }
 0x8b6   : > { %12903 = vst [vmem:[#allocation89_spill] sm:$0xff] %v10151_v12  ;;  %v3841_v12 = vsel %vm3657_vm1, %v9948_v20, 0.0  ;;  %vm12909_vm1 = vcmp.eq.s32.totalorder %v12845_v18, %v9715_v42 }
 0x8b7   : > { %v10153_v37 = vpop.permute.xlu1 %4129  ;;  %v3897_v38 = vsel %vm3617_vm14, %v10010_v29, %v3841_v12  ;;  %vm12182_vm14 = vcmp.eq.s32.totalorder %v12845_v18, %v10072_v31 }
 0x8b8   : > { %v4152_v12 = vsel %vm12182_vm14, %v10085_v11, 0.0  ;;  %vm3994_vm14 = vcmp.eq.s32.totalorder %v12845_v18, %v10076_v57  ;;  %v12938_v57 = vld [vmem:[#allocation82_spill] sm:$0xff] }
 0x8b9   : > { %6009 = vset.pattern.permute.xlu1 %v12852_v33  ;;  %v10156_v19 = vpop.permute.xlu0 %4801 }
 0x8ba   : > { %12904 = vst [vmem:[#allocation66_spill] sm:$0xff] %v10156_v19  ;;  %4592 = vperm.xlu1 %6009, %v9526_v50   ;;  %v3840_v19 = vsel %vm3656_vm12, %v9948_v20, 0.0  ;;  %vm12908_vm12 = vcmp.eq.s32.totalorder %v12845_v18, %v9719_v30 }
 0x8bb   : > { %v3896_v20 = vsel %vm3616_vm3, %v10010_v29, %v3840_v19  ;;  %vm12172_vm3 = vcmp.eq.s32.totalorder %v12845_v18, %v10096_v5 }
 0x8bc   : > { %v10159_v17 = vpop.permute.xlu1 %4733  ;;  %v4456_v51 = vsel %vm12172_vm3, %v4426_v60, 0.0  ;;  %vm12177_vm3 = vcmp.eq.s32.totalorder %v12846_v56, %v10112_v36 }
 0x8bd   : > { %v10161_v23 = vpop.permute.xlu0 %4757 }
 0x8be   : > { %12905 = vst [vmem:[#allocation117_spill] sm:$0xff] %v10161_v23  ;;  %4552 = vperm.xlu1 %6009, %v9496_v22  }
 0x8c1   : > { %v10164_v59 = vpop.permute.xlu1 %4177  ;;  %v4622_v13 = vpop.permute.xlu0 %4621 }
 0x8c2   : > { %6010 = vset.pattern.permute.xlu1 %v12862_v47  ;;  %v10174_v50 = vsel %vm4602_vm11, %v4622_v13, 0.0  ;;  %v10179_v22 = vsel %vm12187_vm15, %v4622_v13, 0.0  ;;  %v3844_v13 = vsel %vm3660_vm0, %v9978_v35, 0.0  ;;  %vm12171_vm0 = vcmp.eq.s32.totalorder %v12846_v56, %v10096_v5 }
 0x8c3   : > { %12906 = vst [vmem:[#allocation15_spill] sm:$0xff] %v10174_v50  ;;  %12907 = vst [vmem:[#allocation97_spill] sm:$0xff] %v10179_v22  ;;  %4749 = vperm.xlu1 %6010, %v9660_v46   ;;  %v10200_v46 = vsel %vm3661_vm6, %v9978_v35, 0.0  ;;  %v3842_v50 = vsel %vm3658_vm5, %v9993_v53, 0.0  ;;  %v10225_v35 = vsel %vm12908_vm12, %v10016_v0, %v3844_v13  ;;  %vm12181_vm6 = vcmp.eq.s32.totalorder %v12846_v56, %v10072_v31 }
 0x8c4   : > { %v3898_v40 = vsel %vm12909_vm1, %v10020_v34, %v3842_v50  ;;  %v4457_v19 = vsel %vm12171_vm0, %v4426_v60, 0.0  ;;  %vm12176_vm5 = vcmp.eq.s32.totalorder %v12845_v18, %v10050_v2  ;;  %v4153_v29 = vsel %vm12181_vm6, %v10085_v11, 0.0 }
 0x8c5   : > { %v10182_v23 = vpop.permute.xlu0 %4625  ;;  %vm12174_vm12 = vcmp.eq.s32.totalorder %v12845_v18, %v10102_v43  ;;  %vm12175_vm1 = vcmp.eq.s32.totalorder %v12846_v56, %v10102_v43  ;;  %vm12178_vm0 = vcmp.eq.s32.totalorder %v12845_v18, %v10112_v36  ;;  %vm12186_vm6 = vcmp.eq.s32.totalorder %v12846_v56, %v10129_v9 }
 0x8c6   : > { %v10202_v22 = vpop.permute.xlu1 %4781  ;;  %v4504_v11 = vsel %vm12174_vm12, %v10109_v62, %v4456_v51  ;;  %v4505_v5 = vsel %vm12175_vm1, %v10109_v62, %v4457_v19  ;;  %vm12180_vm12 = vcmp.eq.s32.totalorder %v12846_v56, %v10118_v55  ;;  %v4760_v62 = vsel %vm12178_vm0, %v10123_v52, 0.0 }
 0x8c7   : > { %6011 = vset.pattern.permute.xlu1 %v12871_v28  ;;  %vm12911_vm1 = vcmp.eq.s32.totalorder %v12846_v56, %v9715_v42  ;;  %vm3955_vm0 = vcmp.eq.s32.totalorder %v12846_v56, %v10047_v44  ;;  %vm12191_vm15 = vcmp.eq.s32.totalorder %v12846_v56, %v10135_v61  ;;  %v12931_v36 = vmov 21  }
 0x8c8   : > { %4291 = vperm.xlu1 %6011, %v9534_v25  }
 0x8ca   : > { %v4170_v53 = vpop.permute.xlu0 %4169 }
 0x8cb   : > { %v10262_v60 = vpop.permute.xlu1 %4239  ;;  %v4200_v50 = vsel %vm12176_vm5, %v4170_v53, %v4152_v12  ;;  %v4201_v13 = vsel %vm12173_vm13, %v4170_v53, %v4153_v29  ;;  %vm12179_vm13 = vcmp.eq.s32.totalorder %v12845_v18, %v10118_v55  ;;  %v3899_v12 = vsel %vm12911_vm1, %v10020_v34, %v3843_v14 }
 0x8cc   : > { %12910 = vst [vmem:[#allocation16_spill] sm:$0xff] %v10262_v60  ;;  %v4216_v31 = vadd.f32 %v4200_v50, %v3896_v20  ;;  %v4217_v16 = vadd.f32 %v4201_v13, %v3897_v38  ;;  %4251 = vperm.xlu1 %6011, %v9506_v10   ;;  %v4761_v20 = vsel %vm12177_vm3, %v10123_v52, 0.0  ;;  %vm12192_vm5 = vcmp.eq.s32.totalorder %v12845_v18, %v10035_v41 }
 0x8cd   : > { %v4808_v29 = vsel %vm12179_vm13, %v10131_v32, %v4760_v62  ;;  %vm3954_vm3 = vcmp.eq.s32.totalorder %v12845_v18, %v10047_v44  ;;  %vm12193_vm1 = vcmp.eq.s32.totalorder %v12845_v18, %v10042_v7  ;;  %vm4301_vm13 = vcmp.eq.s32.totalorder %v12846_v56, %v10042_v7  ;;  %v5571_v44 = vld [vmem:[%s11720_s3 + $0x1f8] sm:$0xff] }
 0x8ce   : > { %v4520_v38 = vadd.f32 %v4504_v11, %v4216_v31  ;;  %v4521_v51 = vadd.f32 %v4505_v5, %v4217_v16  ;;  %v4126_v19 = vpop.permute.xlu0 %4125  ;;  %v4809_v31 = vsel %vm12180_vm12, %v10131_v32, %v4761_v20  ;;  %vm12185_vm12 = vcmp.eq.s32.totalorder %v12845_v18, %v10129_v9  ;;  %5596 = vmatprep.subr.mxu1 %v5571_v44 }
 0x8cf   : > { %v4458_v32 = vsel %vm12185_vm12, %v10140_v4, 0.0  ;;  %v4459_v52 = vsel %vm12186_vm6, %v10140_v4, 0.0  ;;  %v4154_v5 = vsel %vm3994_vm14, %v4126_v19, 0.0  ;;  %v4155_v14 = vsel %vm3995_vm2, %v4126_v19, 0.0 }
 0x8d0   : > { %v10315_v42 = vadd.f32 %v4808_v29, %v4520_v38  ;;  %v10317_v16 = vadd.f32 %v4809_v31, %v4521_v51  ;;  %6012 = vset.pattern.permute.xlu1 %v12847_v21  ;;  %v4482_v34 = vpop.permute.xlu1 %4481  ;;  %vm12195_vm12 = vcmp.eq.s32.totalorder %v12846_v56, %v10053_v6  ;;  %vm12190_vm6 = vcmp.eq.s32.totalorder %v12845_v18, %v10135_v61  ;;  %v12950_v6 = vld [vmem:[#allocation80_spill] sm:$0xff] }
 0x8d1   : > { %4449 = vperm.xlu1 %6012, %v9652_v45   ;;  %v4762_v62 = vsel %vm4602_vm11, %v10159_v17, 0.0  ;;  %v4506_v20 = vsel %vm12190_vm6, %v10114_v63, %v4458_v32  ;;  %v4507_v38 = vsel %vm12191_vm15, %v10114_v63, %v4459_v52  ;;  %vm12194_vm6 = vcmp.eq.s32.totalorder %v12846_v56, %v10078_v27 }
 0x8d2   : > { %v4174_v53 = vpop.permute.xlu0 %4173  ;;  %v4810_v63 = vsel %vm12192_vm5, %v10202_v22, %v4762_v62  ;;  %vm3959_vm15 = vcmp.eq.s32.totalorder %v12846_v56, %v10056_v54  ;;  %v4156_v31 = vsel %vm3996_vm10, %v10153_v37, 0.0  ;;  %v4157_v32 = vsel %vm12194_vm6, %v10153_v37, 0.0 }
 0x8d3   : > { %v4202_v50 = vsel %vm3954_vm3, %v4174_v53, %v4154_v5  ;;  %v4203_v4 = vsel %vm3955_vm0, %v4174_v53, %v4155_v14  ;;  %v4204_v5 = vsel %vm3956_vm8, %v10164_v59, %v4156_v31  ;;  %v4205_v14 = vsel %vm12195_vm12, %v10164_v59, %v4157_v32 }
 0x8d4   : > { %v4218_v13 = vadd.f32 %v4202_v50, %v3898_v40  ;;  %v4219_v11 = vadd.f32 %v4203_v4, %v3899_v12  ;;  %vm3999_vm5 = vcmp.eq.s32.totalorder %v12846_v56, %v10082_v3  ;;  %v4461_v53 = vsel %vm4301_vm13, %v10120_v39, 0.0 }
 0x8d5   : > { %4497 = vperm.xlu1 %6012, %v9686_v26   ;;  %v4584_v40 = vpop.permute.xlu1 %4583  ;;  %vm12196_vm6 = vcmp.eq.s32.totalorder %v12846_v56, %v10262_v60  ;;  %vm12915_vm12 = vcmp.eq.s32.totalorder %v12846_v56, %v9719_v30 }
 0x8d6   : > { %v4522_v51 = vadd.f32 %v4506_v20, %v4218_v13  ;;  %v10374_v19 = vadd.f32 %v4507_v38, %v4219_v11  ;;  %vm4604_vm9 = vcmp.eq.s32.totalorder %v12845_v18, %v4584_v40  ;;  %vm4605_vm11 = vcmp.eq.s32.totalorder %v12846_v56, %v4584_v40  ;;  %v10378_v12 = vpop.permute.xlu0 %4133 }
 0x8d7   : > { %v10389_v26 = vsel %vm4604_vm9, %v10182_v23, 0.0  ;;  %v10394_v29 = vsel %vm4605_vm11, %v10182_v23, 0.0  ;;  %v4460_v23 = vsel %vm12193_vm1, %v10120_v39, 0.0  ;;  %vm12197_vm1 = vcmp.eq.s32.totalorder %v12845_v18, %v10262_v60 }
 0x8d8   : > { %12912 = vst [vmem:[#allocation99_spill] sm:$0xff] %v10389_v26  ;;  %12913 = vst [vmem:[#allocation100_spill] sm:$0xff] %v10394_v29  ;;  %v4826_v52 = vadd.f32 %v4810_v63, %v4522_v51  ;;  %v4159_v59 = vsel %vm3999_vm5, %v10378_v12, 0.0  ;;  %v3901_v39 = vsel %vm12915_vm12, %v10016_v0, %v10200_v46  ;;  %v4508_v4 = vsel %vm12197_vm1, %v4482_v34, %v4460_v23 }
 0x8d9   : > { %6014 = vset.pattern.permute.xlu1 %v12852_v33  ;;  %v10421_v37 = vpop.permute.xlu1 %4543  ;;  %v4509_v13 = vsel %vm12196_vm6, %v4482_v34, %v4461_v53  ;;  %v4220_v11 = vadd.f32 %v4204_v5, %v10225_v35  ;;  %v4221_v62 = vadd.f32 %v4205_v14, %v3901_v39  ;;  %vm12198_vm1 = vcmp.eq.s32.totalorder %v12846_v56, %v10089_v1  ;;  %v12917_v5 = vld [vmem:[#allocation108_spill] sm:$0xff]  ;;  %v12918_v14 = vld [vmem:[#allocation93_spill] sm:$0xff] }
 0x8da   : > { %12914 = vst [vmem:[#allocation101_spill] sm:$0xff] %v10421_v37  ;;  %4595 = vperm.xlu1 %6014, %v9534_v25   ;;  %4842 = vrot.lane.b32.xlu0 %v4826_v52, %s6100_s13  ;;  %v4182_v50 = vpop.permute.xlu0 %4181  ;;  %vm4564_vm12 = vcmp.eq.s32.totalorder %v12845_v18, %v10421_v37  ;;  %vm12204_vm6 = vcmp.eq.s32.totalorder %v12846_v56, %v10421_v37 }
 0x8db   : > { %v10451_v25 = vsel %vm3959_vm15, %v4182_v50, %v4159_v59  ;;  %v4524_v20 = vadd.f32 %v4508_v4, %v4220_v11  ;;  %v4525_v38 = vadd.f32 %v4509_v13, %v4221_v62  ;;  %v12920_v59 = vld [vmem:[#allocation64_spill] sm:$0xff]  ;;  %v12921_v11 = vld [vmem:[#allocation30_spill] sm:$0xff]  ;;  %v12922_v62 = vld [vmem:[#allocation7_spill] sm:$0xff] }
 0x8de   : > { %4555 = vperm.xlu1 %6014, %v9506_v10   ;;  %v4738_v30 = vpop.permute.xlu1 %4737  ;;  %4073 = vperm.xlu0 %6029, %v9598_v8   ;;  %v10456_v0 = vpop.permute.xlu0 %4137 }
 0x8df   : > { %v4764_v46 = vsel %vm4604_vm9, %v4738_v30, 0.0  ;;  %v4765_v35 = vsel %vm4605_vm11, %v4738_v30, 0.0  ;;  %vm12200_vm9 = vcmp.eq.s32.totalorder %v12846_v56, %v10060_v49  ;;  %v4161_v40 = vsel %vm12198_vm1, %v10456_v0, 0.0 }
 0x8e0   : > { %v4812_v10 = vsel %vm4564_vm12, %v10137_v15, %v4764_v46  ;;  %v4813_v34 = vsel %vm12204_vm6, %v10137_v15, %v4765_v35  ;;  %vm12199_vm11 = vcmp.eq.s32.totalorder %v12845_v18, %v10093_v24  ;;  %vm12201_vm1 = vcmp.eq.s32.totalorder %v12845_v18, %v10063_v58 }
 0x8e1   : > { %v4828_v51 = vadd.f32 %v4812_v10, %v4524_v20  ;;  %v10474_v63 = vadd.f32 %v4813_v34, %v4525_v38  ;;  %v12923_v20 = vld [vmem:[#allocation79_spill] sm:$0xff] }
 0x8e2   : > { %6015 = vset.pattern.permute.xlu1 %v12862_v47  ;;  %v10485_v31 = vpop.permute.xlu0 %4185 }
 0x8e3   : > { %4753 = vperm.xlu1 %6015, %v9652_v45   ;;  %v10488_v15 = vpop.permute.xlu1 %4282  ;;  %4844 = vrot.lane.b32.xlu0 %v4828_v51, %s6100_s13  ;;  %v10495_v32 = vsel %vm12200_vm9, %v10485_v31, %v4161_v40  ;;  %vm12203_vm9 = vcmp.eq.s32.totalorder %v12846_v56, %v12923_v20 }
 0x8e4   : > { %12916 = vst [vmem:[#allocation102_spill] sm:$0xff] %v10495_v32  ;;  %v5543_v32 = vld [vmem:[%s11720_s3 + $0x118] sm:$0xff] }
 0x8e6   : > { %v10497_v52 = vpop.permute.xlu0 %4141 }
 0x8e7   : > { %6016 = vset.pattern.permute.xlu1 %v12871_v28  ;;  %v10500_v23 = vpop.permute.xlu1 %4242  ;;  %4077 = vperm.xlu0 %6029, %v12917_v5   ;;  %v4162_v45 = vsel %vm12199_vm11, %v10497_v52, 0.0  ;;  %vm12202_vm11 = vcmp.eq.s32.totalorder %v12846_v56, %v12921_v11 }
 0x8e8   : > { %4294 = vperm.xlu1 %6016, %v12918_v14   ;;  %vm12246_vm6 = vcmp.eq.s32.totalorder %v12845_v18, %v10500_v23 }
 0x8ea   : > { %v10512_v53 = vpop.permute.xlu0 %4189 }
 0x8eb   : > { %v10518_v28 = vsel %vm12201_vm1, %v10512_v53, %v4162_v45  ;;  %vm3998_vm1 = vcmp.eq.s32.totalorder %v12845_v18, %v10082_v3  ;;  %v12925_v45 = vld [vmem:[#allocation9_spill] sm:$0xff]  ;;  %v12934_v3 = vld [vmem:[#allocation31_spill] sm:$0xff] }
 0x8ec   : > { %12919 = vst [vmem:[#allocation109_spill] sm:$0xff] %v10518_v28  ;;  %4254 = vperm.xlu1 %6016, %v12920_v59   ;;  %v10521_v39 = vpop.permute.xlu1 %4437  ;;  %v4158_v34 = vsel %vm3998_vm1, %v10378_v12, 0.0 }
 0x8ee   : > { %v10523_v4 = vpop.permute.xlu0 %4145 }
 0x8ef   : > { %v4165_v38 = vsel %vm12202_vm11, %v10523_v4, 0.0  ;;  %vm3958_vm11 = vcmp.eq.s32.totalorder %v12845_v18, %v10056_v54 }
 0x8f0   : > { %6017 = vset.pattern.permute.xlu1 %v12847_v21  ;;  %v10526_v13 = vpop.permute.xlu1 %4485 }
 0x8f1   : > { %4453 = vperm.xlu1 %6017, %v12922_v62  }
 0x8f2   : > { %v10537_v30 = vpop.permute.xlu0 %4193 }
 0x8f3   : > { %v10543_v46 = vsel %vm12203_vm9, %v10537_v30, %v4165_v38  ;;  %vm12209_vm9 = vcmp.eq.s32.totalorder %v12845_v18, %v10488_v15  ;;  %v12927_v38 = vld [vmem:[#allocation36_spill] sm:$0xff] }
 0x8f4   : > { %v4462_v12 = vsel %vm12209_vm9, %v10521_v39, 0.0 }
 0x8f5   : > { %6019 = vset.pattern.permute.xlu1 %v12852_v33  ;;  %v10546_v35 = vpop.permute.xlu1 %4586  ;;  %v4206_v33 = vsel %vm3958_vm11, %v4182_v50, %v4158_v34  ;;  %v12926_v50 = vld [vmem:[#allocation92_spill] sm:$0xff]  ;;  %v4510_v34 = vsel %vm12246_vm6, %v10526_v13, %v4462_v12  ;;  %v12929_v12 = vld [vmem:[#allocation106_spill] sm:$0xff] }
 0x8f6   : > { %4598 = vperm.xlu1 %6019, %v12918_v14   ;;  %v10549_v10 = vpop.permute.xlu0 %4149  ;;  %v12924_v14 = vld [vmem:[#allocation59_spill] sm:$0xff] }
 0x8f7   : > { %v3846_v62 = vsel %vm3662_vm4, %v12924_v14, 0.0  ;;  %vm12245_vm4 = vcmp.eq.s32.totalorder %v12845_v18, %v10546_v35 }
 0x8f9   : > { %v10559_v51 = vpop.permute.xlu1 %4546 }
 0x8fa   : > { %4558 = vperm.xlu1 %6019, %v12920_v59   ;;  %v10567_v40 = vpop.permute.xlu0 %4197  ;;  %v3902_v59 = vsel %vm3622_vm7, %v12926_v50, %v3846_v62  ;;  %vm12229_vm9 = vcmp.eq.s32.totalorder %v12845_v18, %v10559_v51  ;;  %vm4000_vm7 = vcmp.eq.s32.totalorder %v12845_v18, %v10089_v1  ;;  %v5570_v1 = vld [vmem:[%s11720_s3 + $0x1f0] sm:$0xff] }
 0x8fb   : > { %v4222_v29 = vadd.f32 %v4206_v33, %v3902_v59  ;;  %v12930_v33 = vld [vmem:[#allocation17_spill] sm:$0xff] }
 0x8fd   : > { %v4526_v60 = vadd.f32 %v4510_v34, %v4222_v29  ;;  %v12932_v34 = vld [vmem:[#allocation95_spill] sm:$0xff] }
 0x8fe   : > { %6020 = vset.pattern.permute.xlu1 %v12862_v47  ;;  %v10590_v37 = vpop.permute.xlu1 %4741  ;;  %v10592_v26 = vpop.permute.xlu0 %4057 }
 0x8ff   : > { %12928 = vst [vmem:[#allocation19_spill] sm:$0xff] %v10592_v26  ;;  %v4766_v62 = vsel %vm12245_vm4, %v10590_v37, 0.0  ;;  %4805 = vperm.xlu1 %6020, %v12929_v12   ;;  %v12936_v26 = vld [vmem:[#allocation47_spill] sm:$0xff] }
 0x900   : > { %v4814_v59 = vsel %vm12229_vm9, %v12930_v33, %v4766_v62 }
 0x901   : > { %v4830_v7 = vadd.f32 %v4814_v59, %v4526_v60  ;;  %v12933_v60 = vld [vmem:[#allocation51_spill] sm:$0xff] }
 0x902   : > { %v4014_v55 = vpop.permute.xlu0 %4013 }
 0x903   : > { %6021 = vset.pattern.permute.xlu1 %v12931_v36  ;;  %v10606_v29 = vpop.permute.xlu1 %4285  ;;  %4846 = vrot.lane.b32.xlu0 %v4830_v7, %s6100_s13  ;;  %v4042_v54 = vsel %vm3994_vm14, %v4014_v55, 0.0  ;;  %v4043_v12 = vsel %vm3995_vm2, %v4014_v55, 0.0  ;;  %vm12262_vm2 = vcmp.eq.s32.totalorder %v12845_v18, %v10060_v49  ;;  %v5555_v49 = vld [vmem:[%s11720_s3 + $0x178] sm:$0xff] }
 0x904   : > { %4009 = vperm.xlu1 %6021, %v12932_v34   ;;  %5597 = vmatpush3.msra.mxu1 %v5555_v49  ;;  %v12949_v49 = vld [vmem:[#allocation52_spill] sm:$0xff] }
 0x905   : > { %5598 = vmatprep.subr.mxu1 %v5570_v1  ;;  %v5553_v1 = vld [vmem:[%s11720_s3 + $0x168] sm:$0xff] }
 0x906   : > { %v4062_v43 = vpop.permute.xlu0 %4061 }
 0x907   : > { %v10616_v62 = vpop.permute.xlu1 %4245  ;;  %4081 = vperm.xlu0 %6029, %v12933_v60   ;;  %v4090_v59 = vsel %vm3954_vm3, %v4062_v43, %v4042_v54  ;;  %v4091_v7 = vsel %vm3955_vm0, %v4062_v43, %v4043_v12  ;;  %vm12244_vm3 = vcmp.eq.s32.totalorder %v12845_v18, %v10606_v29  ;;  %v12943_v12 = vld [vmem:[#allocation29_spill] sm:$0xff] }
 0x908   : > { %v10626_v2 = vadd.f32 %v4090_v59, %v12934_v3  ;;  %v10629_v61 = vadd.f32 %v4091_v7, %v12936_v26  ;;  %6022 = vset.pattern.permute.xlu1 %v12847_v21  ;;  %v4160_v3 = vsel %vm4000_vm7, %v10456_v0, 0.0  ;;  %vm12944_vm0 = vcmp.eq.s32.totalorder %v12845_v18, %v12943_v12  ;;  %v12945_v7 = vld [vmem:[#allocation38_spill] sm:$0xff] }
 0x909   : > { %4313 = vperm.xlu1 %6022, %v12932_v34   ;;  %v4208_v26 = vsel %vm12262_vm2, %v10485_v31, %v4160_v3  ;;  %vm12243_vm14 = vcmp.eq.s32.totalorder %v12845_v18, %v10616_v62  ;;  %v12946_v31 = vld [vmem:[#allocation116_spill] sm:$0xff] }
 0x90a   : > { %12935 = vst [vmem:[#allocation24_spill] sm:$0xff] %v10626_v2  ;;  %12937 = vst [vmem:[#allocation73_spill] sm:$0xff] %v10629_v61  ;;  %v5554_v61 = vld [vmem:[%s11720_s3 + $0x170] sm:$0xff] }
 0x90b   : > { %5599 = vmatpush3.msra.mxu1 %v5554_v61  ;;  %v5552_v61 = vld [vmem:[%s11720_s3 + $0x160] sm:$0xff] }
 0x90c   : > { %v10633_v55 = vpop.permute.xlu1 %4441 }
 0x90d   : > { %4361 = vperm.xlu1 %6022, %v12938_v57   ;;  %v4464_v0 = vsel %vm12244_vm3, %v10633_v55, 0.0 }
 0x910   : > { %v10636_v9 = vpop.permute.xlu1 %4489 }
 0x911   : > { %12939 = vst [vmem:[#allocation39_spill] sm:$0xff] %v10636_v9  ;;  %6023 = vset.pattern.permute.xlu1 %v12862_v47  ;;  %v4512_v3 = vsel %vm12243_vm14, %v10636_v9, %v4464_v0 }
 0x912   : > { %4617 = vperm.xlu1 %6023, %v12932_v34   ;;  %v12942_v34 = vld [vmem:[#allocation46_spill] sm:$0xff] }
 0x913   : > { %v3848_v59 = vsel %vm12944_vm0, %v12942_v34, 0.0 }
 0x915   : > { %v10640_v54 = vpop.permute.xlu1 %4589 }
 0x916   : > { %12940 = vst [vmem:[#allocation32_spill] sm:$0xff] %v10640_v54  ;;  %4665 = vperm.xlu1 %6023, %v12938_v57   ;;  %v12947_v57 = vld [vmem:[#allocation111_spill] sm:$0xff] }
 0x917   : > { %vm12948_vm9 = vcmp.eq.s32.totalorder %v12845_v18, %v12947_v57 }
 0x918   : > { %v3904_v44 = vsel %vm12948_vm9, %v12946_v31, %v3848_v59  ;;  %v5569_v59 = vld [vmem:[%s11720_s3 + $0x1e8] sm:$0xff]  ;;  %vm12242_vm9 = vcmp.eq.s32.totalorder %v12845_v18, %v10640_v54 }
 0x919   : > { %v10654_v43 = vpop.permute.xlu1 %4549  ;;  %v4224_v2 = vadd.f32 %v4208_v26, %v3904_v44  ;;  %5600 = vmatprep.subr.mxu1 %v5569_v59  ;;  %v12952_v59 = vld [vmem:[#allocation53_spill] sm:$0xff] }
 0x91a   : > { %12941 = vst [vmem:[#allocation25_spill] sm:$0xff] %v10654_v43  ;;  %6024 = vset.pattern.permute.xlu1 %v12847_v21  ;;  %vm12241_vm0 = vcmp.eq.s32.totalorder %v12845_v18, %v10654_v43  ;;  %5601 = vmatpush3.msra.mxu1 %v5553_v1  ;;  %v5550_v1 = vld [vmem:[%s11720_s3 + $0x150] sm:$0xff] }
 0x91b   : > { %4365 = vperm.xlu1 %6024, %v12945_v7   ;;  %v4528_v28 = vadd.f32 %v4512_v3, %v4224_v2  ;;  %v5568_v3 = vld [vmem:[%s11720_s3 + $0x1e0] sm:$0xff]  ;;  %v5546_v43 = vld [vmem:[%s11720_s3 + $0x130] sm:$0xff] }
 0x91c   : > { %5602 = vmatprep.subr.mxu1 %v5568_v3 }
 0x91d   : > { %5603 = vmatpush3.msra.mxu1 %v5552_v61  ;;  %v5549_v61 = vld [vmem:[%s11720_s3 + $0x148] sm:$0xff] }
 0x91e   : > { %v10696_v0 = vpop.permute.xlu1 %4745 }
 0x91f   : > { %v4768_v26 = vsel %vm12242_vm9, %v10696_v0, 0.0  ;;  %6025 = vset.pattern.permute.xlu1 %v12931_v36  ;;  %vm12247_vm9 = vcmp.eq.s32.totalorder %v12846_v56, %v10063_v58 }
 0x920   : > { %v4816_v44 = vsel %vm12241_vm0, %v12949_v49, %v4768_v26  ;;  %4017 = vperm.xlu1 %6025, %v12950_v6   ;;  %v5567_v26 = vld [vmem:[%s11720_s3 + $0x1d8] sm:$0xff]  ;;  %v12953_v49 = vld [vmem:[#allocation55_spill] sm:$0xff]  ;;  %vm12260_vm0 = vcmp.eq.s32.totalorder %v12846_v56, %v10093_v24 }
 0x921   : > { %v4832_v2 = vadd.f32 %v4816_v44, %v4528_v28  ;;  %v5551_v28 = vld [vmem:[%s11720_s3 + $0x158] sm:$0xff]  ;;  %5604 = vmatprep.subr.mxu1 %v5567_v26  ;;  %v5566_v44 = vld [vmem:[%s11720_s3 + $0x1d0] sm:$0xff]  ;;  %v5564_v26 = vld [vmem:[%s11720_s3 + $0x1c0] sm:$0xff] }
 0x922   : > { %5605 = vmatpush3.msra.mxu1 %v5551_v28  ;;  %v5548_v28 = vld [vmem:[%s11720_s3 + $0x140] sm:$0xff] }
 0x923   : > { %v10722_v27 = vpop.permute.xlu1 %4288  ;;  %4848 = vrot.lane.b32.xlu0 %v4832_v2, %s6100_s13  ;;  %v5565_v2 = vld [vmem:[%s11720_s3 + $0x1c8] sm:$0xff]  ;;  %5606 = vmatprep.subr.mxu1 %v5566_v44 }
 0x924   : > { %12951 = vst [vmem:[#allocation42_spill] sm:$0xff] %v10722_v27  ;;  %4065 = vperm.xlu1 %6025, %v12952_v59   ;;  %5607 = vmatpush3.msra.mxu1 %v5550_v1  ;;  %v12955_v1 = vld [vmem:[#allocation115_spill] sm:$0xff]  ;;  %vm12259_vm14 = vcmp.eq.s32.totalorder %v12846_v56, %v10722_v27 }
 0x925   : > { %5608 = vmatprep.subr.mxu1 %v5565_v2  ;;  %v5547_v2 = vld [vmem:[%s11720_s3 + $0x138] sm:$0xff] }
 0x926   : > { %5609 = vmatpush3.msra.mxu1 %v5549_v61  ;;  %v5562_v61 = vld [vmem:[%s11720_s3 + $0x1b0] sm:$0xff] }
 0x927   : > { %v10738_v3 = vpop.permute.xlu1 %4248  ;;  %4085 = vperm.xlu0 %6029, %v12953_v49   ;;  %5610 = vmatprep.subr.mxu1 %v5564_v26 }
 0x928   : > { %6026 = vset.pattern.permute.xlu1 %v12862_v47  ;;  %5611 = vmatpush3.msra.mxu1 %v5548_v28  ;;  %v5561_v28 = vld [vmem:[%s11720_s3 + $0x1a8] sm:$0xff]  ;;  %vm12258_vm6 = vcmp.eq.s32.totalorder %v12846_v56, %v10738_v3 }
 0x929   : > { %4669 = vperm.xlu1 %6026, %v12945_v7   ;;  %v5563_v7 = vld [vmem:[%s11720_s3 + $0x1b8] sm:$0xff] }
 0x92a   : > { %5612 = vmatprep.subr.mxu1 %v5563_v7  ;;  %v5560_v7 = vld [vmem:[%s11720_s3 + $0x1a0] sm:$0xff] }
 0x92b   : > { %6043 = vset.pattern.permute.xlu0 %v12847_v21  ;;  %5613 = vmatpush3.msra.mxu1 %v5547_v2  ;;  %v5559_v2 = vld [vmem:[%s11720_s3 + $0x198] sm:$0xff] }
 0x92c   : > { %v10756_v44 = vpop.permute.xlu1 %4445  ;;  %4317 = vperm.xlu0 %6043, %v12955_v1   ;;  %5614 = vmatprep.subr.mxu1 %v5562_v61  ;;  %v5545_v1 = vld [vmem:[%s11720_s3 + $0x128] sm:$0xff] }
 0x92d   : > { %12954 = vst [vmem:[#allocation49_spill] sm:$0xff] %v10756_v44  ;;  %6027 = vset.pattern.permute.xlu1 %v12847_v21  ;;  %5615 = vmatpush3.msra.mxu1 %v5546_v43  ;;  %v12956_v43 = vld [vmem:[#allocation119_spill] sm:$0xff] }
 0x92e   : > { %4369 = vperm.xlu1 %6027, %v12952_v59   ;;  %5616 = vmatprep.subr.mxu1 %v5561_v28  ;;  %v12957_v61 = vld [vmem:[#allocation103_spill] sm:$0xff]  ;;  %v5558_v28 = vld [vmem:[%s11720_s3 + $0x190] sm:$0xff] }
 0x92f   : > { %5617 = vmatpush3.msra.mxu1 %v5545_v1  ;;  %v5542_v1 = vld [vmem:[%s11720_s3 + $0x110] sm:$0xff] }
 0x930   : > { %v10770_v26 = vpop.permute.xlu1 %4493  ;;  %4321 = vperm.xlu0 %6043, %v12950_v6   ;;  %v5544_v6 = vld [vmem:[%s11720_s3 + $0x120] sm:$0xff]  ;;  %5618 = vmatprep.subr.mxu1 %v5560_v7  ;;  %v5557_v7 = vld [vmem:[%s11720_s3 + $0x188] sm:$0xff] }
 0x931   : > { %5619 = vmatpush3.msra.mxu1 %v5544_v6 }
 0x932   : > { %6028 = vset.pattern.permute.xlu1 %v12931_v36  ;;  %5620 = vmatprep.subr.mxu1 %v5559_v2  ;;  %v5540_v2 = vld [vmem:[%s11720_s3 + $0x100] sm:$0xff] }
 0x933   : > { %4021 = vperm.xlu1 %6028, %v12956_v43   ;;  %5621 = vmatpush3.msra.mxu1 %v5543_v32  ;;  %v5556_v32 = vld [vmem:[%s11720_s3 + $0x180] sm:$0xff] }
 0x934   : > { %4373 = vperm.xlu0 %6043, %v12957_v61   ;;  %5622 = vmatprep.subr.mxu1 %v5558_v28 }
 0x935   : > { %v10794_v9 = vpop.permute.xlu1 %4592  ;;  %5623 = vmatpush3.msra.mxu1 %v5542_v1 }
 0x936   : > { %12958 = vst [vmem:[#allocation74_spill] sm:$0xff] %v10794_v9  ;;  %5624 = vmatprep.subr.mxu1 %v5557_v7  ;;  %vm12257_vm3 = vcmp.eq.s32.totalorder %v12846_v56, %v10794_v9  ;;  %v12960_v7 = vld [vmem:[#allocation63_spill] sm:$0xff] }
 0x937   : > { %4840 = vrot.lane.b32.xlu1 %v10315_v42, %s6100_s13  ;;  %v5541_v42 = vld [vmem:[%s11720_s3 + $0x108] sm:$0xff] }
 0x938   : > { %4377 = vperm.xlu0 %6043, %v9598_v8   ;;  %6030 = vset.pattern.permute.xlu1 %v12862_v47 }
 0x939   : > { %v10809_v6 = vpop.permute.xlu1 %4552  ;;  %5625 = vmatpush3.msra.mxu1 %v5541_v42  ;;  %v12961_v42 = vld [vmem:[#allocation45_spill] sm:$0xff] }
 0x93a   : > { %5626 = vmatprep.subr.mxu1 %v5556_v32  ;;  %vm12962_vm4 = vcmp.eq.s32.totalorder %v12846_v56, %v12961_v42 }
 0x93b   : > { %4856 = vrot.lane.b32.xlu1 %v10317_v16, %s6100_s13  ;;  %v4163_v16 = vsel %vm12260_vm0, %v10497_v52, 0.0  ;;  %5627 = vmatpush3.msra.mxu1 %v5540_v2  ;;  %v3851_v52 = vsel %vm12962_vm4, %v12960_v7, 0.0  ;;  %v12964_v2 = vld [vmem:[#allocation40_spill] sm:$0xff]  ;;  %vm12256_vm4 = vcmp.eq.s32.totalorder %v12846_v56, %v10809_v6 }
 0x93c   : > { %4381 = vperm.xlu0 %6043, %v12917_v5   ;;  %v4211_v1 = vsel %vm12247_vm9, %v10512_v53, %v4163_v16  ;;  %v4467_v53 = vsel %vm12259_vm14, %v10756_v44, 0.0  ;;  %vm12965_vm9 = vcmp.eq.s32.totalorder %v12846_v56, %v12964_v2  ;;  %v12966_v44 = vld [vmem:[#allocation89_spill] sm:$0xff] }
 0x93d   : > { %v4515_v58 = vsel %vm12258_vm6, %v10770_v26, %v4467_v53  ;;  %vm12263_vm6 = vcmp.eq.s32.totalorder %v12845_v18, %v12923_v20 }
 0x93e   : > { %v10831_v28 = vpop.permute.xlu1 %4749 }
 0x93f   : > { %12959 = vst [vmem:[#allocation105_spill] sm:$0xff] %v10831_v28  ;;  %4673 = vperm.xlu1 %6030, %v12952_v59   ;;  %v4771_v32 = vsel %vm12257_vm3, %v10831_v28, 0.0  ;;  %v12963_v59 = vld [vmem:[#allocation77_spill] sm:$0xff]  ;;  %vm12261_vm3 = vcmp.eq.s32.totalorder %v12845_v18, %v12921_v11 }
 0x940   : > { %4385 = vperm.xlu0 %6043, %v12933_v60   ;;  %v3907_v16 = vsel %vm12965_vm9, %v12963_v59, %v3851_v52  ;;  %v4819_v28 = vsel %vm12256_vm4, %v12966_v44, %v4771_v32  ;;  %vm4563_vm9 = vcmp.eq.s32.totalorder %v12846_v56, %v10035_v41  ;;  %vm12970_vm4 = vcmp.eq.s32.totalorder %v12846_v56, %v10148_v48  ;;  %v12973_v48 = vld [vmem:[#allocation113_spill] sm:$0xff] }
 0x941   : > { %v4227_v24 = vadd.f32 %v4211_v1, %v3907_v16  ;;  %v12969_v1 = vld [vmem:[#allocation11_spill] sm:$0xff]  ;;  %vm12975_vm14 = vcmp.eq.s32.totalorder %v12846_v56, %v12973_v48 }
 0x943   : > { %v10871_v9 = vpop.permute.xlu1 %4291  ;;  %6031 = vset.pattern.permute.xlu1 %v12847_v21  ;;  %v4531_v2 = vadd.f32 %v4515_v58, %v4227_v24  ;;  %v4763_v58 = vsel %vm12970_vm4, %v10159_v17, 0.0  ;;  %v12972_v17 = vld [vmem:[#allocation91_spill] sm:$0xff]  ;;  %vm12974_vm4 = vcmp.eq.s32.totalorder %v12845_v18, %v12973_v48 }
 0x944   : > { %12967 = vst [vmem:[#allocation98_spill] sm:$0xff] %v10871_v9  ;;  %4325 = vperm.xlu1 %6031, %v12956_v43   ;;  %4389 = vperm.xlu0 %6043, %v12953_v49   ;;  %v4811_v24 = vsel %vm4563_vm9, %v10202_v22, %v4763_v58  ;;  %v4164_v22 = vsel %vm12261_vm3, %v10523_v4, 0.0  ;;  %vm12273_vm0 = vcmp.eq.s32.totalorder %v12846_v56, %v10871_v9  ;;  %v12977_v58 = vld [vmem:[#allocation118_spill] sm:$0xff] }
 0x945   : > { %v4835_v52 = vadd.f32 %v4819_v28, %v4531_v2  ;;  %v4827_v28 = vadd.f32 %v4811_v24, %v10374_v19  ;;  %v3853_v19 = vsel %vm12975_vm14, %v12972_v17, 0.0  ;;  %v12978_v24 = vld [vmem:[#allocation26_spill] sm:$0xff] }
 0x946   : > { %vm12979_vm14 = vcmp.eq.s32.totalorder %v12845_v18, %v12978_v24 }
 0x947   : > { %v10876_v53 = vpop.permute.xlu1 %4251 }
 0x948   : > { %12968 = vst [vmem:[#allocation104_spill] sm:$0xff] %v10876_v53  ;;  %6032 = vset.pattern.permute.xlu1 %v12931_v36  ;;  %4866 = vrot.lane.b32.xlu0 %v4835_v52, %s6100_s13  ;;  %vm12267_vm3 = vcmp.eq.s32.totalorder %v12845_v18, %v10876_v53  ;;  %vm12268_vm2 = vcmp.eq.s32.totalorder %v12846_v56, %v10876_v53  ;;  %v11079_v53 = vpop.permute.xlu0 %4069 }
 0x949   : > { %4025 = vperm.xlu1 %6032, %v12969_v1   ;;  %6046 = vset.pattern.permute.xlu0 %v12862_v47 }
 0x94c   : > { %v4450_v32 = vpop.permute.xlu1 %4449 }
 0x94d   : > { %6033 = vset.pattern.permute.xlu1 %v12862_v47 }
 0x94e   : > { %4629 = vperm.xlu1 %6033, %v12956_v43   ;;  %v3852_v43 = vsel %vm12974_vm4, %v12972_v17, 0.0  ;;  %vm12282_vm4 = vcmp.eq.s32.totalorder %v12845_v18, %v10871_v9 }
 0x94f   : > { %v4468_v4 = vsel %vm12282_vm4, %v4450_v32, 0.0 }
 0x950   : > { %v4498_v2 = vpop.permute.xlu1 %4497 }
 0x951   : > { %v4516_v48 = vsel %vm12267_vm3, %v4498_v2, %v4468_v4 }
 0x952   : > { %4858 = vrot.lane.b32.xlu1 %v4827_v28, %s6100_s13  ;;  %v3908_v28 = vsel %vm12979_vm14, %v12977_v58, %v3852_v43 }
 0x955   : > { %v10896_v16 = vpop.permute.xlu1 %4595 }
 0x956   : > { %12971 = vst [vmem:[#allocation107_spill] sm:$0xff] %v10896_v16  ;;  %4677 = vperm.xlu1 %6033, %v12957_v61   ;;  %v4212_v61 = vsel %vm12263_vm6, %v10537_v30, %v4164_v22  ;;  %v4469_v30 = vsel %vm12273_vm0, %v4450_v32, 0.0  ;;  %vm12980_vm6 = vcmp.eq.s32.totalorder %v12846_v56, %v12978_v24  ;;  %vm12272_vm14 = vcmp.eq.s32.totalorder %v12845_v18, %v10896_v16 }
 0x957   : > { %v3909_v17 = vsel %vm12980_vm6, %v12977_v58, %v3853_v19  ;;  %v4517_v32 = vsel %vm12268_vm2, %v4498_v2, %v4469_v30  ;;  %v4228_v22 = vadd.f32 %v4212_v61, %v3908_v28  ;;  %vm12271_vm6 = vcmp.eq.s32.totalorder %v12846_v56, %v10896_v16  ;;  %v12982_v30 = vld [vmem:[#allocation18_spill] sm:$0xff]  ;;  %v12995_v16 = vld [vmem:[#allocation117_spill] sm:$0xff] }
 0x958   : > { %v4229_v9 = vadd.f32 %v10543_v46, %v3909_v17  ;;  %v12981_v46 = vld [vmem:[#allocation66_spill] sm:$0xff] }
 0x959   : > { %v10923_v52 = vpop.permute.xlu1 %4555  ;;  %v4532_v20 = vadd.f32 %v4516_v48, %v4228_v22 }
 0x95a   : > { %12976 = vst [vmem:[#allocation108_spill] sm:$0xff] %v10923_v52  ;;  %6034 = vset.pattern.permute.xlu1 %v12847_v21  ;;  %v4533_v43 = vadd.f32 %v4517_v32, %v4229_v9  ;;  %vm12270_vm3 = vcmp.eq.s32.totalorder %v12845_v18, %v10923_v52  ;;  %vm12269_vm2 = vcmp.eq.s32.totalorder %v12846_v56, %v10923_v52  ;;  %v12983_v32 = vld [vmem:[#allocation34_spill] sm:$0xff] }
 0x95b   : > { %4329 = vperm.xlu1 %6034, %v12969_v1  }
 0x95e   : > { %v4754_v19 = vpop.permute.xlu1 %4753 }
 0x95f   : > { %v4772_v2 = vsel %vm12272_vm14, %v4754_v19, 0.0  ;;  %v4773_v9 = vsel %vm12271_vm6, %v4754_v19, 0.0  ;;  %6035 = vset.pattern.permute.xlu1 %v12931_v36  ;;  %vm12985_vm14 = vcmp.eq.s32.totalorder %v12846_v56, %v12925_v45  ;;  %v12987_v19 = vld [vmem:[#allocation67_spill] sm:$0xff] }
 0x960   : > { %v4820_v61 = vsel %vm12270_vm3, %v12981_v46, %v4772_v2  ;;  %v4821_v4 = vsel %vm12269_vm2, %v12981_v46, %v4773_v9  ;;  %4029 = vperm.xlu1 %6035, %v12982_v30   ;;  %vm12276_vm2 = vcmp.eq.s32.totalorder %v12845_v18, %v12983_v32  ;;  %v3847_v22 = vsel %vm12985_vm14, %v12924_v14, 0.0  ;;  %v12991_v14 = vld [vmem:[#allocation69_spill] sm:$0xff] }
 0x961   : > { %v4836_v58 = vadd.f32 %v4820_v61, %v4532_v20  ;;  %v10976_v24 = vadd.f32 %v4821_v4, %v4533_v43  ;;  %v12986_v43 = vld [vmem:[#allocation8_spill] sm:$0xff]  ;;  %vm12988_vm0 = vcmp.eq.s32.totalorder %v12845_v18, %v12987_v19  ;;  %vm12992_vm14 = vcmp.eq.s32.totalorder %v12845_v18, %v12991_v14 }
 0x962   : > { %v3854_v2 = vsel %vm12988_vm0, %v12986_v43, 0.0  ;;  %v12990_v4 = vld [vmem:[#allocation76_spill] sm:$0xff] }
 0x963   : > { %v10978_v28 = vpop.permute.xlu1 %4294  ;;  %4852 = vrot.lane.b32.xlu0 %v4836_v58, %s6100_s13  ;;  %v3910_v45 = vsel %vm12992_vm14, %v12990_v4, %v3854_v2  ;;  %v12993_v58 = vld [vmem:[#allocation14_spill] sm:$0xff]  ;;  %vm12289_vm14 = vcmp.eq.s32.totalorder %v12846_v56, %v10500_v23 }
 0x964   : > { %6036 = vset.pattern.permute.xlu1 %v12862_v47  ;;  %vm12274_vm3 = vcmp.eq.s32.totalorder %v12845_v18, %v10978_v28 }
 0x965   : > { %4633 = vperm.xlu1 %6036, %v12969_v1   ;;  %v12984_v1 = vld [vmem:[#allocation13_spill] sm:$0xff] }
 0x966   : > { %vm12275_vm6 = vcmp.eq.s32.totalorder %v12845_v18, %v12984_v1 }
 0x967   : > { %v10983_v17 = vpop.permute.xlu1 %4254 }
 0x968   : > { %vm12279_vm0 = vcmp.eq.s32.totalorder %v12845_v18, %v10983_v17 }
 0x969   : > { %4860 = vrot.lane.b32.xlu1 %v10474_v63, %s6100_s13 }
 0x96c   : > { %v10987_v48 = vpop.permute.xlu1 %4453 }
 0x96d   : > { %4681 = vperm.xlu1 %6036, %v9598_v8   ;;  %v4166_v8 = vsel %vm12276_vm2, %v10549_v10, 0.0  ;;  %v4470_v63 = vsel %vm12274_vm3, %v10987_v48, 0.0  ;;  %vm12989_vm3 = vcmp.eq.s32.totalorder %v12846_v56, %v12927_v38  ;;  %vm12288_vm2 = vcmp.eq.s32.totalorder %v12846_v56, %v10546_v35  ;;  %v12994_v38 = vld [vmem:[#allocation120_spill] sm:$0xff] }
 0x96e   : > { %v4214_v9 = vsel %vm12275_vm6, %v10567_v40, %v4166_v8  ;;  %v3903_v61 = vsel %vm12989_vm3, %v12926_v50, %v3847_v22  ;;  %vm4303_vm6 = vcmp.eq.s32.totalorder %v12846_v56, %v10488_v15  ;;  %v4518_v50 = vsel %vm12279_vm0, %v12993_v58, %v4470_v63 }
 0x96f   : > { %v4463_v8 = vsel %vm4303_vm6, %v10521_v39, 0.0  ;;  %v4230_v22 = vadd.f32 %v4214_v9, %v3910_v45  ;;  %v4767_v2 = vsel %vm12288_vm2, %v10590_v37, 0.0  ;;  %v4223_v63 = vadd.f32 %v10451_v25, %v3903_v61 }
 0x970   : > { %v4511_v52 = vsel %vm12289_vm14, %v10526_v13, %v4463_v8  ;;  %vm12287_vm0 = vcmp.eq.s32.totalorder %v12846_v56, %v10559_v51  ;;  %vm12304_vm2 = vcmp.eq.s32.totalorder %v12846_v56, %v10616_v62  ;;  %vm12998_vm14 = vcmp.eq.s32.totalorder %v12846_v56, %v12947_v57 }
 0x971   : > { %v10990_v20 = vpop.permute.xlu1 %4598  ;;  %6037 = vset.pattern.permute.xlu1 %v12847_v21  ;;  %v4534_v37 = vadd.f32 %v4518_v50, %v4230_v22  ;;  %v4815_v25 = vsel %vm12287_vm0, %v12930_v33, %v4767_v2  ;;  %v4527_v61 = vadd.f32 %v4511_v52, %v4223_v63  ;;  %v11085_v33 = vpop.permute.xlu0 %4842  ;;  %vm12997_vm0 = vcmp.eq.s32.totalorder %v12846_v56, %v12943_v12  ;;  %v12999_v12 = vld [vmem:[#allocation39_spill] sm:$0xff] }
 0x972   : > { %4333 = vperm.xlu1 %6037, %v12982_v30   ;;  %vm12286_vm3 = vcmp.eq.s32.totalorder %v12845_v18, %v10990_v20 }
 0x973   : > { %v4774_v39 = vsel %vm12286_vm3, %v12995_v16, 0.0  ;;  %v4831_v8 = vadd.f32 %v4815_v25, %v4527_v61  ;;  %vm12292_vm3 = vcmp.eq.s32.totalorder %v12846_v56, %v10640_v54 }
 0x975   : > { %v11020_v46 = vpop.permute.xlu1 %4558  ;;  %v11090_v2 = vpop.permute.xlu0 %4073 }
 0x976   : > { %6038 = vset.pattern.permute.xlu1 %v12931_v36  ;;  %vm12285_vm4 = vcmp.eq.s32.totalorder %v12845_v18, %v11020_v46 }
 0x977   : > { %4033 = vperm.xlu1 %6038, %v12994_v38  }
 0x97a   : > { %v11067_v9 = vpop.permute.xlu1 %4805 }
 0x97b   : > { %v4822_v13 = vsel %vm12285_vm4, %v11067_v9, %v4774_v39  ;;  %6039 = vset.pattern.permute.xlu1 %v12862_v47  ;;  %vm4305_vm4 = vcmp.eq.s32.totalorder %v12846_v56, %v10606_v29  ;;  %v3849_v39 = vsel %vm12997_vm0, %v12942_v34, 0.0 }
 0x97c   : > { %v4838_v45 = vadd.f32 %v4822_v13, %v4534_v37  ;;  %4637 = vperm.xlu1 %6039, %v12982_v30   ;;  %v11096_v30 = vpop.permute.xlu0 %4844  ;;  %v4769_v37 = vsel %vm12292_vm3, %v10696_v0, 0.0  ;;  %v3905_v25 = vsel %vm12998_vm14, %v12946_v31, %v3849_v39  ;;  %v13000_v13 = vld [vmem:[#allocation102_spill] sm:$0xff]  ;;  %vm13006_vm14 = vcmp.eq.s32.totalorder %v12845_v18, %v12961_v42  ;;  %v13010_v42 = vld [vmem:[#allocation105_spill] sm:$0xff] }
 0x97d   : > { %v4225_v61 = vadd.f32 %v13000_v13, %v3905_v25  ;;  %v13005_v13 = vld [vmem:[#allocation12_spill] sm:$0xff] }
 0x97e   : > { %4854 = vrot.lane.b32.xlu0 %v4838_v45, %s6100_s13  ;;  %v13001_v45 = vld [vmem:[#allocation25_spill] sm:$0xff] }
 0x97f   : > { %v11082_v50 = vpop.permute.xlu1 %4009  ;;  %vm12291_vm0 = vcmp.eq.s32.totalorder %v12846_v56, %v13001_v45 }
 0x980   : > { %4862 = vrot.lane.b32.xlu1 %v4831_v8, %s6100_s13  ;;  %v13002_v8 = vld [vmem:[#allocation52_spill] sm:$0xff]  ;;  %v11137_v11 = vpop.permute.xlu0 %4077 }
 0x981   : > { %v4817_v0 = vsel %vm12291_vm0, %v13002_v8, %v4769_v37  ;;  %vm12303_vm0 = vcmp.eq.s32.totalorder %v12845_v18, %v10722_v27  ;;  %v13008_v8 = vld [vmem:[#allocation94_spill] sm:$0xff] }
 0x984   : > { %v11087_v22 = vpop.permute.xlu1 %4313  ;;  %4685 = vperm.xlu1 %6039, %v12917_v5   ;;  %v12996_v5 = vld [vmem:[#allocation20_spill] sm:$0xff]  ;;  %v11141_v39 = vpop.permute.xlu0 %4846 }
 0x988   : > { %v11092_v52 = vpop.permute.xlu1 %4361  ;;  %6040 = vset.pattern.permute.xlu1 %v12847_v21  ;;  %v11144_v25 = vpop.permute.xlu0 %4081 }
 0x989   : > { %4337 = vperm.xlu1 %6040, %v12994_v38   ;;  %13003 = vst [vmem:[#allocation93_spill] sm:$0xff] %v11144_v25 }
 0x98d   : > { %v11098_v63 = vpop.permute.xlu1 %4617  ;;  %6041 = vset.pattern.permute.xlu1 %v12931_v36  ;;  %v4465_v36 = vsel %vm4305_vm4, %v10633_v55, 0.0 }
 0x98e   : > { %4037 = vperm.xlu1 %6041, %v12996_v5   ;;  %v4513_v34 = vsel %vm12304_vm2, %v12999_v12, %v4465_v36  ;;  %vm13019_vm2 = vcmp.eq.s32.totalorder %v12846_v56, %v12991_v14 }
 0x98f   : > { %v4529_v31 = vadd.f32 %v4513_v34, %v4225_v61  ;;  %v3850_v61 = vsel %vm13006_vm14, %v12960_v7, 0.0  ;;  %vm12302_vm14 = vcmp.eq.s32.totalorder %v12845_v18, %v10809_v6 }
 0x991   : > { %v11131_v55 = vpop.permute.xlu1 %4665  ;;  %v4833_v57 = vadd.f32 %v4817_v0, %v4529_v31 }
 0x992   : > { %6042 = vset.pattern.permute.xlu1 %v12862_v47 }
 0x993   : > { %4641 = vperm.xlu1 %6042, %v12994_v38  }
 0x995   : > { %v11149_v37 = vpop.permute.xlu0 %4848 }
 0x996   : > { %v4366_v36 = vpop.permute.xlu1 %4365  ;;  %13004 = vst [vmem:[#allocation64_spill] sm:$0xff] %v11149_v37 }
 0x997   : > { %4864 = vrot.lane.b32.xlu1 %v4833_v57, %s6100_s13  ;;  %v13011_v57 = vld [vmem:[#allocation35_spill] sm:$0xff] }
 0x99b   : > { %v11146_v12 = vpop.permute.xlu1 %4017  ;;  %4689 = vperm.xlu1 %6042, %v12933_v60   ;;  %v13007_v60 = vld [vmem:[#allocation74_spill] sm:$0xff] }
 0x99c   : > { %v4044_v34 = vsel %vm3996_vm10, %v11146_v12, 0.0  ;;  %vm12300_vm3 = vcmp.eq.s32.totalorder %v12845_v18, %v13007_v60  ;;  %vm12301_vm10 = vcmp.eq.s32.totalorder %v12845_v18, %v10738_v3 }
 0x99d   : > { %v4770_v31 = vsel %vm12300_vm3, %v13010_v42, 0.0  ;;  %vm3967_vm3 = vcmp.eq.s32.totalorder %v12846_v56, %v12984_v1 }
 0x99f   : > { %v11155_v38 = vpop.permute.xlu1 %4065  ;;  %6044 = vset.pattern.permute.xlu1 %v12847_v21  ;;  %v13009_v21 = vld [vmem:[#allocation49_spill] sm:$0xff] }
 0x9a0   : > { %v4092_v0 = vsel %vm3956_vm8, %v11155_v38, %v4044_v34  ;;  %4341 = vperm.xlu1 %6044, %v12996_v5   ;;  %v4466_v7 = vsel %vm12303_vm0, %v13009_v21, 0.0  ;;  %v13012_v34 = vld [vmem:[#allocation40_spill] sm:$0xff]  ;;  %v13014_v21 = vld [vmem:[#allocation109_spill] sm:$0xff] }
 0x9a1   : > { %v11182_v25 = vadd.f32 %v4092_v0, %v13011_v57  ;;  %vm13013_vm8 = vcmp.eq.s32.totalorder %v12845_v18, %v13012_v34  ;;  %v4514_v45 = vsel %vm12301_vm10, %v10770_v26, %v4466_v7  ;;  %v4818_v0 = vsel %vm12302_vm14, %v12966_v44, %v4770_v31 }
 0x9a2   : > { %v3906_v37 = vsel %vm13013_vm8, %v12963_v59, %v3850_v61  ;;  %v11192_v27 = vpop.permute.xlu0 %4085  ;;  %vm13015_vm8 = vcmp.eq.s32.totalorder %v12846_v56, %v12987_v19  ;;  %vm4007_vm10 = vcmp.eq.s32.totalorder %v12846_v56, %v12983_v32  ;;  %vm12305_vm14 = vcmp.eq.s32.totalorder %v12846_v56, %v10978_v28 }
 0x9a3   : > { %v4226_v54 = vadd.f32 %v13014_v21, %v3906_v37  ;;  %v3855_v26 = vsel %vm13015_vm8, %v12986_v43, 0.0  ;;  %v13016_v43 = vld [vmem:[#allocation114_spill] sm:$0xff] }
 0x9a4   : > { %v4670_v42 = vpop.permute.xlu1 %4669  ;;  %6045 = vset.pattern.permute.xlu1 %v12862_v47  ;;  %v4167_v47 = vsel %vm4007_vm10, %v10549_v10, 0.0  ;;  %vm13017_vm8 = vcmp.eq.s32.totalorder %v12845_v18, %v13016_v43  ;;  %vm13018_vm0 = vcmp.eq.s32.totalorder %v12846_v56, %v13016_v43 }
 0x9a5   : > { %v4530_v59 = vadd.f32 %v4514_v45, %v4226_v54  ;;  %4645 = vperm.xlu1 %6045, %v12996_v5   ;;  %v4471_v54 = vsel %vm12305_vm14, %v10987_v48, 0.0  ;;  %v3911_v45 = vsel %vm13019_vm2, %v12990_v4, %v3855_v26  ;;  %v4215_v10 = vsel %vm3967_vm3, %v10567_v40, %v4167_v47  ;;  %v13020_v48 = vld [vmem:[#allocation70_spill] sm:$0xff]  ;;  %v13023_v4 = vld [vmem:[#allocation24_spill] sm:$0xff]  ;;  %v13024_v40 = vld [vmem:[#allocation73_spill] sm:$0xff] }
 0x9a6   : > { %vm13021_vm14 = vcmp.eq.s32.totalorder %v12845_v18, %v13020_v48  ;;  %vm4615_vm2 = vcmp.eq.s32.totalorder %v12846_v56, %v10990_v20  ;;  %v13029_v26 = vld [vmem:[#allocation97_spill] sm:$0xff] }
 0x9a7   : > { %v4834_v37 = vadd.f32 %v4818_v0, %v4530_v59  ;;  %v4318_v44 = vpop.permute.xlu0 %4317  ;;  %v13027_v0 = vld [vmem:[#allocation15_spill] sm:$0xff]  ;;  %v4775_v43 = vsel %vm4615_vm2, %v12995_v16, 0.0 }
 0x9a8   : > { %v4346_v19 = vsel %vm13017_vm8, %v4318_v44, 0.0  ;;  %v4347_v5 = vsel %vm13018_vm0, %v4318_v44, 0.0  ;;  %vm13022_vm8 = vcmp.eq.s32.totalorder %v12846_v56, %v13020_v48  ;;  %vm12306_vm0 = vcmp.eq.s32.totalorder %v12846_v56, %v10983_v17 }
 0x9a9   : > { %v4394_v61 = vsel %vm13021_vm14, %v4366_v36, %v4346_v19  ;;  %v4395_v7 = vsel %vm13022_vm8, %v4366_v36, %v4347_v5  ;;  %v4370_v31 = vpop.permute.xlu1 %4369  ;;  %4850 = vrot.lane.b32.xlu1 %v4834_v37, %s6100_s13  ;;  %v4519_v34 = vsel %vm12306_vm0, %v12993_v58, %v4471_v54  ;;  %v13025_v36 = vld [vmem:[#allocation10_spill] sm:$0xff]  ;;  %vm13028_vm8 = vcmp.eq.s32.totalorder %v12845_v18, %v10035_v41  ;;  %v13032_v19 = vld [vmem:[#allocation21_spill] sm:$0xff] }
 0x9aa   : > { %v4410_v14 = vadd.f32 %v4394_v61, %v13023_v4  ;;  %v4411_v57 = vadd.f32 %v4395_v7, %v13024_v40  ;;  %vm13026_vm14 = vcmp.eq.s32.totalorder %v12845_v18, %v13025_v36  ;;  %v4698_v59 = vsel %vm13028_vm8, %v4670_v42, %v13027_v0  ;;  %v13039_v4 = vld [vmem:[#allocation41_spill] sm:$0xff] }
 0x9ab   : > { %v4040_v21 = vsel %vm13026_vm14, %v11082_v50, 0.0  ;;  %v4699_v37 = vsel %vm4563_vm9, %v4670_v42, %v13029_v26  ;;  %v4231_v44 = vadd.f32 %v4215_v10, %v3911_v45  ;;  %vm13030_vm0 = vcmp.eq.s32.totalorder %v12846_v56, %v13025_v36  ;;  %v13031_v42 = vld [vmem:[#allocation19_spill] sm:$0xff]  ;;  %v13042_v36 = vld [vmem:[#allocation28_spill] sm:$0xff]  ;;  %v4322_v0 = vpop.permute.xlu0 %4321 }
 0x9ac   : > { %v4041_v58 = vsel %vm13030_vm0, %v11082_v50, 0.0  ;;  %v11268_v47 = vadd.f32 %v4698_v59, %v4410_v14  ;;  %v11270_v54 = vadd.f32 %v4699_v37, %v4411_v57  ;;  %vm4575_vm14 = vcmp.eq.s32.totalorder %v12846_v56, %v11020_v46  ;;  %v13044_v59 = vld [vmem:[#allocation68_spill] sm:$0xff]  ;;  %v13045_v37 = vld [vmem:[#allocation85_spill] sm:$0xff] }
 0x9ad   : > { %4693 = vperm.xlu1 %6045, %v12953_v49   ;;  %v4535_v41 = vadd.f32 %v4519_v34, %v4231_v44  ;;  %v4823_v50 = vsel %vm4575_vm14, %v11067_v9, %v4775_v43  ;;  %vm13033_vm9 = vcmp.eq.s32.totalorder %v12845_v18, %v13032_v19  ;;  %vm13034_vm0 = vcmp.eq.s32.totalorder %v12846_v56, %v13032_v19  ;;  %v13035_v49 = vld [vmem:[#allocation23_spill] sm:$0xff] }
 0x9ae   : > { %v4088_v5 = vsel %vm13033_vm9, %v13031_v42, %v4040_v21  ;;  %v4022_v45 = vpop.permute.xlu1 %4021  ;;  %v4089_v16 = vsel %vm13034_vm0, %v13031_v42, %v4041_v58  ;;  %vm13036_vm8 = vcmp.eq.s32.totalorder %v12845_v18, %v13035_v49  ;;  %vm13038_vm9 = vcmp.eq.s32.totalorder %v12846_v56, %v13035_v49  ;;  %v13046_v58 = vld [vmem:[#allocation71_spill] sm:$0xff]  ;;  %v13050_v49 = vld [vmem:[#allocation48_spill] sm:$0xff] }
 0x9af   : > { %v4344_v10 = vsel %vm13036_vm8, %v11087_v22, 0.0  ;;  %v4046_v9 = vsel %vm3998_vm1, %v4022_v45, 0.0  ;;  %v4047_v61 = vsel %vm3999_vm5, %v4022_v45, 0.0  ;;  %v4345_v7 = vsel %vm13038_vm9, %v11087_v22, 0.0 }
 0x9b0   : > { %vm13040_vm0 = vcmp.eq.s32.totalorder %v12845_v18, %v13039_v4  ;;  %v4094_v57 = vsel %vm3958_vm11, %v11079_v53, %v4046_v9  ;;  %v4095_v34 = vsel %vm3959_vm15, %v11079_v53, %v4047_v61  ;;  %v4104_v21 = vadd.f32 %v4088_v5, %v13042_v36  ;;  %v13047_v53 = vld [vmem:[#allocation44_spill] sm:$0xff] }
 0x9b1   : > { %v4392_v14 = vsel %vm13040_vm0, %v11092_v52, %v4344_v10  ;;  %vm13043_vm5 = vcmp.eq.s32.totalorder %v12846_v56, %v13039_v4  ;;  %v11323_v26 = vadd.f32 %v4094_v57, %v13044_v59  ;;  %v11326_v44 = vadd.f32 %v4095_v34, %v13045_v37  ;;  %4868 = vrot.lane.b32.xlu1 %v10976_v24, %s6100_s13  ;;  %v13064_v59 = vld [vmem:[#allocation101_spill] sm:$0xff]  ;;  %v13065_v37 = vld [vmem:[#allocation100_spill] sm:$0xff] }
 0x9b2   : > { %v4393_v22 = vsel %vm13043_vm5, %v11092_v52, %v4345_v7  ;;  %v4105_v43 = vadd.f32 %v4089_v16, %v13046_v58  ;;  %vm13048_vm15 = vcmp.eq.s32.totalorder %v12845_v18, %v13047_v53  ;;  %vm13049_vm1 = vcmp.eq.s32.totalorder %v12846_v56, %v13047_v53  ;;  %v4841_v19 = vpop.permute.xlu1 %4840 }
 0x9b3   : > { %v4648_v42 = vsel %vm13048_vm15, %v11098_v63, 0.0  ;;  %v4649_v52 = vsel %vm13049_vm1, %v11098_v63, 0.0  ;;  %v4839_v5 = vadd.f32 %v4823_v50, %v4535_v41  ;;  %v4408_v45 = vadd.f32 %v4392_v14, %v4104_v21  ;;  %v13054_v63 = vld [vmem:[#allocation90_spill] sm:$0xff] }
 0x9b4   : > { %vm13051_vm11 = vcmp.eq.s32.totalorder %v12845_v18, %v13050_v49  ;;  %vm13052_vm8 = vcmp.eq.s32.totalorder %v12846_v56, %v13050_v49  ;;  %v4409_v10 = vadd.f32 %v4393_v22, %v4105_v43  ;;  %vm13053_vm9 = vcmp.eq.s32.totalorder %v12846_v56, %v13005_v13 }
 0x9b5   : > { %v4696_v24 = vsel %vm13051_vm11, %v11131_v55, %v4648_v42  ;;  %v4697_v16 = vsel %vm13052_vm8, %v11131_v55, %v4649_v52  ;;  %v4045_v48 = vsel %vm13053_vm9, %v11146_v12, 0.0  ;;  %vm13055_vm0 = vcmp.eq.s32.totalorder %v12845_v18, %v13054_v63  ;;  %4870 = vrot.lane.b32.xlu1 %v4839_v5, %s6100_s13  ;;  %v13057_v12 = vld [vmem:[#allocation16_spill] sm:$0xff] }
 0x9b6   : > { %v4348_v41 = vsel %vm13055_vm0, %v4322_v0, 0.0  ;;  %v4349_v50 = vsel %vm4301_vm13, %v4322_v0, 0.0  ;;  %vm13056_vm5 = vcmp.eq.s32.totalorder %v12846_v56, %v13008_v8  ;;  %v4712_v55 = vadd.f32 %v4696_v24, %v4408_v45  ;;  %v4857_v61 = vpop.permute.xlu1 %4856  ;;  %v13063_v0 = vld [vmem:[#allocation99_spill] sm:$0xff] }
 0x9b7   : > { %v4093_v9 = vsel %vm13056_vm5, %v11155_v38, %v4045_v48  ;;  %v4713_v7 = vadd.f32 %v4697_v16, %v4409_v10  ;;  %vm13058_vm15 = vcmp.eq.s32.totalorder %v12845_v18, %v13057_v12  ;;  %vm13059_vm1 = vcmp.eq.s32.totalorder %v12846_v56, %v13057_v12  ;;  %v13062_v38 = vld [vmem:[#allocation43_spill] sm:$0xff]  ;;  %v13072_v16 = vld [vmem:[#allocation2_spill] sm:$0xff] }
 0x9b8   : > { %v4396_v13 = vsel %vm13058_vm15, %v4370_v31, %v4348_v41  ;;  %v4397_v4 = vsel %vm13059_vm1, %v4370_v31, %v4349_v50  ;;  %vm13060_vm13 = vcmp.lt.s32.totalorder %v12845_v18, 16  ;;  %v4109_v40 = vadd.f32 %v4093_v9, %v13062_v38  ;;  %v13069_v45 = vld [vmem:[#allocation75_spill] sm:$0xff]  ;;  %v13073_v48 = vld [vmem:[#allocation6_spill] sm:$0xff]  ;;  %v13082_v38 = vld [vmem:[#allocation72_spill] sm:$0xff] }
 0x9b9   : > { %v4880_v14 = vsel %vm13060_vm13, %v4857_v61, %v4841_v19  ;;  %vm13061_vm11 = vmmov %vm13060_vm13  ;;  %v4412_v21 = vadd.f32 %v4396_v13, %v11182_v25  ;;  %vm13066_vm8 = vcmp.eq.s32.totalorder %v12846_v56, %v13064_v59  ;;  %vm13071_vm0 = vcmp.eq.s32.totalorder %v12846_v56, %v13069_v45 }
 0x9ba   : > { %v4872_v8 = vsel %vm13061_vm11, %v4841_v19, %v4857_v61  ;;  %v4888_v57 = vadd.f32 %v4880_v14, %v4712_v55  ;;  %v4674_v36 = vpop.permute.xlu1 %4673  ;;  %v4413_v22 = vadd.f32 %v4397_v4, %v4109_v40  ;;  %v13067_v19 = vld [vmem:[#allocation3_spill] sm:$0xff]  ;;  %v13076_v4 = vld [vmem:[#allocation5_spill] sm:$0xff] }
 0x9bb   : > { %v4889_v34 = vadd.f32 %v4872_v8, %v4713_v7  ;;  %v4700_v31 = vsel %vm4564_vm12, %v4674_v36, %v13063_v0  ;;  %v4701_v58 = vsel %vm13066_vm8, %v4674_v36, %v13065_v37  ;;  %vm13068_vm9 = vcmp.eq.s32.totalorder %v12846_v56, %v13067_v19 }
 0x9bc   : > { %v4716_v43 = vadd.f32 %v4700_v31, %v4412_v21  ;;  %v4717_v53 = vadd.f32 %v4701_v58, %v4413_v22  ;;  %vm13070_vm12 = vcmp.eq.s32.totalorder %v12845_v18, %v13069_v45  ;;  %vm13077_vm15 = vcmp.eq.s32.totalorder %v12845_v18, %v13076_v4 }
 0x9bd   : > { %5001 = vmatprep.mubr.f32.mxu1 %v4889_v34  ;;  %vm13078_vm1 = vcmp.eq.s32.totalorder %v12846_v56, %v13076_v4  ;;  %v13098_v4 = vld [vmem:[#allocation32_spill] sm:$0xff] }
 0x9be   : > { %5002 = vmatmul.mubr.f32.vlgmr.msra.gmra.mxu1 %v4888_v57  ;;  %v13083_v57 = vld [vmem:[#allocation83_spill] sm:$0xff] }
 0x9bf   : > { %v4326_v42 = vpop.permute.xlu1 %4325 }
 0x9c0   : > { %v4351_v19 = vsel %vm4303_vm6, %v4326_v42, 0.0  ;;  %vm13091_vm6 = vcmp.eq.s32.totalorder %v12845_v18, %v10559_v51 }
 0x9c4   : > { %v4026_v52 = vpop.permute.xlu1 %4025 }
 0x9c5   : > { %v4048_v25 = vsel %vm4000_vm7, %v4026_v52, 0.0  ;;  %v4049_v5 = vsel %vm13068_vm9, %v4026_v52, 0.0  ;;  %vm13074_vm7 = vmmov %vm13061_vm11 }
 0x9c6   : > { %v4096_v49 = vsel %vm13070_vm12, %v11090_v2, %v4048_v25  ;;  %v4097_v24 = vsel %vm13071_vm0, %v11090_v2, %v4049_v5  ;;  %vm13075_vm5 = vmmov %vm13074_vm7  ;;  %vm13086_vm12 = vcmp.eq.s32.totalorder %v12845_v18, %v10488_v15  ;;  %v4374_v25 = vpop.permute.xlu0 %4373  ;;  %vm13087_vm0 = vcmp.eq.s32.totalorder %v12845_v18, %v10500_v23 }
 0x9c7   : > { %v11397_v10 = vadd.f32 %v4096_v49, %v13072_v16  ;;  %v11400_v63 = vadd.f32 %v4097_v24, %v13073_v48  ;;  %vm13084_vm8 = vmmov %vm13075_vm5  ;;  %v4350_v52 = vsel %vm13086_vm12, %v4326_v42, 0.0  ;;  %vm13097_vm12 = vcmp.eq.s32.totalorder %v12846_v56, %v10616_v62 }
 0x9c8   : > { %vm13085_vm9 = vmmov %vm13075_vm5 }
 0x9c9   : > { %v4630_v41 = vpop.permute.xlu1 %4629 }
 0x9cd   : > { %v4859_v50 = vpop.permute.xlu1 %4858 }
 0x9ce   : > { %v4873_v9 = vsel %vm13074_vm7, %v11085_v33, %v4859_v50  ;;  %v4881_v55 = vsel %vm13075_vm5, %v4859_v50, %v11085_v33  ;;  %v13079_v33 = vld [vmem:[#allocation54_spill] sm:$0xff]  ;;  %vm13088_vm7 = vcmp.eq.s32.totalorder %v12846_v56, %v10500_v23  ;;  %vm13089_vm5 = vcmp.eq.s32.totalorder %v12845_v18, %v10546_v35 }
 0x9cf   : > { %v4890_v61 = vadd.f32 %v4881_v55, %v11268_v47  ;;  %v4891_v2 = vadd.f32 %v4873_v9, %v11270_v54  ;;  %vm13080_vm13 = vcmp.eq.s32.totalorder %v12845_v18, %v13079_v33  ;;  %vm13081_vm11 = vcmp.eq.s32.totalorder %v12846_v56, %v13079_v33 }
 0x9d1   : > { %v4678_v7 = vpop.permute.xlu1 %4677  ;;  %5006 = vmatprep.mubr.f32.mxu1 %v4891_v2  ;;  %v4378_v2 = vpop.permute.xlu0 %4377 }
 0x9d2   : > { %5007 = vmatmul.mubr.f32.gmra.mxu1 %v4890_v61 }
 0x9d6   : > { %v4330_v12 = vpop.permute.xlu1 %4329 }
 0x9d7   : > { %v4353_v61 = vsel %vm4305_vm4, %v4330_v12, 0.0 }
 0x9db   : > { %v4030_v13 = vpop.permute.xlu1 %4029 }
 0x9dc   : > { %v4050_v14 = vsel %vm13077_vm15, %v4030_v13, 0.0  ;;  %v4051_v8 = vsel %vm13078_vm1, %v4030_v13, 0.0  ;;  %vm13090_vm15 = vcmp.eq.s32.totalorder %v12846_v56, %v10546_v35  ;;  %vm13092_vm1 = vcmp.eq.s32.totalorder %v12846_v56, %v10559_v51  ;;  %v5150_v51 = vld [vmem:[%s11723_s6 + $0x18] sm:$0xff] }
 0x9dd   : > { %v4098_v47 = vsel %vm13080_vm13, %v11137_v11, %v4050_v14  ;;  %v4099_v54 = vsel %vm13081_vm11, %v11137_v11, %v4051_v8  ;;  %v4655_v5 = vsel %vm13090_vm15, %v4630_v41, 0.0  ;;  %vm13093_vm13 = vmmov %vm13084_vm8  ;;  %5740 = vmatprep.subr.mxu0 %v5150_v51  ;;  %5760 = vmatprep.subr.mxu1 %v5150_v51  ;;  %v4401_v13 = vsel %vm13097_vm12, %v4378_v2, %v4353_v61 }
 0x9de   : > { %v11425_v40 = vadd.f32 %v4098_v47, %v13082_v38  ;;  %v11428_v34 = vadd.f32 %v4099_v54, %v13083_v57  ;;  %v4703_v42 = vsel %vm13092_vm1, %v4678_v7, %v4655_v5  ;;  %vm13094_vm11 = vmmov %vm13084_vm8  ;;  %5741 = vmatpush3.msra.mxu0 %v5150_v51  ;;  %5764 = vmatpush3.msra.mxu1 %v5150_v51  ;;  %v4382_v38 = vpop.permute.xlu0 %4381 }
 0x9df   : > { %v4417_v54 = vadd.f32 %v4401_v13, %v11400_v63  ;;  %vm13105_vm15 = vmmov %vm13094_vm11  ;;  %vm13113_vm12 = vcmp.eq.s32.totalorder %v12846_v56, %v13007_v60 }
 0x9e0   : > { %v4634_v36 = vpop.permute.xlu1 %4633 }
 0x9e4   : > { %v4861_v21 = vpop.permute.xlu1 %4860 }
 0x9e5   : > { %v4874_v22 = vsel %vm13084_vm8, %v11096_v30, %v4861_v21  ;;  %v4882_v0 = vsel %vm13085_vm9, %v4861_v21, %v11096_v30  ;;  %v4398_v30 = vsel %vm13087_vm0, %v4374_v25, %v4350_v52  ;;  %vm13095_vm8 = vcmp.eq.s32.totalorder %v12845_v18, %v10606_v29  ;;  %v13101_v29 = vld [vmem:[#allocation25_spill] sm:$0xff]  ;;  %v5148_v52 = vld [vmem:[%s11723_s6 + $0x8] sm:$0xff] }
 0x9e6   : > { %v4892_v59 = vadd.f32 %v4882_v0, %v4716_v43  ;;  %v4893_v31 = vadd.f32 %v4874_v22, %v4717_v53  ;;  %v4399_v43 = vsel %vm13088_vm7, %v4374_v25, %v4351_v19  ;;  %v4654_v53 = vsel %vm13089_vm5, %v4630_v41, 0.0  ;;  %v13104_v0 = vld [vmem:[#allocation64_spill] sm:$0xff]  ;;  %v5147_v19 = vld [vmem:[%s11723_s6] sm:$0xff]  ;;  %v4386_v25 = vpop.permute.xlu0 %4385 }
 0x9e7   : > { %v4702_v15 = vsel %vm13091_vm6, %v4678_v7, %v4654_v53  ;;  %v4414_v23 = vadd.f32 %v4398_v30, %v11323_v26  ;;  %v4415_v49 = vadd.f32 %v4399_v43, %v11326_v44  ;;  %vm13096_vm9 = vcmp.eq.s32.totalorder %v12845_v18, %v10616_v62  ;;  %vm13106_vm6 = vmmov %vm13094_vm11  ;;  %v13107_v30 = vld [vmem:[#allocation42_spill] sm:$0xff] }
 0x9e8   : > { %v4682_v37 = vpop.permute.xlu1 %4681  ;;  %5011 = vmatprep.mubr.f32.mxu1 %v4893_v31  ;;  %vm13099_vm0 = vcmp.eq.s32.totalorder %v12845_v18, %v13098_v4  ;;  %vm13100_vm7 = vcmp.eq.s32.totalorder %v12846_v56, %v13098_v4  ;;  %vm13102_vm4 = vcmp.eq.s32.totalorder %v12845_v18, %v13101_v29  ;;  %vm13103_vm5 = vcmp.eq.s32.totalorder %v12846_v56, %v13101_v29 }
 0x9e9   : > { %5012 = vmatmul.mubr.f32.gmra.mxu1 %v4892_v59  ;;  %v4718_v24 = vadd.f32 %v4702_v15, %v4414_v23  ;;  %v4719_v16 = vadd.f32 %v4703_v42, %v4415_v49  ;;  %v4656_v14 = vsel %vm13099_vm0, %v4634_v36, 0.0  ;;  %v4657_v8 = vsel %vm13100_vm7, %v4634_v36, 0.0  ;;  %v5149_v36 = vld [vmem:[%s11723_s6 + $0x10] sm:$0xff] }
 0x9ea   : > { %v4705_v47 = vsel %vm13103_vm5, %v4682_v37, %v4657_v8  ;;  %5742 = vmatprep.subr.mxu0 %v5149_v36  ;;  %5761 = vmatprep.subr.mxu1 %v5149_v36  ;;  %vm13108_vm1 = vcmp.eq.s32.totalorder %v12845_v18, %v13107_v30  ;;  %v4390_v15 = vpop.permute.xlu0 %4389  ;;  %vm13118_vm5 = vcmp.eq.s32.totalorder %v12846_v56, %v10809_v6  ;;  %v13129_v8 = vld [vmem:[#allocation60_spill] sm:$0xff] }
 0x9eb   : > { %v4721_v21 = vadd.f32 %v4705_v47, %v4417_v54  ;;  %5743 = vmatpush3.msra.mxu0 %v5149_v36  ;;  %5765 = vmatpush3.msra.mxu1 %v5149_v36  ;;  %v13131_v54 = vld [vmem:[#allocation104_spill] sm:$0xff] }
 0x9ec   : > { %5744 = vmatprep.subr.mxu0 %v5148_v52  ;;  %5762 = vmatprep.subr.mxu1 %v5148_v52 }
 0x9ed   : > { %v11436_v11 = vpop.permute.xlu1 %4333  ;;  %5745 = vmatpush3.msra.mxu0 %v5148_v52  ;;  %5766 = vmatpush3.msra.mxu1 %v5148_v52  ;;  %v13143_v52 = vld [vmem:[#allocation84_spill] sm:$0xff] }
 0x9ee   : > { %5746 = vmatprep.subr.mxu0 %v5147_v19  ;;  %5763 = vmatprep.subr.mxu1 %v5147_v19  ;;  %v4354_v43 = vsel %vm13108_vm1, %v11436_v11, 0.0 }
 0x9ef   : > { %5747 = vmatpush3.msra.mxu0 %v5147_v19  ;;  %5767 = vmatpush3.msra.mxu1 %v5147_v19 }
 0x9f2   : > { %v11438_v58 = vpop.permute.xlu1 %4033 }
 0x9f7   : > { %v11458_v45 = vpop.permute.xlu1 %4637 }
 0x9fb   : > { %v4863_v48 = vpop.permute.xlu1 %4862 }
 0x9fc   : > { %v4875_v35 = vsel %vm13093_vm13, %v11141_v39, %v4863_v48  ;;  %v4883_v41 = vsel %vm13094_vm11, %v4863_v48, %v11141_v39  ;;  %v4352_v39 = vsel %vm13095_vm8, %v4330_v12, 0.0  ;;  %v4704_v12 = vsel %vm13102_vm4, %v4682_v37, %v4656_v14 }
 0x9fd   : > { %v4894_v50 = vadd.f32 %v4883_v41, %v4718_v24  ;;  %v4895_v9 = vadd.f32 %v4875_v35, %v4719_v16  ;;  %v4400_v7 = vsel %vm13096_vm9, %v4378_v2, %v4352_v39  ;;  %vm13109_vm13 = vcmp.eq.s32.totalorder %v12846_v56, %v13107_v30  ;;  %v13114_v24 = vld [vmem:[#allocation30_spill] sm:$0xff]  ;;  %v4867_v2 = vpop.permute.xlu0 %4866 }
 0x9fe   : > { %v4416_v62 = vadd.f32 %v4400_v7, %v11397_v10  ;;  %v4355_v53 = vsel %vm13109_vm13, %v11436_v11, 0.0  ;;  %vm13110_vm11 = vcmp.eq.s32.totalorder %v12845_v18, %v10738_v3  ;;  %vm13111_vm8 = vcmp.eq.s32.totalorder %v12846_v56, %v10738_v3 }
 0x9ff   : > { %v4686_v55 = vpop.permute.xlu1 %4685  ;;  %5016 = vmatprep.mubr.f32.mxu1 %v4895_v9  ;;  %v4402_v42 = vsel %vm13110_vm11, %v4382_v38, %v4354_v43  ;;  %v4403_v23 = vsel %vm13111_vm8, %v4382_v38, %v4355_v53  ;;  %vm13112_vm9 = vcmp.eq.s32.totalorder %v12845_v18, %v13007_v60  ;;  %v4659_v11 = vsel %vm13113_vm12, %v11458_v45, 0.0  ;;  %v13120_v9 = vld [vmem:[#allocation79_spill] sm:$0xff] }
 0xa00   : > { %5017 = vmatmul.mubr.f32.gmra.mxu1 %v4894_v50  ;;  %v4720_v57 = vadd.f32 %v4704_v12, %v4416_v62  ;;  %v4658_v49 = vsel %vm13112_vm9, %v11458_v45, 0.0  ;;  %vm13115_vm0 = vcmp.eq.s32.totalorder %v12845_v18, %v13114_v24  ;;  %vm13116_vm7 = vcmp.eq.s32.totalorder %v12846_v56, %v13114_v24  ;;  %v13119_v50 = vld [vmem:[#allocation93_spill] sm:$0xff] }
 0xa01   : > { %v4052_v16 = vsel %vm13115_vm0, %v11438_v58, 0.0  ;;  %v4053_v3 = vsel %vm13116_vm7, %v11438_v58, 0.0  ;;  %vm13117_vm4 = vcmp.eq.s32.totalorder %v12845_v18, %v10809_v6  ;;  %v4707_v35 = vsel %vm13118_vm5, %v4686_v55, %v4659_v11  ;;  %v13123_v6 = vld [vmem:[#allocation98_spill] sm:$0xff]  ;;  %v4853_v53 = vpop.permute.xlu0 %4852 }
 0xa02   : > { %v4706_v48 = vsel %vm13117_vm4, %v4686_v55, %v4658_v49  ;;  %v4418_v45 = vadd.f32 %v4402_v42, %v11425_v40  ;;  %v4419_v41 = vadd.f32 %v4403_v23, %v11428_v34  ;;  %vm13124_vm1 = vcmp.eq.s32.totalorder %v12845_v18, %v13123_v6 }
 0xa03   : > { %vm13125_vm13 = vcmp.eq.s32.totalorder %v12846_v56, %v13123_v6  ;;  %vm13126_vm11 = vcmp.eq.s32.totalorder %v12845_v18, %v12983_v32  ;;  %vm13127_vm8 = vcmp.lt.s32.totalorder %v12845_v18, 16  ;;  %vm13132_vm12 = vcmp.eq.s32.totalorder %v12845_v18, %v13131_v54 }
 0xa04   : > { %v11477_v26 = vpop.permute.xlu1 %4337  ;;  %v4722_v39 = vadd.f32 %v4706_v48, %v4418_v45  ;;  %v4723_v61 = vadd.f32 %v4707_v35, %v4419_v41  ;;  %vm13128_vm9 = vmmov %vm13127_vm8  ;;  %vm13134_vm0 = vcmp.eq.s32.totalorder %v12845_v18, %v12984_v1  ;;  %vm13138_vm5 = vcmp.eq.s32.totalorder %v12845_v18, %v10978_v28 }
 0xa05   : > { %v4356_v40 = vsel %vm13124_vm1, %v11477_v26, 0.0  ;;  %v4357_v34 = vsel %vm13125_vm13, %v11477_v26, 0.0  ;;  %v13130_v26 = vld [vmem:[#allocation61_spill] sm:$0xff]  ;;  %vm13145_vm1 = vcmp.eq.s32.totalorder %v12845_v18, %v10983_v17  ;;  %vm13146_vm13 = vcmp.eq.s32.totalorder %v12846_v56, %v10983_v17  ;;  %v4855_v35 = vpop.permute.xlu0 %4854 }
 0xa06   : > { %v4404_v38 = vsel %vm13132_vm12, %v4386_v25, %v4356_v40  ;;  %vm13149_vm12 = vmmov %vm13128_vm9 }
 0xa09   : > { %v11479_v44 = vpop.permute.xlu1 %4037 }
 0xa0a   : > { %v4054_v55 = vsel %vm13126_vm11, %v11479_v44, 0.0  ;;  %v4055_v7 = vsel %vm4007_vm10, %v11479_v44, 0.0  ;;  %vm13133_vm10 = vcmp.eq.s32.totalorder %v12846_v56, %v13131_v54  ;;  %vm13147_vm11 = vcmp.eq.s32.totalorder %v12845_v18, %v10990_v20 }
 0xa0b   : > { %v4405_v32 = vsel %vm13133_vm10, %v4386_v25, %v4357_v34  ;;  %v4102_v44 = vsel %vm13134_vm0, %v11192_v27, %v4054_v55  ;;  %v13144_v25 = vld [vmem:[#allocation87_spill] sm:$0xff]  ;;  %vm13152_vm10 = vcmask 261120  }
 0xa0c   : > { %v4118_v19 = vadd.f32 %v4102_v44, %v13143_v52  ;;  %vm13153_vm0 = vmmov %vm13152_vm10 }
 0xa0e   : > { %v11499_v33 = vpop.permute.xlu1 %4641 }
 0xa12   : > { %v4865_v22 = vpop.permute.xlu1 %4864 }
 0xa13   : > { %v4876_v59 = vsel %vm13105_vm15, %v13104_v0, %v4865_v22  ;;  %v4884_v31 = vsel %vm13106_vm6, %v4865_v22, %v13104_v0  ;;  %vm13121_vm15 = vcmp.eq.s32.totalorder %v12845_v18, %v13120_v9  ;;  %vm13122_vm6 = vcmp.eq.s32.totalorder %v12846_v56, %v13120_v9 }
 0xa14   : > { %v4896_v10 = vadd.f32 %v4884_v31, %v4720_v57  ;;  %v4897_v63 = vadd.f32 %v4876_v59, %v4721_v21  ;;  %v4100_v51 = vsel %vm13121_vm15, %v13119_v50, %v4052_v16  ;;  %v4101_v58 = vsel %vm13122_vm6, %v13119_v50, %v4053_v3  ;;  %v13135_v21 = vld [vmem:[#allocation107_spill] sm:$0xff] }
 0xa15   : > { %v4116_v29 = vadd.f32 %v4100_v51, %v13129_v8  ;;  %v4117_v12 = vadd.f32 %v4101_v58, %v13130_v26  ;;  %v4103_v57 = vsel %vm3967_vm3, %v11192_v27, %v4055_v7  ;;  %vm13136_vm7 = vcmp.eq.s32.totalorder %v12845_v18, %v13135_v21  ;;  %v13140_v27 = vld [vmem:[#allocation108_spill] sm:$0xff]  ;;  %v5684_v51 = vpop.f32.mrf.mxu0 }
 0xa16   : > { %v4690_v37 = vpop.permute.xlu1 %4689  ;;  %5021 = vmatprep.mubr.f32.mxu1 %v4897_v63  ;;  %v4660_v22 = vsel %vm13136_vm7, %v11499_v33, 0.0  ;;  %vm13137_vm4 = vcmp.eq.s32.totalorder %v12846_v56, %v13135_v21  ;;  %vm13139_vm15 = vcmp.eq.s32.totalorder %v12846_v56, %v10978_v28  ;;  %vm13141_vm3 = vcmp.eq.s32.totalorder %v12845_v18, %v13140_v27  ;;  %vm13154_vm7 = vmmov %vm13153_vm0 }
 0xa17   : > { %5022 = vmatmul.mubr.f32.gmra.mxu1 %v4896_v10  ;;  %v4661_v36 = vsel %vm13137_vm4, %v11499_v33, 0.0  ;;  %v4708_v31 = vsel %vm13141_vm3, %v4690_v37, %v4660_v22  ;;  %vm13142_vm6 = vcmp.eq.s32.totalorder %v12846_v56, %v13140_v27  ;;  %v4420_v33 = vadd.f32 %v4404_v38, %v4116_v29  ;;  %v5685_v58 = vpop.f32.mrf.mxu0  ;;  %vm13155_vm4 = vmmov %vm13153_vm0 }
 0xa18   : > { %v4709_v10 = vsel %vm13142_vm6, %v4690_v37, %v4661_v36  ;;  %v4421_v63 = vadd.f32 %v4405_v32, %v4117_v12  ;;  %v4119_v30 = vadd.f32 %v4103_v57, %v13144_v25  ;;  %vm13158_vm3 = vmmov %vm13153_vm0 }
 0xa19   : > { %v5687_v34 = vpop.f32.mrf.mxu0  ;;  %vm13159_vm6 = vmmov %vm13153_vm0 }
 0xa1a   : > { %v4725_v42 = vadd.f32 %v4709_v10, %v4421_v63 }
 0xa1b   : > { %v4342_v5 = vpop.permute.xlu1 %4341  ;;  %v5688_v55 = vpop.f32.mrf.mxu0 }
 0xa1c   : > { %v4358_v0 = vsel %vm13138_vm5, %v4342_v5, 0.0  ;;  %v4359_v59 = vsel %vm13139_vm15, %v4342_v5, 0.0  ;;  %v4724_v5 = vadd.f32 %v4708_v31, %v4420_v33  ;;  %vm13156_vm5 = vmmov %vm13153_vm0 }
 0xa1d   : > { %v4406_v28 = vsel %vm13145_vm1, %v4390_v15, %v4358_v0  ;;  %v4407_v43 = vsel %vm13146_vm13, %v4390_v15, %v4359_v59  ;;  %v5690_v8 = vpop.f32.mrf.mxu0  ;;  %vm13157_vm15 = vmmov %vm13153_vm0 }
 0xa1e   : > { %v4422_v16 = vadd.f32 %v4406_v28, %v4118_v19  ;;  %v4423_v3 = vadd.f32 %v4407_v43, %v4119_v30  ;;  %vm13164_vm1 = vmmov %vm13153_vm0 }
 0xa1f   : > { %v5691_v29 = vpop.f32.mrf.mxu0  ;;  %vm13165_vm13 = vmmov %vm13153_vm0 }
 0xa20   : > { %v4646_v60 = vpop.permute.xlu1 %4645 }
 0xa21   : > { %v4662_v37 = vsel %vm13147_vm11, %v4646_v60, 0.0  ;;  %v4663_v23 = vsel %vm4615_vm2, %v4646_v60, 0.0  ;;  %vm13150_vm2 = vmmov %vm13128_vm9  ;;  %v5693_v38 = vpop.f32.mrf.mxu0 }
 0xa22   : > { %vm13170_vm11 = vmmov %vm13153_vm0 }
 0xa23   : > { %v5694_v32 = vpop.f32.mrf.mxu0 }
 0xa24   : > { %v4851_v13 = vpop.permute.xlu1 %4850  ;;  %v5695_v21 = vadd.f32 %v5694_v32, %v5693_v38 }
 0xa25   : > { %v4877_v4 = vsel %vm13127_vm8, %v4851_v13, %v4867_v2  ;;  %v4885_v14 = vsel %vm13128_vm9, %v4867_v2, %v4851_v13  ;;  %vm13148_vm8 = vcmp.eq.s32.totalorder %v12845_v18, %v11020_v46  ;;  %v5686_v2 = vadd.f32 %v5685_v58, %v5684_v51  ;;  %v5696_v0 = vpop.f32.mrf.mxu0  ;;  %v5581_v58 = vld [vmem:[%s11725_s8] ss:$0 sm:$0xff] }
 0xa26   : > { %v4898_v47 = vadd.f32 %v4885_v14, %v4722_v39  ;;  %v4899_v62 = vadd.f32 %v4877_v4, %v4723_v61  ;;  %v5689_v18 = vadd.f32 %v5688_v55, %v5687_v34  ;;  %v6079_v34 = vld [vmem:[%s6196_s23 + $0x8] sm:$0xff] }
 0xa27   : > { %v5697_v59 = vpop.f32.mrf.mxu0 }
 0xa28   : > { %v4694_v1 = vpop.permute.xlu1 %4693  ;;  %5026 = vmatprep.mubr.f32.mxu1 %v4899_v62  ;;  %v5698_v31 = vadd.f32 %v5697_v59, %v5696_v0  ;;  %v6082_v0 = vld [vmem:[%s6196_s23 + $0x10] sm:$0xff] }
 0xa29   : > { %5027 = vmatmul.mubr.f32.gmra.mxu1 %v4898_v47  ;;  %v4710_v11 = vsel %vm13148_vm8, %v4694_v1, %v4662_v37  ;;  %v4711_v17 = vsel %vm4575_vm14, %v4694_v1, %v4663_v23  ;;  %vm13151_vm14 = vmmov %vm13150_vm2  ;;  %v5692_v47 = vadd.f32 %v5691_v29, %v5690_v8  ;;  %v5699_v63 = vpop.f32.mrf.mxu0  ;;  %v13168_v29 = vld [vmem:[#allocation50_spill] sm:$0xff] }
 0xa2a   : > { %v4726_v60 = vadd.f32 %v4710_v11, %v4422_v16  ;;  %v4727_v45 = vadd.f32 %v4711_v17, %v4423_v3  ;;  %vm13171_vm8 = vmmov %vm13153_vm0 }
 0xa2b   : > { %v5700_v52 = vpop.f32.mrf.mxu0 }
 0xa2c   : > { %v4869_v49 = vpop.permute.xlu1 %4868  ;;  %v5701_v28 = vadd.f32 %v5700_v52, %v5699_v63 }
 0xa2d   : > { %v4878_v15 = vsel %vm13128_vm9, %v4853_v53, %v4869_v49  ;;  %v4886_v24 = vsel %vm13149_vm12, %v4869_v49, %v4853_v53  ;;  %v5702_v19 = vpop.f32.mrf.mxu0  ;;  %vm13178_vm9 = vmmov %vm13153_vm0 }
 0xa2e   : > { %v4900_v48 = vadd.f32 %v4886_v24, %v4724_v5  ;;  %v4901_v20 = vadd.f32 %v4878_v15, %v4725_v42  ;;  %vm13181_vm12 = vmmov %vm13153_vm0 }
 0xa2f   : > { %v5703_v53 = vpop.f32.mrf.mxu0 }
 0xa30   : > { %v4871_v41 = vpop.permute.xlu1 %4870  ;;  %5031 = vmatprep.mubr.f32.mxu1 %v4901_v20  ;;  %v5704_v49 = vadd.f32 %v5703_v53, %v5702_v19 }
 0xa31   : > { %v4879_v50 = vsel %vm13150_vm2, %v4855_v35, %v4871_v41  ;;  %v4887_v56 = vsel %vm13151_vm14, %v4871_v41, %v4855_v35  ;;  %5032 = vmatmul.mubr.f32.gmra.mxu1 %v4900_v48  ;;  %v5705_v42 = vpop.f32.mrf.mxu0  ;;  %v13160_v35 = vld [vmem:[#allocation56_spill] sm:$0xff]  ;;  %v5572_v41 = vld [vmem:[%s11724_s7] ss:$0 sm:$0xff]  ;;  %vm13182_vm2 = vmmov %vm13153_vm0 }
 0xa32   : > { %v4902_v46 = vadd.f32 %v4887_v56, %v4726_v60  ;;  %v4903_v9 = vadd.f32 %v4879_v50, %v4727_v45  ;;  %v13161_v60 = vld [vmem:[#allocation88_spill] sm:$0xff]  ;;  %v13162_v50 = vld [vmem:[#allocation22_spill] sm:$0xff]  ;;  %v13163_v56 = vld [vmem:[#allocation27_spill] sm:$0xff] }
 0xa33   : > { %v5706_v17 = vpop.f32.mrf.mxu0  ;;  %v3321_v45 = vadd.f32 %v13161_v60, %v13160_v35  ;;  %vm13183_vm14 = vmmov %vm13153_vm0 }
 0xa34   : > { %5036 = vmatprep.mubr.f32.mxu1 %v4903_v9  ;;  %v5707_v3 = vadd.f32 %v5706_v17, %v5705_v42  ;;  %v6084_v17 = vld [vmem:[%s6196_s23 + $0x20] sm:$0xff] }
 0xa35   : > { %5037 = vmatmul.mubr.f32.gmra.mxu1 %v4902_v46  ;;  %v3320_v46 = vadd.f32 %v13163_v56, %v13162_v50  ;;  %v5159_v9 = vmul.f32 %v5572_v41, %v3321_v45 }
 0xa7e   : > { %v5628_v39 = vpop.f32.mrf.mxu1 }
 0xa80   : > { %v5629_v61 = vpop.f32.mrf.mxu1 }
 0xa81   : > { %v5630_v6 = vadd.f32 %v5629_v61, %v5628_v39  ;;  %v5158_v61 = vmul.f32 %v5572_v41, %v3320_v46  ;;  %v6085_v46 = vld [vmem:[%s6196_s23 + $0x38] sm:$0xff] }
 0xa83   : > { %v5109_v40 = vadd.f32 %v5686_v2, %v5630_v6 }
 0xa85   : > { %5748 = vmatprep.mubr.msk.f32.mxu0 %vm13152_vm10, %v5109_v40 }
 0xa92   : > { %v5631_v7 = vpop.f32.mrf.mxu1 }
 0xa94   : > { %v5632_v13 = vpop.f32.mrf.mxu1 }
 0xa95   : > { %v5633_v4 = vadd.f32 %v5632_v13, %v5631_v7  ;;  %v6080_v13 = vld [vmem:[%s6196_s23] sm:$0xff] }
 0xa97   : > { %v5114_v14 = vadd.f32 %v5689_v18, %v5633_v4  ;;  %v13166_v4 = vld [vmem:[#allocation37_spill] sm:$0xff] }
 0xa99   : > { %5749 = vmatmul.mubr.msk.f32.vlgmr.msra.gmra.mxu0 %vm13153_vm0, %v5114_v14  ;;  %v13167_v14 = vld [vmem:[#allocation65_spill] sm:$0xff] }
 0xa9a   : > { %v3323_v8 = vadd.f32 %v13167_v14, %v13166_v4 }
 0xaa9   : > { %v5634_v26 = vpop.f32.mrf.mxu1 }
 0xaab   : > { %v5635_v12 = vpop.f32.mrf.mxu1 }
 0xaac   : > { %v5636_v62 = vadd.f32 %v5635_v12, %v5634_v26  ;;  %v13169_v26 = vld [vmem:[#allocation33_spill] sm:$0xff] }
 0xaad   : > { %v3322_v12 = vadd.f32 %v13169_v26, %v13168_v29 }
 0xaae   : > { %v5119_v54 = vadd.f32 %v5692_v47, %v5636_v62  ;;  %v5161_v47 = vmul.f32 %v5572_v41, %v3323_v8 }
 0xaaf   : > { %v5160_v38 = vmul.f32 %v5572_v41, %v3322_v12 }
 0xab0   : > { %5751 = vmatprep.mubr.msk.f32.mxu1 %vm13154_vm7, %v5119_v54 }
 0xac0   : > { %v5637_v44 = vpop.f32.mrf.mxu1 }
 0xac2   : > { %v5638_v57 = vpop.f32.mrf.mxu1 }
 0xac3   : > { %v5639_v22 = vadd.f32 %v5638_v57, %v5637_v44 }
 0xac5   : > { %v5124_v36 = vadd.f32 %v5695_v21, %v5639_v22  ;;  %v6081_v21 = vld [vmem:[%s6196_s23 + $0x18] sm:$0xff] }
 0xac7   : > { %5752 = vmatmul.mubr.msk.f32.vlgmr.msra.gmra.mxu1 %vm13155_vm4, %v5124_v36 }
 0xad7   : > { %v5640_v1 = vpop.f32.mrf.mxu1 }
 0xad9   : > { %v5641_v27 = vpop.f32.mrf.mxu1 }
 0xada   : > { %v5642_v10 = vadd.f32 %v5641_v27, %v5640_v1  ;;  %v13172_v1 = vld [vmem:[#allocation57_spill] sm:$0xff]  ;;  %v13173_v27 = vld [vmem:[#allocation96_spill] sm:$0xff] }
 0xadc   : > { %v5129_v33 = vadd.f32 %v5698_v31, %v5642_v10  ;;  %v3325_v31 = vadd.f32 %v13173_v27, %v13172_v1  ;;  %v13174_v10 = vld [vmem:[#allocation58_spill] sm:$0xff] }
 0xade   : > { %5754 = vmatprep.mubr.msk.f32.mxu1 %vm13156_vm5, %v5129_v33  ;;  %v13175_v33 = vld [vmem:[#allocation86_spill] sm:$0xff]  ;;  %v5163_v52 = vmul.f32 %v5572_v41, %v3325_v31 }
 0xadf   : > { %v3324_v63 = vadd.f32 %v13175_v33, %v13174_v10 }
 0xae9   : > { %v5643_v25 = vpop.f32.mrf.mxu1 }
 0xaeb   : > { %v5644_v30 = vpop.f32.mrf.mxu1 }
 0xaec   : > { %v5645_v43 = vadd.f32 %v5644_v30, %v5643_v25  ;;  %v5162_v30 = vmul.f32 %v5572_v41, %v3324_v63 }
 0xaee   : > { %v5134_v5 = vadd.f32 %v5701_v28, %v5645_v43 }
 0xaf0   : > { %5755 = vmatmul.mubr.msk.f32.gmra.mxu1 %vm13157_vm15, %v5134_v5  ;;  %v6083_v5 = vld [vmem:[%s6196_s23 + $0x28] sm:$0xff] }
 0xaf1   : > { %v5646_v37 = vpop.f32.mrf.mxu1 }
 0xaf3   : > { %v5647_v23 = vpop.f32.mrf.mxu1 }
 0xaf4   : > { %v5648_v11 = vadd.f32 %v5647_v23, %v5646_v37  ;;  %v13176_v23 = vld [vmem:[#allocation110_spill] sm:$0xff] }
 0xaf5   : > { %v5649_v15 = vpop.f32.mrf.mxu1 }
 0xaf6   : > { %v5139_v24 = vadd.f32 %v5704_v49, %v5648_v11  ;;  %v13177_v49 = vld [vmem:[#allocation81_spill] sm:$0xff] }
 0xaf7   : > { %v5650_v16 = vpop.f32.mrf.mxu1  ;;  %v3327_v11 = vadd.f32 %v13177_v49, %v13176_v23 }
 0xaf8   : > { %v5651_v48 = vadd.f32 %v5650_v16, %v5649_v15  ;;  %5757 = vmatprep.mubr.msk.f32.mxu1 %vm13158_vm3, %v5139_v24  ;;  %v13179_v24 = vld [vmem:[#allocation112_spill] sm:$0xff]  ;;  %v13180_v16 = vld [vmem:[#allocation62_spill] sm:$0xff] }
 0xafa   : > { %v5144_v20 = vadd.f32 %v5707_v3, %v5651_v48  ;;  %v3326_v3 = vadd.f32 %v13180_v16, %v13179_v24  ;;  %v5165_v48 = vmul.f32 %v5572_v41, %v3327_v11 }
 0xafc   : > { %5758 = vmatmul.mubr.msk.f32.gmra.mxu1 %vm13159_vm6, %v5144_v20  ;;  %v5164_v60 = vmul.f32 %v5572_v41, %v3326_v3 }
 0xb59   : > { %v5750_v51 = vpop.f32.mrf.mxu0 }
 0xb5a   : > { %v5262_v39 = vadd.f32 %v5750_v51, %v5159_v9 }
 0xb5b   : > { %v5256_v2 = vpop.f32.mrf.mxu0 }
 0xb5c   : > { %v5303_v6 = vadd.f32 %v5581_v58, %v5262_v39  ;;  %v5257_v40 = vadd.f32 %v5256_v2, %v5158_v61  ;;  %v6086_v39 = vld [vmem:[%s6196_s23 + $0x30] sm:$0xff] }
 0xb5e   : > { %v5311_v55 = vadd.f32 %v6079_v34, %v5303_v6  ;;  %v5302_v7 = vadd.f32 %v5581_v58, %v5257_v40 }
 0xb60   : > { %5319 = vst.msk [vmem:[%s11676_s26 + $0x8] sm:$0xff] %vm13164_vm1, %v5311_v55  ;;  %v5310_v18 = vadd.f32 %v6080_v13, %v5302_v7 }
 0xb62   : > { %5318 = vst.msk [vmem:[%s11676_s26] sm:$0xff] %vm13165_vm13, %v5310_v18 }
 0xb87   : > { %v5753_v62 = vpop.f32.mrf.mxu1 }
 0xb88   : > { %v5272_v54 = vadd.f32 %v5753_v62, %v5161_v47 }
 0xb89   : > { %v5266_v32 = vpop.f32.mrf.mxu1 }
 0xb8a   : > { %v5305_v44 = vadd.f32 %v5581_v58, %v5272_v54  ;;  %v5267_v57 = vadd.f32 %v5266_v32, %v5160_v38 }
 0xb8c   : > { %v5313_v22 = vadd.f32 %v6081_v21, %v5305_v44  ;;  %v5304_v36 = vadd.f32 %v5581_v58, %v5267_v57 }
 0xb8e   : > { %5321 = vst.msk [vmem:[%s11676_s26 + $0x18] sm:$0xff] %vm13170_vm11, %v5313_v22  ;;  %v5312_v59 = vadd.f32 %v6082_v0, %v5304_v36 }
 0xb90   : > { %5320 = vst.msk [vmem:[%s11676_s26 + $0x10] sm:$0xff] %vm13171_vm8, %v5312_v59 }
 0xbb0   : > { %v5756_v19 = vpop.f32.mrf.mxu1 }
 0xbb1   : > { %v5282_v25 = vadd.f32 %v5756_v19, %v5163_v52 }
 0xbb2   : > { %v5276_v28 = vpop.f32.mrf.mxu1 }
 0xbb3   : > { %v5307_v43 = vadd.f32 %v5581_v58, %v5282_v25  ;;  %v5277_v53 = vadd.f32 %v5276_v28, %v5162_v30 }
 0xbb5   : > { %v5315_v42 = vadd.f32 %v6083_v5, %v5307_v43  ;;  %v5306_v37 = vadd.f32 %v5581_v58, %v5277_v53 }
 0xbb7   : > { %5323 = vst.msk [vmem:[%s11676_s26 + $0x28] sm:$0xff] %vm13178_vm9, %v5315_v42  ;;  %v5314_v15 = vadd.f32 %v6084_v17, %v5306_v37 }
 0xbb9   : > { %5322 = vst.msk [vmem:[%s11676_s26 + $0x20] sm:$0xff] %vm13181_vm12, %v5314_v15 }
 0xbbc   : > { %v5759_v20 = vpop.f32.mrf.mxu1 }
 0xbbd   : > { %v5292_v35 = vadd.f32 %v5759_v20, %v5165_v48 }
 0xbbe   : > { %v5286_v45 = vpop.f32.mrf.mxu1 }
 0xbbf   : > { %v5309_v50 = vadd.f32 %v5581_v58, %v5292_v35  ;;  %v5287_v56 = vadd.f32 %v5286_v45, %v5164_v60 }
 0xbc1   : > { %v5317_v9 = vadd.f32 %v6085_v46, %v5309_v50  ;;  %v5308_v51 = vadd.f32 %v5581_v58, %v5287_v56 }
 0xbc3   : > { %5325 = vst.msk [vmem:[%s11676_s26 + $0x38] sm:$0xff] %vm13182_vm2, %v5317_v9  ;;  %v5316_v61 = vadd.f32 %v6086_v39, %v5308_v51 }
 0xbc5   : > { %5324 = vst.msk [vmem:[%s11676_s26 + $0x30] sm:$0xff] %vm13183_vm14, %v5316_v61 }
 0xbc6 PF: > { %s19_s30 = sadd.s32 1, %s6093_s30  }
 0xbc7   : > { %p16_p4 = scmp.ge.s32.totalorder %s19_s30, 6  }
 0xbc9   :  { %18 = sbr.rel (!%p16_p4) target bundleno = 1 (0x1), region = 93 }

</bundles_post_ra>
